<compile_context>
chip_gen: v7x
topology: tpu7x:2x2x1
jax: 0.10.0
libtpu: 0.0.40
codegen_flags: <defaults>
</compile_context>

<pallas_src>
import jax
import jax.numpy as jnp
from jax.experimental import pallas as pl
from jax.experimental.pallas import tpu as pltpu

_H = 128                # resized image height / width
_L0 = _H * _H           # flat pixels per channel


# --------------------------------------------------------------------------
# Fused conv tower kernel (one grid step per image)
# --------------------------------------------------------------------------
def _fused_conv_kernel(x_ref, w1_ref, b1_ref, w2_ref, b2_ref, w3_ref, b3_ref,
                       o_ref, a0_ref, a1_ref, a2_ref):
    f32 = jnp.float32
    bf16 = jnp.bfloat16

    # ---- stage the image: 3 kx-shifted channel blocks (kx folded into K) ----
    a0_ref[...] = jnp.zeros(a0_ref.shape, bf16)          # zero the pad channels
    img = x_ref[0]                                       # (3, 128*128) bf16
    a0_ref[0:3, :] = img
    a0_ref[8:11, :] = jnp.roll(img, -1, axis=1)          # x shifted by 1 lane
    a0_ref[16:19, :] = jnp.roll(img, -2, axis=1)         # x shifted by 2 lanes

    # 0/1 matrix extracting the 14 valid (dilation-8) output columns of conv3
    pidx = jax.lax.broadcasted_iota(jnp.int32, (128, 14), 0)
    xidx = jax.lax.broadcasted_iota(jnp.int32, (128, 14), 1)
    sel = (pidx == 8 * xidx).astype(bf16)

    def conv_block(in_ref, w_ref, b_ref, out_write, *, hp, rc, d):
        """3x3 valid conv + bias + ReLU + 2x2 maxpool on flat stride-128 rows.

        in_ref : (3*cin_pad, Hin*128) bf16, kx taps pre-folded into sublanes,
                 valid pixels at lane w*d of each 128-lane row.
        hp     : pooled output rows, rc: pooled rows per chunk (rc | hp),
        d      : input lane dilation.
        """
        nflat = 2 * rc * 128                      # flat conv lanes per chunk
        cout = b_ref.shape[0]
        bias = b_ref[...]                         # (cout, 1) f32

        def chunk(c, carry):
            base = pl.multiple_of(c * nflat, 128)
            acc = jnp.zeros((cout, nflat), f32)
            for ky in range(3):                   # ky taps; kx already in K
                off = pl.multiple_of(base + ky * 128, 128)
                xs = in_ref[:, pl.ds(off, nflat)]                # aligned read
                acc = acc + jnp.dot(w_ref[ky], xs,
                                    preferred_element_type=f32)
            acc = jnp.maximum(acc + bias, 0.0)    # bias + ReLU
            for rl in range(rc):                  # fused 2x2 max pool
                lo = 2 * rl * 128
                rowmax = jnp.maximum(acc[:, lo:lo + 128],
                                     acc[:, lo + 128:lo + 256])
                pooled = jnp.maximum(rowmax, jnp.roll(rowmax, -d, axis=1))
                out_write(c * rc + rl, pooled)
            return carry

        jax.lax.fori_loop(0, hp // rc, chunk, 0)

    def folded_writer(dst_ref, cout, dn):
        # Store the pooled row 3x, lane-shifted by kx*dn, so the next layer's
        # K dimension already contains all 3 kx taps (aligned full-width vst).
        def _write(r, pooled):
            start = pl.multiple_of(r * 128, 128)
            pb = pooled.astype(jnp.bfloat16)
            dst_ref[0:cout, pl.ds(start, 128)] = pb
            dst_ref[cout:2 * cout, pl.ds(start, 128)] = jnp.roll(pb, -dn, axis=1)
            dst_ref[2 * cout:3 * cout, pl.ds(start, 128)] = jnp.roll(pb, -2 * dn,
                                                                     axis=1)
        return _write

    def out_writer(r, pooled):
        # Compact the dilation-8 valid columns into a dense (64, 14) row block.
        dense = jnp.dot(pooled.astype(jnp.bfloat16), sel,
                        preferred_element_type=f32)
        start = pl.multiple_of(r * 64, 64)
        o_ref[0, pl.ds(start, 64), :] = dense.astype(jnp.bfloat16)

    # conv1: 3 -> 16, 128x128 -> pooled 63x63   (input dilation 1)
    conv_block(a0_ref, w1_ref, b1_ref, folded_writer(a1_ref, 16, 2),
               hp=63, rc=3, d=1)
    # conv2: 16 -> 32, 63x63 -> pooled 30x30    (input dilation 2)
    conv_block(a1_ref, w2_ref, b2_ref, folded_writer(a2_ref, 32, 4),
               hp=30, rc=3, d=2)
    # conv3: 32 -> 64, 30x30 -> pooled 14x14    (input dilation 4)
    conv_block(a2_ref, w3_ref, b3_ref, out_writer, hp=14, rc=2, d=4)


def _conv_tower(x_flat, w1q, b1, w2q, b2, w3q, b3):
    n = x_flat.shape[0]
    return pl.pallas_call(
        _fused_conv_kernel,
        out_shape=jax.ShapeDtypeStruct((n, 896, 14), jnp.bfloat16),
        grid=(n,),
        in_specs=[
            pl.BlockSpec((1, 3, _L0), lambda i: (i, 0, 0)),
            pl.BlockSpec((3, 16, 24), lambda i: (0, 0, 0)),
            pl.BlockSpec((16, 1), lambda i: (0, 0)),
            pl.BlockSpec((3, 32, 48), lambda i: (0, 0, 0)),
            pl.BlockSpec((32, 1), lambda i: (0, 0)),
            pl.BlockSpec((3, 64, 96), lambda i: (0, 0, 0)),
            pl.BlockSpec((64, 1), lambda i: (0, 0)),
        ],
        out_specs=pl.BlockSpec((1, 896, 14), lambda i: (i, 0, 0)),
        scratch_shapes=[
            pltpu.VMEM((24, _L0), jnp.bfloat16),         # image, kx-folded
            pltpu.VMEM((48, 63 * 128), jnp.bfloat16),    # pooled conv1
            pltpu.VMEM((96, 30 * 128), jnp.bfloat16),    # pooled conv2
        ],
        compiler_params=pltpu.CompilerParams(
            dimension_semantics=("parallel",),
        ),
    )(x_flat, w1q, b1, w2q, b2, w3q, b3)


# --------------------------------------------------------------------------
# Fused fully-connected stack (fc1 -> ReLU -> fc2 -> ReLU -> fc3)
# --------------------------------------------------------------------------
def _fc_kernel(x_ref, w1_ref, b1_ref, w2_ref, b2_ref, w3_ref, b3_ref, o_ref):
    h = jnp.dot(x_ref[...], w1_ref[...], preferred_element_type=jnp.float32)
    h = jnp.maximum(h + b1_ref[...], 0.0)
    h = jnp.dot(h, w2_ref[...], preferred_element_type=jnp.float32)
    h = jnp.maximum(h + b2_ref[...], 0.0)
    o_ref[...] = jnp.dot(h, w3_ref[...],
                         preferred_element_type=jnp.float32) + b3_ref[...]


def _fc_stack(x, w1, b1, w2, b2, w3, b3):
    n = x.shape[0]
    e = w3.shape[1]
    specs = [pl.BlockSpec(a.shape, lambda i: (0, 0))
             for a in (x, w1, b1, w2, b2, w3, b3)]
    return pl.pallas_call(
        _fc_kernel,
        out_shape=jax.ShapeDtypeStruct((n, e), jnp.float32),
        grid=(1,),
        in_specs=specs,
        out_specs=pl.BlockSpec((n, e), lambda i: (0, 0)),
        compiler_params=pltpu.CompilerParams(
            dimension_semantics=("arbitrary",),
        ),
    )(x, w1, b1, w2, b2, w3, b3)


# --------------------------------------------------------------------------
# Forward pass (weight re-layouts are tiny, fused XLA ops inside jit)
# --------------------------------------------------------------------------
def _prep_conv_w(w, cin_pad):
    """torch (cout, cin, 3, 3) -> (ky, cout, kx*cin_pad + ci), bf16."""
    cout, cin = w.shape[0], w.shape[1]
    if cin_pad != cin:
        w = jnp.pad(w, ((0, 0), (0, cin_pad - cin), (0, 0), (0, 0)))
    wq = jnp.transpose(w, (2, 0, 3, 1)).reshape(3, cout, 3 * cin_pad)
    return wq.astype(jnp.bfloat16)


def net_forward(x_nchw, params):
    n, c, _, _ = x_nchw.shape
    # T.Resize((128, 128)): bilinear, half-pixel centers.
    # TODO(synk): torchvision antialias only differs when downscaling; we upscale.
    x = jax.image.resize(x_nchw.astype(jnp.float32), (n, c, _H, _H),
                         method="bilinear")
    x_flat = x.reshape(n, 3, _L0).astype(jnp.bfloat16)

    conv_out = _conv_tower(
        x_flat,
        _prep_conv_w(params["w1"], 8), params["b1"].reshape(16, 1).astype(jnp.float32),
        _prep_conv_w(params["w2"], 16), params["b2"].reshape(32, 1).astype(jnp.float32),
        _prep_conv_w(params["w3"], 32), params["b3"].reshape(64, 1).astype(jnp.float32),
    )                                         # (n, 896, 14) == (n, 14*64, 14)

    fc_in = conv_out.reshape(n, 896 * 14)     # free, row-major flatten

    # torch flattens CHW as c*196 + r*14 + x; the kernel emits (r, c, x) order,
    # so permute fc1's weight rows (keeps loading real torch weights correct).
    w1p = (params["fw1"].reshape(32, 64, 14, 14).transpose(2, 1, 3, 0)
           .reshape(12544, 32).astype(jnp.bfloat16))
    out = _fc_stack(
        fc_in,
        w1p, params["fb1"].reshape(1, 32).astype(jnp.float32),
        params["fw2"].T.astype(jnp.float32), params["fb2"].reshape(1, 16).astype(jnp.float32),
        params["fw3"].T.astype(jnp.float32), params["fb3"].reshape(1, -1).astype(jnp.float32),
    )
    return out


# --------------------------------------------------------------------------
# Parameter init (torch-equivalent layouts)
# --------------------------------------------------------------------------
def init_params(key, emb_dim):
    ks = jax.random.split(key, 12)

    def conv_w(k, cout, cin):
        fan_in = cin * 9
        return jax.random.normal(k, (cout, cin, 3, 3), jnp.float32) / jnp.sqrt(fan_in)

    def lin_w(k, fout, fin):
        return jax.random.normal(k, (fout, fin), jnp.float32) / jnp.sqrt(fin)

    return {
        "w1": conv_w(ks[0], 16, 3),  "b1": 0.01 * jax.random.normal(ks[1], (16,), jnp.float32),
        "w2": conv_w(ks[2], 32, 16), "b2": 0.01 * jax.random.normal(ks[3], (32,), jnp.float32),
        "w3": conv_w(ks[4], 64, 32), "b3": 0.01 * jax.random.normal(ks[5], (64,), jnp.float32),
        "fw1": lin_w(ks[6], 32, 64 * 14 * 14),
        "fb1": 0.01 * jax.random.normal(ks[7], (32,), jnp.float32),
        "fw2": lin_w(ks[8], 16, 32),
        "fb2": 0.01 * jax.random.normal(ks[9], (16,), jnp.float32),
        "fw3": lin_w(ks[10], emb_dim, 16),
        "fb3": 0.01 * jax.random.normal(ks[11], (emb_dim,), jnp.float32),
    }


# --------------------------------------------------------------------------
if __name__ == "__main__":
    emb_dim = 8
    key = jax.random.PRNGKey(0)
    k_x, k_p = jax.random.split(key)
    # small NCHW input batch; the forward resizes it to 128x128 anyway
    x = jax.random.normal(k_x, (2, 3, 32, 32), jnp.float32)
    params = init_params(k_p, emb_dim)

    fwd = jax.jit(net_forward)
    out = jax.block_until_ready(fwd(x, params))
    assert out.shape == (2, emb_dim), out.shape
    assert bool(jnp.all(jnp.isfinite(out)))
    print("KERNEL_OK")
</pallas_src>

<mosaic_0001>
module attributes {stable_mosaic.version = 11 : i64} {
  func.func @_fused_conv_kernel(%arg0: i32, %arg1: memref<1x3x16384xbf16, #tpu.memory_space<vmem>>, %arg2: memref<3x16x24xbf16, #tpu.memory_space<vmem>>, %arg3: memref<16x1xf32, #tpu.memory_space<vmem>>, %arg4: memref<3x32x48xbf16, #tpu.memory_space<vmem>>, %arg5: memref<32x1xf32, #tpu.memory_space<vmem>>, %arg6: memref<3x64x96xbf16, #tpu.memory_space<vmem>>, %arg7: memref<64x1xf32, #tpu.memory_space<vmem>>, %arg8: memref<1x896x14xbf16, #tpu.memory_space<vmem>>, %arg9: memref<24x16384xbf16, #tpu.memory_space<vmem>>, %arg10: memref<48x8064xbf16, #tpu.memory_space<vmem>>, %arg11: memref<96x3840xbf16, #tpu.memory_space<vmem>>) attributes {dimension_semantics = [#tpu.dimension_semantics<parallel>], iteration_bounds = array<i64: 2>, scalar_prefetch = 0 : i64, scratch_operands = 3 : i64, tpu.core_type = #tpu.core_type<tc>, window_params = [{transform_indices = @transform_0, window_bounds = array<i64: 1, 3, 16384>}, {pipeline_mode = #tpu.pipeline_mode<synchronous>, transform_indices = @transform_1, window_bounds = array<i64: 3, 16, 24>}, {pipeline_mode = #tpu.pipeline_mode<synchronous>, transform_indices = @transform_2, window_bounds = array<i64: 16, 1>}, {pipeline_mode = #tpu.pipeline_mode<synchronous>, transform_indices = @transform_3, window_bounds = array<i64: 3, 32, 48>}, {pipeline_mode = #tpu.pipeline_mode<synchronous>, transform_indices = @transform_4, window_bounds = array<i64: 32, 1>}, {pipeline_mode = #tpu.pipeline_mode<synchronous>, transform_indices = @transform_5, window_bounds = array<i64: 3, 64, 96>}, {pipeline_mode = #tpu.pipeline_mode<synchronous>, transform_indices = @transform_6, window_bounds = array<i64: 64, 1>}, {transform_indices = @transform_7, window_bounds = array<i64: 1, 896, 14>}]} {
    %cst = arith.constant 0.000000e+00 : bf16
    %0 = vector.broadcast %cst : bf16 to vector<24x16384xbf16>
    %c0 = arith.constant 0 : index
    %c0_0 = arith.constant 0 : index
    %1 = vector.load %arg9[%c0, %c0_0] : memref<24x16384xbf16, #tpu.memory_space<vmem>>, vector<24x16384xbf16>
    tpu.vector_store %arg9[%c0, %c0_0], %0 {strides = array<i32>} : memref<24x16384xbf16, #tpu.memory_space<vmem>>, vector<24x16384xbf16>,
    %c0_1 = arith.constant 0 : index
    %c0_2 = arith.constant 0 : index
    %c0_3 = arith.constant 0 : index
    %2 = vector.load %arg1[%c0_1, %c0_2, %c0_3] : memref<1x3x16384xbf16, #tpu.memory_space<vmem>>, vector<1x3x16384xbf16>
    %3 = vector.shape_cast %2 : vector<1x3x16384xbf16> to vector<3x16384xbf16>
    %c0_4 = arith.constant 0 : index
    %c0_5 = arith.constant 0 : index
    %4 = vector.load %arg9[%c0_4, %c0_5] : memref<24x16384xbf16, #tpu.memory_space<vmem>>, vector<3x16384xbf16>
    tpu.vector_store %arg9[%c0_4, %c0_5], %3 {strides = array<i32>} : memref<24x16384xbf16, #tpu.memory_space<vmem>>, vector<3x16384xbf16>,
    %5 = vector.extract_strided_slice %3 {offsets = [0, 1], sizes = [3, 16383], strides = [1, 1]} : vector<3x16384xbf16> to vector<3x16383xbf16>
    %6 = vector.extract_strided_slice %3 {offsets = [0, 0], sizes = [3, 1], strides = [1, 1]} : vector<3x16384xbf16> to vector<3x1xbf16>
    %7 = tpu.concatenate %5, %6 in 1 : vector<3x16383xbf16>, vector<3x1xbf16> -> vector<3x16384xbf16>
    %c8 = arith.constant 8 : index
    %c0_6 = arith.constant 0 : index
    %8 = vector.load %arg9[%c8, %c0_6] : memref<24x16384xbf16, #tpu.memory_space<vmem>>, vector<3x16384xbf16>
    tpu.vector_store %arg9[%c8, %c0_6], %7 {strides = array<i32>} : memref<24x16384xbf16, #tpu.memory_space<vmem>>, vector<3x16384xbf16>,
    %9 = vector.extract_strided_slice %3 {offsets = [0, 2], sizes = [3, 16382], strides = [1, 1]} : vector<3x16384xbf16> to vector<3x16382xbf16>
    %10 = vector.extract_strided_slice %3 {offsets = [0, 0], sizes = [3, 2], strides = [1, 1]} : vector<3x16384xbf16> to vector<3x2xbf16>
    %11 = tpu.concatenate %9, %10 in 1 : vector<3x16382xbf16>, vector<3x2xbf16> -> vector<3x16384xbf16>
    %c16 = arith.constant 16 : index
    %c0_7 = arith.constant 0 : index
    %12 = vector.load %arg9[%c16, %c0_7] : memref<24x16384xbf16, #tpu.memory_space<vmem>>, vector<3x16384xbf16>
    tpu.vector_store %arg9[%c16, %c0_7], %11 {strides = array<i32>} : memref<24x16384xbf16, #tpu.memory_space<vmem>>, vector<3x16384xbf16>,
    %13 = tpu.iota {dimensions = array<i32: 0>} : vector<128x14xi32>
    %14 = tpu.iota {dimensions = array<i32: 1>} : vector<128x14xi32>
    %c8_i32 = arith.constant 8 : i32
    %15 = vector.broadcast %c8_i32 : i32 to vector<128x14xi32>
    %16 = arith.muli %15, %14 : vector<128x14xi32>
    %17 = arith.cmpi eq, %13, %16 : vector<128x14xi32>
    %18 = arith.extui %17 : vector<128x14xi1> to vector<128x14xi32>
    %19 = arith.sitofp %18 : vector<128x14xi32> to vector<128x14xf32>
    %20 = arith.truncf %19 : vector<128x14xf32> to vector<128x14xbf16>
    %c0_8 = arith.constant 0 : index
    %c0_9 = arith.constant 0 : index
    %21 = vector.load %arg3[%c0_8, %c0_9] : memref<16x1xf32, #tpu.memory_space<vmem>>, vector<16x1xf32>
    %c0_i32 = arith.constant 0 : i32
    %c21_i32 = arith.constant 21 : i32
    %22 = arith.addi %c0_i32, %c21_i32 : i32
    %c1_i32 = arith.constant 1 : i32
    scf.for %arg12 = %c0_i32 to %22 step %c1_i32  : i32 {
      %c768_i32 = arith.constant 768 : i32
      %27 = arith.muli %arg12, %c768_i32 : i32
      %28 = tpu.assume_multiple %27, 128 : i32
      %cst_21 = arith.constant 0.000000e+00 : f32
      %29 = vector.broadcast %cst_21 : f32 to vector<16x768xf32>
      %c0_i32_22 = arith.constant 0 : i32
      %30 = arith.addi %28, %c0_i32_22 : i32
      %31 = tpu.assume_multiple %30, 128 : i32
      %c0_23 = arith.constant 0 : index
      %32 = arith.index_cast %31 : i32 to index
      %33 = vector.load %arg9[%c0_23, %32] : memref<24x16384xbf16, #tpu.memory_space<vmem>>, vector<24x768xbf16>
      %c0_24 = arith.constant 0 : index
      %c0_25 = arith.constant 0 : index
      %c0_26 = arith.constant 0 : index
      %34 = vector.load %arg2[%c0_24, %c0_25, %c0_26] : memref<3x16x24xbf16, #tpu.memory_space<vmem>>, vector<1x16x24xbf16>
      %35 = vector.shape_cast %34 : vector<1x16x24xbf16> to vector<16x24xbf16>
      %cst_27 = arith.constant dense<0.000000e+00> : vector<16x768xf32>
      %36 = tpu.matmul %35, %33, %cst_27 {dimension_numbers = #tpu.dot_dimension_numbers<[1], [0], [0], [1], [0, 0, 1, 1], [], []>} : vector<16x24xbf16>, vector<24x768xbf16>, vector<16x768xf32> -> vector<16x768xf32>
      %37 = arith.addf %29, %36 : vector<16x768xf32>
      %c128_i32 = arith.constant 128 : i32
      %38 = arith.addi %28, %c128_i32 : i32
      %39 = tpu.assume_multiple %38, 128 : i32
      %c0_28 = arith.constant 0 : index
      %40 = arith.index_cast %39 : i32 to index
      %41 = vector.load %arg9[%c0_28, %40] : memref<24x16384xbf16, #tpu.memory_space<vmem>>, vector<24x768xbf16>
      %c1 = arith.constant 1 : index
      %c0_29 = arith.constant 0 : index
      %c0_30 = arith.constant 0 : index
      %42 = vector.load %arg2[%c1, %c0_29, %c0_30] : memref<3x16x24xbf16, #tpu.memory_space<vmem>>, vector<1x16x24xbf16>
      %43 = vector.shape_cast %42 : vector<1x16x24xbf16> to vector<16x24xbf16>
      %cst_31 = arith.constant dense<0.000000e+00> : vector<16x768xf32>
      %44 = tpu.matmul %43, %41, %cst_31 {dimension_numbers = #tpu.dot_dimension_numbers<[1], [0], [0], [1], [0, 0, 1, 1], [], []>} : vector<16x24xbf16>, vector<24x768xbf16>, vector<16x768xf32> -> vector<16x768xf32>
      %45 = arith.addf %37, %44 : vector<16x768xf32>
      %c256_i32 = arith.constant 256 : i32
      %46 = arith.addi %28, %c256_i32 : i32
      %47 = tpu.assume_multiple %46, 128 : i32
      %c0_32 = arith.constant 0 : index
      %48 = arith.index_cast %47 : i32 to index
      %49 = vector.load %arg9[%c0_32, %48] : memref<24x16384xbf16, #tpu.memory_space<vmem>>, vector<24x768xbf16>
      %c2 = arith.constant 2 : index
      %c0_33 = arith.constant 0 : index
      %c0_34 = arith.constant 0 : index
      %50 = vector.load %arg2[%c2, %c0_33, %c0_34] : memref<3x16x24xbf16, #tpu.memory_space<vmem>>, vector<1x16x24xbf16>
      %51 = vector.shape_cast %50 : vector<1x16x24xbf16> to vector<16x24xbf16>
      %cst_35 = arith.constant dense<0.000000e+00> : vector<16x768xf32>
      %52 = tpu.matmul %51, %49, %cst_35 {dimension_numbers = #tpu.dot_dimension_numbers<[1], [0], [0], [1], [0, 0, 1, 1], [], []>} : vector<16x24xbf16>, vector<24x768xbf16>, vector<16x768xf32> -> vector<16x768xf32>
      %53 = arith.addf %45, %52 : vector<16x768xf32>
      %54 = vector.broadcast %21 : vector<16x1xf32> to vector<16x768xf32>
      %55 = arith.addf %53, %54 : vector<16x768xf32>
      %cst_36 = arith.constant 0.000000e+00 : f32
      %56 = vector.broadcast %cst_36 : f32 to vector<16x768xf32>
      %57 = arith.maximumf %55, %56 : vector<16x768xf32>
      %58 = vector.extract_strided_slice %57 {offsets = [0, 0], sizes = [16, 128], strides = [1, 1]} : vector<16x768xf32> to vector<16x128xf32>
      %59 = vector.extract_strided_slice %57 {offsets = [0, 128], sizes = [16, 128], strides = [1, 1]} : vector<16x768xf32> to vector<16x128xf32>
      %60 = arith.maximumf %58, %59 : vector<16x128xf32>
      %61 = vector.extract_strided_slice %60 {offsets = [0, 1], sizes = [16, 127], strides = [1, 1]} : vector<16x128xf32> to vector<16x127xf32>
      %62 = vector.extract_strided_slice %60 {offsets = [0, 0], sizes = [16, 1], strides = [1, 1]} : vector<16x128xf32> to vector<16x1xf32>
      %63 = tpu.concatenate %61, %62 in 1 : vector<16x127xf32>, vector<16x1xf32> -> vector<16x128xf32>
      %64 = arith.maximumf %60, %63 : vector<16x128xf32>
      %c3_i32 = arith.constant 3 : i32
      %65 = arith.muli %arg12, %c3_i32 : i32
      %c0_i32_37 = arith.constant 0 : i32
      %66 = arith.addi %65, %c0_i32_37 : i32
      %c128_i32_38 = arith.constant 128 : i32
      %67 = arith.muli %66, %c128_i32_38 : i32
      %68 = tpu.assume_multiple %67, 128 : i32
      %69 = arith.truncf %64 : vector<16x128xf32> to vector<16x128xbf16>
      %c0_39 = arith.constant 0 : index
      %70 = arith.index_cast %68 : i32 to index
      %71 = vector.load %arg10[%c0_39, %70] : memref<48x8064xbf16, #tpu.memory_space<vmem>>, vector<16x128xbf16>
      tpu.vector_store %arg10[%c0_39, %70], %69 {strides = array<i32>} : memref<48x8064xbf16, #tpu.memory_space<vmem>>, vector<16x128xbf16>,
      %72 = vector.extract_strided_slice %69 {offsets = [0, 2], sizes = [16, 126], strides = [1, 1]} : vector<16x128xbf16> to vector<16x126xbf16>
      %73 = vector.extract_strided_slice %69 {offsets = [0, 0], sizes = [16, 2], strides = [1, 1]} : vector<16x128xbf16> to vector<16x2xbf16>
      %74 = tpu.concatenate %72, %73 in 1 : vector<16x126xbf16>, vector<16x2xbf16> -> vector<16x128xbf16>
      %c16_40 = arith.constant 16 : index
      %75 = arith.index_cast %68 : i32 to index
      %76 = vector.load %arg10[%c16_40, %75] : memref<48x8064xbf16, #tpu.memory_space<vmem>>, vector<16x128xbf16>
      tpu.vector_store %arg10[%c16_40, %75], %74 {strides = array<i32>} : memref<48x8064xbf16, #tpu.memory_space<vmem>>, vector<16x128xbf16>,
      %77 = vector.extract_strided_slice %69 {offsets = [0, 4], sizes = [16, 124], strides = [1, 1]} : vector<16x128xbf16> to vector<16x124xbf16>
      %78 = vector.extract_strided_slice %69 {offsets = [0, 0], sizes = [16, 4], strides = [1, 1]} : vector<16x128xbf16> to vector<16x4xbf16>
      %79 = tpu.concatenate %77, %78 in 1 : vector<16x124xbf16>, vector<16x4xbf16> -> vector<16x128xbf16>
      %c32 = arith.constant 32 : index
      %80 = arith.index_cast %68 : i32 to index
      %81 = vector.load %arg10[%c32, %80] : memref<48x8064xbf16, #tpu.memory_space<vmem>>, vector<16x128xbf16>
      tpu.vector_store %arg10[%c32, %80], %79 {strides = array<i32>} : memref<48x8064xbf16, #tpu.memory_space<vmem>>, vector<16x128xbf16>,
      %82 = vector.extract_strided_slice %57 {offsets = [0, 256], sizes = [16, 128], strides = [1, 1]} : vector<16x768xf32> to vector<16x128xf32>
      %83 = vector.extract_strided_slice %57 {offsets = [0, 384], sizes = [16, 128], strides = [1, 1]} : vector<16x768xf32> to vector<16x128xf32>
      %84 = arith.maximumf %82, %83 : vector<16x128xf32>
      %85 = vector.extract_strided_slice %84 {offsets = [0, 1], sizes = [16, 127], strides = [1, 1]} : vector<16x128xf32> to vector<16x127xf32>
      %86 = vector.extract_strided_slice %84 {offsets = [0, 0], sizes = [16, 1], strides = [1, 1]} : vector<16x128xf32> to vector<16x1xf32>
      %87 = tpu.concatenate %85, %86 in 1 : vector<16x127xf32>, vector<16x1xf32> -> vector<16x128xf32>
      %88 = arith.maximumf %84, %87 : vector<16x128xf32>
      %c3_i32_41 = arith.constant 3 : i32
      %89 = arith.muli %arg12, %c3_i32_41 : i32
      %c1_i32_42 = arith.constant 1 : i32
      %90 = arith.addi %89, %c1_i32_42 : i32
      %c128_i32_43 = arith.constant 128 : i32
      %91 = arith.muli %90, %c128_i32_43 : i32
      %92 = tpu.assume_multiple %91, 128 : i32
      %93 = arith.truncf %88 : vector<16x128xf32> to vector<16x128xbf16>
      %c0_44 = arith.constant 0 : index
      %94 = arith.index_cast %92 : i32 to index
      %95 = vector.load %arg10[%c0_44, %94] : memref<48x8064xbf16, #tpu.memory_space<vmem>>, vector<16x128xbf16>
      tpu.vector_store %arg10[%c0_44, %94], %93 {strides = array<i32>} : memref<48x8064xbf16, #tpu.memory_space<vmem>>, vector<16x128xbf16>,
      %96 = vector.extract_strided_slice %93 {offsets = [0, 2], sizes = [16, 126], strides = [1, 1]} : vector<16x128xbf16> to vector<16x126xbf16>
      %97 = vector.extract_strided_slice %93 {offsets = [0, 0], sizes = [16, 2], strides = [1, 1]} : vector<16x128xbf16> to vector<16x2xbf16>
      %98 = tpu.concatenate %96, %97 in 1 : vector<16x126xbf16>, vector<16x2xbf16> -> vector<16x128xbf16>
      %c16_45 = arith.constant 16 : index
      %99 = arith.index_cast %92 : i32 to index
      %100 = vector.load %arg10[%c16_45, %99] : memref<48x8064xbf16, #tpu.memory_space<vmem>>, vector<16x128xbf16>
      tpu.vector_store %arg10[%c16_45, %99], %98 {strides = array<i32>} : memref<48x8064xbf16, #tpu.memory_space<vmem>>, vector<16x128xbf16>,
      %101 = vector.extract_strided_slice %93 {offsets = [0, 4], sizes = [16, 124], strides = [1, 1]} : vector<16x128xbf16> to vector<16x124xbf16>
      %102 = vector.extract_strided_slice %93 {offsets = [0, 0], sizes = [16, 4], strides = [1, 1]} : vector<16x128xbf16> to vector<16x4xbf16>
      %103 = tpu.concatenate %101, %102 in 1 : vector<16x124xbf16>, vector<16x4xbf16> -> vector<16x128xbf16>
      %c32_46 = arith.constant 32 : index
      %104 = arith.index_cast %92 : i32 to index
      %105 = vector.load %arg10[%c32_46, %104] : memref<48x8064xbf16, #tpu.memory_space<vmem>>, vector<16x128xbf16>
      tpu.vector_store %arg10[%c32_46, %104], %103 {strides = array<i32>} : memref<48x8064xbf16, #tpu.memory_space<vmem>>, vector<16x128xbf16>,
      %106 = vector.extract_strided_slice %57 {offsets = [0, 512], sizes = [16, 128], strides = [1, 1]} : vector<16x768xf32> to vector<16x128xf32>
      %107 = vector.extract_strided_slice %57 {offsets = [0, 640], sizes = [16, 128], strides = [1, 1]} : vector<16x768xf32> to vector<16x128xf32>
      %108 = arith.maximumf %106, %107 : vector<16x128xf32>
      %109 = vector.extract_strided_slice %108 {offsets = [0, 1], sizes = [16, 127], strides = [1, 1]} : vector<16x128xf32> to vector<16x127xf32>
      %110 = vector.extract_strided_slice %108 {offsets = [0, 0], sizes = [16, 1], strides = [1, 1]} : vector<16x128xf32> to vector<16x1xf32>
      %111 = tpu.concatenate %109, %110 in 1 : vector<16x127xf32>, vector<16x1xf32> -> vector<16x128xf32>
      %112 = arith.maximumf %108, %111 : vector<16x128xf32>
      %c3_i32_47 = arith.constant 3 : i32
      %113 = arith.muli %arg12, %c3_i32_47 : i32
      %c2_i32 = arith.constant 2 : i32
      %114 = arith.addi %113, %c2_i32 : i32
      %c128_i32_48 = arith.constant 128 : i32
      %115 = arith.muli %114, %c128_i32_48 : i32
      %116 = tpu.assume_multiple %115, 128 : i32
      %117 = arith.truncf %112 : vector<16x128xf32> to vector<16x128xbf16>
      %c0_49 = arith.constant 0 : index
      %118 = arith.index_cast %116 : i32 to index
      %119 = vector.load %arg10[%c0_49, %118] : memref<48x8064xbf16, #tpu.memory_space<vmem>>, vector<16x128xbf16>
      tpu.vector_store %arg10[%c0_49, %118], %117 {strides = array<i32>} : memref<48x8064xbf16, #tpu.memory_space<vmem>>, vector<16x128xbf16>,
      %120 = vector.extract_strided_slice %117 {offsets = [0, 2], sizes = [16, 126], strides = [1, 1]} : vector<16x128xbf16> to vector<16x126xbf16>
      %121 = vector.extract_strided_slice %117 {offsets = [0, 0], sizes = [16, 2], strides = [1, 1]} : vector<16x128xbf16> to vector<16x2xbf16>
      %122 = tpu.concatenate %120, %121 in 1 : vector<16x126xbf16>, vector<16x2xbf16> -> vector<16x128xbf16>
      %c16_50 = arith.constant 16 : index
      %123 = arith.index_cast %116 : i32 to index
      %124 = vector.load %arg10[%c16_50, %123] : memref<48x8064xbf16, #tpu.memory_space<vmem>>, vector<16x128xbf16>
      tpu.vector_store %arg10[%c16_50, %123], %122 {strides = array<i32>} : memref<48x8064xbf16, #tpu.memory_space<vmem>>, vector<16x128xbf16>,
      %125 = vector.extract_strided_slice %117 {offsets = [0, 4], sizes = [16, 124], strides = [1, 1]} : vector<16x128xbf16> to vector<16x124xbf16>
      %126 = vector.extract_strided_slice %117 {offsets = [0, 0], sizes = [16, 4], strides = [1, 1]} : vector<16x128xbf16> to vector<16x4xbf16>
      %127 = tpu.concatenate %125, %126 in 1 : vector<16x124xbf16>, vector<16x4xbf16> -> vector<16x128xbf16>
      %c32_51 = arith.constant 32 : index
      %128 = arith.index_cast %116 : i32 to index
      %129 = vector.load %arg10[%c32_51, %128] : memref<48x8064xbf16, #tpu.memory_space<vmem>>, vector<16x128xbf16>
      tpu.vector_store %arg10[%c32_51, %128], %127 {strides = array<i32>} : memref<48x8064xbf16, #tpu.memory_space<vmem>>, vector<16x128xbf16>,
    }
    %c21_i32_10 = arith.constant 21 : i32
    %c0_11 = arith.constant 0 : index
    %c0_12 = arith.constant 0 : index
    %23 = vector.load %arg5[%c0_11, %c0_12] : memref<32x1xf32, #tpu.memory_space<vmem>>, vector<32x1xf32>
    %c0_i32_13 = arith.constant 0 : i32
    %c10_i32 = arith.constant 10 : i32
    %24 = arith.addi %c0_i32_13, %c10_i32 : i32
    %c1_i32_14 = arith.constant 1 : i32
    scf.for %arg12 = %c0_i32_13 to %24 step %c1_i32_14  : i32 {
      %c768_i32 = arith.constant 768 : i32
      %27 = arith.muli %arg12, %c768_i32 : i32
      %28 = tpu.assume_multiple %27, 128 : i32
      %cst_21 = arith.constant 0.000000e+00 : f32
      %29 = vector.broadcast %cst_21 : f32 to vector<32x768xf32>
      %c0_i32_22 = arith.constant 0 : i32
      %30 = arith.addi %28, %c0_i32_22 : i32
      %31 = tpu.assume_multiple %30, 128 : i32
      %c0_23 = arith.constant 0 : index
      %32 = arith.index_cast %31 : i32 to index
      %33 = vector.load %arg10[%c0_23, %32] : memref<48x8064xbf16, #tpu.memory_space<vmem>>, vector<48x768xbf16>
      %c0_24 = arith.constant 0 : index
      %c0_25 = arith.constant 0 : index
      %c0_26 = arith.constant 0 : index
      %34 = vector.load %arg4[%c0_24, %c0_25, %c0_26] : memref<3x32x48xbf16, #tpu.memory_space<vmem>>, vector<1x32x48xbf16>
      %35 = vector.shape_cast %34 : vector<1x32x48xbf16> to vector<32x48xbf16>
      %cst_27 = arith.constant dense<0.000000e+00> : vector<32x768xf32>
      %36 = tpu.matmul %35, %33, %cst_27 {dimension_numbers = #tpu.dot_dimension_numbers<[1], [0], [0], [1], [0, 0, 1, 1], [], []>} : vector<32x48xbf16>, vector<48x768xbf16>, vector<32x768xf32> -> vector<32x768xf32>
      %37 = arith.addf %29, %36 : vector<32x768xf32>
      %c128_i32 = arith.constant 128 : i32
      %38 = arith.addi %28, %c128_i32 : i32
      %39 = tpu.assume_multiple %38, 128 : i32
      %c0_28 = arith.constant 0 : index
      %40 = arith.index_cast %39 : i32 to index
      %41 = vector.load %arg10[%c0_28, %40] : memref<48x8064xbf16, #tpu.memory_space<vmem>>, vector<48x768xbf16>
      %c1 = arith.constant 1 : index
      %c0_29 = arith.constant 0 : index
      %c0_30 = arith.constant 0 : index
      %42 = vector.load %arg4[%c1, %c0_29, %c0_30] : memref<3x32x48xbf16, #tpu.memory_space<vmem>>, vector<1x32x48xbf16>
      %43 = vector.shape_cast %42 : vector<1x32x48xbf16> to vector<32x48xbf16>
      %cst_31 = arith.constant dense<0.000000e+00> : vector<32x768xf32>
      %44 = tpu.matmul %43, %41, %cst_31 {dimension_numbers = #tpu.dot_dimension_numbers<[1], [0], [0], [1], [0, 0, 1, 1], [], []>} : vector<32x48xbf16>, vector<48x768xbf16>, vector<32x768xf32> -> vector<32x768xf32>
      %45 = arith.addf %37, %44 : vector<32x768xf32>
      %c256_i32 = arith.constant 256 : i32
      %46 = arith.addi %28, %c256_i32 : i32
      %47 = tpu.assume_multiple %46, 128 : i32
      %c0_32 = arith.constant 0 : index
      %48 = arith.index_cast %47 : i32 to index
      %49 = vector.load %arg10[%c0_32, %48] : memref<48x8064xbf16, #tpu.memory_space<vmem>>, vector<48x768xbf16>
      %c2 = arith.constant 2 : index
      %c0_33 = arith.constant 0 : index
      %c0_34 = arith.constant 0 : index
      %50 = vector.load %arg4[%c2, %c0_33, %c0_34] : memref<3x32x48xbf16, #tpu.memory_space<vmem>>, vector<1x32x48xbf16>
      %51 = vector.shape_cast %50 : vector<1x32x48xbf16> to vector<32x48xbf16>
      %cst_35 = arith.constant dense<0.000000e+00> : vector<32x768xf32>
      %52 = tpu.matmul %51, %49, %cst_35 {dimension_numbers = #tpu.dot_dimension_numbers<[1], [0], [0], [1], [0, 0, 1, 1], [], []>} : vector<32x48xbf16>, vector<48x768xbf16>, vector<32x768xf32> -> vector<32x768xf32>
      %53 = arith.addf %45, %52 : vector<32x768xf32>
      %54 = vector.broadcast %23 : vector<32x1xf32> to vector<32x768xf32>
      %55 = arith.addf %53, %54 : vector<32x768xf32>
      %cst_36 = arith.constant 0.000000e+00 : f32
      %56 = vector.broadcast %cst_36 : f32 to vector<32x768xf32>
      %57 = arith.maximumf %55, %56 : vector<32x768xf32>
      %58 = vector.extract_strided_slice %57 {offsets = [0, 0], sizes = [32, 128], strides = [1, 1]} : vector<32x768xf32> to vector<32x128xf32>
      %59 = vector.extract_strided_slice %57 {offsets = [0, 128], sizes = [32, 128], strides = [1, 1]} : vector<32x768xf32> to vector<32x128xf32>
      %60 = arith.maximumf %58, %59 : vector<32x128xf32>
      %61 = vector.extract_strided_slice %60 {offsets = [0, 2], sizes = [32, 126], strides = [1, 1]} : vector<32x128xf32> to vector<32x126xf32>
      %62 = vector.extract_strided_slice %60 {offsets = [0, 0], sizes = [32, 2], strides = [1, 1]} : vector<32x128xf32> to vector<32x2xf32>
      %63 = tpu.concatenate %61, %62 in 1 : vector<32x126xf32>, vector<32x2xf32> -> vector<32x128xf32>
      %64 = arith.maximumf %60, %63 : vector<32x128xf32>
      %c3_i32 = arith.constant 3 : i32
      %65 = arith.muli %arg12, %c3_i32 : i32
      %c0_i32_37 = arith.constant 0 : i32
      %66 = arith.addi %65, %c0_i32_37 : i32
      %c128_i32_38 = arith.constant 128 : i32
      %67 = arith.muli %66, %c128_i32_38 : i32
      %68 = tpu.assume_multiple %67, 128 : i32
      %69 = arith.truncf %64 : vector<32x128xf32> to vector<32x128xbf16>
      %c0_39 = arith.constant 0 : index
      %70 = arith.index_cast %68 : i32 to index
      %71 = vector.load %arg11[%c0_39, %70] : memref<96x3840xbf16, #tpu.memory_space<vmem>>, vector<32x128xbf16>
      tpu.vector_store %arg11[%c0_39, %70], %69 {strides = array<i32>} : memref<96x3840xbf16, #tpu.memory_space<vmem>>, vector<32x128xbf16>,
      %72 = vector.extract_strided_slice %69 {offsets = [0, 4], sizes = [32, 124], strides = [1, 1]} : vector<32x128xbf16> to vector<32x124xbf16>
      %73 = vector.extract_strided_slice %69 {offsets = [0, 0], sizes = [32, 4], strides = [1, 1]} : vector<32x128xbf16> to vector<32x4xbf16>
      %74 = tpu.concatenate %72, %73 in 1 : vector<32x124xbf16>, vector<32x4xbf16> -> vector<32x128xbf16>
      %c32 = arith.constant 32 : index
      %75 = arith.index_cast %68 : i32 to index
      %76 = vector.load %arg11[%c32, %75] : memref<96x3840xbf16, #tpu.memory_space<vmem>>, vector<32x128xbf16>
      tpu.vector_store %arg11[%c32, %75], %74 {strides = array<i32>} : memref<96x3840xbf16, #tpu.memory_space<vmem>>, vector<32x128xbf16>,
      %77 = vector.extract_strided_slice %69 {offsets = [0, 8], sizes = [32, 120], strides = [1, 1]} : vector<32x128xbf16> to vector<32x120xbf16>
      %78 = vector.extract_strided_slice %69 {offsets = [0, 0], sizes = [32, 8], strides = [1, 1]} : vector<32x128xbf16> to vector<32x8xbf16>
      %79 = tpu.concatenate %77, %78 in 1 : vector<32x120xbf16>, vector<32x8xbf16> -> vector<32x128xbf16>
      %c64 = arith.constant 64 : index
      %80 = arith.index_cast %68 : i32 to index
      %81 = vector.load %arg11[%c64, %80] : memref<96x3840xbf16, #tpu.memory_space<vmem>>, vector<32x128xbf16>
      tpu.vector_store %arg11[%c64, %80], %79 {strides = array<i32>} : memref<96x3840xbf16, #tpu.memory_space<vmem>>, vector<32x128xbf16>,
      %82 = vector.extract_strided_slice %57 {offsets = [0, 256], sizes = [32, 128], strides = [1, 1]} : vector<32x768xf32> to vector<32x128xf32>
      %83 = vector.extract_strided_slice %57 {offsets = [0, 384], sizes = [32, 128], strides = [1, 1]} : vector<32x768xf32> to vector<32x128xf32>
      %84 = arith.maximumf %82, %83 : vector<32x128xf32>
      %85 = vector.extract_strided_slice %84 {offsets = [0, 2], sizes = [32, 126], strides = [1, 1]} : vector<32x128xf32> to vector<32x126xf32>
      %86 = vector.extract_strided_slice %84 {offsets = [0, 0], sizes = [32, 2], strides = [1, 1]} : vector<32x128xf32> to vector<32x2xf32>
      %87 = tpu.concatenate %85, %86 in 1 : vector<32x126xf32>, vector<32x2xf32> -> vector<32x128xf32>
      %88 = arith.maximumf %84, %87 : vector<32x128xf32>
      %c3_i32_40 = arith.constant 3 : i32
      %89 = arith.muli %arg12, %c3_i32_40 : i32
      %c1_i32_41 = arith.constant 1 : i32
      %90 = arith.addi %89, %c1_i32_41 : i32
      %c128_i32_42 = arith.constant 128 : i32
      %91 = arith.muli %90, %c128_i32_42 : i32
      %92 = tpu.assume_multiple %91, 128 : i32
      %93 = arith.truncf %88 : vector<32x128xf32> to vector<32x128xbf16>
      %c0_43 = arith.constant 0 : index
      %94 = arith.index_cast %92 : i32 to index
      %95 = vector.load %arg11[%c0_43, %94] : memref<96x3840xbf16, #tpu.memory_space<vmem>>, vector<32x128xbf16>
      tpu.vector_store %arg11[%c0_43, %94], %93 {strides = array<i32>} : memref<96x3840xbf16, #tpu.memory_space<vmem>>, vector<32x128xbf16>,
      %96 = vector.extract_strided_slice %93 {offsets = [0, 4], sizes = [32, 124], strides = [1, 1]} : vector<32x128xbf16> to vector<32x124xbf16>
      %97 = vector.extract_strided_slice %93 {offsets = [0, 0], sizes = [32, 4], strides = [1, 1]} : vector<32x128xbf16> to vector<32x4xbf16>
      %98 = tpu.concatenate %96, %97 in 1 : vector<32x124xbf16>, vector<32x4xbf16> -> vector<32x128xbf16>
      %c32_44 = arith.constant 32 : index
      %99 = arith.index_cast %92 : i32 to index
      %100 = vector.load %arg11[%c32_44, %99] : memref<96x3840xbf16, #tpu.memory_space<vmem>>, vector<32x128xbf16>
      tpu.vector_store %arg11[%c32_44, %99], %98 {strides = array<i32>} : memref<96x3840xbf16, #tpu.memory_space<vmem>>, vector<32x128xbf16>,
      %101 = vector.extract_strided_slice %93 {offsets = [0, 8], sizes = [32, 120], strides = [1, 1]} : vector<32x128xbf16> to vector<32x120xbf16>
      %102 = vector.extract_strided_slice %93 {offsets = [0, 0], sizes = [32, 8], strides = [1, 1]} : vector<32x128xbf16> to vector<32x8xbf16>
      %103 = tpu.concatenate %101, %102 in 1 : vector<32x120xbf16>, vector<32x8xbf16> -> vector<32x128xbf16>
      %c64_45 = arith.constant 64 : index
      %104 = arith.index_cast %92 : i32 to index
      %105 = vector.load %arg11[%c64_45, %104] : memref<96x3840xbf16, #tpu.memory_space<vmem>>, vector<32x128xbf16>
      tpu.vector_store %arg11[%c64_45, %104], %103 {strides = array<i32>} : memref<96x3840xbf16, #tpu.memory_space<vmem>>, vector<32x128xbf16>,
      %106 = vector.extract_strided_slice %57 {offsets = [0, 512], sizes = [32, 128], strides = [1, 1]} : vector<32x768xf32> to vector<32x128xf32>
      %107 = vector.extract_strided_slice %57 {offsets = [0, 640], sizes = [32, 128], strides = [1, 1]} : vector<32x768xf32> to vector<32x128xf32>
      %108 = arith.maximumf %106, %107 : vector<32x128xf32>
      %109 = vector.extract_strided_slice %108 {offsets = [0, 2], sizes = [32, 126], strides = [1, 1]} : vector<32x128xf32> to vector<32x126xf32>
      %110 = vector.extract_strided_slice %108 {offsets = [0, 0], sizes = [32, 2], strides = [1, 1]} : vector<32x128xf32> to vector<32x2xf32>
      %111 = tpu.concatenate %109, %110 in 1 : vector<32x126xf32>, vector<32x2xf32> -> vector<32x128xf32>
      %112 = arith.maximumf %108, %111 : vector<32x128xf32>
      %c3_i32_46 = arith.constant 3 : i32
      %113 = arith.muli %arg12, %c3_i32_46 : i32
      %c2_i32 = arith.constant 2 : i32
      %114 = arith.addi %113, %c2_i32 : i32
      %c128_i32_47 = arith.constant 128 : i32
      %115 = arith.muli %114, %c128_i32_47 : i32
      %116 = tpu.assume_multiple %115, 128 : i32
      %117 = arith.truncf %112 : vector<32x128xf32> to vector<32x128xbf16>
      %c0_48 = arith.constant 0 : index
      %118 = arith.index_cast %116 : i32 to index
      %119 = vector.load %arg11[%c0_48, %118] : memref<96x3840xbf16, #tpu.memory_space<vmem>>, vector<32x128xbf16>
      tpu.vector_store %arg11[%c0_48, %118], %117 {strides = array<i32>} : memref<96x3840xbf16, #tpu.memory_space<vmem>>, vector<32x128xbf16>,
      %120 = vector.extract_strided_slice %117 {offsets = [0, 4], sizes = [32, 124], strides = [1, 1]} : vector<32x128xbf16> to vector<32x124xbf16>
      %121 = vector.extract_strided_slice %117 {offsets = [0, 0], sizes = [32, 4], strides = [1, 1]} : vector<32x128xbf16> to vector<32x4xbf16>
      %122 = tpu.concatenate %120, %121 in 1 : vector<32x124xbf16>, vector<32x4xbf16> -> vector<32x128xbf16>
      %c32_49 = arith.constant 32 : index
      %123 = arith.index_cast %116 : i32 to index
      %124 = vector.load %arg11[%c32_49, %123] : memref<96x3840xbf16, #tpu.memory_space<vmem>>, vector<32x128xbf16>
      tpu.vector_store %arg11[%c32_49, %123], %122 {strides = array<i32>} : memref<96x3840xbf16, #tpu.memory_space<vmem>>, vector<32x128xbf16>,
      %125 = vector.extract_strided_slice %117 {offsets = [0, 8], sizes = [32, 120], strides = [1, 1]} : vector<32x128xbf16> to vector<32x120xbf16>
      %126 = vector.extract_strided_slice %117 {offsets = [0, 0], sizes = [32, 8], strides = [1, 1]} : vector<32x128xbf16> to vector<32x8xbf16>
      %127 = tpu.concatenate %125, %126 in 1 : vector<32x120xbf16>, vector<32x8xbf16> -> vector<32x128xbf16>
      %c64_50 = arith.constant 64 : index
      %128 = arith.index_cast %116 : i32 to index
      %129 = vector.load %arg11[%c64_50, %128] : memref<96x3840xbf16, #tpu.memory_space<vmem>>, vector<32x128xbf16>
      tpu.vector_store %arg11[%c64_50, %128], %127 {strides = array<i32>} : memref<96x3840xbf16, #tpu.memory_space<vmem>>, vector<32x128xbf16>,
    }
    %c10_i32_15 = arith.constant 10 : i32
    %c0_16 = arith.constant 0 : index
    %c0_17 = arith.constant 0 : index
    %25 = vector.load %arg7[%c0_16, %c0_17] : memref<64x1xf32, #tpu.memory_space<vmem>>, vector<64x1xf32>
    %c0_i32_18 = arith.constant 0 : i32
    %c7_i32 = arith.constant 7 : i32
    %26 = arith.addi %c0_i32_18, %c7_i32 : i32
    %c1_i32_19 = arith.constant 1 : i32
    scf.for %arg12 = %c0_i32_18 to %26 step %c1_i32_19  : i32 {
      %c512_i32 = arith.constant 512 : i32
      %27 = arith.muli %arg12, %c512_i32 : i32
      %28 = tpu.assume_multiple %27, 128 : i32
      %cst_21 = arith.constant 0.000000e+00 : f32
      %29 = vector.broadcast %cst_21 : f32 to vector<64x512xf32>
      %c0_i32_22 = arith.constant 0 : i32
      %30 = arith.addi %28, %c0_i32_22 : i32
      %31 = tpu.assume_multiple %30, 128 : i32
      %c0_23 = arith.constant 0 : index
      %32 = arith.index_cast %31 : i32 to index
      %33 = vector.load %arg11[%c0_23, %32] : memref<96x3840xbf16, #tpu.memory_space<vmem>>, vector<96x512xbf16>
      %c0_24 = arith.constant 0 : index
      %c0_25 = arith.constant 0 : index
      %c0_26 = arith.constant 0 : index
      %34 = vector.load %arg6[%c0_24, %c0_25, %c0_26] : memref<3x64x96xbf16, #tpu.memory_space<vmem>>, vector<1x64x96xbf16>
      %35 = vector.shape_cast %34 : vector<1x64x96xbf16> to vector<64x96xbf16>
      %cst_27 = arith.constant dense<0.000000e+00> : vector<64x512xf32>
      %36 = tpu.matmul %35, %33, %cst_27 {dimension_numbers = #tpu.dot_dimension_numbers<[1], [0], [0], [1], [0, 0, 1, 1], [], []>} : vector<64x96xbf16>, vector<96x512xbf16>, vector<64x512xf32> -> vector<64x512xf32>
      %37 = arith.addf %29, %36 : vector<64x512xf32>
      %c128_i32 = arith.constant 128 : i32
      %38 = arith.addi %28, %c128_i32 : i32
      %39 = tpu.assume_multiple %38, 128 : i32
      %c0_28 = arith.constant 0 : index
      %40 = arith.index_cast %39 : i32 to index
      %41 = vector.load %arg11[%c0_28, %40] : memref<96x3840xbf16, #tpu.memory_space<vmem>>, vector<96x512xbf16>
      %c1 = arith.constant 1 : index
      %c0_29 = arith.constant 0 : index
      %c0_30 = arith.constant 0 : index
      %42 = vector.load %arg6[%c1, %c0_29, %c0_30] : memref<3x64x96xbf16, #tpu.memory_space<vmem>>, vector<1x64x96xbf16>
      %43 = vector.shape_cast %42 : vector<1x64x96xbf16> to vector<64x96xbf16>
      %cst_31 = arith.constant dense<0.000000e+00> : vector<64x512xf32>
      %44 = tpu.matmul %43, %41, %cst_31 {dimension_numbers = #tpu.dot_dimension_numbers<[1], [0], [0], [1], [0, 0, 1, 1], [], []>} : vector<64x96xbf16>, vector<96x512xbf16>, vector<64x512xf32> -> vector<64x512xf32>
      %45 = arith.addf %37, %44 : vector<64x512xf32>
      %c256_i32 = arith.constant 256 : i32
      %46 = arith.addi %28, %c256_i32 : i32
      %47 = tpu.assume_multiple %46, 128 : i32
      %c0_32 = arith.constant 0 : index
      %48 = arith.index_cast %47 : i32 to index
      %49 = vector.load %arg11[%c0_32, %48] : memref<96x3840xbf16, #tpu.memory_space<vmem>>, vector<96x512xbf16>
      %c2 = arith.constant 2 : index
      %c0_33 = arith.constant 0 : index
      %c0_34 = arith.constant 0 : index
      %50 = vector.load %arg6[%c2, %c0_33, %c0_34] : memref<3x64x96xbf16, #tpu.memory_space<vmem>>, vector<1x64x96xbf16>
      %51 = vector.shape_cast %50 : vector<1x64x96xbf16> to vector<64x96xbf16>
      %cst_35 = arith.constant dense<0.000000e+00> : vector<64x512xf32>
      %52 = tpu.matmul %51, %49, %cst_35 {dimension_numbers = #tpu.dot_dimension_numbers<[1], [0], [0], [1], [0, 0, 1, 1], [], []>} : vector<64x96xbf16>, vector<96x512xbf16>, vector<64x512xf32> -> vector<64x512xf32>
      %53 = arith.addf %45, %52 : vector<64x512xf32>
      %54 = vector.broadcast %25 : vector<64x1xf32> to vector<64x512xf32>
      %55 = arith.addf %53, %54 : vector<64x512xf32>
      %cst_36 = arith.constant 0.000000e+00 : f32
      %56 = vector.broadcast %cst_36 : f32 to vector<64x512xf32>
      %57 = arith.maximumf %55, %56 : vector<64x512xf32>
      %58 = vector.extract_strided_slice %57 {offsets = [0, 0], sizes = [64, 128], strides = [1, 1]} : vector<64x512xf32> to vector<64x128xf32>
      %59 = vector.extract_strided_slice %57 {offsets = [0, 128], sizes = [64, 128], strides = [1, 1]} : vector<64x512xf32> to vector<64x128xf32>
      %60 = arith.maximumf %58, %59 : vector<64x128xf32>
      %61 = vector.extract_strided_slice %60 {offsets = [0, 4], sizes = [64, 124], strides = [1, 1]} : vector<64x128xf32> to vector<64x124xf32>
      %62 = vector.extract_strided_slice %60 {offsets = [0, 0], sizes = [64, 4], strides = [1, 1]} : vector<64x128xf32> to vector<64x4xf32>
      %63 = tpu.concatenate %61, %62 in 1 : vector<64x124xf32>, vector<64x4xf32> -> vector<64x128xf32>
      %64 = arith.maximumf %60, %63 : vector<64x128xf32>
      %c2_i32 = arith.constant 2 : i32
      %65 = arith.muli %arg12, %c2_i32 : i32
      %c0_i32_37 = arith.constant 0 : i32
      %66 = arith.addi %65, %c0_i32_37 : i32
      %67 = arith.truncf %64 : vector<64x128xf32> to vector<64x128xbf16>
      %cst_38 = arith.constant dense<0.000000e+00> : vector<64x14xf32>
      %68 = tpu.matmul %67, %20, %cst_38 {dimension_numbers = #tpu.dot_dimension_numbers<[1], [0], [0], [1], [0, 0, 1, 1], [], []>} : vector<64x128xbf16>, vector<128x14xbf16>, vector<64x14xf32> -> vector<64x14xf32>
      %c64_i32 = arith.constant 64 : i32
      %69 = arith.muli %66, %c64_i32 : i32
      %70 = tpu.assume_multiple %69, 64 : i32
      %71 = arith.truncf %68 : vector<64x14xf32> to vector<64x14xbf16>
      %c0_39 = arith.constant 0 : index
      %72 = arith.index_cast %70 : i32 to index
      %c0_40 = arith.constant 0 : index
      %73 = vector.load %arg8[%c0_39, %72, %c0_40] : memref<1x896x14xbf16, #tpu.memory_space<vmem>>, vector<1x64x14xbf16>
      %74 = vector.shape_cast %73 : vector<1x64x14xbf16> to vector<64x14xbf16>
      %75 = vector.shape_cast %71 : vector<64x14xbf16> to vector<1x64x14xbf16>
      tpu.vector_store %arg8[%c0_39, %72, %c0_40], %75 {strides = array<i32>} : memref<1x896x14xbf16, #tpu.memory_space<vmem>>, vector<1x64x14xbf16>,
      %76 = vector.extract_strided_slice %57 {offsets = [0, 256], sizes = [64, 128], strides = [1, 1]} : vector<64x512xf32> to vector<64x128xf32>
      %77 = vector.extract_strided_slice %57 {offsets = [0, 384], sizes = [64, 128], strides = [1, 1]} : vector<64x512xf32> to vector<64x128xf32>
      %78 = arith.maximumf %76, %77 : vector<64x128xf32>
      %79 = vector.extract_strided_slice %78 {offsets = [0, 4], sizes = [64, 124], strides = [1, 1]} : vector<64x128xf32> to vector<64x124xf32>
      %80 = vector.extract_strided_slice %78 {offsets = [0, 0], sizes = [64, 4], strides = [1, 1]} : vector<64x128xf32> to vector<64x4xf32>
      %81 = tpu.concatenate %79, %80 in 1 : vector<64x124xf32>, vector<64x4xf32> -> vector<64x128xf32>
      %82 = arith.maximumf %78, %81 : vector<64x128xf32>
      %c2_i32_41 = arith.constant 2 : i32
      %83 = arith.muli %arg12, %c2_i32_41 : i32
      %c1_i32_42 = arith.constant 1 : i32
      %84 = arith.addi %83, %c1_i32_42 : i32
      %85 = arith.truncf %82 : vector<64x128xf32> to vector<64x128xbf16>
      %cst_43 = arith.constant dense<0.000000e+00> : vector<64x14xf32>
      %86 = tpu.matmul %85, %20, %cst_43 {dimension_numbers = #tpu.dot_dimension_numbers<[1], [0], [0], [1], [0, 0, 1, 1], [], []>} : vector<64x128xbf16>, vector<128x14xbf16>, vector<64x14xf32> -> vector<64x14xf32>
      %c64_i32_44 = arith.constant 64 : i32
      %87 = arith.muli %84, %c64_i32_44 : i32
      %88 = tpu.assume_multiple %87, 64 : i32
      %89 = arith.truncf %86 : vector<64x14xf32> to vector<64x14xbf16>
      %c0_45 = arith.constant 0 : index
      %90 = arith.index_cast %88 : i32 to index
      %c0_46 = arith.constant 0 : index
      %91 = vector.load %arg8[%c0_45, %90, %c0_46] : memref<1x896x14xbf16, #tpu.memory_space<vmem>>, vector<1x64x14xbf16>
      %92 = vector.shape_cast %91 : vector<1x64x14xbf16> to vector<64x14xbf16>
      %93 = vector.shape_cast %89 : vector<64x14xbf16> to vector<1x64x14xbf16>
      tpu.vector_store %arg8[%c0_45, %90, %c0_46], %93 {strides = array<i32>} : memref<1x896x14xbf16, #tpu.memory_space<vmem>>, vector<1x64x14xbf16>,
    }
    %c7_i32_20 = arith.constant 7 : i32
    return
  }
  func.func @transform_0(%arg0: i32) -> (i32, i32, i32) {
    %c0_i32 = arith.constant 0 : i32
    %c0_i32_0 = arith.constant 0 : i32
    %c0_i32_1 = arith.constant 0 : i32
    return %arg0, %c0_i32, %c0_i32_0 : i32, i32, i32
  }
  func.func @transform_1(%arg0: i32) -> (i32, i32, i32) {
    %c0_i32 = arith.constant 0 : i32
    %c0_i32_0 = arith.constant 0 : i32
    %c0_i32_1 = arith.constant 0 : i32
    %c0_i32_2 = arith.constant 0 : i32
    return %c0_i32, %c0_i32_0, %c0_i32_1 : i32, i32, i32
  }
  func.func @transform_2(%arg0: i32) -> (i32, i32) {
    %c0_i32 = arith.constant 0 : i32
    %c0_i32_0 = arith.constant 0 : i32
    %c0_i32_1 = arith.constant 0 : i32
    return %c0_i32, %c0_i32_0 : i32, i32
  }
  func.func @transform_3(%arg0: i32) -> (i32, i32, i32) {
    %c0_i32 = arith.constant 0 : i32
    %c0_i32_0 = arith.constant 0 : i32
    %c0_i32_1 = arith.constant 0 : i32
    %c0_i32_2 = arith.constant 0 : i32
    return %c0_i32, %c0_i32_0, %c0_i32_1 : i32, i32, i32
  }
  func.func @transform_4(%arg0: i32) -> (i32, i32) {
    %c0_i32 = arith.constant 0 : i32
    %c0_i32_0 = arith.constant 0 : i32
    %c0_i32_1 = arith.constant 0 : i32
    return %c0_i32, %c0_i32_0 : i32, i32
  }
  func.func @transform_5(%arg0: i32) -> (i32, i32, i32) {
    %c0_i32 = arith.constant 0 : i32
    %c0_i32_0 = arith.constant 0 : i32
    %c0_i32_1 = arith.constant 0 : i32
    %c0_i32_2 = arith.constant 0 : i32
    return %c0_i32, %c0_i32_0, %c0_i32_1 : i32, i32, i32
  }
  func.func @transform_6(%arg0: i32) -> (i32, i32) {
    %c0_i32 = arith.constant 0 : i32
    %c0_i32_0 = arith.constant 0 : i32
    %c0_i32_1 = arith.constant 0 : i32
    return %c0_i32, %c0_i32_0 : i32, i32
  }
  func.func @transform_7(%arg0: i32) -> (i32, i32, i32) {
    %c0_i32 = arith.constant 0 : i32
    %c0_i32_0 = arith.constant 0 : i32
    %c0_i32_1 = arith.constant 0 : i32
    return %arg0, %c0_i32, %c0_i32_0 : i32, i32, i32
  }
}

module attributes {stable_mosaic.version = 11 : i64} {
  func.func @_fc_kernel(%arg0: i32, %arg1: memref<2x12544xbf16, #tpu.memory_space<vmem>>, %arg2: memref<12544x32xbf16, #tpu.memory_space<vmem>>, %arg3: memref<1x32xf32, #tpu.memory_space<vmem>>, %arg4: memref<32x16xf32, #tpu.memory_space<vmem>>, %arg5: memref<1x16xf32, #tpu.memory_space<vmem>>, %arg6: memref<16x8xf32, #tpu.memory_space<vmem>>, %arg7: memref<1x8xf32, #tpu.memory_space<vmem>>, %arg8: memref<2x8xf32, #tpu.memory_space<vmem>>) attributes {dimension_semantics = [#tpu.dimension_semantics<arbitrary>], iteration_bounds = array<i64: 1>, scalar_prefetch = 0 : i64, scratch_operands = 0 : i64, tpu.core_type = #tpu.core_type<tc>, window_params = [{pipeline_mode = #tpu.pipeline_mode<synchronous>, transform_indices = @transform_0, window_bounds = array<i64: 2, 12544>}, {pipeline_mode = #tpu.pipeline_mode<synchronous>, transform_indices = @transform_1, window_bounds = array<i64: 12544, 32>}, {pipeline_mode = #tpu.pipeline_mode<synchronous>, transform_indices = @transform_2, window_bounds = array<i64: 1, 32>}, {pipeline_mode = #tpu.pipeline_mode<synchronous>, transform_indices = @transform_3, window_bounds = array<i64: 32, 16>}, {pipeline_mode = #tpu.pipeline_mode<synchronous>, transform_indices = @transform_4, window_bounds = array<i64: 1, 16>}, {pipeline_mode = #tpu.pipeline_mode<synchronous>, transform_indices = @transform_5, window_bounds = array<i64: 16, 8>}, {pipeline_mode = #tpu.pipeline_mode<synchronous>, transform_indices = @transform_6, window_bounds = array<i64: 1, 8>}, {pipeline_mode = #tpu.pipeline_mode<synchronous>, transform_indices = @transform_7, window_bounds = array<i64: 2, 8>}]} {
    %c0 = arith.constant 0 : index
    %c0_0 = arith.constant 0 : index
    %0 = vector.load %arg1[%c0, %c0_0] : memref<2x12544xbf16, #tpu.memory_space<vmem>>, vector<2x12544xbf16>
    %c0_1 = arith.constant 0 : index
    %c0_2 = arith.constant 0 : index
    %1 = vector.load %arg2[%c0_1, %c0_2] : memref<12544x32xbf16, #tpu.memory_space<vmem>>, vector<12544x32xbf16>
    %cst = arith.constant dense<0.000000e+00> : vector<2x32xf32>
    %2 = tpu.matmul %0, %1, %cst {dimension_numbers = #tpu.dot_dimension_numbers<[1], [0], [0], [1], [0, 0, 1, 1], [], []>} : vector<2x12544xbf16>, vector<12544x32xbf16>, vector<2x32xf32> -> vector<2x32xf32>
    %c0_3 = arith.constant 0 : index
    %c0_4 = arith.constant 0 : index
    %3 = vector.load %arg3[%c0_3, %c0_4] : memref<1x32xf32, #tpu.memory_space<vmem>>, vector<1x32xf32>
    %4 = vector.broadcast %3 : vector<1x32xf32> to vector<2x32xf32>
    %5 = arith.addf %2, %4 : vector<2x32xf32>
    %cst_5 = arith.constant 0.000000e+00 : f32
    %6 = vector.broadcast %cst_5 : f32 to vector<2x32xf32>
    %7 = arith.maximumf %5, %6 : vector<2x32xf32>
    %c0_6 = arith.constant 0 : index
    %c0_7 = arith.constant 0 : index
    %8 = vector.load %arg4[%c0_6, %c0_7] : memref<32x16xf32, #tpu.memory_space<vmem>>, vector<32x16xf32>
    %cst_8 = arith.constant dense<0.000000e+00> : vector<2x16xf32>
    %9 = tpu.matmul %7, %8, %cst_8 {dimension_numbers = #tpu.dot_dimension_numbers<[1], [0], [0], [1], [0, 0, 1, 1], [], []>} : vector<2x32xf32>, vector<32x16xf32>, vector<2x16xf32> -> vector<2x16xf32>
    %c0_9 = arith.constant 0 : index
    %c0_10 = arith.constant 0 : index
    %10 = vector.load %arg5[%c0_9, %c0_10] : memref<1x16xf32, #tpu.memory_space<vmem>>, vector<1x16xf32>
    %11 = vector.broadcast %10 : vector<1x16xf32> to vector<2x16xf32>
    %12 = arith.addf %9, %11 : vector<2x16xf32>
    %cst_11 = arith.constant 0.000000e+00 : f32
    %13 = vector.broadcast %cst_11 : f32 to vector<2x16xf32>
    %14 = arith.maximumf %12, %13 : vector<2x16xf32>
    %c0_12 = arith.constant 0 : index
    %c0_13 = arith.constant 0 : index
    %15 = vector.load %arg6[%c0_12, %c0_13] : memref<16x8xf32, #tpu.memory_space<vmem>>, vector<16x8xf32>
    %cst_14 = arith.constant dense<0.000000e+00> : vector<2x8xf32>
    %16 = tpu.matmul %14, %15, %cst_14 {dimension_numbers = #tpu.dot_dimension_numbers<[1], [0], [0], [1], [0, 0, 1, 1], [], []>} : vector<2x16xf32>, vector<16x8xf32>, vector<2x8xf32> -> vector<2x8xf32>
    %c0_15 = arith.constant 0 : index
    %c0_16 = arith.constant 0 : index
    %17 = vector.load %arg7[%c0_15, %c0_16] : memref<1x8xf32, #tpu.memory_space<vmem>>, vector<1x8xf32>
    %18 = vector.broadcast %17 : vector<1x8xf32> to vector<2x8xf32>
    %19 = arith.addf %16, %18 : vector<2x8xf32>
    %c0_17 = arith.constant 0 : index
    %c0_18 = arith.constant 0 : index
    %20 = vector.load %arg8[%c0_17, %c0_18] : memref<2x8xf32, #tpu.memory_space<vmem>>, vector<2x8xf32>
    tpu.vector_store %arg8[%c0_17, %c0_18], %19 {strides = array<i32>} : memref<2x8xf32, #tpu.memory_space<vmem>>, vector<2x8xf32>,
    return
  }
  func.func @transform_0(%arg0: i32) -> (i32, i32) {
    %c0_i32 = arith.constant 0 : i32
    %c0_i32_0 = arith.constant 0 : i32
    %c0_i32_1 = arith.constant 0 : i32
    return %c0_i32, %c0_i32_0 : i32, i32
  }
  func.func @transform_1(%arg0: i32) -> (i32, i32) {
    %c0_i32 = arith.constant 0 : i32
    %c0_i32_0 = arith.constant 0 : i32
    %c0_i32_1 = arith.constant 0 : i32
    return %c0_i32, %c0_i32_0 : i32, i32
  }
  func.func @transform_2(%arg0: i32) -> (i32, i32) {
    %c0_i32 = arith.constant 0 : i32
    %c0_i32_0 = arith.constant 0 : i32
    %c0_i32_1 = arith.constant 0 : i32
    return %c0_i32, %c0_i32_0 : i32, i32
  }
  func.func @transform_3(%arg0: i32) -> (i32, i32) {
    %c0_i32 = arith.constant 0 : i32
    %c0_i32_0 = arith.constant 0 : i32
    %c0_i32_1 = arith.constant 0 : i32
    return %c0_i32, %c0_i32_0 : i32, i32
  }
  func.func @transform_4(%arg0: i32) -> (i32, i32) {
    %c0_i32 = arith.constant 0 : i32
    %c0_i32_0 = arith.constant 0 : i32
    %c0_i32_1 = arith.constant 0 : i32
    return %c0_i32, %c0_i32_0 : i32, i32
  }
  func.func @transform_5(%arg0: i32) -> (i32, i32) {
    %c0_i32 = arith.constant 0 : i32
    %c0_i32_0 = arith.constant 0 : i32
    %c0_i32_1 = arith.constant 0 : i32
    return %c0_i32, %c0_i32_0 : i32, i32
  }
  func.func @transform_6(%arg0: i32) -> (i32, i32) {
    %c0_i32 = arith.constant 0 : i32
    %c0_i32_0 = arith.constant 0 : i32
    %c0_i32_1 = arith.constant 0 : i32
    return %c0_i32, %c0_i32_0 : i32, i32
  }
  func.func @transform_7(%arg0: i32) -> (i32, i32) {
    %c0_i32 = arith.constant 0 : i32
    %c0_i32_0 = arith.constant 0 : i32
    %c0_i32_1 = arith.constant 0 : i32
    return %c0_i32, %c0_i32_0 : i32, i32
  }
}

</mosaic_0001>

<bundles_post_ra>
// kernel: net_forward.2
= control target key start
LH: loop header
LB: loop body
LE: loop exit
PB: predicated region body
PF: predicated region fallthrough
CT: control target
= control target key end

     0   :  { %s6914_s24 = smov 0   ;;  %s9732_s0 = inlined_call_operand.vmem [shape: bf16[2,3,16384], index: 0, kind: input, shape index: {}]   ;;  %s9733_s1 = inlined_call_operand.vmem [shape: bf16[3,16,24], index: 1, kind: input, shape index: {}]   ;;  %s9734_s2 = inlined_call_operand.vmem [shape: f32[16,1], index: 2, kind: input, shape index: {}]   ;;  %s9735_s3 = inlined_call_operand.vmem [shape: bf16[3,32,48], index: 3, kind: input, shape index: {}]   ;;  %s9736_s4 = inlined_call_operand.vmem [shape: f32[32,1], index: 4, kind: input, shape index: {}]   ;;  %s9737_s5 = inlined_call_operand.vmem [shape: bf16[3,64,96], index: 5, kind: input, shape index: {}]   ;;  %s9738_s6 = inlined_call_operand.vmem [shape: f32[64,1], index: 6, kind: input, shape index: {}]   ;;  %s9739_s7 = inlined_call_operand.vmem [shape: bf16[2,896,14], index: 7, kind: output, shape index: {}]  }
   0x1 LB: > { %s6000_s25 = sadd.s32 4294967295, %s6845_s24   ;;  %p6004_p0 = scmp.ge.s32.totalorder %s6845_s24, 1  ;;  %s6845_s24 = sphi %s6914_s24, %s17_s24  }
   0x2   : > { %p237_p1 = scmp.lt.s32.totalorder %s6845_s24, 3 }
   0x4   : > { %p238_p2 = pnand %p6004_p0, %p237_p1 }
   0x6   : > { %241 = sbr.rel (%p238_p2) target bundleno = 2501 (0x9c5), region = 48 }
   0xd   : > { %p6924_p3 = scmp.lt.s32.totalorder %s6000_s25, 1  ;;  %v540_v0 = vlaneseq  ;;  %v6859_v1 = vmov 0   ;;  %v6860_v2 = vmov 1983009808   ;;  %vm1080_vm0 = vcmask 1041408   ;;  %s6861_s12 = smov 127  }
   0xe   : > { %280 = vst [vmem:[#allocation2] sm:$0xff] %v6859_v1  ;;  %v6929_v3 = vunpack.c.l.s4 %v6860_v2  ;;  %vm1081_vm1 = vsmask.f32 1280  ;;  %281 = vst [vmem:[#allocation2 + $0x8] sm:$0xff] %v6859_v1  ;;  %vm1083_vm2 = vcmask 1045508   ;;  %s6862_s13 = smov 126  }
   0xf   : > { %282 = vst [vmem:[#allocation2 + $0x10] sm:$0xff] %v6859_v1  ;;  %283 = vst [vmem:[#allocation2 + $0x18] sm:$0xff] %v6859_v1  ;;  %s10040_s25 = smov (!%p6924_p3, %s6000_s25), 1  ;;  %v7127_v4 = vshrl.u32 %v540_v0, 7  ;;  %vm1084_vm3 = vsmask.f32 5376 }
  0x10   : > { %284 = vst [vmem:[#allocation2 + $0x20] sm:$0xff] %v6859_v1  ;;  %285 = vst [vmem:[#allocation2 + $0x28] sm:$0xff] %v6859_v1  ;;  %v539_v5 = vunpack.c.0.s8 %v6929_v3  ;;  %v3035_v6 = vand.u32 127, %v540_v0  ;;  %s6372_s27 = sshll.u32 %s10040_s25, 8  ;;  %s6618_s28 = smul.u32 448, %s10040_s25 }
  0x11   : > { %286 = vst [vmem:[#allocation2 + $0x30] sm:$0xff] %v6859_v1  ;;  %287 = vst [vmem:[#allocation2 + $0x38] sm:$0xff] %v6859_v1  ;;  %v7138_v8 = vadd.s32 8, %v7127_v4  ;;  %v7141_v9 = vadd.s32 16, %v7127_v4  ;;  %v7144_v10 = vadd.s32 24, %v7127_v4  ;;  %v7147_v11 = vadd.s32 32, %v7127_v4  ;;  %s7152_s8 = scalar_lea.vmem %s9732_s0, %s6372_s27 }
  0x12   : > { %288 = vst [vmem:[#allocation2 + $0x40] sm:$0xff] %v6859_v1  ;;  %289 = vst [vmem:[#allocation2 + $0x48] sm:$0xff] %v6859_v1  ;;  %v7155_v12 = vsub.s32 %v539_v5, %v7127_v4  ;;  %v7162_v14 = vadd.s32 40, %v7127_v4  ;;  %v7165_v15 = vadd.s32 48, %v7127_v4  ;;  %v7168_v16 = vadd.s32 56, %v7127_v4  ;;  %s7173_s11 = scalar_lea.vmem %s9739_s7, %s6618_s28  ;;  %v472_v17 = vld [vmem:[%s7152_s8] sm:$0xff] }
  0x13   : > { %290 = vst [vmem:[#allocation2 + $0x50] sm:$0xff] %v6859_v1  ;;  %291 = vst [vmem:[#allocation2 + $0x58] sm:$0xff] %v6859_v1  ;;  %v7177_v18 = vadd.s32 64, %v7127_v4  ;;  %v7180_v19 = vadd.s32 72, %v7127_v4  ;;  %v7183_v20 = vadd.s32 80, %v7127_v4  ;;  %v7186_v21 = vadd.s32 88, %v7127_v4 }
  0x14   : > { %292 = vst [vmem:[#allocation2 + $0x60] sm:$0xff] %v6859_v1  ;;  %293 = vst [vmem:[#allocation2 + $0x68] sm:$0xff] %v6859_v1  ;;  %v473_v22 = vld [vmem:[%s7152_s8 + $0x8] sm:$0xff]  ;;  %v7190_v23 = vrot.slane %v472_v17, %v7155_v12  ;;  %v7193_v24 = vadd.s32 96, %v7127_v4  ;;  %v7196_v25 = vadd.s32 104, %v7127_v4  ;;  %v7199_v26 = vadd.s32 112, %v7127_v4 }
  0x15   : > { %294 = vst [vmem:[#allocation2 + $0x70] sm:$0xff] %v6859_v1  ;;  %295 = vst [vmem:[#allocation2 + $0x78] sm:$0xff] %v6859_v1  ;;  %v474_v27 = vld [vmem:[%s7152_s8 + $0x10] sm:$0xff]  ;;  %v1087_v29 = vld [vmem:[#allocation2] sm:$0x33]  ;;  %v7211_v30 = vadd.s32 120, %v7127_v4  ;;  %v536_v32 = vcombine.high %v472_v17, %v472_v17  ;;  %v7216_v33 = vrot.slane %v473_v22, %v7155_v12  ;;  %v551_v36 = vcombine.high %v473_v22, %v473_v22 }
  0x16   : > { %296 = vst [vmem:[#allocation2 + $0x80] sm:$0xff] %v6859_v1  ;;  %297 = vst [vmem:[#allocation2 + $0x88] sm:$0xff] %v6859_v1  ;;  %v7213_v31 = vmul.u32 8, %v3035_v6  ;;  %1343 = vrot.lane.b32.xlu0 %v7190_v23, %s6861_s12  ;;  %v7225_v35 = vcombine.high %v7190_v23, %v7190_v23  ;;  %v7228_v37 = vrot.slane %v474_v27, %v7155_v12  ;;  %v1093_v38 = vld [vmem:[#allocation2 + $0x10] sm:$0x33]  ;;  %v475_v40 = vld [vmem:[%s7152_s8 + $0x18] sm:$0xff] }
  0x17   : > { %298 = vst [vmem:[#allocation2 + $0x90] sm:$0xff] %v6859_v1  ;;  %299 = vst [vmem:[#allocation2 + $0x98] sm:$0xff] %v6859_v1  ;;  %v1099_v39 = vld [vmem:[#allocation2 + $0x20] sm:$0x33]  ;;  %v1090_v41 = vld [vmem:[#allocation2 + $0x8] sm:$0x33]  ;;  %v7266_v43 = vrot.slane %v536_v32, %v7155_v12  ;;  %v7272_v45 = vrot.slane %v551_v36, %v7155_v12  ;;  %v566_v48 = vcombine.high %v474_v27, %v474_v27 }
  0x18   : > { %300 = vst [vmem:[#allocation2 + $0xa0] sm:$0xff] %v6859_v1  ;;  %301 = vst [vmem:[#allocation2 + $0xa8] sm:$0xff] %v6859_v1  ;;  %vm3038_vm8 = vcmp.eq.s32.totalorder %v7138_v8, %v7213_v31  ;;  %vm3039_vm9 = vcmp.eq.s32.totalorder %v7141_v9, %v7213_v31  ;;  %vm3040_vm10 = vcmp.eq.s32.totalorder %v7144_v10, %v7213_v31  ;;  %v1096_v42 = vld [vmem:[#allocation2 + $0x18] sm:$0x33]  ;;  %v1105_v46 = vld [vmem:[#allocation2 + $0x30] sm:$0x33] }
  0x19   : > { %302 = vst [vmem:[#allocation2 + $0xb0] sm:$0xff] %v6859_v1  ;;  %303 = vst [vmem:[#allocation2 + $0xb8] sm:$0xff] %v6859_v1  ;;  %vm3041_vm11 = vcmp.eq.s32.totalorder %v7147_v11, %v7213_v31  ;;  %vm3042_vm12 = vcmp.eq.s32.totalorder %v7162_v14, %v7213_v31  ;;  %vm3043_vm13 = vcmp.eq.s32.totalorder %v7165_v15, %v7213_v31  ;;  %v476_v50 = vld [vmem:[%s7152_s8 + $0x20] sm:$0xff]  ;;  %v477_v51 = vld [vmem:[%s7152_s8 + $0x28] sm:$0xff]  ;;  %1347 = vrot.lane.b32.xlu1 %v7266_v43, %s6861_s12  ;;  %s8955_s18 = smov 0  }
  0x1a   : > { %304 = vst [vmem:[#allocation2 + $0xc0] sm:$0xff] %v6859_v1  ;;  %305 = vst [vmem:[#allocation2 + $0xc8] sm:$0xff] %v6859_v1  ;;  %vm3044_vm14 = vcmp.eq.s32.totalorder %v7168_v16, %v7213_v31  ;;  %vm3045_vm15 = vcmp.eq.s32.totalorder %v7177_v18, %v7213_v31  ;;  %1351 = vrot.lane.b32.xlu0 %v7216_v33, %s6861_s12  ;;  %v7278_v49 = vrot.slane %v475_v40, %v7155_v12  ;;  %v1102_v55 = vld [vmem:[#allocation2 + $0x28] sm:$0x33]  ;;  %v1111_v59 = vld [vmem:[#allocation2 + $0x40] sm:$0x33] }
  0x1b   : > { %306 = vst [vmem:[#allocation2 + $0xd0] sm:$0xff] %v6859_v1  ;;  %307 = vst [vmem:[#allocation2 + $0xd8] sm:$0xff] %v6859_v1  ;;  %v7289_v53 = vcombine.high %v7216_v33, %v7216_v33  ;;  %v7297_v56 = vrot.slane %v566_v48, %v7155_v12  ;;  %v581_v58 = vcombine.high %v475_v40, %v475_v40  ;;  %v1117_v60 = vld [vmem:[#allocation2 + $0x50] sm:$0x33]  ;;  %v1108_v62 = vld [vmem:[#allocation2 + $0x38] sm:$0x33] }
  0x1c   : > { %308 = vst [vmem:[#allocation2 + $0xe0] sm:$0xff] %v6859_v1  ;;  %309 = vst [vmem:[#allocation2 + $0xe8] sm:$0xff] %v6859_v1  ;;  %v478_v61 = vld [vmem:[%s7152_s8 + $0x30] sm:$0xff]  ;;  %v7304_v63 = vrot.slane %v476_v50, %v7155_v12  ;;  %v596_v0 = vcombine.high %v476_v50, %v476_v50  ;;  %v611_v2 = vcombine.high %v477_v51, %v477_v51  ;;  %v1114_v7 = vld [vmem:[#allocation2 + $0x48] sm:$0x33] }
  0x1d   : > { %310 = vst [vmem:[#allocation2 + $0xf0] sm:$0xff] %v6859_v1  ;;  %311 = vst [vmem:[#allocation2 + $0xf8] sm:$0xff] %v6859_v1  ;;  %v7311_v3 = vcombine.high %v7266_v43, %v7266_v43  ;;  %v7317_v6 = vrot.slane %v581_v58, %v7155_v12  ;;  %v1123_v13 = vld [vmem:[#allocation2 + $0x60] sm:$0x33]  ;;  %1353 = vrot.lane.b32.xlu1 %v7289_v53, %s6861_s12  ;;  %v7331_v32 = vrot.slane %v478_v61, %v7155_v12 }
  0x1e   : > { %312 = vst [vmem:[#allocation2 + $0x100] sm:$0xff] %v6859_v1  ;;  %313 = vst [vmem:[#allocation2 + $0x108] sm:$0xff] %v6859_v1  ;;  %1345 = vrot.lane.b32.xlu0 %v7225_v35, %s6861_s12  ;;  %v7325_v22 = vrot.slane %v596_v0, %v7155_v12  ;;  %v1135_v50 = vld [vmem:[#allocation2 + $0x80] sm:$0x33]  ;;  %v1141_v58 = vld [vmem:[#allocation2 + $0x90] sm:$0x33] }
  0x1f   : > { %314 = vst [vmem:[#allocation2 + $0x110] sm:$0xff] %v6859_v1  ;;  %315 = vst [vmem:[#allocation2 + $0x118] sm:$0xff] %v6859_v1 }
  0x20   : > { %316 = vst [vmem:[#allocation2 + $0x120] sm:$0xff] %v6859_v1  ;;  %317 = vst [vmem:[#allocation2 + $0x128] sm:$0xff] %v6859_v1 }
  0x21   : > { %318 = vst [vmem:[#allocation2 + $0x130] sm:$0xff] %v6859_v1  ;;  %319 = vst [vmem:[#allocation2 + $0x138] sm:$0xff] %v6859_v1  ;;  %1349 = vrot.lane.b32.xlu1 %v7311_v3, %s6861_s12 }
  0x22   : > { %320 = vst [vmem:[#allocation2 + $0x140] sm:$0xff] %v6859_v1  ;;  %321 = vst [vmem:[#allocation2 + $0x148] sm:$0xff] %v6859_v1  ;;  %1355 = vrot.lane.b32.xlu0 %v7272_v45, %s6861_s12 }
  0x23   : > { %322 = vst [vmem:[#allocation2 + $0x150] sm:$0xff] %v6859_v1  ;;  %323 = vst [vmem:[#allocation2 + $0x158] sm:$0xff] %v6859_v1 }
  0x24   : > { %324 = vst [vmem:[#allocation2 + $0x160] sm:$0xff] %v6859_v1  ;;  %325 = vst [vmem:[#allocation2 + $0x168] sm:$0xff] %v6859_v1 }
  0x25   : > { %326 = vst [vmem:[#allocation2 + $0x170] sm:$0xff] %v6859_v1  ;;  %327 = vst [vmem:[#allocation2 + $0x178] sm:$0xff] %v6859_v1 }
  0x26   : > { %328 = vst [vmem:[#allocation2 + $0x180] sm:$0xff] %v6859_v1  ;;  %329 = vst [vmem:[#allocation2 + $0x188] sm:$0xff] %v6859_v1  ;;  %1359 = vrot.lane.b32.xlu0 %v7228_v37, %s6861_s12 }
  0x27   : > { %330 = vst [vmem:[#allocation2 + $0x190] sm:$0xff] %v6859_v1  ;;  %331 = vst [vmem:[#allocation2 + $0x198] sm:$0xff] %v6859_v1 }
  0x28   : > { %332 = vst [vmem:[#allocation2 + $0x1a0] sm:$0xff] %v6859_v1  ;;  %333 = vst [vmem:[#allocation2 + $0x1a8] sm:$0xff] %v6859_v1 }
  0x29   : > { %334 = vst [vmem:[#allocation2 + $0x1b0] sm:$0xff] %v6859_v1  ;;  %335 = vst [vmem:[#allocation2 + $0x1b8] sm:$0xff] %v6859_v1 }
  0x2a   : > { %336 = vst [vmem:[#allocation2 + $0x1c0] sm:$0xff] %v6859_v1  ;;  %337 = vst [vmem:[#allocation2 + $0x1c8] sm:$0xff] %v6859_v1  ;;  %1363 = vrot.lane.b32.xlu0 %v7297_v56, %s6861_s12 }
  0x2b   : > { %338 = vst [vmem:[#allocation2 + $0x1d0] sm:$0xff] %v6859_v1  ;;  %339 = vst [vmem:[#allocation2 + $0x1d8] sm:$0xff] %v6859_v1 }
  0x2c   : > { %340 = vst [vmem:[#allocation2 + $0x1e0] sm:$0xff] %v6859_v1  ;;  %341 = vst [vmem:[#allocation2 + $0x1e8] sm:$0xff] %v6859_v1 }
  0x2d   : > { %342 = vst [vmem:[#allocation2 + $0x1f0] sm:$0xff] %v6859_v1  ;;  %343 = vst [vmem:[#allocation2 + $0x1f8] sm:$0xff] %v6859_v1 }
  0x2e   : > { %344 = vst [vmem:[#allocation2 + $0x200] sm:$0xff] %v6859_v1  ;;  %345 = vst [vmem:[#allocation2 + $0x208] sm:$0xff] %v6859_v1  ;;  %1367 = vrot.lane.b32.xlu0 %v7278_v49, %s6861_s12 }
  0x2f   : > { %346 = vst [vmem:[#allocation2 + $0x210] sm:$0xff] %v6859_v1  ;;  %347 = vst [vmem:[#allocation2 + $0x218] sm:$0xff] %v6859_v1 }
  0x30   : > { %348 = vst [vmem:[#allocation2 + $0x220] sm:$0xff] %v6859_v1  ;;  %349 = vst [vmem:[#allocation2 + $0x228] sm:$0xff] %v6859_v1 }
  0x31   : > { %350 = vst [vmem:[#allocation2 + $0x230] sm:$0xff] %v6859_v1  ;;  %351 = vst [vmem:[#allocation2 + $0x238] sm:$0xff] %v6859_v1 }
  0x32   : > { %352 = vst [vmem:[#allocation2 + $0x240] sm:$0xff] %v6859_v1  ;;  %353 = vst [vmem:[#allocation2 + $0x248] sm:$0xff] %v6859_v1  ;;  %1371 = vrot.lane.b32.xlu0 %v7317_v6, %s6861_s12 }
  0x33   : > { %354 = vst [vmem:[#allocation2 + $0x250] sm:$0xff] %v6859_v1  ;;  %355 = vst [vmem:[#allocation2 + $0x258] sm:$0xff] %v6859_v1 }
  0x34   : > { %356 = vst [vmem:[#allocation2 + $0x260] sm:$0xff] %v6859_v1  ;;  %357 = vst [vmem:[#allocation2 + $0x268] sm:$0xff] %v6859_v1 }
  0x35   : > { %358 = vst [vmem:[#allocation2 + $0x270] sm:$0xff] %v6859_v1  ;;  %359 = vst [vmem:[#allocation2 + $0x278] sm:$0xff] %v6859_v1 }
  0x36   : > { %360 = vst [vmem:[#allocation2 + $0x280] sm:$0xff] %v6859_v1  ;;  %361 = vst [vmem:[#allocation2 + $0x288] sm:$0xff] %v6859_v1  ;;  %1375 = vrot.lane.b32.xlu0 %v7304_v63, %s6861_s12 }
  0x37   : > { %362 = vst [vmem:[#allocation2 + $0x290] sm:$0xff] %v6859_v1  ;;  %363 = vst [vmem:[#allocation2 + $0x298] sm:$0xff] %v6859_v1 }
  0x38   : > { %364 = vst [vmem:[#allocation2 + $0x2a0] sm:$0xff] %v6859_v1  ;;  %365 = vst [vmem:[#allocation2 + $0x2a8] sm:$0xff] %v6859_v1 }
  0x39   : > { %366 = vst [vmem:[#allocation2 + $0x2b0] sm:$0xff] %v6859_v1  ;;  %367 = vst [vmem:[#allocation2 + $0x2b8] sm:$0xff] %v6859_v1 }
  0x3a   : > { %368 = vst [vmem:[#allocation2 + $0x2c0] sm:$0xff] %v6859_v1  ;;  %369 = vst [vmem:[#allocation2 + $0x2c8] sm:$0xff] %v6859_v1  ;;  %1379 = vrot.lane.b32.xlu0 %v7325_v22, %s6861_s12 }
  0x3b   : > { %370 = vst [vmem:[#allocation2 + $0x2d0] sm:$0xff] %v6859_v1  ;;  %371 = vst [vmem:[#allocation2 + $0x2d8] sm:$0xff] %v6859_v1 }
  0x3c   : > { %372 = vst [vmem:[#allocation2 + $0x2e0] sm:$0xff] %v6859_v1  ;;  %373 = vst [vmem:[#allocation2 + $0x2e8] sm:$0xff] %v6859_v1 }
  0x3d   : > { %374 = vst [vmem:[#allocation2 + $0x2f0] sm:$0xff] %v6859_v1  ;;  %375 = vst [vmem:[#allocation2 + $0x2f8] sm:$0xff] %v6859_v1 }
  0x3e   : > { %376 = vst [vmem:[#allocation2 + $0x300] sm:$0xff] %v6859_v1  ;;  %377 = vst [vmem:[#allocation2 + $0x308] sm:$0xff] %v6859_v1 }
  0x3f   : > { %378 = vst [vmem:[#allocation2 + $0x310] sm:$0xff] %v6859_v1  ;;  %379 = vst [vmem:[#allocation2 + $0x318] sm:$0xff] %v6859_v1 }
  0x40   : > { %380 = vst [vmem:[#allocation2 + $0x320] sm:$0xff] %v6859_v1  ;;  %381 = vst [vmem:[#allocation2 + $0x328] sm:$0xff] %v6859_v1 }
  0x41   : > { %382 = vst [vmem:[#allocation2 + $0x330] sm:$0xff] %v6859_v1  ;;  %383 = vst [vmem:[#allocation2 + $0x338] sm:$0xff] %v6859_v1 }
  0x42   : > { %384 = vst [vmem:[#allocation2 + $0x340] sm:$0xff] %v6859_v1  ;;  %385 = vst [vmem:[#allocation2 + $0x348] sm:$0xff] %v6859_v1 }
  0x43   : > { %386 = vst [vmem:[#allocation2 + $0x350] sm:$0xff] %v6859_v1  ;;  %387 = vst [vmem:[#allocation2 + $0x358] sm:$0xff] %v6859_v1 }
  0x44   : > { %388 = vst [vmem:[#allocation2 + $0x360] sm:$0xff] %v6859_v1  ;;  %389 = vst [vmem:[#allocation2 + $0x368] sm:$0xff] %v6859_v1 }
  0x45   : > { %390 = vst [vmem:[#allocation2 + $0x370] sm:$0xff] %v6859_v1  ;;  %391 = vst [vmem:[#allocation2 + $0x378] sm:$0xff] %v6859_v1 }
  0x46   : > { %392 = vst [vmem:[#allocation2 + $0x380] sm:$0xff] %v6859_v1  ;;  %393 = vst [vmem:[#allocation2 + $0x388] sm:$0xff] %v6859_v1 }
  0x47   : > { %394 = vst [vmem:[#allocation2 + $0x390] sm:$0xff] %v6859_v1  ;;  %395 = vst [vmem:[#allocation2 + $0x398] sm:$0xff] %v6859_v1 }
  0x48   : > { %396 = vst [vmem:[#allocation2 + $0x3a0] sm:$0xff] %v6859_v1  ;;  %397 = vst [vmem:[#allocation2 + $0x3a8] sm:$0xff] %v6859_v1 }
  0x49   : > { %398 = vst [vmem:[#allocation2 + $0x3b0] sm:$0xff] %v6859_v1  ;;  %399 = vst [vmem:[#allocation2 + $0x3b8] sm:$0xff] %v6859_v1 }
  0x4a   : > { %400 = vst [vmem:[#allocation2 + $0x3c0] sm:$0xff] %v6859_v1  ;;  %401 = vst [vmem:[#allocation2 + $0x3c8] sm:$0xff] %v6859_v1 }
  0x4b   : > { %402 = vst [vmem:[#allocation2 + $0x3d0] sm:$0xff] %v6859_v1  ;;  %403 = vst [vmem:[#allocation2 + $0x3d8] sm:$0xff] %v6859_v1 }
  0x4c   : > { %404 = vst [vmem:[#allocation2 + $0x3e0] sm:$0xff] %v6859_v1  ;;  %405 = vst [vmem:[#allocation2 + $0x3e8] sm:$0xff] %v6859_v1 }
  0x4d   : > { %406 = vst [vmem:[#allocation2 + $0x3f0] sm:$0xff] %v6859_v1  ;;  %407 = vst [vmem:[#allocation2 + $0x3f8] sm:$0xff] %v6859_v1 }
  0x4e   : > { %408 = vst [vmem:[#allocation2 + $0x400] sm:$0xff] %v6859_v1  ;;  %409 = vst [vmem:[#allocation2 + $0x408] sm:$0xff] %v6859_v1 }
  0x4f   : > { %410 = vst [vmem:[#allocation2 + $0x410] sm:$0xff] %v6859_v1  ;;  %411 = vst [vmem:[#allocation2 + $0x418] sm:$0xff] %v6859_v1 }
  0x50   : > { %412 = vst [vmem:[#allocation2 + $0x420] sm:$0xff] %v6859_v1  ;;  %413 = vst [vmem:[#allocation2 + $0x428] sm:$0xff] %v6859_v1 }
  0x51   : > { %414 = vst [vmem:[#allocation2 + $0x430] sm:$0xff] %v6859_v1  ;;  %415 = vst [vmem:[#allocation2 + $0x438] sm:$0xff] %v6859_v1 }
  0x52   : > { %416 = vst [vmem:[#allocation2 + $0x440] sm:$0xff] %v6859_v1  ;;  %417 = vst [vmem:[#allocation2 + $0x448] sm:$0xff] %v6859_v1 }
  0x53   : > { %418 = vst [vmem:[#allocation2 + $0x450] sm:$0xff] %v6859_v1  ;;  %419 = vst [vmem:[#allocation2 + $0x458] sm:$0xff] %v6859_v1 }
  0x54   : > { %420 = vst [vmem:[#allocation2 + $0x460] sm:$0xff] %v6859_v1  ;;  %421 = vst [vmem:[#allocation2 + $0x468] sm:$0xff] %v6859_v1 }
  0x55   : > { %422 = vst [vmem:[#allocation2 + $0x470] sm:$0xff] %v6859_v1  ;;  %423 = vst [vmem:[#allocation2 + $0x478] sm:$0xff] %v6859_v1 }
  0x56   : > { %424 = vst [vmem:[#allocation2 + $0x480] sm:$0xff] %v6859_v1  ;;  %425 = vst [vmem:[#allocation2 + $0x488] sm:$0xff] %v6859_v1 }
  0x57   : > { %426 = vst [vmem:[#allocation2 + $0x490] sm:$0xff] %v6859_v1  ;;  %427 = vst [vmem:[#allocation2 + $0x498] sm:$0xff] %v6859_v1 }
  0x58   : > { %428 = vst [vmem:[#allocation2 + $0x4a0] sm:$0xff] %v6859_v1  ;;  %429 = vst [vmem:[#allocation2 + $0x4a8] sm:$0xff] %v6859_v1 }
  0x59   : > { %430 = vst [vmem:[#allocation2 + $0x4b0] sm:$0xff] %v6859_v1  ;;  %431 = vst [vmem:[#allocation2 + $0x4b8] sm:$0xff] %v6859_v1 }
  0x5a   : > { %432 = vst [vmem:[#allocation2 + $0x4c0] sm:$0xff] %v6859_v1  ;;  %433 = vst [vmem:[#allocation2 + $0x4c8] sm:$0xff] %v6859_v1 }
  0x5b   : > { %434 = vst [vmem:[#allocation2 + $0x4d0] sm:$0xff] %v6859_v1  ;;  %435 = vst [vmem:[#allocation2 + $0x4d8] sm:$0xff] %v6859_v1 }
  0x5c   : > { %436 = vst [vmem:[#allocation2 + $0x4e0] sm:$0xff] %v6859_v1  ;;  %437 = vst [vmem:[#allocation2 + $0x4e8] sm:$0xff] %v6859_v1 }
  0x5d   : > { %438 = vst [vmem:[#allocation2 + $0x4f0] sm:$0xff] %v6859_v1  ;;  %439 = vst [vmem:[#allocation2 + $0x4f8] sm:$0xff] %v6859_v1 }
  0x5e   : > { %440 = vst [vmem:[#allocation2 + $0x500] sm:$0xff] %v6859_v1  ;;  %441 = vst [vmem:[#allocation2 + $0x508] sm:$0xff] %v6859_v1 }
  0x5f   : > { %442 = vst [vmem:[#allocation2 + $0x510] sm:$0xff] %v6859_v1  ;;  %443 = vst [vmem:[#allocation2 + $0x518] sm:$0xff] %v6859_v1 }
  0x60   : > { %444 = vst [vmem:[#allocation2 + $0x520] sm:$0xff] %v6859_v1  ;;  %445 = vst [vmem:[#allocation2 + $0x528] sm:$0xff] %v6859_v1 }
  0x61   : > { %446 = vst [vmem:[#allocation2 + $0x530] sm:$0xff] %v6859_v1  ;;  %447 = vst [vmem:[#allocation2 + $0x538] sm:$0xff] %v6859_v1 }
  0x62   : > { %448 = vst [vmem:[#allocation2 + $0x540] sm:$0xff] %v6859_v1  ;;  %449 = vst [vmem:[#allocation2 + $0x548] sm:$0xff] %v6859_v1 }
  0x63   : > { %450 = vst [vmem:[#allocation2 + $0x550] sm:$0xff] %v6859_v1  ;;  %451 = vst [vmem:[#allocation2 + $0x558] sm:$0xff] %v6859_v1 }
  0x64   : > { %452 = vst [vmem:[#allocation2 + $0x560] sm:$0xff] %v6859_v1  ;;  %453 = vst [vmem:[#allocation2 + $0x568] sm:$0xff] %v6859_v1 }
  0x65   : > { %454 = vst [vmem:[#allocation2 + $0x570] sm:$0xff] %v6859_v1  ;;  %455 = vst [vmem:[#allocation2 + $0x578] sm:$0xff] %v6859_v1 }
  0x66   : > { %456 = vst [vmem:[#allocation2 + $0x580] sm:$0xff] %v6859_v1  ;;  %457 = vst [vmem:[#allocation2 + $0x588] sm:$0xff] %v6859_v1 }
  0x67   : > { %458 = vst [vmem:[#allocation2 + $0x590] sm:$0xff] %v6859_v1  ;;  %459 = vst [vmem:[#allocation2 + $0x598] sm:$0xff] %v6859_v1 }
  0x68   : > { %460 = vst [vmem:[#allocation2 + $0x5a0] sm:$0xff] %v6859_v1  ;;  %461 = vst [vmem:[#allocation2 + $0x5a8] sm:$0xff] %v6859_v1 }
  0x69   : > { %462 = vst [vmem:[#allocation2 + $0x5b0] sm:$0xff] %v6859_v1  ;;  %463 = vst [vmem:[#allocation2 + $0x5b8] sm:$0xff] %v6859_v1 }
  0x6a   : > { %464 = vst [vmem:[#allocation2 + $0x5c0] sm:$0xff] %v6859_v1  ;;  %465 = vst [vmem:[#allocation2 + $0x5c8] sm:$0xff] %v6859_v1 }
  0x6b   : > { %466 = vst [vmem:[#allocation2 + $0x5d0] sm:$0xff] %v6859_v1  ;;  %467 = vst [vmem:[#allocation2 + $0x5d8] sm:$0xff] %v6859_v1 }
  0x6c   : > { %468 = vst [vmem:[#allocation2 + $0x5e0] sm:$0xff] %v6859_v1  ;;  %469 = vst [vmem:[#allocation2 + $0x5e8] sm:$0xff] %v6859_v1 }
  0x6d   : > { %470 = vst [vmem:[#allocation2 + $0x5f0] sm:$0xff] %v6859_v1  ;;  %471 = vst [vmem:[#allocation2 + $0x5f8] sm:$0xff] %v6859_v1  ;;  %v7307_v1 = vrot.slane %v477_v51, %v7155_v12  ;;  %v7360_v51 = vcombine.high %v7272_v45, %v7272_v45 }
  0x6e   : > { %9837 = vst [vmem:[#allocation5_spill] sm:$0xff] %v7127_v4  ;;  %vm7133_vm4 = vmand %vm1080_vm0, %vm1081_vm1  ;;  %vm3047_vm1 = vcmp.eq.s32.totalorder %v7183_v20, %v7213_v31  ;;  %v7625_v4 = vcombine.high %v7331_v32, %v7331_v32  ;;  %vm1599_vm0 = vcmask 1039360  }
  0x6f   : > { %9840 = vst [vmem:[#allocation6_spill] sm:$0xff] %v7138_v8  ;;  %9841 = vst [vmem:[#allocation7_spill] sm:$0xff] %v7141_v9  ;;  %1357 = vrot.lane.b32.xlu1 %v7360_v51, %s6861_s12  ;;  %1383 = vrot.lane.b32.xlu0 %v7307_v1, %s6861_s12 }
  0x70   : > { %9842 = vst [vmem:[#allocation8_spill] sm:$0xff] %v7144_v10  ;;  %9843 = vst [vmem:[#allocation9_spill] sm:$0xff] %v7147_v11 }
  0x71   : > { %vm7157_vm5 = vmand %vm1083_vm2, %vm1084_vm3  ;;  %9846 = vst [vmem:[#allocation10_spill] sm:$0xff] %v7162_v14  ;;  %vm3048_vm2 = vcmp.eq.s32.totalorder %v7186_v21, %v7213_v31  ;;  %vm3049_vm3 = vcmp.eq.s32.totalorder %v7193_v24, %v7213_v31 }
  0x72   : > { %9847 = vst [vmem:[#allocation11_spill] sm:$0xff] %v7165_v15  ;;  %9848 = vst [vmem:[#allocation12_spill] sm:$0xff] %v7168_v16 }
  0x73   : > { %9849 = vst [vmem:[#allocation13_spill] sm:$0xff] %v7177_v18  ;;  %9850 = vst [vmem:[#allocation14_spill] sm:$0xff] %v7180_v19  ;;  %v1180_v19 = vld [vmem:[#allocation2 + $0xf8] sm:$0x33]  ;;  %v489_v18 = vld [vmem:[%s7152_s8 + $0x88] sm:$0xff] }
  0x74   : > { %9851 = vst [vmem:[#allocation15_spill] sm:$0xff] %v7183_v20  ;;  %9852 = vst [vmem:[#allocation16_spill] sm:$0xff] %v7186_v21  ;;  %v791_v15 = vcombine.high %v489_v18, %v489_v18 }
  0x75   : > { %9853 = vst [vmem:[#allocation17_spill] sm:$0xff] %v7193_v24  ;;  %9854 = vst [vmem:[#allocation18_spill] sm:$0xff] %v7196_v25  ;;  %v1183_v24 = vld [vmem:[#allocation2 + $0x100] sm:$0x33] }
  0x76   : > { %9855 = vst [vmem:[#allocation19_spill] sm:$0xff] %v7199_v26  ;;  %vm7206_vm6 = vmor %vm7157_vm5, %vm7133_vm4  ;;  %vm3050_vm4 = vcmp.eq.s32.totalorder %v7196_v25, %v7213_v31  ;;  %v1177_v26 = vld [vmem:[#allocation2 + $0xf0] sm:$0x33]  ;;  %v488_v25 = vld [vmem:[%s7152_s8 + $0x80] sm:$0xff]  ;;  %vm2436_vm5 = vcmask 1031168  }
  0x77   : > { %9858 = vst [vmem:[#allocation20_spill] sm:$0xff] %v7211_v30  ;;  %9859 = vst [vmem:[#allocation21_spill] sm:$0xff] %v7213_v31  ;;  %v1088_v34 = vsel %vm7206_vm6, %v7190_v23, %v1087_v29  ;;  %v1094_v44 = vsel %vm7206_vm6, %v7216_v33, %v1093_v38  ;;  %v1100_v47 = vsel %vm7206_vm6, %v7228_v37, %v1099_v39  ;;  %v1120_v29 = vld [vmem:[#allocation2 + $0x58] sm:$0x33]  ;;  %v480_v39 = vld [vmem:[%s7152_s8 + $0x40] sm:$0xff] }
  0x78   : > { %1089 = vst [vmem:[#allocation2] sm:$0x33] %v1088_v34  ;;  %1095 = vst [vmem:[#allocation2 + $0x10] sm:$0x33] %v1094_v44  ;;  %v1091_v52 = vsel %vm7206_vm6, %v7266_v43, %v1090_v41  ;;  %v1097_v54 = vsel %vm7206_vm6, %v7272_v45, %v1096_v42  ;;  %v1106_v57 = vsel %vm7206_vm6, %v7278_v49, %v1105_v46  ;;  %v479_v34 = vld [vmem:[%s7152_s8 + $0x38] sm:$0xff]  ;;  %v481_v44 = vld [vmem:[%s7152_s8 + $0x48] sm:$0xff] }
  0x79   : > { %1101 = vst [vmem:[#allocation2 + $0x20] sm:$0x33] %v1100_v47  ;;  %1092 = vst [vmem:[#allocation2 + $0x8] sm:$0x33] %v1091_v52  ;;  %v1103_v5 = vsel %vm7206_vm6, %v7297_v56, %v1102_v55  ;;  %v1112_v17 = vsel %vm7206_vm6, %v7304_v63, %v1111_v59  ;;  %v1118_v27 = vsel %vm7206_vm6, %v7307_v1, %v1117_v60  ;;  %v1129_v42 = vld [vmem:[#allocation2 + $0x70] sm:$0x33] }
  0x7a   : > { %1098 = vst [vmem:[#allocation2 + $0x18] sm:$0x33] %v1097_v54  ;;  %1107 = vst [vmem:[#allocation2 + $0x30] sm:$0x33] %v1106_v57  ;;  %v1109_v36 = vsel %vm7206_vm6, %v7317_v6, %v1108_v62  ;;  %v7340_v38 = vrot.slane %v611_v2, %v7155_v12  ;;  %v1115_v40 = vsel %vm7206_vm6, %v7325_v22, %v1114_v7  ;;  %v1126_v52 = vld [vmem:[#allocation2 + $0x68] sm:$0x33] }
  0x7b   : > { %9860 = vst [vmem:[#allocation22_spill] sm:$0xff] %v7304_v63  ;;  %9861 = vst [vmem:[#allocation23_spill] sm:$0xff] %v7307_v1  ;;  %v1124_v41 = vsel %vm7206_vm6, %v7331_v32, %v1123_v13  ;;  %v626_v47 = vcombine.high %v478_v61, %v478_v61  ;;  %v7354_v48 = vrot.slane %v479_v34, %v7155_v12  ;;  %v1132_v61 = vld [vmem:[#allocation2 + $0x78] sm:$0x33]  ;;  %v1138_v62 = vld [vmem:[#allocation2 + $0x88] sm:$0x33] }
  0x7c   : > { %9862 = vst [vmem:[#allocation24_spill] sm:$0xff] %v7317_v6  ;;  %1104 = vst [vmem:[#allocation2 + $0x28] sm:$0x33] %v1103_v5  ;;  %v1121_v46 = vsel %vm7206_vm6, %v7340_v38, %v1120_v29  ;;  %v641_v54 = vcombine.high %v479_v34, %v479_v34  ;;  %v7363_v55 = vrot.slane %v480_v39, %v7155_v12  ;;  %v1144_v34 = vld [vmem:[#allocation2 + $0x98] sm:$0x33]  ;;  %1387 = vrot.lane.b32.xlu0 %v7340_v38, %s6861_s12  ;;  %v494_v31 = vld [vmem:[%s7152_s8 + $0xb0] sm:$0xff] }
  0x7d   : > { %9863 = vst [vmem:[#allocation25_spill] sm:$0xff] %v7325_v22  ;;  %9864 = vst [vmem:[#allocation26_spill] sm:$0xff] %v7331_v32  ;;  %v656_v57 = vcombine.high %v480_v39, %v480_v39  ;;  %v7368_v59 = vrot.slane %v626_v47, %v7155_v12  ;;  %v1130_v60 = vsel %vm7206_vm6, %v7354_v48, %v1129_v42  ;;  %v1147_v42 = vld [vmem:[#allocation2 + $0xa0] sm:$0x33] }
  0x7e   : > { %1113 = vst [vmem:[#allocation2 + $0x40] sm:$0x33] %v1112_v17  ;;  %1119 = vst [vmem:[#allocation2 + $0x50] sm:$0x33] %v1118_v27  ;;  %v7374_v0 = vrot.slane %v481_v44, %v7155_v12  ;;  %v671_v2 = vcombine.high %v481_v44, %v481_v44  ;;  %v7377_v5 = vrot.slane %v641_v54, %v7155_v12  ;;  %v482_v17 = vld [vmem:[%s7152_s8 + $0x50] sm:$0xff]  ;;  %v484_v44 = vld [vmem:[%s7152_s8 + $0x60] sm:$0xff] }
  0x7f   : > { %9865 = vst [vmem:[#allocation27_spill] sm:$0xff] %v7340_v38  ;;  %1110 = vst [vmem:[#allocation2 + $0x38] sm:$0x33] %v1109_v36  ;;  %v1136_v7 = vsel %vm7206_vm6, %v7363_v55, %v1135_v50  ;;  %v7383_v13 = vrot.slane %v656_v57, %v7155_v12  ;;  %v1127_v27 = vsel %vm7206_vm6, %v7368_v59, %v1126_v52  ;;  %v483_v36 = vld [vmem:[%s7152_s8 + $0x58] sm:$0xff]  ;;  %v1153_v54 = vld [vmem:[#allocation2 + $0xb0] sm:$0x33] }
  0x80   : > { %1116 = vst [vmem:[#allocation2 + $0x48] sm:$0x33] %v1115_v40  ;;  %1125 = vst [vmem:[#allocation2 + $0x60] sm:$0x33] %v1124_v41  ;;  %v1142_v29 = vsel %vm7206_vm6, %v7374_v0, %v1141_v58  ;;  %v7397_v39 = vcombine.high %v7228_v37, %v7228_v37  ;;  %v1133_v40 = vsel %vm7206_vm6, %v7377_v5, %v1132_v61  ;;  %1391 = vrot.lane.b32.xlu0 %v7331_v32, %s6861_s12  ;;  %v495_v32 = vld [vmem:[%s7152_s8 + $0xb8] sm:$0xff] }
  0x81   : > { %9866 = vst [vmem:[#allocation28_spill] sm:$0xff] %v7354_v48  ;;  %1122 = vst [vmem:[#allocation2 + $0x58] sm:$0x33] %v1121_v46  ;;  %v1139_v41 = vsel %vm7206_vm6, %v7383_v13, %v1138_v62  ;;  %v485_v46 = vld [vmem:[%s7152_s8 + $0x68] sm:$0xff]  ;;  %v7410_v47 = vrot.slane %v671_v2, %v7155_v12  ;;  %v7413_v50 = vrot.slane %v482_v17, %v7155_v12  ;;  %v1165_v62 = vld [vmem:[#allocation2 + $0xd0] sm:$0x33] }
  0x82   : > { %9867 = vst [vmem:[#allocation29_spill] sm:$0xff] %v7363_v55  ;;  %9868 = vst [vmem:[#allocation30_spill] sm:$0xff] %v7368_v59  ;;  %v686_v52 = vcombine.high %v482_v17, %v482_v17  ;;  %v7416_v57 = vrot.slane %v483_v36, %v7155_v12  ;;  %v701_v58 = vcombine.high %v483_v36, %v483_v36  ;;  %1361 = vrot.lane.b32.xlu1 %v7397_v39, %s6861_s12 }
  0x83   : > { %9869 = vst [vmem:[#allocation31_spill] sm:$0xff] %v7374_v0  ;;  %1131 = vst [vmem:[#allocation2 + $0x70] sm:$0x33] %v1130_v60  ;;  %v1159_v60 = vld [vmem:[#allocation2 + $0xc0] sm:$0x33]  ;;  %v716_v61 = vcombine.high %v484_v44, %v484_v44  ;;  %v1148_v2 = vsel %vm7206_vm6, %v7413_v50, %v1147_v42  ;;  %v7425_v17 = vrot.slane %v484_v44, %v7155_v12 }
  0x84   : > { %9870 = vst [vmem:[#allocation32_spill] sm:$0xff] %v7377_v5  ;;  %9871 = vst [vmem:[#allocation33_spill] sm:$0xff] %v7383_v13  ;;  %v7428_v36 = vrot.slane %v485_v46, %v7155_v12  ;;  %v7443_v42 = vrot.slane %v701_v58, %v7155_v12  ;;  %v1162_v44 = vld [vmem:[#allocation2 + $0xc8] sm:$0x33]  ;;  %v487_v58 = vld [vmem:[%s7152_s8 + $0x78] sm:$0xff]  ;;  %1395 = vrot.lane.b32.xlu0 %v7368_v59, %s6861_s12 }
  0x85   : > { %1137 = vst [vmem:[#allocation2 + $0x80] sm:$0x33] %v1136_v7  ;;  %1128 = vst [vmem:[#allocation2 + $0x68] sm:$0x33] %v1127_v27  ;;  %v1145_v7 = vsel %vm7206_vm6, %v7410_v47, %v1144_v34  ;;  %v1150_v27 = vld [vmem:[#allocation2 + $0xa8] sm:$0x33]  ;;  %v7434_v34 = vcombine.high %v7297_v56, %v7297_v56 }
  0x86   : > { %1143 = vst [vmem:[#allocation2 + $0x90] sm:$0x33] %v1142_v29  ;;  %1134 = vst [vmem:[#allocation2 + $0x78] sm:$0x33] %v1133_v40  ;;  %v1156_v29 = vld [vmem:[#allocation2 + $0xb8] sm:$0x33]  ;;  %v7437_v40 = vrot.slane %v686_v52, %v7155_v12  ;;  %v7451_v52 = vrot.slane %v716_v61, %v7155_v12  ;;  %v731_v61 = vcombine.high %v485_v46, %v485_v46 }
  0x87   : > { %1140 = vst [vmem:[#allocation2 + $0x88] sm:$0x33] %v1139_v41  ;;  %9872 = vst [vmem:[#allocation34_spill] sm:$0xff] %v7410_v47  ;;  %v1154_v41 = vsel %vm7206_vm6, %v7416_v57, %v1153_v54  ;;  %v1166_v54 = vsel %vm7206_vm6, %v7428_v36, %v1165_v62  ;;  %v1171_v62 = vld [vmem:[#allocation2 + $0xe0] sm:$0x33]  ;;  %1365 = vrot.lane.b32.xlu1 %v7434_v34, %s6861_s12 }
  0x88   : > { %9873 = vst [vmem:[#allocation35_spill] sm:$0xff] %v7413_v50  ;;  %9874 = vst [vmem:[#allocation36_spill] sm:$0xff] %v7416_v57  ;;  %v1151_v30 = vsel %vm7206_vm6, %v7437_v40, %v1150_v27  ;;  %v7472_v27 = vcombine.high %v7278_v49, %v7278_v49  ;;  %v7483_v46 = vrot.slane %v731_v61, %v7155_v12  ;;  %1399 = vrot.lane.b32.xlu0 %v7354_v48, %s6861_s12 }
  0x89   : > { %9875 = vst [vmem:[#allocation37_spill] sm:$0xff] %v7425_v17  ;;  %9876 = vst [vmem:[#allocation38_spill] sm:$0xff] %v7428_v36  ;;  %v7495_v61 = vrot.slane %v488_v25, %v7155_v12 }
  0x8a   : > { %9877 = vst [vmem:[#allocation39_spill] sm:$0xff] %v7434_v34  ;;  %1146 = vst [vmem:[#allocation2 + $0x98] sm:$0x33] %v1145_v7  ;;  %v1160_v7 = vsel %vm7206_vm6, %v7425_v17, %v1159_v60  ;;  %v1163_v60 = vsel %vm7206_vm6, %v7451_v52, %v1162_v44  ;;  %v7478_v44 = vrot.slane %v487_v58, %v7155_v12  ;;  %v1276_v34 = vld [vmem:[#allocation2 + $0x1f8] sm:$0x33] }
  0x8b   : > { %1149 = vst [vmem:[#allocation2 + $0xa0] sm:$0x33] %v1148_v2  ;;  %9878 = vst [vmem:[#allocation40_spill] sm:$0xff] %v7437_v40  ;;  %v486_v2 = vld [vmem:[%s7152_s8 + $0x70] sm:$0xff]  ;;  %1369 = vrot.lane.b32.xlu1 %v7472_v27, %s6861_s12 }
  0x8c   : > { %9879 = vst [vmem:[#allocation41_spill] sm:$0xff] %v7443_v42  ;;  %1155 = vst [vmem:[#allocation2 + $0xb0] sm:$0x33] %v1154_v41  ;;  %v1157_v41 = vsel %vm7206_vm6, %v7443_v42, %v1156_v29  ;;  %v1168_v29 = vld [vmem:[#allocation2 + $0xd8] sm:$0x33]  ;;  %v1178_v20 = vsel %vm7206_vm6, %v7478_v44, %v1177_v26  ;;  %v7509_v26 = vcombine.high %v7317_v6, %v7317_v6  ;;  %1403 = vrot.lane.b32.xlu0 %v7377_v5, %s6861_s12 }
  0x8d   : > { %9880 = vst [vmem:[#allocation42_spill] sm:$0xff] %v7451_v52  ;;  %1161 = vst [vmem:[#allocation2 + $0xc0] sm:$0x33] %v1160_v7  ;;  %v746_v7 = vcombine.high %v486_v2, %v486_v2 }
  0x8e   : > { %1167 = vst [vmem:[#allocation2 + $0xd0] sm:$0x33] %v1166_v54  ;;  %1152 = vst [vmem:[#allocation2 + $0xa8] sm:$0x33] %v1151_v30  ;;  %v7475_v30 = vrot.slane %v486_v2, %v7155_v12  ;;  %v1174_v54 = vld [vmem:[#allocation2 + $0xe8] sm:$0x33] }
  0x8f   : > { %1158 = vst [vmem:[#allocation2 + $0xb8] sm:$0x33] %v1157_v41  ;;  %9881 = vst [vmem:[#allocation43_spill] sm:$0xff] %v7472_v27  ;;  %v761_v41 = vcombine.high %v487_v58, %v487_v58  ;;  %v7489_v2 = vrot.slane %v746_v7, %v7155_v12  ;;  %v1169_v58 = vsel %vm7206_vm6, %v7483_v46, %v1168_v29  ;;  %v490_v7 = vld [vmem:[%s7152_s8 + $0x90] sm:$0xff]  ;;  %1373 = vrot.lane.b32.xlu1 %v7509_v26, %s6861_s12 }
  0x90   : > { %1164 = vst [vmem:[#allocation2 + $0xc8] sm:$0x33] %v1163_v60  ;;  %9882 = vst [vmem:[#allocation44_spill] sm:$0xff] %v7475_v30  ;;  %v776_v60 = vcombine.high %v488_v25, %v488_v25  ;;  %v1172_v21 = vsel %vm7206_vm6, %v7475_v30, %v1171_v62  ;;  %v1189_v29 = vld [vmem:[#allocation2 + $0x110] sm:$0x33]  ;;  %v7530_v14 = vrot.slane %v490_v7, %v7155_v12  ;;  %1407 = vrot.lane.b32.xlu0 %v7363_v55, %s6861_s12 }
  0x91   : > { %9883 = vst [vmem:[#allocation45_spill] sm:$0xff] %v7478_v44  ;;  %9884 = vst [vmem:[#allocation46_spill] sm:$0xff] %v7483_v46  ;;  %v7502_v62 = vrot.slane %v761_v41, %v7155_v12  ;;  %v1175_v25 = vsel %vm7206_vm6, %v7489_v2, %v1174_v54  ;;  %v491_v41 = vld [vmem:[%s7152_s8 + $0x98] sm:$0xff]  ;;  %v7527_v54 = vrot.slane %v489_v18, %v7155_v12 }
  0x92   : > { %9885 = vst [vmem:[#allocation47_spill] sm:$0xff] %v7489_v2  ;;  %1173 = vst [vmem:[#allocation2 + $0xe0] sm:$0x33] %v1172_v21  ;;  %v1186_v21 = vld [vmem:[#allocation2 + $0x108] sm:$0x33]  ;;  %v7524_v16 = vrot.slane %v776_v60, %v7155_v12  ;;  %v806_v11 = vcombine.high %v490_v7, %v490_v7  ;;  %v7539_v9 = vrot.slane %v491_v41, %v7155_v12 }
  0x93   : > { %1179 = vst [vmem:[#allocation2 + $0xf0] sm:$0x33] %v1178_v20  ;;  %9886 = vst [vmem:[#allocation48_spill] sm:$0xff] %v7502_v62  ;;  %v1184_v20 = vsel %vm7206_vm6, %v7495_v61, %v1183_v24  ;;  %v1195_v24 = vld [vmem:[#allocation2 + $0x120] sm:$0x33]  ;;  %v7546_v18 = vcombine.high %v7304_v63, %v7304_v63  ;;  %v7549_v7 = vrot.slane %v791_v15, %v7155_v12 }
  0x94   : > { %9887 = vst [vmem:[#allocation49_spill] sm:$0xff] %v7509_v26  ;;  %1170 = vst [vmem:[#allocation2 + $0xd8] sm:$0x33] %v1169_v58  ;;  %v1181_v58 = vsel %vm7206_vm6, %v7502_v62, %v1180_v19  ;;  %v1187_v10 = vsel %vm7206_vm6, %v7524_v16, %v1186_v21  ;;  %v1190_v19 = vsel %vm7206_vm6, %v7527_v54, %v1189_v29  ;;  %v1192_v60 = vld [vmem:[#allocation2 + $0x118] sm:$0x33]  ;;  %1411 = vrot.lane.b32.xlu0 %v7383_v13, %s6861_s12 }
  0x95   : > { %1176 = vst [vmem:[#allocation2 + $0xe8] sm:$0x33] %v1175_v25  ;;  %1185 = vst [vmem:[#allocation2 + $0x100] sm:$0x33] %v1184_v20  ;;  %v1201_v25 = vld [vmem:[#allocation2 + $0x130] sm:$0x33]  ;;  %v1196_v21 = vsel %vm7206_vm6, %v7530_v14, %v1195_v24  ;;  %v7555_v29 = vrot.slane %v806_v11, %v7155_v12  ;;  %v1193_v15 = vsel %vm7206_vm6, %v7549_v7, %v1192_v60  ;;  %1377 = vrot.lane.b32.xlu1 %v7546_v18, %s6861_s12 }
  0x96   : > { %1182 = vst [vmem:[#allocation2 + $0xf8] sm:$0x33] %v1181_v58  ;;  %v1198_v20 = vld [vmem:[#allocation2 + $0x128] sm:$0x33]  ;;  %v492_v58 = vld [vmem:[%s7152_s8 + $0xa0] sm:$0xff]  ;;  %9888 = vst [vmem:[#allocation50_spill] sm:$0xff] %v7546_v18  ;;  %v1202_v8 = vsel %vm7206_vm6, %v7539_v9, %v1201_v25  ;;  %v7578_v60 = vcombine.high %v7325_v22, %v7325_v22 }
  0x97   : > { %1188 = vst [vmem:[#allocation2 + $0x108] sm:$0x33] %v1187_v10  ;;  %1191 = vst [vmem:[#allocation2 + $0x110] sm:$0x33] %v1190_v19  ;;  %v821_v10 = vcombine.high %v491_v41, %v491_v41  ;;  %v1199_v24 = vsel %vm7206_vm6, %v7555_v29, %v1198_v20  ;;  %v1204_v11 = vld [vmem:[#allocation2 + $0x138] sm:$0x33]  ;;  %v7569_v19 = vrot.slane %v492_v58, %v7155_v12 }
  0x98   : > { %1197 = vst [vmem:[#allocation2 + $0x120] sm:$0x33] %v1196_v21  ;;  %1203 = vst [vmem:[#allocation2 + $0x130] sm:$0x33] %v1202_v8  ;;  %v1207_v41 = vld [vmem:[#allocation2 + $0x140] sm:$0x33]  ;;  %v836_v25 = vcombine.high %v492_v58, %v492_v58  ;;  %1415 = vrot.lane.b32.xlu0 %v7374_v0, %s6861_s12 }
  0x99   : > { %1194 = vst [vmem:[#allocation2 + $0x118] sm:$0x33] %v1193_v15  ;;  %1200 = vst [vmem:[#allocation2 + $0x128] sm:$0x33] %v1199_v24  ;;  %v7572_v21 = vrot.slane %v821_v10, %v7155_v12  ;;  %v1208_v8 = vsel %vm7206_vm6, %v7569_v19, %v1207_v41  ;;  %v1210_v10 = vld [vmem:[#allocation2 + $0x148] sm:$0x33]  ;;  %1381 = vrot.lane.b32.xlu1 %v7578_v60, %s6861_s12  ;;  %v7596_v24 = vcombine.high %v7307_v1, %v7307_v1 }
  0x9a   : > { %9889 = vst [vmem:[#allocation51_spill] sm:$0xff] %v7578_v60  ;;  %1209 = vst [vmem:[#allocation2 + $0x140] sm:$0x33] %v1208_v8  ;;  %v7589_v58 = vrot.slane %v836_v25, %v7155_v12  ;;  %v493_v15 = vld [vmem:[%s7152_s8 + $0xa8] sm:$0xff]  ;;  %v1213_v8 = vld [vmem:[#allocation2 + $0x150] sm:$0x33] }
  0x9b   : > { %v1205_v20 = vsel %vm7206_vm6, %v7572_v21, %v1204_v11  ;;  %9890 = vst [vmem:[#allocation52_spill] sm:$0xff] %v7596_v24  ;;  %v7604_v11 = vrot.slane %v493_v15, %v7155_v12  ;;  %v851_v25 = vcombine.high %v493_v15, %v493_v15  ;;  %v1216_v15 = vld [vmem:[#allocation2 + $0x158] sm:$0x33]  ;;  %9892 = vst [vmem:[#allocation54_spill] sm:$0xff] %v7625_v4  ;;  %v1267_v60 = vld [vmem:[#allocation2 + $0x1e0] sm:$0x33] }
  0x9c   : > { %1206 = vst [vmem:[#allocation2 + $0x138] sm:$0x33] %v1205_v20  ;;  %v1211_v41 = vsel %vm7206_vm6, %v7589_v58, %v1210_v10  ;;  %v7610_v20 = vcombine.high %v7340_v38, %v7340_v38  ;;  %1419 = vrot.lane.b32.xlu0 %v7410_v47, %s6861_s12  ;;  %v502_v38 = vld [vmem:[%s7152_s8 + $0xf0] sm:$0xff]  ;;  %v1270_v1 = vld [vmem:[#allocation2 + $0x1e8] sm:$0x33] }
  0x9d   : > { %1212 = vst [vmem:[#allocation2 + $0x148] sm:$0x33] %v1211_v41  ;;  %1385 = vrot.lane.b32.xlu1 %v7596_v24, %s6861_s12  ;;  %v1214_v10 = vsel %vm7206_vm6, %v7604_v11, %v1213_v8  ;;  %v7618_v41 = vrot.slane %v851_v25, %v7155_v12  ;;  %v7633_v25 = vrot.slane %v494_v31, %v7155_v12  ;;  %v1219_v24 = vld [vmem:[#allocation2 + $0x160] sm:$0x33] }
  0x9e   : > { %9891 = vst [vmem:[#allocation53_spill] sm:$0xff] %v7610_v20  ;;  %1215 = vst [vmem:[#allocation2 + $0x150] sm:$0x33] %v1214_v10  ;;  %v866_v10 = vcombine.high %v494_v31, %v494_v31  ;;  %v1222_v31 = vld [vmem:[#allocation2 + $0x168] sm:$0x33] }
  0x9f   : > { %v1217_v8 = vsel %vm7206_vm6, %v7618_v41, %v1216_v15  ;;  %v1220_v15 = vsel %vm7206_vm6, %v7633_v25, %v1219_v24 }
  0xa0   : > { %1218 = vst [vmem:[#allocation2 + $0x158] sm:$0x33] %v1217_v8  ;;  %1221 = vst [vmem:[#allocation2 + $0x160] sm:$0x33] %v1220_v15  ;;  %v7647_v8 = vrot.slane %v866_v10, %v7155_v12  ;;  %v7662_v10 = vrot.slane %v495_v32, %v7155_v12  ;;  %v881_v15 = vcombine.high %v495_v32, %v495_v32  ;;  %v1228_v32 = vld [vmem:[#allocation2 + $0x178] sm:$0x33]  ;;  %1423 = vrot.lane.b32.xlu0 %v7413_v50, %s6861_s12 }
  0xa1   : > { %1389 = vrot.lane.b32.xlu1 %v7610_v20, %s6861_s12  ;;  %v7639_v20 = vcombine.high %v7368_v59, %v7368_v59  ;;  %v1225_v59 = vld [vmem:[#allocation2 + $0x170] sm:$0x33] }
  0xa2   : > { %v1223_v24 = vsel %vm7206_vm6, %v7647_v8, %v1222_v31  ;;  %v1226_v31 = vsel %vm7206_vm6, %v7662_v10, %v1225_v59 }
  0xa3   : > { %9893 = vst [vmem:[#allocation55_spill] sm:$0xff] %v7639_v20  ;;  %1224 = vst [vmem:[#allocation2 + $0x168] sm:$0x33] %v1223_v24  ;;  %v7676_v24 = vrot.slane %v881_v15, %v7155_v12 }
  0xa4   : > { %1227 = vst [vmem:[#allocation2 + $0x170] sm:$0x33] %v1226_v31  ;;  %1427 = vrot.lane.b32.xlu0 %v7437_v40, %s6861_s12 }
  0xa5   : > { %1393 = vrot.lane.b32.xlu1 %v7625_v4, %s6861_s12  ;;  %v7654_v4 = vcombine.high %v7354_v48, %v7354_v48  ;;  %v496_v48 = vld [vmem:[%s7152_s8 + $0xc0] sm:$0xff]  ;;  %v1229_v59 = vsel %vm7206_vm6, %v7676_v24, %v1228_v32 }
  0xa6   : > { %1230 = vst [vmem:[#allocation2 + $0x178] sm:$0x33] %v1229_v59  ;;  %v7691_v15 = vrot.slane %v496_v48, %v7155_v12  ;;  %v896_v31 = vcombine.high %v496_v48, %v496_v48  ;;  %v1234_v48 = vld [vmem:[#allocation2 + $0x188] sm:$0x33] }
  0xa7   : > { %9894 = vst [vmem:[#allocation56_spill] sm:$0xff] %v7654_v4 }
  0xa8   : > { %v7705_v59 = vrot.slane %v896_v31, %v7155_v12  ;;  %1431 = vrot.lane.b32.xlu0 %v7416_v57, %s6861_s12 }
  0xa9   : > { %1397 = vrot.lane.b32.xlu1 %v7639_v20, %s6861_s12  ;;  %v7668_v20 = vcombine.high %v7377_v5, %v7377_v5  ;;  %v1231_v5 = vld [vmem:[#allocation2 + $0x180] sm:$0x33] }
  0xaa   : > { %v1232_v32 = vsel %vm7206_vm6, %v7691_v15, %v1231_v5  ;;  %v1235_v5 = vsel %vm7206_vm6, %v7705_v59, %v1234_v48 }
  0xab   : > { %9895 = vst [vmem:[#allocation57_spill] sm:$0xff] %v7668_v20  ;;  %1233 = vst [vmem:[#allocation2 + $0x180] sm:$0x33] %v1232_v32 }
  0xac   : > { %1236 = vst [vmem:[#allocation2 + $0x188] sm:$0x33] %v1235_v5  ;;  %1435 = vrot.lane.b32.xlu0 %v7443_v42, %s6861_s12 }
  0xad   : > { %1401 = vrot.lane.b32.xlu1 %v7654_v4, %s6861_s12  ;;  %v7683_v4 = vcombine.high %v7363_v55, %v7363_v55  ;;  %v497_v55 = vld [vmem:[%s7152_s8 + $0xc8] sm:$0xff] }
  0xae   : > { %v7720_v31 = vrot.slane %v497_v55, %v7155_v12  ;;  %v911_v32 = vcombine.high %v497_v55, %v497_v55  ;;  %v1240_v55 = vld [vmem:[#allocation2 + $0x198] sm:$0x33] }
  0xaf   : > { %9896 = vst [vmem:[#allocation58_spill] sm:$0xff] %v7683_v4 }
  0xb0   : > { %v7734_v5 = vrot.slane %v911_v32, %v7155_v12  ;;  %1439 = vrot.lane.b32.xlu0 %v7425_v17, %s6861_s12 }
  0xb1   : > { %1405 = vrot.lane.b32.xlu1 %v7668_v20, %s6861_s12  ;;  %v7697_v20 = vcombine.high %v7383_v13, %v7383_v13  ;;  %v1237_v13 = vld [vmem:[#allocation2 + $0x190] sm:$0x33] }
  0xb2   : > { %v1238_v48 = vsel %vm7206_vm6, %v7720_v31, %v1237_v13  ;;  %v1241_v13 = vsel %vm7206_vm6, %v7734_v5, %v1240_v55 }
  0xb3   : > { %9897 = vst [vmem:[#allocation59_spill] sm:$0xff] %v7697_v20  ;;  %1239 = vst [vmem:[#allocation2 + $0x190] sm:$0x33] %v1238_v48 }
  0xb4   : > { %1242 = vst [vmem:[#allocation2 + $0x198] sm:$0x33] %v1241_v13  ;;  %1443 = vrot.lane.b32.xlu0 %v7451_v52, %s6861_s12 }
  0xb5   : > { %1409 = vrot.lane.b32.xlu1 %v7683_v4, %s6861_s12  ;;  %v7712_v4 = vcombine.high %v7374_v0, %v7374_v0  ;;  %v498_v0 = vld [vmem:[%s7152_s8 + $0xd0] sm:$0xff] }
  0xb6   : > { %v7749_v32 = vrot.slane %v498_v0, %v7155_v12  ;;  %v926_v48 = vcombine.high %v498_v0, %v498_v0  ;;  %v1246_v0 = vld [vmem:[#allocation2 + $0x1a8] sm:$0x33] }
  0xb7   : > { %9898 = vst [vmem:[#allocation60_spill] sm:$0xff] %v7712_v4 }
  0xb8   : > { %v7763_v13 = vrot.slane %v926_v48, %v7155_v12  ;;  %1447 = vrot.lane.b32.xlu0 %v7428_v36, %s6861_s12 }
  0xb9   : > { %1413 = vrot.lane.b32.xlu1 %v7697_v20, %s6861_s12  ;;  %v7726_v20 = vcombine.high %v7410_v47, %v7410_v47  ;;  %v1243_v47 = vld [vmem:[#allocation2 + $0x1a0] sm:$0x33] }
  0xba   : > { %v1244_v55 = vsel %vm7206_vm6, %v7749_v32, %v1243_v47  ;;  %v1247_v47 = vsel %vm7206_vm6, %v7763_v13, %v1246_v0 }
  0xbb   : > { %9899 = vst [vmem:[#allocation61_spill] sm:$0xff] %v7726_v20  ;;  %1245 = vst [vmem:[#allocation2 + $0x1a0] sm:$0x33] %v1244_v55 }
  0xbc   : > { %1248 = vst [vmem:[#allocation2 + $0x1a8] sm:$0x33] %v1247_v47  ;;  %1451 = vrot.lane.b32.xlu0 %v7483_v46, %s6861_s12 }
  0xbd   : > { %1417 = vrot.lane.b32.xlu1 %v7712_v4, %s6861_s12  ;;  %v7741_v4 = vcombine.high %v7413_v50, %v7413_v50  ;;  %v499_v50 = vld [vmem:[%s7152_s8 + $0xd8] sm:$0xff] }
  0xbe   : > { %v7778_v48 = vrot.slane %v499_v50, %v7155_v12  ;;  %v941_v55 = vcombine.high %v499_v50, %v499_v50  ;;  %v1252_v50 = vld [vmem:[#allocation2 + $0x1b8] sm:$0x33] }
  0xbf   : > { %9900 = vst [vmem:[#allocation62_spill] sm:$0xff] %v7741_v4 }
  0xc0   : > { %v7792_v47 = vrot.slane %v941_v55, %v7155_v12  ;;  %1455 = vrot.lane.b32.xlu0 %v7475_v30, %s6861_s12 }
  0xc1   : > { %1421 = vrot.lane.b32.xlu1 %v7726_v20, %s6861_s12  ;;  %v7755_v20 = vcombine.high %v7437_v40, %v7437_v40  ;;  %v1249_v40 = vld [vmem:[#allocation2 + $0x1b0] sm:$0x33] }
  0xc2   : > { %v1250_v0 = vsel %vm7206_vm6, %v7778_v48, %v1249_v40  ;;  %v1253_v40 = vsel %vm7206_vm6, %v7792_v47, %v1252_v50 }
  0xc3   : > { %9901 = vst [vmem:[#allocation63_spill] sm:$0xff] %v7755_v20  ;;  %1251 = vst [vmem:[#allocation2 + $0x1b0] sm:$0x33] %v1250_v0 }
  0xc4   : > { %1254 = vst [vmem:[#allocation2 + $0x1b8] sm:$0x33] %v1253_v40  ;;  %1459 = vrot.lane.b32.xlu0 %v7489_v2, %s6861_s12 }
  0xc5   : > { %1425 = vrot.lane.b32.xlu1 %v7741_v4, %s6861_s12  ;;  %v7770_v4 = vcombine.high %v7416_v57, %v7416_v57  ;;  %v500_v57 = vld [vmem:[%s7152_s8 + $0xe0] sm:$0xff] }
  0xc6   : > { %v7807_v55 = vrot.slane %v500_v57, %v7155_v12  ;;  %v956_v0 = vcombine.high %v500_v57, %v500_v57  ;;  %v1258_v57 = vld [vmem:[#allocation2 + $0x1c8] sm:$0x33] }
  0xc7   : > { %9902 = vst [vmem:[#allocation64_spill] sm:$0xff] %v7770_v4 }
  0xc8   : > { %v7821_v40 = vrot.slane %v956_v0, %v7155_v12  ;;  %1463 = vrot.lane.b32.xlu0 %v7478_v44, %s6861_s12 }
  0xc9   : > { %1429 = vrot.lane.b32.xlu1 %v7755_v20, %s6861_s12  ;;  %v7784_v20 = vcombine.high %v7443_v42, %v7443_v42  ;;  %v1255_v42 = vld [vmem:[#allocation2 + $0x1c0] sm:$0x33] }
  0xca   : > { %v1256_v50 = vsel %vm7206_vm6, %v7807_v55, %v1255_v42  ;;  %v1259_v42 = vsel %vm7206_vm6, %v7821_v40, %v1258_v57 }
  0xcb   : > { %9903 = vst [vmem:[#allocation65_spill] sm:$0xff] %v7784_v20  ;;  %1257 = vst [vmem:[#allocation2 + $0x1c0] sm:$0x33] %v1256_v50 }
  0xcc   : > { %1260 = vst [vmem:[#allocation2 + $0x1c8] sm:$0x33] %v1259_v42  ;;  %1467 = vrot.lane.b32.xlu0 %v7502_v62, %s6861_s12 }
  0xcd   : > { %1433 = vrot.lane.b32.xlu1 %v7770_v4, %s6861_s12  ;;  %v7799_v4 = vcombine.high %v7425_v17, %v7425_v17  ;;  %v501_v17 = vld [vmem:[%s7152_s8 + $0xe8] sm:$0xff] }
  0xce   : > { %v7836_v0 = vrot.slane %v501_v17, %v7155_v12  ;;  %v971_v50 = vcombine.high %v501_v17, %v501_v17  ;;  %v7852_v17 = vpop.permute.xlu0 %1343 }
  0xcf   : > { %9904 = vst [vmem:[#allocation66_spill] sm:$0xff] %v7799_v4  ;;  %9908 = vst [vmem:[#allocation70_spill] sm:$0xff] %v7852_v17 }
  0xd0   : > { %v7850_v42 = vrot.slane %v971_v50, %v7155_v12  ;;  %v7867_v50 = vrot.slane %v502_v38, %v7155_v12  ;;  %1471 = vrot.lane.b32.xlu0 %v7495_v61, %s6861_s12 }
  0xd1   : > { %1437 = vrot.lane.b32.xlu1 %v7784_v20, %s6861_s12  ;;  %v7813_v20 = vcombine.high %v7451_v52, %v7451_v52  ;;  %v1261_v52 = vld [vmem:[#allocation2 + $0x1d0] sm:$0x33] }
  0xd2   : > { %v1262_v57 = vsel %vm7206_vm6, %v7836_v0, %v1261_v52 }
  0xd3   : > { %9905 = vst [vmem:[#allocation67_spill] sm:$0xff] %v7813_v20  ;;  %1263 = vst [vmem:[#allocation2 + $0x1d0] sm:$0x33] %v1262_v57  ;;  %v986_v57 = vcombine.high %v502_v38, %v502_v38 }
  0xd4   : > { %1475 = vrot.lane.b32.xlu0 %v7524_v16, %s6861_s12 }
  0xd5   : > { %1441 = vrot.lane.b32.xlu1 %v7799_v4, %s6861_s12  ;;  %v7828_v4 = vcombine.high %v7428_v36, %v7428_v36  ;;  %v1264_v36 = vld [vmem:[#allocation2 + $0x1d8] sm:$0x33]  ;;  %v7881_v38 = vrot.slane %v986_v57, %v7155_v12 }
  0xd6   : > { %v1265_v52 = vsel %vm7206_vm6, %v7850_v42, %v1264_v36  ;;  %v1268_v36 = vsel %vm7206_vm6, %v7867_v50, %v1267_v60 }
  0xd7   : > { %9906 = vst [vmem:[#allocation68_spill] sm:$0xff] %v7828_v4  ;;  %1266 = vst [vmem:[#allocation2 + $0x1d8] sm:$0x33] %v1265_v52  ;;  %v1348_v52 = vpop.permute.xlu1 %1347  ;;  %v1271_v57 = vsel %vm7206_vm6, %v7881_v38, %v1270_v1  ;;  %v1994_v1 = vld [vmem:[#allocation2 + $0x210] sm:$0x33] }
  0xd8   : > { %1269 = vst [vmem:[#allocation2 + $0x1e0] sm:$0x33] %v1268_v36  ;;  %v7891_v36 = vcombine.high %v7478_v44, %v7478_v44  ;;  %1272 = vst [vmem:[#allocation2 + $0x1e8] sm:$0x33] %v1271_v57  ;;  %v1273_v44 = vld [vmem:[#allocation2 + $0x1f0] sm:$0x33]  ;;  %1479 = vrot.lane.b32.xlu0 %v7527_v54, %s6861_s12 }
  0xd9   : > { %1445 = vrot.lane.b32.xlu1 %v7813_v20, %s6861_s12  ;;  %v7842_v20 = vcombine.high %v7483_v46, %v7483_v46  ;;  %v1352_v46 = vpop.permute.xlu0 %1351 }
  0xda   : > { %9911 = vst [vmem:[#allocation73_spill] sm:$0xff] %v7891_v36 }
  0xdb   : > { %9907 = vst [vmem:[#allocation69_spill] sm:$0xff] %v7842_v20 }
  0xdc   : > { %1483 = vrot.lane.b32.xlu0 %v7549_v7, %s6861_s12 }
  0xdd   : > { %1449 = vrot.lane.b32.xlu1 %v7828_v4, %s6861_s12  ;;  %v7859_v4 = vcombine.high %v7475_v30, %v7475_v30  ;;  %v1346_v30 = vpop.permute.xlu0 %1345 }
  0xde   : > { %v1600_v18 = vsel %vm1599_vm0, %v7852_v17, %v1346_v30  ;;  %v1601_v60 = vsel %vm1599_vm0, %v1346_v30, %v1348_v52 }
  0xdf   : > { %9909 = vst [vmem:[#allocation71_spill] sm:$0xff] %v7859_v4  ;;  %v6008_v22 = vcombine.low %v1600_v18, %v1601_v60  ;;  %v7909_v60 = vcombine.high %v7502_v62, %v7502_v62 }
  0xe0   : > { %1487 = vrot.lane.b32.xlu0 %v7530_v14, %s6861_s12 }
  0xe1   : > { %1453 = vrot.lane.b32.xlu1 %v7842_v20, %s6861_s12  ;;  %v7873_v20 = vcombine.high %v7489_v2, %v7489_v2  ;;  %v1988_v2 = vld [vmem:[#allocation2 + $0x200] sm:$0x33]  ;;  %v1356_v63 = vpop.permute.xlu0 %1355 }
  0xe2   : > { %v1989_v30 = vsel %vm7206_vm6, %v6008_v22, %v1988_v2 }
  0xe3   : > { %9910 = vst [vmem:[#allocation72_spill] sm:$0xff] %v7873_v20  ;;  %1990 = vst [vmem:[#allocation2 + $0x200] sm:$0x33] %v1989_v30  ;;  %v1991_v30 = vld [vmem:[#allocation2 + $0x208] sm:$0x33] }
  0xe4   : > { %1491 = vrot.lane.b32.xlu0 %v7555_v29, %s6861_s12 }
  0xe5   : > { %1457 = vrot.lane.b32.xlu1 %v7859_v4, %s6861_s12  ;;  %v503_v4 = vld [vmem:[%s7152_s8 + $0xf8] sm:$0xff]  ;;  %v1360_v6 = vpop.permute.xlu0 %1359 }
  0xe6   : > { %v7899_v26 = vrot.slane %v503_v4, %v7155_v12  ;;  %v1001_v17 = vcombine.high %v503_v4, %v503_v4 }
  0xe8   : > { %v1274_v4 = vsel %vm7206_vm6, %v7899_v26, %v1273_v44  ;;  %v7917_v57 = vrot.slane %v1001_v17, %v7155_v12  ;;  %1495 = vrot.lane.b32.xlu0 %v7539_v9, %s6861_s12 }
  0xe9   : > { %1461 = vrot.lane.b32.xlu1 %v7873_v20, %s6861_s12  ;;  %v1354_v20 = vpop.permute.xlu1 %1353  ;;  %1275 = vst [vmem:[#allocation2 + $0x1f0] sm:$0x33] %v1274_v4 }
  0xea   : > { %v1604_v27 = vsel %vm1599_vm0, %v1352_v46, %v1354_v20  ;;  %v1605_v18 = vsel %vm1599_vm0, %v1354_v20, %v1356_v63  ;;  %v1277_v12 = vsel %vm7206_vm6, %v7917_v57, %v1276_v34  ;;  %v7942_v34 = vcombine.high %v7524_v16, %v7524_v16 }
  0xeb   : > { %v6010_v22 = vcombine.low %v1604_v27, %v1605_v18  ;;  %v7927_v27 = vcombine.high %v7495_v61, %v7495_v61  ;;  %1278 = vst [vmem:[#allocation2 + $0x1f8] sm:$0x33] %v1277_v12  ;;  %v7954_v12 = vcombine.high %v7527_v54, %v7527_v54 }
  0xec   : > { %1499 = vrot.lane.b32.xlu0 %v7572_v21, %s6861_s12 }
  0xed   : > { %1465 = vrot.lane.b32.xlu1 %v7891_v36, %s6861_s12  ;;  %v1350_v2 = vpop.permute.xlu1 %1349  ;;  %v1995_v62 = vsel %vm7206_vm6, %v6010_v22, %v1994_v1  ;;  %v1364_v1 = vpop.permute.xlu0 %1363 }
  0xee   : > { %v1602_v20 = vsel %vm1599_vm0, %v1348_v52, %v1350_v2  ;;  %v1603_v36 = vsel %vm1599_vm0, %v1350_v2, %v1352_v46  ;;  %1996 = vst [vmem:[#allocation2 + $0x210] sm:$0x33] %v1995_v62  ;;  %v1997_v52 = vld [vmem:[#allocation2 + $0x218] sm:$0x33]  ;;  %v2000_v2 = vld [vmem:[#allocation2 + $0x220] sm:$0x33] }
  0xef   : > { %v6009_v44 = vcombine.low %v1602_v20, %v1603_v36 }
  0xf0   : > { %1503 = vrot.lane.b32.xlu0 %v7569_v19, %s6861_s12 }
  0xf1   : > { %1469 = vrot.lane.b32.xlu1 %v7909_v60, %s6861_s12  ;;  %v1992_v46 = vsel %vm7206_vm6, %v6009_v44, %v1991_v30  ;;  %v1358_v17 = vpop.permute.xlu1 %1357  ;;  %v1368_v20 = vpop.permute.xlu0 %1367 }
  0xf2   : > { %1993 = vst [vmem:[#allocation2 + $0x208] sm:$0x33] %v1992_v46  ;;  %v1606_v62 = vsel %vm1599_vm0, %v1356_v63, %v1358_v17  ;;  %v1607_v36 = vsel %vm1599_vm0, %v1358_v17, %v1360_v6 }
  0xf3   : > { %v6011_v18 = vcombine.low %v1606_v62, %v1607_v36  ;;  %v2003_v62 = vld [vmem:[#allocation2 + $0x228] sm:$0x33] }
  0xf4   : > { %1507 = vrot.lane.b32.xlu0 %v7589_v58, %s6861_s12 }
  0xf5   : > { %1473 = vrot.lane.b32.xlu1 %v7927_v27, %s6861_s12  ;;  %v1998_v4 = vsel %vm7206_vm6, %v6011_v18, %v1997_v52  ;;  %v1362_v22 = vpop.permute.xlu1 %1361  ;;  %v1372_v36 = vpop.permute.xlu0 %1371 }
  0xf6   : > { %1999 = vst [vmem:[#allocation2 + $0x218] sm:$0x33] %v1998_v4  ;;  %v1608_v63 = vsel %vm1599_vm0, %v1360_v6, %v1362_v22  ;;  %v1609_v30 = vsel %vm1599_vm0, %v1362_v22, %v1364_v1  ;;  %v7966_v4 = vcombine.high %v7549_v7, %v7549_v7 }
  0xf7   : > { %v6012_v44 = vcombine.low %v1608_v63, %v1609_v30 }
  0xf8   : > { %1511 = vrot.lane.b32.xlu0 %v7604_v11, %s6861_s12 }
  0xf9   : > { %1477 = vrot.lane.b32.xlu1 %v7942_v34, %s6861_s12  ;;  %v2001_v46 = vsel %vm7206_vm6, %v6012_v44, %v2000_v2  ;;  %v1366_v17 = vpop.permute.xlu1 %1365  ;;  %v2006_v2 = vld [vmem:[#allocation2 + $0x230] sm:$0x33]  ;;  %v1376_v44 = vpop.permute.xlu0 %1375 }
  0xfa   : > { %2002 = vst [vmem:[#allocation2 + $0x220] sm:$0x33] %v2001_v46  ;;  %v1610_v6 = vsel %vm1599_vm0, %v1364_v1, %v1366_v17  ;;  %v1611_v52 = vsel %vm1599_vm0, %v1366_v17, %v1368_v20  ;;  %v7978_v17 = vcombine.high %v7530_v14, %v7530_v14 }
  0xfb   : > { %v6013_v18 = vcombine.low %v1610_v6, %v1611_v52  ;;  %v2009_v52 = vld [vmem:[#allocation2 + $0x238] sm:$0x33] }
  0xfc   : > { %1515 = vrot.lane.b32.xlu0 %v7618_v41, %s6861_s12 }
  0xfd   : > { %1481 = vrot.lane.b32.xlu1 %v7954_v12, %s6861_s12  ;;  %v2004_v22 = vsel %vm7206_vm6, %v6013_v18, %v2003_v62  ;;  %v1370_v63 = vpop.permute.xlu1 %1369 }
  0xfe   : > { %2005 = vst [vmem:[#allocation2 + $0x228] sm:$0x33] %v2004_v22  ;;  %v1612_v1 = vsel %vm1599_vm0, %v1368_v20, %v1370_v63  ;;  %v1613_v30 = vsel %vm1599_vm0, %v1370_v63, %v1372_v36  ;;  %v1380_v22 = vpop.permute.xlu0 %1379 }
  0xff   : > { %v6014_v46 = vcombine.low %v1612_v1, %v1613_v30  ;;  %v7990_v1 = vcombine.high %v7555_v29, %v7555_v29 }
 0x100   : > { %1519 = vrot.lane.b32.xlu0 %v7633_v25, %s6861_s12 }
 0x101   : > { %1485 = vrot.lane.b32.xlu1 %v7966_v4, %s6861_s12  ;;  %v2007_v6 = vsel %vm7206_vm6, %v6014_v46, %v2006_v2  ;;  %v1374_v62 = vpop.permute.xlu1 %1373  ;;  %9912 = vst [vmem:[#allocation74_spill] sm:$0xff] %v7990_v1  ;;  %v2012_v46 = vld [vmem:[#allocation2 + $0x240] sm:$0x33] }
 0x102   : > { %2008 = vst [vmem:[#allocation2 + $0x230] sm:$0x33] %v2007_v6  ;;  %v1614_v20 = vsel %vm1599_vm0, %v1372_v36, %v1374_v62  ;;  %v1615_v18 = vsel %vm1599_vm0, %v1374_v62, %v1376_v44  ;;  %v1384_v62 = vpop.permute.xlu0 %1383 }
 0x103   : > { %v6015_v63 = vcombine.low %v1614_v20, %v1615_v18  ;;  %v8002_v18 = vcombine.high %v7539_v9, %v7539_v9 }
 0x104   : > { %1523 = vrot.lane.b32.xlu0 %v7647_v8, %s6861_s12 }
 0x105   : > { %1489 = vrot.lane.b32.xlu1 %v7978_v17, %s6861_s12  ;;  %v2010_v2 = vsel %vm7206_vm6, %v6015_v63, %v2009_v52  ;;  %9913 = vst [vmem:[#allocation75_spill] sm:$0xff] %v8002_v18 }
 0x106   : > { %2011 = vst [vmem:[#allocation2 + $0x238] sm:$0x33] %v2010_v2  ;;  %v2015_v2 = vld [vmem:[#allocation2 + $0x248] sm:$0x33] }
 0x107   : > { %v1378_v30 = vpop.permute.xlu1 %1377 }
 0x108   : > { %v1616_v36 = vsel %vm1599_vm0, %v1376_v44, %v1378_v30  ;;  %v1617_v6 = vsel %vm1599_vm0, %v1378_v30, %v1380_v22  ;;  %1527 = vrot.lane.b32.xlu0 %v7662_v10, %s6861_s12 }
 0x109   : > { %v6016_v20 = vcombine.low %v1616_v36, %v1617_v6  ;;  %1493 = vrot.lane.b32.xlu1 %v7990_v1, %s6861_s12  ;;  %v1388_v36 = vpop.permute.xlu0 %1387  ;;  %v8014_v1 = vcombine.high %v7572_v21, %v7572_v21 }
 0x10b   : > { %v2013_v52 = vsel %vm7206_vm6, %v6016_v20, %v2012_v46  ;;  %v1382_v63 = vpop.permute.xlu1 %1381  ;;  %9914 = vst [vmem:[#allocation76_spill] sm:$0xff] %v8014_v1 }
 0x10c   : > { %2014 = vst [vmem:[#allocation2 + $0x240] sm:$0x33] %v2013_v52  ;;  %v1618_v44 = vsel %vm1599_vm0, %v1380_v22, %v1382_v63  ;;  %v1619_v30 = vsel %vm1599_vm0, %v1382_v63, %v1384_v62  ;;  %v2018_v52 = vld [vmem:[#allocation2 + $0x250] sm:$0x33]  ;;  %1531 = vrot.lane.b32.xlu0 %v7676_v24, %s6861_s12 }
 0x10d   : > { %v6017_v6 = vcombine.low %v1618_v44, %v1619_v30  ;;  %1497 = vrot.lane.b32.xlu1 %v8002_v18, %s6861_s12  ;;  %v1392_v44 = vpop.permute.xlu0 %1391  ;;  %v8026_v18 = vcombine.high %v7569_v19, %v7569_v19 }
 0x10f   : > { %v2016_v46 = vsel %vm7206_vm6, %v6017_v6, %v2015_v2  ;;  %v1386_v20 = vpop.permute.xlu1 %1385  ;;  %9915 = vst [vmem:[#allocation77_spill] sm:$0xff] %v8026_v18 }
 0x110   : > { %2017 = vst [vmem:[#allocation2 + $0x248] sm:$0x33] %v2016_v46  ;;  %v1620_v22 = vsel %vm1599_vm0, %v1384_v62, %v1386_v20  ;;  %v1621_v63 = vsel %vm1599_vm0, %v1386_v20, %v1388_v36  ;;  %v2021_v46 = vld [vmem:[#allocation2 + $0x258] sm:$0x33]  ;;  %1535 = vrot.lane.b32.xlu0 %v7691_v15, %s6861_s12 }
 0x111   : > { %v6018_v30 = vcombine.low %v1620_v22, %v1621_v63  ;;  %1501 = vrot.lane.b32.xlu1 %v8014_v1, %s6861_s12  ;;  %v1396_v22 = vpop.permute.xlu0 %1395  ;;  %v8038_v1 = vcombine.high %v7589_v58, %v7589_v58 }
 0x113   : > { %v2019_v2 = vsel %vm7206_vm6, %v6018_v30, %v2018_v52  ;;  %v1390_v6 = vpop.permute.xlu1 %1389  ;;  %9916 = vst [vmem:[#allocation78_spill] sm:$0xff] %v8038_v1 }
 0x114   : > { %2020 = vst [vmem:[#allocation2 + $0x250] sm:$0x33] %v2019_v2  ;;  %v1622_v62 = vsel %vm1599_vm0, %v1388_v36, %v1390_v6  ;;  %v1623_v20 = vsel %vm1599_vm0, %v1390_v6, %v1392_v44  ;;  %v2024_v2 = vld [vmem:[#allocation2 + $0x260] sm:$0x33]  ;;  %1539 = vrot.lane.b32.xlu0 %v7705_v59, %s6861_s12 }
 0x115   : > { %v6019_v63 = vcombine.low %v1622_v62, %v1623_v20  ;;  %1505 = vrot.lane.b32.xlu1 %v8026_v18, %s6861_s12  ;;  %v1400_v62 = vpop.permute.xlu0 %1399  ;;  %v8050_v18 = vcombine.high %v7604_v11, %v7604_v11 }
 0x117   : > { %v2022_v52 = vsel %vm7206_vm6, %v6019_v63, %v2021_v46  ;;  %v1394_v30 = vpop.permute.xlu1 %1393  ;;  %9917 = vst [vmem:[#allocation79_spill] sm:$0xff] %v8050_v18 }
 0x118   : > { %2023 = vst [vmem:[#allocation2 + $0x258] sm:$0x33] %v2022_v52  ;;  %v1624_v36 = vsel %vm1599_vm0, %v1392_v44, %v1394_v30  ;;  %v1625_v6 = vsel %vm1599_vm0, %v1394_v30, %v1396_v22  ;;  %v2027_v52 = vld [vmem:[#allocation2 + $0x268] sm:$0x33]  ;;  %1543 = vrot.lane.b32.xlu0 %v7720_v31, %s6861_s12 }
 0x119   : > { %v6020_v20 = vcombine.low %v1624_v36, %v1625_v6  ;;  %1509 = vrot.lane.b32.xlu1 %v8038_v1, %s6861_s12  ;;  %v1404_v36 = vpop.permute.xlu0 %1403  ;;  %v8062_v1 = vcombine.high %v7618_v41, %v7618_v41 }
 0x11b   : > { %v2025_v46 = vsel %vm7206_vm6, %v6020_v20, %v2024_v2  ;;  %v1398_v63 = vpop.permute.xlu1 %1397  ;;  %9918 = vst [vmem:[#allocation80_spill] sm:$0xff] %v8062_v1 }
 0x11c   : > { %2026 = vst [vmem:[#allocation2 + $0x260] sm:$0x33] %v2025_v46  ;;  %v1626_v44 = vsel %vm1599_vm0, %v1396_v22, %v1398_v63  ;;  %v1627_v30 = vsel %vm1599_vm0, %v1398_v63, %v1400_v62  ;;  %v2030_v46 = vld [vmem:[#allocation2 + $0x270] sm:$0x33]  ;;  %1547 = vrot.lane.b32.xlu0 %v7734_v5, %s6861_s12 }
 0x11d   : > { %v6021_v6 = vcombine.low %v1626_v44, %v1627_v30  ;;  %1513 = vrot.lane.b32.xlu1 %v8050_v18, %s6861_s12  ;;  %v1408_v44 = vpop.permute.xlu0 %1407  ;;  %v8074_v18 = vcombine.high %v7633_v25, %v7633_v25 }
 0x11f   : > { %v2028_v2 = vsel %vm7206_vm6, %v6021_v6, %v2027_v52  ;;  %v1402_v20 = vpop.permute.xlu1 %1401  ;;  %9919 = vst [vmem:[#allocation81_spill] sm:$0xff] %v8074_v18 }
 0x120   : > { %2029 = vst [vmem:[#allocation2 + $0x268] sm:$0x33] %v2028_v2  ;;  %v1628_v22 = vsel %vm1599_vm0, %v1400_v62, %v1402_v20  ;;  %v1629_v63 = vsel %vm1599_vm0, %v1402_v20, %v1404_v36  ;;  %v2033_v2 = vld [vmem:[#allocation2 + $0x278] sm:$0x33]  ;;  %1551 = vrot.lane.b32.xlu0 %v7749_v32, %s6861_s12 }
 0x121   : > { %v6022_v30 = vcombine.low %v1628_v22, %v1629_v63  ;;  %1517 = vrot.lane.b32.xlu1 %v8062_v1, %s6861_s12  ;;  %v1412_v22 = vpop.permute.xlu0 %1411  ;;  %v8086_v1 = vcombine.high %v7647_v8, %v7647_v8 }
 0x123   : > { %v2031_v52 = vsel %vm7206_vm6, %v6022_v30, %v2030_v46  ;;  %v1406_v6 = vpop.permute.xlu1 %1405  ;;  %9920 = vst [vmem:[#allocation82_spill] sm:$0xff] %v8086_v1 }
 0x124   : > { %2032 = vst [vmem:[#allocation2 + $0x270] sm:$0x33] %v2031_v52  ;;  %v1630_v62 = vsel %vm1599_vm0, %v1404_v36, %v1406_v6  ;;  %v1631_v20 = vsel %vm1599_vm0, %v1406_v6, %v1408_v44  ;;  %v2036_v52 = vld [vmem:[#allocation2 + $0x280] sm:$0x33]  ;;  %1555 = vrot.lane.b32.xlu0 %v7763_v13, %s6861_s12 }
 0x125   : > { %v6023_v63 = vcombine.low %v1630_v62, %v1631_v20  ;;  %1521 = vrot.lane.b32.xlu1 %v8074_v18, %s6861_s12  ;;  %v1416_v62 = vpop.permute.xlu0 %1415  ;;  %v8098_v18 = vcombine.high %v7662_v10, %v7662_v10 }
 0x127   : > { %v2034_v46 = vsel %vm7206_vm6, %v6023_v63, %v2033_v2  ;;  %v1410_v30 = vpop.permute.xlu1 %1409  ;;  %9921 = vst [vmem:[#allocation83_spill] sm:$0xff] %v8098_v18 }
 0x128   : > { %2035 = vst [vmem:[#allocation2 + $0x278] sm:$0x33] %v2034_v46  ;;  %v1632_v36 = vsel %vm1599_vm0, %v1408_v44, %v1410_v30  ;;  %v1633_v6 = vsel %vm1599_vm0, %v1410_v30, %v1412_v22  ;;  %v2039_v46 = vld [vmem:[#allocation2 + $0x288] sm:$0x33]  ;;  %1559 = vrot.lane.b32.xlu0 %v7778_v48, %s6861_s12 }
 0x129   : > { %v6024_v20 = vcombine.low %v1632_v36, %v1633_v6  ;;  %1525 = vrot.lane.b32.xlu1 %v8086_v1, %s6861_s12  ;;  %v1420_v36 = vpop.permute.xlu0 %1419  ;;  %v8110_v1 = vcombine.high %v7676_v24, %v7676_v24 }
 0x12b   : > { %v2037_v2 = vsel %vm7206_vm6, %v6024_v20, %v2036_v52  ;;  %v1414_v63 = vpop.permute.xlu1 %1413  ;;  %9922 = vst [vmem:[#allocation84_spill] sm:$0xff] %v8110_v1 }
 0x12c   : > { %2038 = vst [vmem:[#allocation2 + $0x280] sm:$0x33] %v2037_v2  ;;  %v1634_v44 = vsel %vm1599_vm0, %v1412_v22, %v1414_v63  ;;  %v1635_v30 = vsel %vm1599_vm0, %v1414_v63, %v1416_v62  ;;  %v2042_v2 = vld [vmem:[#allocation2 + $0x290] sm:$0x33]  ;;  %1563 = vrot.lane.b32.xlu0 %v7792_v47, %s6861_s12 }
 0x12d   : > { %v6025_v6 = vcombine.low %v1634_v44, %v1635_v30  ;;  %1529 = vrot.lane.b32.xlu1 %v8098_v18, %s6861_s12  ;;  %v1424_v44 = vpop.permute.xlu0 %1423  ;;  %v8122_v18 = vcombine.high %v7691_v15, %v7691_v15 }
 0x12f   : > { %v2040_v52 = vsel %vm7206_vm6, %v6025_v6, %v2039_v46  ;;  %v1418_v20 = vpop.permute.xlu1 %1417  ;;  %9923 = vst [vmem:[#allocation85_spill] sm:$0xff] %v8122_v18 }
 0x130   : > { %2041 = vst [vmem:[#allocation2 + $0x288] sm:$0x33] %v2040_v52  ;;  %v1636_v22 = vsel %vm1599_vm0, %v1416_v62, %v1418_v20  ;;  %v1637_v63 = vsel %vm1599_vm0, %v1418_v20, %v1420_v36  ;;  %v2045_v52 = vld [vmem:[#allocation2 + $0x298] sm:$0x33]  ;;  %1567 = vrot.lane.b32.xlu0 %v7807_v55, %s6861_s12 }
 0x131   : > { %v6026_v30 = vcombine.low %v1636_v22, %v1637_v63  ;;  %1533 = vrot.lane.b32.xlu1 %v8110_v1, %s6861_s12  ;;  %v1428_v22 = vpop.permute.xlu0 %1427  ;;  %v8134_v1 = vcombine.high %v7705_v59, %v7705_v59 }
 0x133   : > { %v2043_v46 = vsel %vm7206_vm6, %v6026_v30, %v2042_v2  ;;  %v1422_v6 = vpop.permute.xlu1 %1421  ;;  %9924 = vst [vmem:[#allocation86_spill] sm:$0xff] %v8134_v1 }
 0x134   : > { %2044 = vst [vmem:[#allocation2 + $0x290] sm:$0x33] %v2043_v46  ;;  %v1638_v62 = vsel %vm1599_vm0, %v1420_v36, %v1422_v6  ;;  %v1639_v20 = vsel %vm1599_vm0, %v1422_v6, %v1424_v44  ;;  %v2048_v46 = vld [vmem:[#allocation2 + $0x2a0] sm:$0x33]  ;;  %1571 = vrot.lane.b32.xlu0 %v7821_v40, %s6861_s12 }
 0x135   : > { %v6027_v63 = vcombine.low %v1638_v62, %v1639_v20  ;;  %1537 = vrot.lane.b32.xlu1 %v8122_v18, %s6861_s12  ;;  %v1432_v62 = vpop.permute.xlu0 %1431  ;;  %v8146_v18 = vcombine.high %v7720_v31, %v7720_v31 }
 0x137   : > { %v2046_v2 = vsel %vm7206_vm6, %v6027_v63, %v2045_v52  ;;  %v1426_v30 = vpop.permute.xlu1 %1425  ;;  %9925 = vst [vmem:[#allocation87_spill] sm:$0xff] %v8146_v18 }
 0x138   : > { %2047 = vst [vmem:[#allocation2 + $0x298] sm:$0x33] %v2046_v2  ;;  %v1640_v36 = vsel %vm1599_vm0, %v1424_v44, %v1426_v30  ;;  %v1641_v6 = vsel %vm1599_vm0, %v1426_v30, %v1428_v22  ;;  %v2051_v2 = vld [vmem:[#allocation2 + $0x2a8] sm:$0x33]  ;;  %1575 = vrot.lane.b32.xlu0 %v7836_v0, %s6861_s12 }
 0x139   : > { %v6028_v20 = vcombine.low %v1640_v36, %v1641_v6  ;;  %1541 = vrot.lane.b32.xlu1 %v8134_v1, %s6861_s12  ;;  %v1436_v36 = vpop.permute.xlu0 %1435  ;;  %v8158_v1 = vcombine.high %v7734_v5, %v7734_v5 }
 0x13b   : > { %v2049_v52 = vsel %vm7206_vm6, %v6028_v20, %v2048_v46  ;;  %v1430_v63 = vpop.permute.xlu1 %1429  ;;  %9926 = vst [vmem:[#allocation88_spill] sm:$0xff] %v8158_v1 }
 0x13c   : > { %2050 = vst [vmem:[#allocation2 + $0x2a0] sm:$0x33] %v2049_v52  ;;  %v1642_v44 = vsel %vm1599_vm0, %v1428_v22, %v1430_v63  ;;  %v1643_v30 = vsel %vm1599_vm0, %v1430_v63, %v1432_v62  ;;  %v2054_v52 = vld [vmem:[#allocation2 + $0x2b0] sm:$0x33]  ;;  %1579 = vrot.lane.b32.xlu0 %v7850_v42, %s6861_s12 }
 0x13d   : > { %v6029_v6 = vcombine.low %v1642_v44, %v1643_v30  ;;  %1545 = vrot.lane.b32.xlu1 %v8146_v18, %s6861_s12  ;;  %v1440_v44 = vpop.permute.xlu0 %1439  ;;  %v8170_v18 = vcombine.high %v7749_v32, %v7749_v32 }
 0x13f   : > { %v2052_v46 = vsel %vm7206_vm6, %v6029_v6, %v2051_v2  ;;  %v1434_v20 = vpop.permute.xlu1 %1433  ;;  %9927 = vst [vmem:[#allocation89_spill] sm:$0xff] %v8170_v18 }
 0x140   : > { %2053 = vst [vmem:[#allocation2 + $0x2a8] sm:$0x33] %v2052_v46  ;;  %v1644_v22 = vsel %vm1599_vm0, %v1432_v62, %v1434_v20  ;;  %v1645_v63 = vsel %vm1599_vm0, %v1434_v20, %v1436_v36  ;;  %v2057_v46 = vld [vmem:[#allocation2 + $0x2b8] sm:$0x33]  ;;  %1583 = vrot.lane.b32.xlu0 %v7867_v50, %s6861_s12 }
 0x141   : > { %v6030_v30 = vcombine.low %v1644_v22, %v1645_v63  ;;  %1549 = vrot.lane.b32.xlu1 %v8158_v1, %s6861_s12  ;;  %v1444_v22 = vpop.permute.xlu0 %1443  ;;  %v8182_v1 = vcombine.high %v7763_v13, %v7763_v13 }
 0x143   : > { %v2055_v2 = vsel %vm7206_vm6, %v6030_v30, %v2054_v52  ;;  %v1438_v6 = vpop.permute.xlu1 %1437  ;;  %9928 = vst [vmem:[#allocation90_spill] sm:$0xff] %v8182_v1 }
 0x144   : > { %2056 = vst [vmem:[#allocation2 + $0x2b0] sm:$0x33] %v2055_v2  ;;  %v1646_v62 = vsel %vm1599_vm0, %v1436_v36, %v1438_v6  ;;  %v1647_v20 = vsel %vm1599_vm0, %v1438_v6, %v1440_v44  ;;  %v2060_v2 = vld [vmem:[#allocation2 + $0x2c0] sm:$0x33]  ;;  %1587 = vrot.lane.b32.xlu0 %v7881_v38, %s6861_s12 }
 0x145   : > { %v6031_v63 = vcombine.low %v1646_v62, %v1647_v20  ;;  %1553 = vrot.lane.b32.xlu1 %v8170_v18, %s6861_s12  ;;  %v1448_v62 = vpop.permute.xlu0 %1447  ;;  %v8194_v18 = vcombine.high %v7778_v48, %v7778_v48 }
 0x147   : > { %v2058_v52 = vsel %vm7206_vm6, %v6031_v63, %v2057_v46  ;;  %v1442_v30 = vpop.permute.xlu1 %1441  ;;  %9929 = vst [vmem:[#allocation91_spill] sm:$0xff] %v8194_v18 }
 0x148   : > { %2059 = vst [vmem:[#allocation2 + $0x2b8] sm:$0x33] %v2058_v52  ;;  %v1648_v36 = vsel %vm1599_vm0, %v1440_v44, %v1442_v30  ;;  %v1649_v6 = vsel %vm1599_vm0, %v1442_v30, %v1444_v22  ;;  %v2063_v52 = vld [vmem:[#allocation2 + $0x2c8] sm:$0x33]  ;;  %1591 = vrot.lane.b32.xlu0 %v7899_v26, %s6861_s12 }
 0x149   : > { %v6032_v20 = vcombine.low %v1648_v36, %v1649_v6  ;;  %1557 = vrot.lane.b32.xlu1 %v8182_v1, %s6861_s12  ;;  %v1452_v36 = vpop.permute.xlu0 %1451  ;;  %v8206_v1 = vcombine.high %v7792_v47, %v7792_v47 }
 0x14b   : > { %v2061_v46 = vsel %vm7206_vm6, %v6032_v20, %v2060_v2  ;;  %v1446_v63 = vpop.permute.xlu1 %1445  ;;  %9930 = vst [vmem:[#allocation92_spill] sm:$0xff] %v8206_v1 }
 0x14c   : > { %2062 = vst [vmem:[#allocation2 + $0x2c0] sm:$0x33] %v2061_v46  ;;  %v1650_v44 = vsel %vm1599_vm0, %v1444_v22, %v1446_v63  ;;  %v1651_v30 = vsel %vm1599_vm0, %v1446_v63, %v1448_v62  ;;  %v2066_v46 = vld [vmem:[#allocation2 + $0x2d0] sm:$0x33]  ;;  %1595 = vrot.lane.b32.xlu0 %v7917_v57, %s6861_s12 }
 0x14d   : > { %v6033_v6 = vcombine.low %v1650_v44, %v1651_v30  ;;  %1561 = vrot.lane.b32.xlu1 %v8194_v18, %s6861_s12  ;;  %v1456_v44 = vpop.permute.xlu0 %1455  ;;  %v8218_v18 = vcombine.high %v7807_v55, %v7807_v55 }
 0x14f   : > { %v2064_v2 = vsel %vm7206_vm6, %v6033_v6, %v2063_v52  ;;  %v1450_v20 = vpop.permute.xlu1 %1449  ;;  %9931 = vst [vmem:[#allocation93_spill] sm:$0xff] %v8218_v18 }
 0x150   : > { %2065 = vst [vmem:[#allocation2 + $0x2c8] sm:$0x33] %v2064_v2  ;;  %v1652_v22 = vsel %vm1599_vm0, %v1448_v62, %v1450_v20  ;;  %v1653_v63 = vsel %vm1599_vm0, %v1450_v20, %v1452_v36  ;;  %v2069_v2 = vld [vmem:[#allocation2 + $0x2d8] sm:$0x33]  ;;  %2180 = vrot.lane.b32.xlu0 %v7190_v23, %s6862_s13 }
 0x151   : > { %v6034_v30 = vcombine.low %v1652_v22, %v1653_v63  ;;  %1565 = vrot.lane.b32.xlu1 %v8206_v1, %s6861_s12  ;;  %v1460_v22 = vpop.permute.xlu0 %1459  ;;  %v8230_v1 = vcombine.high %v7821_v40, %v7821_v40 }
 0x153   : > { %v2067_v52 = vsel %vm7206_vm6, %v6034_v30, %v2066_v46  ;;  %v1454_v6 = vpop.permute.xlu1 %1453  ;;  %9932 = vst [vmem:[#allocation94_spill] sm:$0xff] %v8230_v1 }
 0x154   : > { %2068 = vst [vmem:[#allocation2 + $0x2d0] sm:$0x33] %v2067_v52  ;;  %v1654_v62 = vsel %vm1599_vm0, %v1452_v36, %v1454_v6  ;;  %v1655_v20 = vsel %vm1599_vm0, %v1454_v6, %v1456_v44  ;;  %v2072_v52 = vld [vmem:[#allocation2 + $0x2e0] sm:$0x33]  ;;  %2184 = vrot.lane.b32.xlu0 %v7266_v43, %s6862_s13 }
 0x155   : > { %v6035_v63 = vcombine.low %v1654_v62, %v1655_v20  ;;  %1569 = vrot.lane.b32.xlu1 %v8218_v18, %s6861_s12  ;;  %v1464_v62 = vpop.permute.xlu0 %1463  ;;  %v8242_v18 = vcombine.high %v7836_v0, %v7836_v0 }
 0x157   : > { %v2070_v46 = vsel %vm7206_vm6, %v6035_v63, %v2069_v2  ;;  %v1458_v30 = vpop.permute.xlu1 %1457  ;;  %9933 = vst [vmem:[#allocation95_spill] sm:$0xff] %v8242_v18 }
 0x158   : > { %2071 = vst [vmem:[#allocation2 + $0x2d8] sm:$0x33] %v2070_v46  ;;  %v1656_v36 = vsel %vm1599_vm0, %v1456_v44, %v1458_v30  ;;  %v1657_v6 = vsel %vm1599_vm0, %v1458_v30, %v1460_v22  ;;  %v2075_v46 = vld [vmem:[#allocation2 + $0x2e8] sm:$0x33]  ;;  %2188 = vrot.lane.b32.xlu0 %v7216_v33, %s6862_s13 }
 0x159   : > { %v6036_v20 = vcombine.low %v1656_v36, %v1657_v6  ;;  %1573 = vrot.lane.b32.xlu1 %v8230_v1, %s6861_s12  ;;  %v1468_v36 = vpop.permute.xlu0 %1467  ;;  %v8254_v1 = vcombine.high %v7850_v42, %v7850_v42 }
 0x15b   : > { %v2073_v2 = vsel %vm7206_vm6, %v6036_v20, %v2072_v52  ;;  %v1462_v63 = vpop.permute.xlu1 %1461  ;;  %9934 = vst [vmem:[#allocation96_spill] sm:$0xff] %v8254_v1 }
 0x15c   : > { %2074 = vst [vmem:[#allocation2 + $0x2e0] sm:$0x33] %v2073_v2  ;;  %v1658_v44 = vsel %vm1599_vm0, %v1460_v22, %v1462_v63  ;;  %v1659_v30 = vsel %vm1599_vm0, %v1462_v63, %v1464_v62  ;;  %v2078_v2 = vld [vmem:[#allocation2 + $0x2f0] sm:$0x33]  ;;  %2192 = vrot.lane.b32.xlu0 %v7272_v45, %s6862_s13 }
 0x15d   : > { %v6037_v6 = vcombine.low %v1658_v44, %v1659_v30  ;;  %1577 = vrot.lane.b32.xlu1 %v8242_v18, %s6861_s12  ;;  %v1472_v44 = vpop.permute.xlu0 %1471  ;;  %v8266_v18 = vcombine.high %v7867_v50, %v7867_v50 }
 0x15f   : > { %v2076_v52 = vsel %vm7206_vm6, %v6037_v6, %v2075_v46  ;;  %v1466_v20 = vpop.permute.xlu1 %1465  ;;  %9935 = vst [vmem:[#allocation97_spill] sm:$0xff] %v8266_v18 }
 0x160   : > { %2077 = vst [vmem:[#allocation2 + $0x2e8] sm:$0x33] %v2076_v52  ;;  %v1660_v22 = vsel %vm1599_vm0, %v1464_v62, %v1466_v20  ;;  %v1661_v63 = vsel %vm1599_vm0, %v1466_v20, %v1468_v36  ;;  %v2081_v52 = vld [vmem:[#allocation2 + $0x2f8] sm:$0x33]  ;;  %2196 = vrot.lane.b32.xlu0 %v7228_v37, %s6862_s13 }
 0x161   : > { %v6038_v30 = vcombine.low %v1660_v22, %v1661_v63  ;;  %1581 = vrot.lane.b32.xlu1 %v8254_v1, %s6861_s12  ;;  %v1476_v22 = vpop.permute.xlu0 %1475  ;;  %v8278_v1 = vcombine.high %v7881_v38, %v7881_v38 }
 0x163   : > { %v2079_v46 = vsel %vm7206_vm6, %v6038_v30, %v2078_v2  ;;  %v1470_v6 = vpop.permute.xlu1 %1469  ;;  %9936 = vst [vmem:[#allocation98_spill] sm:$0xff] %v8278_v1 }
 0x164   : > { %2080 = vst [vmem:[#allocation2 + $0x2f0] sm:$0x33] %v2079_v46  ;;  %v1662_v62 = vsel %vm1599_vm0, %v1468_v36, %v1470_v6  ;;  %v1663_v20 = vsel %vm1599_vm0, %v1470_v6, %v1472_v44  ;;  %v2084_v46 = vld [vmem:[#allocation2 + $0x300] sm:$0x33]  ;;  %2200 = vrot.lane.b32.xlu0 %v7297_v56, %s6862_s13 }
 0x165   : > { %v6039_v63 = vcombine.low %v1662_v62, %v1663_v20  ;;  %1585 = vrot.lane.b32.xlu1 %v8266_v18, %s6861_s12  ;;  %v1480_v62 = vpop.permute.xlu0 %1479  ;;  %v8290_v18 = vcombine.high %v7899_v26, %v7899_v26 }
 0x167   : > { %v2082_v2 = vsel %vm7206_vm6, %v6039_v63, %v2081_v52  ;;  %v1474_v30 = vpop.permute.xlu1 %1473  ;;  %9937 = vst [vmem:[#allocation99_spill] sm:$0xff] %v8290_v18 }
 0x168   : > { %2083 = vst [vmem:[#allocation2 + $0x2f8] sm:$0x33] %v2082_v2  ;;  %v1664_v36 = vsel %vm1599_vm0, %v1472_v44, %v1474_v30  ;;  %v1665_v6 = vsel %vm1599_vm0, %v1474_v30, %v1476_v22  ;;  %v2087_v2 = vld [vmem:[#allocation2 + $0x308] sm:$0x33]  ;;  %2204 = vrot.lane.b32.xlu0 %v7278_v49, %s6862_s13 }
 0x169   : > { %v6040_v20 = vcombine.low %v1664_v36, %v1665_v6  ;;  %1589 = vrot.lane.b32.xlu1 %v8278_v1, %s6861_s12  ;;  %v1484_v36 = vpop.permute.xlu0 %1483  ;;  %v8302_v1 = vcombine.high %v7917_v57, %v7917_v57 }
 0x16b   : > { %v2085_v52 = vsel %vm7206_vm6, %v6040_v20, %v2084_v46  ;;  %v1478_v63 = vpop.permute.xlu1 %1477 }
 0x16c   : > { %2086 = vst [vmem:[#allocation2 + $0x300] sm:$0x33] %v2085_v52  ;;  %v1666_v44 = vsel %vm1599_vm0, %v1476_v22, %v1478_v63  ;;  %v1667_v30 = vsel %vm1599_vm0, %v1478_v63, %v1480_v62  ;;  %v2090_v52 = vld [vmem:[#allocation2 + $0x310] sm:$0x33] }
 0x16d   : > { %v6041_v6 = vcombine.low %v1666_v44, %v1667_v30  ;;  %1593 = vrot.lane.b32.xlu1 %v8290_v18, %s6861_s12  ;;  %v1488_v44 = vpop.permute.xlu0 %1487 }
 0x16f   : > { %v2088_v46 = vsel %vm7206_vm6, %v6041_v6, %v2087_v2  ;;  %v1482_v22 = vpop.permute.xlu1 %1481  ;;  %v2093_v6 = vld [vmem:[#allocation2 + $0x318] sm:$0x33] }
 0x170   : > { %2089 = vst [vmem:[#allocation2 + $0x308] sm:$0x33] %v2088_v46  ;;  %v1668_v20 = vsel %vm1599_vm0, %v1480_v62, %v1482_v22  ;;  %v1669_v63 = vsel %vm1599_vm0, %v1482_v22, %v1484_v36 }
 0x171   : > { %v6042_v30 = vcombine.low %v1668_v20, %v1669_v63  ;;  %1597 = vrot.lane.b32.xlu1 %v8302_v1, %s6861_s12  ;;  %v1492_v46 = vpop.permute.xlu0 %1491  ;;  %v2096_v63 = vld [vmem:[#allocation2 + $0x320] sm:$0x33] }
 0x173   : > { %v2091_v23 = vsel %vm7206_vm6, %v6042_v30, %v2090_v52  ;;  %v1486_v18 = vpop.permute.xlu1 %1485 }
 0x174   : > { %2092 = vst [vmem:[#allocation2 + $0x310] sm:$0x33] %v2091_v23  ;;  %v1670_v2 = vsel %vm1599_vm0, %v1484_v36, %v1486_v18  ;;  %v1671_v62 = vsel %vm1599_vm0, %v1486_v18, %v1488_v44 }
 0x175   : > { %v6043_v22 = vcombine.low %v1670_v2, %v1671_v62  ;;  %2182 = vrot.lane.b32.xlu1 %v7225_v35, %s6862_s13  ;;  %v1496_v30 = vpop.permute.xlu0 %1495  ;;  %v2099_v2 = vld [vmem:[#allocation2 + $0x328] sm:$0x33] }
 0x177   : > { %v2094_v43 = vsel %vm7206_vm6, %v6043_v22, %v2093_v6  ;;  %v1490_v20 = vpop.permute.xlu1 %1489 }
 0x178   : > { %2095 = vst [vmem:[#allocation2 + $0x318] sm:$0x33] %v2094_v43  ;;  %v1672_v52 = vsel %vm1599_vm0, %v1488_v44, %v1490_v20  ;;  %v1673_v36 = vsel %vm1599_vm0, %v1490_v20, %v1492_v46  ;;  %v2102_v43 = vld [vmem:[#allocation2 + $0x330] sm:$0x33] }
 0x179   : > { %v6044_v18 = vcombine.low %v1672_v52, %v1673_v36  ;;  %2186 = vrot.lane.b32.xlu1 %v7311_v3, %s6862_s13  ;;  %v1500_v6 = vpop.permute.xlu0 %1499  ;;  %v2105_v36 = vld [vmem:[#allocation2 + $0x338] sm:$0x33] }
 0x17b   : > { %v2097_v33 = vsel %vm7206_vm6, %v6044_v18, %v2096_v63  ;;  %v1494_v35 = vpop.permute.xlu1 %1493 }
 0x17c   : > { %2098 = vst [vmem:[#allocation2 + $0x320] sm:$0x33] %v2097_v33  ;;  %v1674_v23 = vsel %vm1599_vm0, %v1492_v46, %v1494_v35  ;;  %v1675_v44 = vsel %vm1599_vm0, %v1494_v35, %v1496_v30 }
 0x17d   : > { %v6045_v62 = vcombine.low %v1674_v23, %v1675_v44  ;;  %2190 = vrot.lane.b32.xlu1 %v7289_v53, %s6862_s13  ;;  %v1504_v20 = vpop.permute.xlu0 %1503  ;;  %v2108_v23 = vld [vmem:[#allocation2 + $0x340] sm:$0x33] }
 0x17f   : > { %v2100_v45 = vsel %vm7206_vm6, %v6045_v62, %v2099_v2  ;;  %v1498_v3 = vpop.permute.xlu1 %1497  ;;  %v9938_v62 = vld [vmem:[#allocation39_spill] sm:$0xff] }
 0x180   : > { %2101 = vst [vmem:[#allocation2 + $0x328] sm:$0x33] %v2100_v45  ;;  %v1676_v22 = vsel %vm1599_vm0, %v1496_v30, %v1498_v3  ;;  %v1677_v46 = vsel %vm1599_vm0, %v1498_v3, %v1500_v6 }
 0x181   : > { %v6046_v52 = vcombine.low %v1676_v22, %v1677_v46  ;;  %2194 = vrot.lane.b32.xlu1 %v7360_v51, %s6862_s13  ;;  %v1508_v18 = vpop.permute.xlu0 %1507  ;;  %v2111_v22 = vld [vmem:[#allocation2 + $0x348] sm:$0x33] }
 0x183   : > { %v2103_v37 = vsel %vm7206_vm6, %v6046_v52, %v2102_v43  ;;  %v1502_v53 = vpop.permute.xlu1 %1501  ;;  %v9940_v52 = vld [vmem:[#allocation43_spill] sm:$0xff] }
 0x184   : > { %2104 = vst [vmem:[#allocation2 + $0x330] sm:$0x33] %v2103_v37  ;;  %v1678_v63 = vsel %vm1599_vm0, %v1500_v6, %v1502_v53  ;;  %v1679_v30 = vsel %vm1599_vm0, %v1502_v53, %v1504_v20  ;;  %v9941_v37 = vld [vmem:[#allocation22_spill] sm:$0xff] }
 0x185   : > { %v6047_v33 = vcombine.low %v1678_v63, %v1679_v30  ;;  %2198 = vrot.lane.b32.xlu1 %v7397_v39, %s6862_s13  ;;  %v1512_v44 = vpop.permute.xlu0 %1511  ;;  %v9939_v39 = vld [vmem:[#allocation24_spill] sm:$0xff]  ;;  %v2114_v30 = vld [vmem:[#allocation2 + $0x350] sm:$0x33] }
 0x186   : > { %2208 = vrot.lane.b32.xlu0 %v9939_v39, %s6862_s13 }
 0x187   : > { %v2106_v56 = vsel %vm7206_vm6, %v6047_v33, %v2105_v36  ;;  %v1506_v51 = vpop.permute.xlu1 %1505 }
 0x188   : > { %2107 = vst [vmem:[#allocation2 + $0x338] sm:$0x33] %v2106_v56  ;;  %v1680_v35 = vsel %vm1599_vm0, %v1504_v20, %v1506_v51  ;;  %v1681_v2 = vsel %vm1599_vm0, %v1506_v51, %v1508_v18  ;;  %v9942_v51 = vld [vmem:[#allocation49_spill] sm:$0xff] }
 0x189   : > { %v6048_v6 = vcombine.low %v1680_v35, %v1681_v2  ;;  %2202 = vrot.lane.b32.xlu1 %v9938_v62, %s6862_s13  ;;  %v1516_v46 = vpop.permute.xlu0 %1515  ;;  %v9943_v35 = vld [vmem:[#allocation25_spill] sm:$0xff]  ;;  %v2117_v62 = vld [vmem:[#allocation2 + $0x358] sm:$0x33] }
 0x18a   : > { %2212 = vrot.lane.b32.xlu0 %v9941_v37, %s6862_s13 }
 0x18b   : > { %v2109_v49 = vsel %vm7206_vm6, %v6048_v6, %v2108_v23  ;;  %v1510_v45 = vpop.permute.xlu1 %1509 }
 0x18c   : > { %2110 = vst [vmem:[#allocation2 + $0x340] sm:$0x33] %v2109_v49  ;;  %v1682_v3 = vsel %vm1599_vm0, %v1508_v18, %v1510_v45  ;;  %v1683_v43 = vsel %vm1599_vm0, %v1510_v45, %v1512_v44  ;;  %v9944_v45 = vld [vmem:[#allocation50_spill] sm:$0xff] }
 0x18d   : > { %v6049_v20 = vcombine.low %v1682_v3, %v1683_v43  ;;  %2206 = vrot.lane.b32.xlu1 %v9940_v52, %s6862_s13  ;;  %v1520_v33 = vpop.permute.xlu0 %1519  ;;  %v9945_v3 = vld [vmem:[#allocation23_spill] sm:$0xff]  ;;  %v2120_v52 = vld [vmem:[#allocation2 + $0x360] sm:$0x33] }
 0x18e   : > { %2216 = vrot.lane.b32.xlu0 %v9943_v35, %s6862_s13 }
 0x18f   : > { %v2112_v53 = vsel %vm7206_vm6, %v6049_v20, %v2111_v22  ;;  %v1514_v63 = vpop.permute.xlu1 %1513 }
 0x190   : > { %2113 = vst [vmem:[#allocation2 + $0x348] sm:$0x33] %v2112_v53  ;;  %v1684_v36 = vsel %vm1599_vm0, %v1512_v44, %v1514_v63  ;;  %v1685_v18 = vsel %vm1599_vm0, %v1514_v63, %v1516_v46  ;;  %v9946_v63 = vld [vmem:[#allocation51_spill] sm:$0xff] }
 0x191   : > { %v6050_v56 = vcombine.low %v1684_v36, %v1685_v18  ;;  %2210 = vrot.lane.b32.xlu1 %v9942_v51, %s6862_s13  ;;  %v1524_v39 = vpop.permute.xlu0 %1523  ;;  %v9947_v36 = vld [vmem:[#allocation27_spill] sm:$0xff]  ;;  %v2123_v51 = vld [vmem:[#allocation2 + $0x368] sm:$0x33] }
 0x192   : > { %2220 = vrot.lane.b32.xlu0 %v9945_v3, %s6862_s13 }
 0x193   : > { %v2115_v23 = vsel %vm7206_vm6, %v6050_v56, %v2114_v30  ;;  %v1518_v2 = vpop.permute.xlu1 %1517 }
 0x194   : > { %2116 = vst [vmem:[#allocation2 + $0x350] sm:$0x33] %v2115_v23  ;;  %v1686_v6 = vsel %vm1599_vm0, %v1516_v46, %v1518_v2  ;;  %v1687_v44 = vsel %vm1599_vm0, %v1518_v2, %v1520_v33  ;;  %v9948_v2 = vld [vmem:[#allocation52_spill] sm:$0xff] }
 0x195   : > { %v6051_v49 = vcombine.low %v1686_v6, %v1687_v44  ;;  %2214 = vrot.lane.b32.xlu1 %v9944_v45, %s6862_s13  ;;  %v1528_v37 = vpop.permute.xlu0 %1527  ;;  %v9949_v6 = vld [vmem:[#allocation26_spill] sm:$0xff] }
 0x196   : > { %2224 = vrot.lane.b32.xlu0 %v9947_v36, %s6862_s13  ;;  %v2126_v45 = vld [vmem:[#allocation2 + $0x370] sm:$0x33] }
 0x197   : > { %v2118_v22 = vsel %vm7206_vm6, %v6051_v49, %v2117_v62  ;;  %v1522_v43 = vpop.permute.xlu1 %1521 }
 0x198   : > { %2119 = vst [vmem:[#allocation2 + $0x358] sm:$0x33] %v2118_v22  ;;  %v1688_v20 = vsel %vm1599_vm0, %v1520_v33, %v1522_v43  ;;  %v1689_v46 = vsel %vm1599_vm0, %v1522_v43, %v1524_v39  ;;  %v9950_v43 = vld [vmem:[#allocation53_spill] sm:$0xff] }
 0x199   : > { %v6052_v53 = vcombine.low %v1688_v20, %v1689_v46  ;;  %2218 = vrot.lane.b32.xlu1 %v9946_v63, %s6862_s13  ;;  %v1532_v35 = vpop.permute.xlu0 %1531  ;;  %v9951_v20 = vld [vmem:[#allocation30_spill] sm:$0xff]  ;;  %v2129_v63 = vld [vmem:[#allocation2 + $0x378] sm:$0x33] }
 0x19a   : > { %2228 = vrot.lane.b32.xlu0 %v9949_v6, %s6862_s13 }
 0x19b   : > { %v2121_v30 = vsel %vm7206_vm6, %v6052_v53, %v2120_v52  ;;  %v1526_v18 = vpop.permute.xlu1 %1525 }
 0x19c   : > { %2122 = vst [vmem:[#allocation2 + $0x360] sm:$0x33] %v2121_v30  ;;  %v1690_v56 = vsel %vm1599_vm0, %v1524_v39, %v1526_v18  ;;  %v1691_v33 = vsel %vm1599_vm0, %v1526_v18, %v1528_v37  ;;  %v9952_v18 = vld [vmem:[#allocation54_spill] sm:$0xff] }
 0x19d   : > { %v6053_v23 = vcombine.low %v1690_v56, %v1691_v33  ;;  %2222 = vrot.lane.b32.xlu1 %v9948_v2, %s6862_s13  ;;  %v1536_v3 = vpop.permute.xlu0 %1535  ;;  %v9953_v56 = vld [vmem:[#allocation28_spill] sm:$0xff] }
 0x19e   : > { %2232 = vrot.lane.b32.xlu0 %v9951_v20, %s6862_s13  ;;  %v2132_v2 = vld [vmem:[#allocation2 + $0x380] sm:$0x33] }
 0x19f   : > { %v2124_v62 = vsel %vm7206_vm6, %v6053_v23, %v2123_v51  ;;  %v1530_v44 = vpop.permute.xlu1 %1529 }
 0x1a0   : > { %2125 = vst [vmem:[#allocation2 + $0x368] sm:$0x33] %v2124_v62  ;;  %v1692_v49 = vsel %vm1599_vm0, %v1528_v37, %v1530_v44  ;;  %v1693_v39 = vsel %vm1599_vm0, %v1530_v44, %v1532_v35  ;;  %v9954_v44 = vld [vmem:[#allocation55_spill] sm:$0xff] }
 0x1a1   : > { %v6054_v22 = vcombine.low %v1692_v49, %v1693_v39  ;;  %2226 = vrot.lane.b32.xlu1 %v9950_v43, %s6862_s13  ;;  %v1540_v36 = vpop.permute.xlu0 %1539  ;;  %v9955_v49 = vld [vmem:[#allocation32_spill] sm:$0xff]  ;;  %v2135_v43 = vld [vmem:[#allocation2 + $0x388] sm:$0x33] }
 0x1a2   : > { %2236 = vrot.lane.b32.xlu0 %v9953_v56, %s6862_s13 }
 0x1a3   : > { %v2127_v52 = vsel %vm7206_vm6, %v6054_v22, %v2126_v45  ;;  %v1534_v46 = vpop.permute.xlu1 %1533 }
 0x1a4   : > { %2128 = vst [vmem:[#allocation2 + $0x370] sm:$0x33] %v2127_v52  ;;  %v1694_v53 = vsel %vm1599_vm0, %v1532_v35, %v1534_v46  ;;  %v1695_v37 = vsel %vm1599_vm0, %v1534_v46, %v1536_v3  ;;  %v9956_v46 = vld [vmem:[#allocation56_spill] sm:$0xff] }
 0x1a5   : > { %v6055_v30 = vcombine.low %v1694_v53, %v1695_v37  ;;  %2230 = vrot.lane.b32.xlu1 %v9952_v18, %s6862_s13  ;;  %v1544_v6 = vpop.permute.xlu0 %1543  ;;  %v9957_v53 = vld [vmem:[#allocation29_spill] sm:$0xff]  ;;  %v2138_v18 = vld [vmem:[#allocation2 + $0x390] sm:$0x33] }
 0x1a6   : > { %2240 = vrot.lane.b32.xlu0 %v9955_v49, %s6862_s13 }
 0x1a7   : > { %v2130_v51 = vsel %vm7206_vm6, %v6055_v30, %v2129_v63  ;;  %v1538_v33 = vpop.permute.xlu1 %1537 }
 0x1a8   : > { %2131 = vst [vmem:[#allocation2 + $0x378] sm:$0x33] %v2130_v51  ;;  %v1696_v23 = vsel %vm1599_vm0, %v1536_v3, %v1538_v33  ;;  %v1697_v35 = vsel %vm1599_vm0, %v1538_v33, %v1540_v36  ;;  %v9958_v33 = vld [vmem:[#allocation57_spill] sm:$0xff] }
 0x1a9   : > { %v6056_v62 = vcombine.low %v1696_v23, %v1697_v35  ;;  %2234 = vrot.lane.b32.xlu1 %v9954_v44, %s6862_s13  ;;  %v1548_v20 = vpop.permute.xlu0 %1547  ;;  %v9959_v23 = vld [vmem:[#allocation33_spill] sm:$0xff]  ;;  %v2141_v44 = vld [vmem:[#allocation2 + $0x398] sm:$0x33] }
 0x1aa   : > { %2244 = vrot.lane.b32.xlu0 %v9957_v53, %s6862_s13 }
 0x1ab   : > { %v2133_v45 = vsel %vm7206_vm6, %v6056_v62, %v2132_v2  ;;  %v1542_v39 = vpop.permute.xlu1 %1541 }
 0x1ac   : > { %2134 = vst [vmem:[#allocation2 + $0x380] sm:$0x33] %v2133_v45  ;;  %v1698_v22 = vsel %vm1599_vm0, %v1540_v36, %v1542_v39  ;;  %v1699_v3 = vsel %vm1599_vm0, %v1542_v39, %v1544_v6  ;;  %v9960_v39 = vld [vmem:[#allocation58_spill] sm:$0xff] }
 0x1ad   : > { %v6057_v52 = vcombine.low %v1698_v22, %v1699_v3  ;;  %2238 = vrot.lane.b32.xlu1 %v9956_v46, %s6862_s13  ;;  %v1552_v56 = vpop.permute.xlu0 %1551  ;;  %v9961_v22 = vld [vmem:[#allocation31_spill] sm:$0xff]  ;;  %v2144_v46 = vld [vmem:[#allocation2 + $0x3a0] sm:$0x33] }
 0x1ae   : > { %2248 = vrot.lane.b32.xlu0 %v9959_v23, %s6862_s13 }
 0x1af   : > { %v2136_v63 = vsel %vm7206_vm6, %v6057_v52, %v2135_v43  ;;  %v1546_v37 = vpop.permute.xlu1 %1545 }
 0x1b0   : > { %2137 = vst [vmem:[#allocation2 + $0x388] sm:$0x33] %v2136_v63  ;;  %v1700_v30 = vsel %vm1599_vm0, %v1544_v6, %v1546_v37  ;;  %v1701_v36 = vsel %vm1599_vm0, %v1546_v37, %v1548_v20  ;;  %v9962_v37 = vld [vmem:[#allocation59_spill] sm:$0xff] }
 0x1b1   : > { %v6058_v51 = vcombine.low %v1700_v30, %v1701_v36  ;;  %2242 = vrot.lane.b32.xlu1 %v9958_v33, %s6862_s13  ;;  %v1556_v49 = vpop.permute.xlu0 %1555  ;;  %v9963_v30 = vld [vmem:[#allocation34_spill] sm:$0xff]  ;;  %v2147_v33 = vld [vmem:[#allocation2 + $0x3a8] sm:$0x33] }
 0x1b2   : > { %2252 = vrot.lane.b32.xlu0 %v9961_v22, %s6862_s13 }
 0x1b3   : > { %v2139_v2 = vsel %vm7206_vm6, %v6058_v51, %v2138_v18  ;;  %v1550_v35 = vpop.permute.xlu1 %1549 }
 0x1b4   : > { %2140 = vst [vmem:[#allocation2 + $0x390] sm:$0x33] %v2139_v2  ;;  %v1702_v62 = vsel %vm1599_vm0, %v1548_v20, %v1550_v35  ;;  %v1703_v6 = vsel %vm1599_vm0, %v1550_v35, %v1552_v56  ;;  %v9964_v35 = vld [vmem:[#allocation60_spill] sm:$0xff] }
 0x1b5   : > { %v6059_v45 = vcombine.low %v1702_v62, %v1703_v6  ;;  %2246 = vrot.lane.b32.xlu1 %v9960_v39, %s6862_s13  ;;  %v1560_v53 = vpop.permute.xlu0 %1559  ;;  %v9965_v62 = vld [vmem:[#allocation35_spill] sm:$0xff]  ;;  %v2150_v39 = vld [vmem:[#allocation2 + $0x3b0] sm:$0x33] }
 0x1b6   : > { %2256 = vrot.lane.b32.xlu0 %v9963_v30, %s6862_s13 }
 0x1b7   : > { %v2142_v43 = vsel %vm7206_vm6, %v6059_v45, %v2141_v44  ;;  %v1554_v3 = vpop.permute.xlu1 %1553 }
 0x1b8   : > { %2143 = vst [vmem:[#allocation2 + $0x398] sm:$0x33] %v2142_v43  ;;  %v1704_v52 = vsel %vm1599_vm0, %v1552_v56, %v1554_v3  ;;  %v1705_v20 = vsel %vm1599_vm0, %v1554_v3, %v1556_v49  ;;  %v9966_v3 = vld [vmem:[#allocation61_spill] sm:$0xff] }
 0x1b9   : > { %v6060_v63 = vcombine.low %v1704_v52, %v1705_v20  ;;  %2250 = vrot.lane.b32.xlu1 %v9962_v37, %s6862_s13  ;;  %v1564_v23 = vpop.permute.xlu0 %1563  ;;  %v9967_v52 = vld [vmem:[#allocation40_spill] sm:$0xff]  ;;  %v2153_v37 = vld [vmem:[#allocation2 + $0x3b8] sm:$0x33] }
 0x1ba   : > { %2260 = vrot.lane.b32.xlu0 %v9965_v62, %s6862_s13 }
 0x1bb   : > { %v2145_v18 = vsel %vm7206_vm6, %v6060_v63, %v2144_v46  ;;  %v1558_v36 = vpop.permute.xlu1 %1557 }
 0x1bc   : > { %2146 = vst [vmem:[#allocation2 + $0x3a0] sm:$0x33] %v2145_v18  ;;  %v1706_v51 = vsel %vm1599_vm0, %v1556_v49, %v1558_v36  ;;  %v1707_v56 = vsel %vm1599_vm0, %v1558_v36, %v1560_v53  ;;  %v9968_v36 = vld [vmem:[#allocation62_spill] sm:$0xff] }
 0x1bd   : > { %v6061_v2 = vcombine.low %v1706_v51, %v1707_v56  ;;  %2254 = vrot.lane.b32.xlu1 %v9964_v35, %s6862_s13  ;;  %v1568_v22 = vpop.permute.xlu0 %1567  ;;  %v9969_v51 = vld [vmem:[#allocation36_spill] sm:$0xff] }
 0x1be   : > { %2264 = vrot.lane.b32.xlu0 %v9967_v52, %s6862_s13  ;;  %v2156_v35 = vld [vmem:[#allocation2 + $0x3c0] sm:$0x33] }
 0x1bf   : > { %v2148_v44 = vsel %vm7206_vm6, %v6061_v2, %v2147_v33  ;;  %v1562_v6 = vpop.permute.xlu1 %1561 }
 0x1c0   : > { %2149 = vst [vmem:[#allocation2 + $0x3a8] sm:$0x33] %v2148_v44  ;;  %v1708_v45 = vsel %vm1599_vm0, %v1560_v53, %v1562_v6  ;;  %v1709_v49 = vsel %vm1599_vm0, %v1562_v6, %v1564_v23  ;;  %v9970_v6 = vld [vmem:[#allocation63_spill] sm:$0xff] }
 0x1c1   : > { %v6062_v43 = vcombine.low %v1708_v45, %v1709_v49  ;;  %2258 = vrot.lane.b32.xlu1 %v9966_v3, %s6862_s13  ;;  %v1572_v30 = vpop.permute.xlu0 %1571  ;;  %v9971_v45 = vld [vmem:[#allocation41_spill] sm:$0xff] }
 0x1c2   : > { %2268 = vrot.lane.b32.xlu0 %v9969_v51, %s6862_s13  ;;  %v2159_v3 = vld [vmem:[#allocation2 + $0x3c8] sm:$0x33] }
 0x1c3   : > { %v2151_v46 = vsel %vm7206_vm6, %v6062_v43, %v2150_v39  ;;  %v1566_v20 = vpop.permute.xlu1 %1565 }
 0x1c4   : > { %2152 = vst [vmem:[#allocation2 + $0x3b0] sm:$0x33] %v2151_v46  ;;  %v1710_v63 = vsel %vm1599_vm0, %v1564_v23, %v1566_v20  ;;  %v1711_v53 = vsel %vm1599_vm0, %v1566_v20, %v1568_v22  ;;  %v9972_v20 = vld [vmem:[#allocation64_spill] sm:$0xff] }
 0x1c5   : > { %v6063_v18 = vcombine.low %v1710_v63, %v1711_v53  ;;  %2262 = vrot.lane.b32.xlu1 %v9968_v36, %s6862_s13  ;;  %v1576_v62 = vpop.permute.xlu0 %1575  ;;  %v9973_v63 = vld [vmem:[#allocation37_spill] sm:$0xff]  ;;  %v2162_v36 = vld [vmem:[#allocation2 + $0x3d0] sm:$0x33] }
 0x1c6   : > { %2272 = vrot.lane.b32.xlu0 %v9971_v45, %s6862_s13 }
 0x1c7   : > { %v2154_v33 = vsel %vm7206_vm6, %v6063_v18, %v2153_v37  ;;  %v1570_v56 = vpop.permute.xlu1 %1569 }
 0x1c8   : > { %2155 = vst [vmem:[#allocation2 + $0x3b8] sm:$0x33] %v2154_v33  ;;  %v1712_v2 = vsel %vm1599_vm0, %v1568_v22, %v1570_v56  ;;  %v1713_v23 = vsel %vm1599_vm0, %v1570_v56, %v1572_v30  ;;  %v9974_v56 = vld [vmem:[#allocation65_spill] sm:$0xff] }
 0x1c9   : > { %v6064_v44 = vcombine.low %v1712_v2, %v1713_v23  ;;  %2266 = vrot.lane.b32.xlu1 %v9970_v6, %s6862_s13  ;;  %v1580_v52 = vpop.permute.xlu0 %1579  ;;  %v9975_v2 = vld [vmem:[#allocation42_spill] sm:$0xff]  ;;  %v2165_v6 = vld [vmem:[#allocation2 + $0x3d8] sm:$0x33] }
 0x1ca   : > { %2276 = vrot.lane.b32.xlu0 %v9973_v63, %s6862_s13 }
 0x1cb   : > { %v2157_v39 = vsel %vm7206_vm6, %v6064_v44, %v2156_v35  ;;  %v1574_v49 = vpop.permute.xlu1 %1573 }
 0x1cc   : > { %2158 = vst [vmem:[#allocation2 + $0x3c0] sm:$0x33] %v2157_v39  ;;  %v1714_v43 = vsel %vm1599_vm0, %v1572_v30, %v1574_v49  ;;  %v1715_v22 = vsel %vm1599_vm0, %v1574_v49, %v1576_v62  ;;  %v9976_v49 = vld [vmem:[#allocation66_spill] sm:$0xff] }
 0x1cd   : > { %v6065_v46 = vcombine.low %v1714_v43, %v1715_v22  ;;  %2270 = vrot.lane.b32.xlu1 %v9972_v20, %s6862_s13  ;;  %v1584_v51 = vpop.permute.xlu0 %1583  ;;  %v9977_v43 = vld [vmem:[#allocation38_spill] sm:$0xff]  ;;  %v2168_v20 = vld [vmem:[#allocation2 + $0x3e0] sm:$0x33] }
 0x1ce   : > { %2280 = vrot.lane.b32.xlu0 %v9975_v2, %s6862_s13 }
 0x1cf   : > { %v2160_v37 = vsel %vm7206_vm6, %v6065_v46, %v2159_v3  ;;  %v1578_v53 = vpop.permute.xlu1 %1577 }
 0x1d0   : > { %2161 = vst [vmem:[#allocation2 + $0x3c8] sm:$0x33] %v2160_v37  ;;  %v1716_v18 = vsel %vm1599_vm0, %v1576_v62, %v1578_v53  ;;  %v1717_v30 = vsel %vm1599_vm0, %v1578_v53, %v1580_v52  ;;  %v9978_v53 = vld [vmem:[#allocation67_spill] sm:$0xff] }
 0x1d1   : > { %v6066_v33 = vcombine.low %v1716_v18, %v1717_v30  ;;  %2274 = vrot.lane.b32.xlu1 %v9974_v56, %s6862_s13  ;;  %v1588_v45 = vpop.permute.xlu0 %1587  ;;  %v9979_v18 = vld [vmem:[#allocation46_spill] sm:$0xff]  ;;  %v2171_v56 = vld [vmem:[#allocation2 + $0x3e8] sm:$0x33] }
 0x1d2   : > { %2284 = vrot.lane.b32.xlu0 %v9977_v43, %s6862_s13 }
 0x1d3   : > { %v2163_v35 = vsel %vm7206_vm6, %v6066_v33, %v2162_v36  ;;  %v1582_v23 = vpop.permute.xlu1 %1581 }
 0x1d4   : > { %2164 = vst [vmem:[#allocation2 + $0x3d0] sm:$0x33] %v2163_v35  ;;  %v1718_v44 = vsel %vm1599_vm0, %v1580_v52, %v1582_v23  ;;  %v1719_v62 = vsel %vm1599_vm0, %v1582_v23, %v1584_v51  ;;  %v9980_v23 = vld [vmem:[#allocation68_spill] sm:$0xff] }
 0x1d5   : > { %v6067_v39 = vcombine.low %v1718_v44, %v1719_v62  ;;  %2278 = vrot.lane.b32.xlu1 %v9976_v49, %s6862_s13  ;;  %v1592_v63 = vpop.permute.xlu0 %1591  ;;  %v9981_v44 = vld [vmem:[#allocation44_spill] sm:$0xff]  ;;  %v2174_v49 = vld [vmem:[#allocation2 + $0x3f0] sm:$0x33] }
 0x1d6   : > { %2288 = vrot.lane.b32.xlu0 %v9979_v18, %s6862_s13 }
 0x1d7   : > { %v2166_v3 = vsel %vm7206_vm6, %v6067_v39, %v2165_v6  ;;  %v1586_v22 = vpop.permute.xlu1 %1585 }
 0x1d8   : > { %2167 = vst [vmem:[#allocation2 + $0x3d8] sm:$0x33] %v2166_v3  ;;  %v1720_v46 = vsel %vm1599_vm0, %v1584_v51, %v1586_v22  ;;  %v1721_v52 = vsel %vm1599_vm0, %v1586_v22, %v1588_v45  ;;  %v9982_v22 = vld [vmem:[#allocation69_spill] sm:$0xff] }
 0x1d9   : > { %v6068_v37 = vcombine.low %v1720_v46, %v1721_v52  ;;  %2282 = vrot.lane.b32.xlu1 %v9978_v53, %s6862_s13  ;;  %v1596_v2 = vpop.permute.xlu0 %1595  ;;  %v9983_v46 = vld [vmem:[#allocation47_spill] sm:$0xff]  ;;  %v9984_v53 = vld [vmem:[#allocation70_spill] sm:$0xff] }
 0x1da   : > { %2292 = vrot.lane.b32.xlu0 %v9981_v44, %s6862_s13 }
 0x1db   : > { %v2169_v36 = vsel %vm7206_vm6, %v6068_v37, %v2168_v20  ;;  %v1590_v30 = vpop.permute.xlu1 %1589  ;;  %v2177_v37 = vld [vmem:[#allocation2 + $0x3f8] sm:$0x33] }
 0x1dc   : > { %2170 = vst [vmem:[#allocation2 + $0x3e0] sm:$0x33] %v2169_v36  ;;  %v1722_v33 = vsel %vm1599_vm0, %v1588_v45, %v1590_v30  ;;  %v1723_v51 = vsel %vm1599_vm0, %v1590_v30, %v1592_v63 }
 0x1dd   : > { %v6069_v35 = vcombine.low %v1722_v33, %v1723_v51  ;;  %2286 = vrot.lane.b32.xlu1 %v9980_v23, %s6862_s13  ;;  %v8534_v43 = vpop.permute.xlu0 %2180  ;;  %v9985_v33 = vld [vmem:[#allocation71_spill] sm:$0xff]  ;;  %v2825_v23 = vld [vmem:[#allocation2 + $0x400] sm:$0x33] }
 0x1de   : > { %2296 = vrot.lane.b32.xlu0 %v9983_v46, %s6862_s13  ;;  %v2828_v46 = vld [vmem:[#allocation2 + $0x408] sm:$0x33] }
 0x1df   : > { %v2172_v6 = vsel %vm7206_vm6, %v6069_v35, %v2171_v56  ;;  %v1594_v62 = vpop.permute.xlu1 %1593  ;;  %v9986_v56 = vld [vmem:[#allocation45_spill] sm:$0xff] }
 0x1e0   : > { %2173 = vst [vmem:[#allocation2 + $0x3e8] sm:$0x33] %v2172_v6  ;;  %v1724_v39 = vsel %vm1599_vm0, %v1592_v63, %v1594_v62  ;;  %v1725_v45 = vsel %vm1599_vm0, %v1594_v62, %v1596_v2 }
 0x1e1   : > { %v6070_v3 = vcombine.low %v1724_v39, %v1725_v45  ;;  %2290 = vrot.lane.b32.xlu1 %v9982_v22, %s6862_s13  ;;  %v2185_v36 = vpop.permute.xlu0 %2184  ;;  %v9987_v39 = vld [vmem:[#allocation72_spill] sm:$0xff] }
 0x1e2   : > { %2300 = vrot.lane.b32.xlu0 %v9986_v56, %s6862_s13 }
 0x1e3   : > { %v2175_v20 = vsel %vm7206_vm6, %v6070_v3, %v2174_v49  ;;  %v1598_v52 = vpop.permute.xlu1 %1597  ;;  %v9988_v49 = vld [vmem:[#allocation48_spill] sm:$0xff] }
 0x1e4   : > { %2176 = vst [vmem:[#allocation2 + $0x3f0] sm:$0x33] %v2175_v20  ;;  %v1726_v63 = vsel %vm1599_vm0, %v1596_v2, %v1598_v52  ;;  %v1730_v18 = vsel %vm1599_vm0, %v1598_v52, %v9984_v53 }
 0x1e5   : > { %v6071_v30 = vcombine.low %v1726_v63, %v1730_v18  ;;  %2294 = vrot.lane.b32.xlu1 %v9985_v33, %s6862_s13  ;;  %v2189_v6 = vpop.permute.xlu0 %2188  ;;  %v9989_v63 = vld [vmem:[#allocation73_spill] sm:$0xff]  ;;  %v2831_v33 = vld [vmem:[#allocation2 + $0x410] sm:$0x33] }
 0x1e6   : > { %2304 = vrot.lane.b32.xlu0 %v9988_v49, %s6862_s13  ;;  %v2837_v49 = vld [vmem:[#allocation2 + $0x420] sm:$0x33] }
 0x1e7   : > { %v2178_v51 = vsel %vm7206_vm6, %v6071_v30, %v2177_v37  ;;  %v2183_v35 = vpop.permute.xlu1 %2182 }
 0x1e8   : > { %2179 = vst [vmem:[#allocation2 + $0x3f8] sm:$0x33] %v2178_v51  ;;  %v2437_v2 = vsel %vm2436_vm5, %v8534_v43, %v2183_v35  ;;  %v2438_v44 = vsel %vm2436_vm5, %v2183_v35, %v2185_v36 }
 0x1e9   : > { %v6072_v62 = vcombine.low %v2437_v2, %v2438_v44  ;;  %2298 = vrot.lane.b32.xlu1 %v9987_v39, %s6862_s13  ;;  %v2193_v52 = vpop.permute.xlu0 %2192 }
 0x1ea   : > { %2308 = vrot.lane.b32.xlu0 %v7495_v61, %s6862_s13 }
 0x1eb   : > { %v2826_v45 = vsel %vm7206_vm6, %v6072_v62, %v2825_v23  ;;  %v2187_v3 = vpop.permute.xlu1 %2186  ;;  %v2834_v23 = vld [vmem:[#allocation2 + $0x418] sm:$0x33] }
 0x1ec   : > { %2827 = vst [vmem:[#allocation2 + $0x400] sm:$0x33] %v2826_v45  ;;  %v2439_v22 = vsel %vm2436_vm5, %v2185_v36, %v2187_v3  ;;  %v2440_v20 = vsel %vm2436_vm5, %v2187_v3, %v2189_v6 }
 0x1ed   : > { %v6073_v37 = vcombine.low %v2439_v22, %v2440_v20  ;;  %2302 = vrot.lane.b32.xlu1 %v9989_v63, %s6862_s13  ;;  %v2197_v56 = vpop.permute.xlu0 %2196  ;;  %v2840_v20 = vld [vmem:[#allocation2 + $0x428] sm:$0x33] }
 0x1ee   : > { %2312 = vrot.lane.b32.xlu0 %v7524_v16, %s6862_s13 }
 0x1ef   : > { %v2829_v53 = vsel %vm7206_vm6, %v6073_v37, %v2828_v46  ;;  %v2191_v18 = vpop.permute.xlu1 %2190 }
 0x1f0   : > { %2830 = vst [vmem:[#allocation2 + $0x408] sm:$0x33] %v2829_v53  ;;  %v2441_v30 = vsel %vm2436_vm5, %v2189_v6, %v2191_v18  ;;  %v2442_v36 = vsel %vm2436_vm5, %v2191_v18, %v2193_v52  ;;  %v2843_v18 = vld [vmem:[#allocation2 + $0x430] sm:$0x33] }
 0x1f1   : > { %v6074_v51 = vcombine.low %v2441_v30, %v2442_v36  ;;  %2306 = vrot.lane.b32.xlu1 %v7909_v60, %s6862_s13  ;;  %v2201_v6 = vpop.permute.xlu0 %2200 }
 0x1f2   : > { %2316 = vrot.lane.b32.xlu0 %v7527_v54, %s6862_s13 }
 0x1f3   : > { %v2832_v61 = vsel %vm7206_vm6, %v6074_v51, %v2831_v33  ;;  %v2195_v35 = vpop.permute.xlu1 %2194  ;;  %v2846_v51 = vld [vmem:[#allocation2 + $0x438] sm:$0x33] }
 0x1f4   : > { %2833 = vst [vmem:[#allocation2 + $0x410] sm:$0x33] %v2832_v61  ;;  %v2443_v2 = vsel %vm2436_vm5, %v2193_v52, %v2195_v35  ;;  %v2444_v44 = vsel %vm2436_vm5, %v2195_v35, %v2197_v56 }
 0x1f5   : > { %v6075_v62 = vcombine.low %v2443_v2, %v2444_v44  ;;  %2310 = vrot.lane.b32.xlu1 %v7927_v27, %s6862_s13  ;;  %v2205_v3 = vpop.permute.xlu0 %2204  ;;  %v2849_v44 = vld [vmem:[#allocation2 + $0x440] sm:$0x33] }
 0x1f6   : > { %2320 = vrot.lane.b32.xlu0 %v7549_v7, %s6862_s13 }
 0x1f7   : > { %v2835_v16 = vsel %vm7206_vm6, %v6075_v62, %v2834_v23  ;;  %v2199_v60 = vpop.permute.xlu1 %2198 }
 0x1f8   : > { %2836 = vst [vmem:[#allocation2 + $0x418] sm:$0x33] %v2835_v16  ;;  %v2445_v39 = vsel %vm2436_vm5, %v2197_v56, %v2199_v60  ;;  %v2446_v45 = vsel %vm2436_vm5, %v2199_v60, %v2201_v6  ;;  %v9990_v60 = vld [vmem:[#allocation74_spill] sm:$0xff] }
 0x1f9   : > { %v6076_v22 = vcombine.low %v2445_v39, %v2446_v45  ;;  %2314 = vrot.lane.b32.xlu1 %v7942_v34, %s6862_s13  ;;  %v2209_v37 = vpop.permute.xlu0 %2208 }
 0x1fa   : > { %2324 = vrot.lane.b32.xlu0 %v7530_v14, %s6862_s13 }
 0x1fb   : > { %v2838_v54 = vsel %vm7206_vm6, %v6076_v22, %v2837_v49  ;;  %v2203_v27 = vpop.permute.xlu1 %2202  ;;  %v2852_v49 = vld [vmem:[#allocation2 + $0x448] sm:$0x33] }
 0x1fc   : > { %2839 = vst [vmem:[#allocation2 + $0x420] sm:$0x33] %v2838_v54  ;;  %v2447_v46 = vsel %vm2436_vm5, %v2201_v6, %v2203_v27  ;;  %v2448_v52 = vsel %vm2436_vm5, %v2203_v27, %v2205_v3  ;;  %v9991_v54 = vld [vmem:[#allocation75_spill] sm:$0xff] }
 0x1fd   : > { %v6077_v63 = vcombine.low %v2447_v46, %v2448_v52  ;;  %2318 = vrot.lane.b32.xlu1 %v7954_v12, %s6862_s13  ;;  %v2213_v33 = vpop.permute.xlu0 %2212 }
 0x1fe   : > { %2328 = vrot.lane.b32.xlu0 %v7555_v29, %s6862_s13 }
 0x1ff   : > { %v2841_v7 = vsel %vm7206_vm6, %v6077_v63, %v2840_v20  ;;  %v2207_v34 = vpop.permute.xlu1 %2206  ;;  %v2855_v20 = vld [vmem:[#allocation2 + $0x450] sm:$0x33] }
 0x200   : > { %2842 = vst [vmem:[#allocation2 + $0x428] sm:$0x33] %v2841_v7  ;;  %v2449_v53 = vsel %vm2436_vm5, %v2205_v3, %v2207_v34  ;;  %v2450_v30 = vsel %vm2436_vm5, %v2207_v34, %v2209_v37  ;;  %v9992_v7 = vld [vmem:[#allocation76_spill] sm:$0xff] }
 0x201   : > { %v6078_v36 = vcombine.low %v2449_v53, %v2450_v30  ;;  %2322 = vrot.lane.b32.xlu1 %v7966_v4, %s6862_s13  ;;  %v2217_v35 = vpop.permute.xlu0 %2216 }
 0x202   : > { %2332 = vrot.lane.b32.xlu0 %v7539_v9, %s6862_s13 }
 0x203   : > { %v2844_v14 = vsel %vm7206_vm6, %v6078_v36, %v2843_v18  ;;  %v2211_v12 = vpop.permute.xlu1 %2210  ;;  %v2858_v18 = vld [vmem:[#allocation2 + $0x458] sm:$0x33] }
 0x204   : > { %2845 = vst [vmem:[#allocation2 + $0x430] sm:$0x33] %v2844_v14  ;;  %v2451_v56 = vsel %vm2436_vm5, %v2209_v37, %v2211_v12  ;;  %v2452_v61 = vsel %vm2436_vm5, %v2211_v12, %v2213_v33  ;;  %v9993_v14 = vld [vmem:[#allocation77_spill] sm:$0xff] }
 0x205   : > { %v6079_v2 = vcombine.low %v2451_v56, %v2452_v61  ;;  %2326 = vrot.lane.b32.xlu1 %v7978_v17, %s6862_s13  ;;  %v2221_v62 = vpop.permute.xlu0 %2220 }
 0x206   : > { %2336 = vrot.lane.b32.xlu0 %v7572_v21, %s6862_s13 }
 0x207   : > { %v2847_v29 = vsel %vm7206_vm6, %v6079_v2, %v2846_v51  ;;  %v2215_v4 = vpop.permute.xlu1 %2214  ;;  %v2861_v51 = vld [vmem:[#allocation2 + $0x460] sm:$0x33] }
 0x208   : > { %2848 = vst [vmem:[#allocation2 + $0x438] sm:$0x33] %v2847_v29  ;;  %v2453_v23 = vsel %vm2436_vm5, %v2213_v33, %v2215_v4  ;;  %v2454_v6 = vsel %vm2436_vm5, %v2215_v4, %v2217_v35  ;;  %v9994_v29 = vld [vmem:[#allocation78_spill] sm:$0xff] }
 0x209   : > { %v6080_v16 = vcombine.low %v2453_v23, %v2454_v6  ;;  %2330 = vrot.lane.b32.xlu1 %v9990_v60, %s6862_s13  ;;  %v2225_v3 = vpop.permute.xlu0 %2224  ;;  %v9995_v60 = vld [vmem:[#allocation79_spill] sm:$0xff] }
 0x20a   : > { %2340 = vrot.lane.b32.xlu0 %v7569_v19, %s6862_s13 }
 0x20b   : > { %v2850_v9 = vsel %vm7206_vm6, %v6080_v16, %v2849_v44  ;;  %v2219_v17 = vpop.permute.xlu1 %2218  ;;  %v2864_v44 = vld [vmem:[#allocation2 + $0x468] sm:$0x33] }
 0x20c   : > { %2851 = vst [vmem:[#allocation2 + $0x440] sm:$0x33] %v2850_v9  ;;  %v2455_v39 = vsel %vm2436_vm5, %v2217_v35, %v2219_v17  ;;  %v2456_v45 = vsel %vm2436_vm5, %v2219_v17, %v2221_v62 }
 0x20d   : > { %v6081_v22 = vcombine.low %v2455_v39, %v2456_v45  ;;  %2334 = vrot.lane.b32.xlu1 %v9991_v54, %s6862_s13  ;;  %v2229_v37 = vpop.permute.xlu0 %2228  ;;  %v2867_v39 = vld [vmem:[#allocation2 + $0x470] sm:$0x33] }
 0x20e   : > { %2344 = vrot.lane.b32.xlu0 %v7589_v58, %s6862_s13 }
 0x20f   : > { %v2853_v21 = vsel %vm7206_vm6, %v6081_v22, %v2852_v49  ;;  %v2223_v27 = vpop.permute.xlu1 %2222  ;;  %v9996_v22 = vld [vmem:[#allocation80_spill] sm:$0xff] }
 0x210   : > { %2854 = vst [vmem:[#allocation2 + $0x448] sm:$0x33] %v2853_v21  ;;  %v2457_v46 = vsel %vm2436_vm5, %v2221_v62, %v2223_v27  ;;  %v2458_v52 = vsel %vm2436_vm5, %v2223_v27, %v2225_v3  ;;  %v2870_v27 = vld [vmem:[#allocation2 + $0x478] sm:$0x33] }
 0x211   : > { %v6082_v63 = vcombine.low %v2457_v46, %v2458_v52  ;;  %2338 = vrot.lane.b32.xlu1 %v9992_v7, %s6862_s13  ;;  %v2233_v33 = vpop.permute.xlu0 %2232 }
 0x212   : > { %2348 = vrot.lane.b32.xlu0 %v7604_v11, %s6862_s13 }
 0x213   : > { %v2856_v19 = vsel %vm7206_vm6, %v6082_v63, %v2855_v20  ;;  %v2227_v34 = vpop.permute.xlu1 %2226 }
 0x214   : > { %2857 = vst [vmem:[#allocation2 + $0x450] sm:$0x33] %v2856_v19  ;;  %v2459_v53 = vsel %vm2436_vm5, %v2225_v3, %v2227_v34  ;;  %v2460_v30 = vsel %vm2436_vm5, %v2227_v34, %v2229_v37  ;;  %v2873_v19 = vld [vmem:[#allocation2 + $0x480] sm:$0x33] }
 0x215   : > { %v6083_v36 = vcombine.low %v2459_v53, %v2460_v30  ;;  %2342 = vrot.lane.b32.xlu1 %v9993_v14, %s6862_s13  ;;  %v2237_v35 = vpop.permute.xlu0 %2236  ;;  %v9998_v30 = vld [vmem:[#allocation82_spill] sm:$0xff]  ;;  %v2876_v14 = vld [vmem:[#allocation2 + $0x488] sm:$0x33] }
 0x216   : > { %2352 = vrot.lane.b32.xlu0 %v7618_v41, %s6862_s13 }
 0x217   : > { %v2859_v58 = vsel %vm7206_vm6, %v6083_v36, %v2858_v18  ;;  %v2231_v12 = vpop.permute.xlu1 %2230 }
 0x218   : > { %2860 = vst [vmem:[#allocation2 + $0x458] sm:$0x33] %v2859_v58  ;;  %v2461_v56 = vsel %vm2436_vm5, %v2229_v37, %v2231_v12  ;;  %v2462_v61 = vsel %vm2436_vm5, %v2231_v12, %v2233_v33  ;;  %v9997_v37 = vld [vmem:[#allocation81_spill] sm:$0xff] }
 0x219   : > { %v6084_v2 = vcombine.low %v2461_v56, %v2462_v61  ;;  %2346 = vrot.lane.b32.xlu1 %v9994_v29, %s6862_s13  ;;  %v2241_v62 = vpop.permute.xlu0 %2240 }
 0x21a   : > { %2356 = vrot.lane.b32.xlu0 %v7633_v25, %s6862_s13 }
 0x21b   : > { %v2862_v11 = vsel %vm7206_vm6, %v6084_v2, %v2861_v51  ;;  %v2235_v4 = vpop.permute.xlu1 %2234  ;;  %v9999_v51 = vld [vmem:[#allocation83_spill] sm:$0xff]  ;;  %v2879_v2 = vld [vmem:[#allocation2 + $0x490] sm:$0x33] }
 0x21c   : > { %2863 = vst [vmem:[#allocation2 + $0x460] sm:$0x33] %v2862_v11  ;;  %v2463_v23 = vsel %vm2436_vm5, %v2233_v33, %v2235_v4  ;;  %v2464_v6 = vsel %vm2436_vm5, %v2235_v4, %v2237_v35 }
 0x21d   : > { %v6085_v16 = vcombine.low %v2463_v23, %v2464_v6  ;;  %2350 = vrot.lane.b32.xlu1 %v9995_v60, %s6862_s13  ;;  %v2245_v45 = vpop.permute.xlu0 %2244  ;;  %v10000_v23 = vld [vmem:[#allocation84_spill] sm:$0xff] }
 0x21e   : > { %2360 = vrot.lane.b32.xlu0 %v7647_v8, %s6862_s13 }
 0x21f   : > { %v2865_v41 = vsel %vm7206_vm6, %v6085_v16, %v2864_v44  ;;  %v2239_v9 = vpop.permute.xlu1 %2238 }
 0x220   : > { %2866 = vst [vmem:[#allocation2 + $0x468] sm:$0x33] %v2865_v41  ;;  %v2465_v17 = vsel %vm2436_vm5, %v2237_v35, %v2239_v9  ;;  %v2466_v49 = vsel %vm2436_vm5, %v2239_v9, %v2241_v62  ;;  %v10001_v9 = vld [vmem:[#allocation85_spill] sm:$0xff] }
 0x221   : > { %v6086_v3 = vcombine.low %v2465_v17, %v2466_v49  ;;  %2354 = vrot.lane.b32.xlu1 %v9996_v22, %s6862_s13  ;;  %v2249_v20 = vpop.permute.xlu0 %2248  ;;  %v2885_v49 = vld [vmem:[#allocation2 + $0x4a0] sm:$0x33] }
 0x222   : > { %2364 = vrot.lane.b32.xlu0 %v7662_v10, %s6862_s13 }
 0x223   : > { %v2868_v25 = vsel %vm7206_vm6, %v6086_v3, %v2867_v39  ;;  %v2243_v54 = vpop.permute.xlu1 %2242 }
 0x224   : > { %2869 = vst [vmem:[#allocation2 + $0x470] sm:$0x33] %v2868_v25  ;;  %v2467_v21 = vsel %vm2436_vm5, %v2241_v62, %v2243_v54  ;;  %v2468_v46 = vsel %vm2436_vm5, %v2243_v54, %v2245_v45  ;;  %v2882_v62 = vld [vmem:[#allocation2 + $0x498] sm:$0x33]  ;;  %v10002_v25 = vld [vmem:[#allocation86_spill] sm:$0xff] }
 0x225   : > { %v6087_v52 = vcombine.low %v2467_v21, %v2468_v46  ;;  %2358 = vrot.lane.b32.xlu1 %v9997_v37, %s6862_s13  ;;  %v2253_v53 = vpop.permute.xlu0 %2252  ;;  %v10003_v37 = vld [vmem:[#allocation87_spill] sm:$0xff] }
 0x226   : > { %2368 = vrot.lane.b32.xlu0 %v7676_v24, %s6862_s13 }
 0x227   : > { %v2871_v8 = vsel %vm7206_vm6, %v6087_v52, %v2870_v27  ;;  %v2247_v63 = vpop.permute.xlu1 %2246  ;;  %v2888_v27 = vld [vmem:[#allocation2 + $0x4a8] sm:$0x33] }
 0x228   : > { %2872 = vst [vmem:[#allocation2 + $0x478] sm:$0x33] %v2871_v8  ;;  %v2469_v7 = vsel %vm2436_vm5, %v2245_v45, %v2247_v63  ;;  %v2470_v34 = vsel %vm2436_vm5, %v2247_v63, %v2249_v20 }
 0x229   : > { %v6088_v18 = vcombine.low %v2469_v7, %v2470_v34  ;;  %2362 = vrot.lane.b32.xlu1 %v9998_v30, %s6862_s13  ;;  %v2257_v12 = vpop.permute.xlu0 %2256  ;;  %v2891_v7 = vld [vmem:[#allocation2 + $0x4b0] sm:$0x33] }
 0x22a   : > { %2372 = vrot.lane.b32.xlu0 %v7691_v15, %s6862_s13 }
 0x22b   : > { %v2874_v10 = vsel %vm7206_vm6, %v6088_v18, %v2873_v19  ;;  %v2251_v33 = vpop.permute.xlu1 %2250  ;;  %v10004_v18 = vld [vmem:[#allocation88_spill] sm:$0xff] }
 0x22c   : > { %2875 = vst [vmem:[#allocation2 + $0x480] sm:$0x33] %v2874_v10  ;;  %v2471_v36 = vsel %vm2436_vm5, %v2249_v20, %v2251_v33  ;;  %v2472_v58 = vsel %vm2436_vm5, %v2251_v33, %v2253_v53  ;;  %v2894_v33 = vld [vmem:[#allocation2 + $0x4b8] sm:$0x33] }
 0x22d   : > { %v6089_v56 = vcombine.low %v2471_v36, %v2472_v58  ;;  %2366 = vrot.lane.b32.xlu1 %v9999_v51, %s6862_s13  ;;  %v2261_v11 = vpop.permute.xlu0 %2260 }
 0x22e   : > { %2376 = vrot.lane.b32.xlu0 %v7705_v59, %s6862_s13 }
 0x22f   : > { %v2877_v24 = vsel %vm7206_vm6, %v6089_v56, %v2876_v14  ;;  %v2255_v61 = vpop.permute.xlu1 %2254 }
 0x230   : > { %2878 = vst [vmem:[#allocation2 + $0x488] sm:$0x33] %v2877_v24  ;;  %v2473_v35 = vsel %vm2436_vm5, %v2253_v53, %v2255_v61  ;;  %v2474_v29 = vsel %vm2436_vm5, %v2255_v61, %v2257_v12  ;;  %v2897_v24 = vld [vmem:[#allocation2 + $0x4c0] sm:$0x33] }
 0x231   : > { %v6090_v4 = vcombine.low %v2473_v35, %v2474_v29  ;;  %2370 = vrot.lane.b32.xlu1 %v10000_v23, %s6862_s13  ;;  %v2265_v60 = vpop.permute.xlu0 %2264  ;;  %v10006_v29 = vld [vmem:[#allocation90_spill] sm:$0xff]  ;;  %v2900_v23 = vld [vmem:[#allocation2 + $0x4c8] sm:$0x33] }
 0x232   : > { %2380 = vrot.lane.b32.xlu0 %v7720_v31, %s6862_s13 }
 0x233   : > { %v2880_v15 = vsel %vm7206_vm6, %v6090_v4, %v2879_v2  ;;  %v2259_v44 = vpop.permute.xlu1 %2258 }
 0x234   : > { %2881 = vst [vmem:[#allocation2 + $0x490] sm:$0x33] %v2880_v15  ;;  %v2475_v6 = vsel %vm2436_vm5, %v2257_v12, %v2259_v44  ;;  %v2476_v16 = vsel %vm2436_vm5, %v2259_v44, %v2261_v11  ;;  %v10005_v12 = vld [vmem:[#allocation89_spill] sm:$0xff] }
 0x235   : > { %v6091_v41 = vcombine.low %v2475_v6, %v2476_v16  ;;  %2374 = vrot.lane.b32.xlu1 %v10001_v9, %s6862_s13  ;;  %v2269_v3 = vpop.permute.xlu0 %2268 }
 0x236   : > { %2384 = vrot.lane.b32.xlu0 %v7734_v5, %s6862_s13 }
 0x237   : > { %v2883_v59 = vsel %vm7206_vm6, %v6091_v41, %v2882_v62  ;;  %v2263_v17 = vpop.permute.xlu1 %2262  ;;  %v10007_v62 = vld [vmem:[#allocation91_spill] sm:$0xff]  ;;  %v2903_v41 = vld [vmem:[#allocation2 + $0x4d0] sm:$0x33] }
 0x238   : > { %2884 = vst [vmem:[#allocation2 + $0x498] sm:$0x33] %v2883_v59  ;;  %v2477_v39 = vsel %vm2436_vm5, %v2261_v11, %v2263_v17  ;;  %v2478_v45 = vsel %vm2436_vm5, %v2263_v17, %v2265_v60 }
 0x239   : > { %v6092_v22 = vcombine.low %v2477_v39, %v2478_v45  ;;  %2378 = vrot.lane.b32.xlu1 %v10002_v25, %s6862_s13  ;;  %v2273_v20 = vpop.permute.xlu0 %2272  ;;  %v10008_v39 = vld [vmem:[#allocation92_spill] sm:$0xff] }
 0x23a   : > { %2388 = vrot.lane.b32.xlu0 %v7749_v32, %s6862_s13 }
 0x23b   : > { %v2886_v31 = vsel %vm7206_vm6, %v6092_v22, %v2885_v49  ;;  %v2267_v54 = vpop.permute.xlu1 %2266 }
 0x23c   : > { %2887 = vst [vmem:[#allocation2 + $0x4a0] sm:$0x33] %v2886_v31  ;;  %v2479_v21 = vsel %vm2436_vm5, %v2265_v60, %v2267_v54  ;;  %v2480_v46 = vsel %vm2436_vm5, %v2267_v54, %v2269_v3  ;;  %v10009_v54 = vld [vmem:[#allocation93_spill] sm:$0xff] }
 0x23d   : > { %v6093_v52 = vcombine.low %v2479_v21, %v2480_v46  ;;  %2382 = vrot.lane.b32.xlu1 %v10003_v37, %s6862_s13  ;;  %v2277_v34 = vpop.permute.xlu0 %2276  ;;  %v2909_v46 = vld [vmem:[#allocation2 + $0x4e0] sm:$0x33] }
 0x23e   : > { %2392 = vrot.lane.b32.xlu0 %v7763_v13, %s6862_s13 }
 0x23f   : > { %v2889_v5 = vsel %vm7206_vm6, %v6093_v52, %v2888_v27  ;;  %v2271_v8 = vpop.permute.xlu1 %2270 }
 0x240   : > { %2890 = vst [vmem:[#allocation2 + $0x4a8] sm:$0x33] %v2889_v5  ;;  %v2481_v63 = vsel %vm2436_vm5, %v2269_v3, %v2271_v8  ;;  %v2482_v19 = vsel %vm2436_vm5, %v2271_v8, %v2273_v20  ;;  %v2906_v3 = vld [vmem:[#allocation2 + $0x4d8] sm:$0x33]  ;;  %v10010_v5 = vld [vmem:[#allocation94_spill] sm:$0xff] }
 0x241   : > { %v6094_v53 = vcombine.low %v2481_v63, %v2482_v19  ;;  %2386 = vrot.lane.b32.xlu1 %v10004_v18, %s6862_s13  ;;  %v2281_v14 = vpop.permute.xlu0 %2280  ;;  %v10011_v18 = vld [vmem:[#allocation95_spill] sm:$0xff] }
 0x242   : > { %2396 = vrot.lane.b32.xlu0 %v7778_v48, %s6862_s13 }
 0x243   : > { %v2892_v32 = vsel %vm7206_vm6, %v6094_v53, %v2891_v7  ;;  %v2275_v30 = vpop.permute.xlu1 %2274  ;;  %v2912_v7 = vld [vmem:[#allocation2 + $0x4e8] sm:$0x33] }
 0x244   : > { %2893 = vst [vmem:[#allocation2 + $0x4b0] sm:$0x33] %v2892_v32  ;;  %v2483_v10 = vsel %vm2436_vm5, %v2273_v20, %v2275_v30  ;;  %v2484_v36 = vsel %vm2436_vm5, %v2275_v30, %v2277_v34 }
 0x245   : > { %v6095_v58 = vcombine.low %v2483_v10, %v2484_v36  ;;  %2390 = vrot.lane.b32.xlu1 %v10005_v12, %s6862_s13  ;;  %v2285_v35 = vpop.permute.xlu0 %2284  ;;  %v2915_v10 = vld [vmem:[#allocation2 + $0x4f0] sm:$0x33] }
 0x246   : > { %2400 = vrot.lane.b32.xlu0 %v7792_v47, %s6862_s13 }
 0x247   : > { %v2895_v13 = vsel %vm7206_vm6, %v6095_v58, %v2894_v33  ;;  %v2279_v56 = vpop.permute.xlu1 %2278  ;;  %v10012_v58 = vld [vmem:[#allocation96_spill] sm:$0xff] }
 0x248   : > { %2896 = vst [vmem:[#allocation2 + $0x4b8] sm:$0x33] %v2895_v13  ;;  %v2485_v51 = vsel %vm2436_vm5, %v2277_v34, %v2279_v56  ;;  %v2486_v61 = vsel %vm2436_vm5, %v2279_v56, %v2281_v14  ;;  %v2918_v56 = vld [vmem:[#allocation2 + $0x4f8] sm:$0x33] }
 0x249   : > { %v6096_v2 = vcombine.low %v2485_v51, %v2486_v61  ;;  %2394 = vrot.lane.b32.xlu1 %v10006_v29, %s6862_s13  ;;  %v2289_v44 = vpop.permute.xlu0 %2288 }
 0x24a   : > { %2404 = vrot.lane.b32.xlu0 %v7807_v55, %s6862_s13 }
 0x24b   : > { %v2898_v48 = vsel %vm7206_vm6, %v6096_v2, %v2897_v24  ;;  %v2283_v11 = vpop.permute.xlu1 %2282 }
 0x24c   : > { %2899 = vst [vmem:[#allocation2 + $0x4c0] sm:$0x33] %v2898_v48  ;;  %v2487_v4 = vsel %vm2436_vm5, %v2281_v14, %v2283_v11  ;;  %v2488_v15 = vsel %vm2436_vm5, %v2283_v11, %v2285_v35  ;;  %v2921_v48 = vld [vmem:[#allocation2 + $0x500] sm:$0x33] }
 0x24d   : > { %v6097_v6 = vcombine.low %v2487_v4, %v2488_v15  ;;  %2398 = vrot.lane.b32.xlu1 %v10007_v62, %s6862_s13  ;;  %v2293_v59 = vpop.permute.xlu0 %2292 }
 0x24e   : > { %2408 = vrot.lane.b32.xlu0 %v7821_v40, %s6862_s13 }
 0x24f   : > { %v2901_v47 = vsel %vm7206_vm6, %v6097_v6, %v2900_v23  ;;  %v2287_v16 = vpop.permute.xlu1 %2286  ;;  %v8813_v23 = vld [vmem:[%s9734_s2] sm:$0xff] }
 0x250   : > { %2902 = vst [vmem:[#allocation2 + $0x4c8] sm:$0x33] %v2901_v47  ;;  %v2489_v60 = vsel %vm2436_vm5, %v2285_v35, %v2287_v16  ;;  %v2490_v9 = vsel %vm2436_vm5, %v2287_v16, %v2289_v44  ;;  %v10013_v35 = vld [vmem:[#allocation97_spill] sm:$0xff] }
 0x251   : > { %v6098_v17 = vcombine.low %v2489_v60, %v2490_v9  ;;  %2402 = vrot.lane.b32.xlu1 %v10008_v39, %s6862_s13  ;;  %v2297_v25 = vpop.permute.xlu0 %2296  ;;  %v2924_v16 = vld [vmem:[#allocation2 + $0x508] sm:$0x33] }
 0x252   : > { %2412 = vrot.lane.b32.xlu0 %v7836_v0, %s6862_s13 }
 0x253   : > { %v2904_v55 = vsel %vm7206_vm6, %v6098_v17, %v2903_v41  ;;  %v2291_v49 = vpop.permute.xlu1 %2290 }
 0x254   : > { %2905 = vst [vmem:[#allocation2 + $0x4d0] sm:$0x33] %v2904_v55  ;;  %v2491_v45 = vsel %vm2436_vm5, %v2289_v44, %v2291_v49  ;;  %v2492_v22 = vsel %vm2436_vm5, %v2291_v49, %v2293_v59  ;;  %v10014_v44 = vld [vmem:[#allocation98_spill] sm:$0xff] }
 0x255   : > { %v6099_v31 = vcombine.low %v2491_v45, %v2492_v22  ;;  %2406 = vrot.lane.b32.xlu1 %v10009_v54, %s6862_s13  ;;  %v2301_v52 = vpop.permute.xlu0 %2300  ;;  %v2927_v55 = vld [vmem:[#allocation2 + $0x510] sm:$0x33]  ;;  %v2930_v54 = vld [vmem:[#allocation2 + $0x518] sm:$0x33] }
 0x256   : > { %2416 = vrot.lane.b32.xlu0 %v7850_v42, %s6862_s13 }
 0x257   : > { %v2907_v40 = vsel %vm7206_vm6, %v6099_v31, %v2906_v3  ;;  %v2295_v21 = vpop.permute.xlu1 %2294 }
 0x258   : > { %2908 = vst [vmem:[#allocation2 + $0x4d8] sm:$0x33] %v2907_v40  ;;  %v2493_v27 = vsel %vm2436_vm5, %v2293_v59, %v2295_v21  ;;  %v2494_v20 = vsel %vm2436_vm5, %v2295_v21, %v2297_v25  ;;  %v10015_v59 = vld [vmem:[#allocation99_spill] sm:$0xff] }
 0x259   : > { %v6100_v37 = vcombine.low %v2493_v27, %v2494_v20  ;;  %2410 = vrot.lane.b32.xlu1 %v10010_v5, %s6862_s13  ;;  %v2305_v34 = vpop.permute.xlu0 %2304 }
 0x25a   : > { %2420 = vrot.lane.b32.xlu0 %v7867_v50, %s6862_s13 }
 0x25b   : > { %v2910_v0 = vsel %vm7206_vm6, %v6100_v37, %v2909_v46  ;;  %v2299_v8 = vpop.permute.xlu1 %2298 }
 0x25c   : > { %2911 = vst [vmem:[#allocation2 + $0x4e0] sm:$0x33] %v2910_v0  ;;  %v2495_v63 = vsel %vm2436_vm5, %v2297_v25, %v2299_v8  ;;  %v2496_v19 = vsel %vm2436_vm5, %v2299_v8, %v2301_v52 }
 0x25d   : > { %v6101_v53 = vcombine.low %v2495_v63, %v2496_v19  ;;  %2414 = vrot.lane.b32.xlu1 %v10011_v18, %s6862_s13  ;;  %v2309_v36 = vpop.permute.xlu0 %2308  ;;  %v2936_v19 = vld [vmem:[#allocation2 + $0x528] sm:$0x33] }
 0x25e   : > { %2424 = vrot.lane.b32.xlu0 %v7881_v38, %s6862_s13 }
 0x25f   : > { %v2913_v42 = vsel %vm7206_vm6, %v6101_v53, %v2912_v7  ;;  %v2303_v32 = vpop.permute.xlu1 %2302 }
 0x260   : > { %2914 = vst [vmem:[#allocation2 + $0x4e8] sm:$0x33] %v2913_v42  ;;  %v2497_v30 = vsel %vm2436_vm5, %v2301_v52, %v2303_v32  ;;  %v2498_v33 = vsel %vm2436_vm5, %v2303_v32, %v2305_v34 }
 0x261   : > { %v6102_v14 = vcombine.low %v2497_v30, %v2498_v33  ;;  %2418 = vrot.lane.b32.xlu1 %v10012_v58, %s6862_s13  ;;  %v2313_v24 = vpop.permute.xlu0 %2312 }
 0x262   : > { %2428 = vrot.lane.b32.xlu0 %v7899_v26, %s6862_s13  ;;  %v8818_v26 = vld [vmem:[%s9734_s2 + $0x8] sm:$0xff] }
 0x263   : > { %v2916_v50 = vsel %vm7206_vm6, %v6102_v14, %v2915_v10  ;;  %v2307_v12 = vpop.permute.xlu1 %2306  ;;  %v2939_v10 = vld [vmem:[#allocation2 + $0x530] sm:$0x33] }
 0x264   : > { %2917 = vst [vmem:[#allocation2 + $0x4f0] sm:$0x33] %v2916_v50  ;;  %v2499_v13 = vsel %vm2436_vm5, %v2305_v34, %v2307_v12  ;;  %v2500_v51 = vsel %vm2436_vm5, %v2307_v12, %v2309_v36 }
 0x265   : > { %v6103_v61 = vcombine.low %v2499_v13, %v2500_v51  ;;  %2422 = vrot.lane.b32.xlu1 %v10013_v35, %s6862_s13  ;;  %v2317_v4 = vpop.permute.xlu0 %2316  ;;  %v2942_v13 = vld [vmem:[#allocation2 + $0x538] sm:$0x33] }
 0x266   : > { %2432 = vrot.lane.b32.xlu0 %v7917_v57, %s6862_s13 }
 0x267   : > { %v2919_v38 = vsel %vm7206_vm6, %v6103_v61, %v2918_v56  ;;  %v2311_v2 = vpop.permute.xlu1 %2310 }
 0x268   : > { %2920 = vst [vmem:[#allocation2 + $0x4f8] sm:$0x33] %v2919_v38  ;;  %v2501_v29 = vsel %vm2436_vm5, %v2309_v36, %v2311_v2  ;;  %v2502_v11 = vsel %vm2436_vm5, %v2311_v2, %v2313_v24  ;;  %v2945_v2 = vld [vmem:[#allocation2 + $0x540] sm:$0x33] }
 0x269   : > { %v6104_v15 = vcombine.low %v2501_v29, %v2502_v11  ;;  %2426 = vrot.lane.b32.xlu1 %v10014_v44, %s6862_s13  ;;  %v2321_v41 = vpop.permute.xlu0 %2320 }
 0x26b   : > { %v2922_v6 = vsel %vm7206_vm6, %v6104_v15, %v2921_v48  ;;  %v2315_v62 = vpop.permute.xlu1 %2314 }
 0x26c   : > { %2923 = vst [vmem:[#allocation2 + $0x500] sm:$0x33] %v2922_v6  ;;  %v2503_v47 = vsel %vm2436_vm5, %v2313_v24, %v2315_v62  ;;  %v2504_v60 = vsel %vm2436_vm5, %v2315_v62, %v2317_v4  ;;  %v2948_v6 = vld [vmem:[#allocation2 + $0x548] sm:$0x33] }
 0x26d   : > { %v6105_v9 = vcombine.low %v2503_v47, %v2504_v60  ;;  %2430 = vrot.lane.b32.xlu1 %v10015_v59, %s6862_s13  ;;  %v2325_v45 = vpop.permute.xlu0 %2324  ;;  %v2951_v59 = vld [vmem:[#allocation2 + $0x550] sm:$0x33] }
 0x26f   : > { %v2925_v17 = vsel %vm7206_vm6, %v6105_v9, %v2924_v16  ;;  %v2319_v39 = vpop.permute.xlu1 %2318 }
 0x270   : > { %2926 = vst [vmem:[#allocation2 + $0x508] sm:$0x33] %v2925_v17  ;;  %v2505_v57 = vsel %vm2436_vm5, %v2317_v4, %v2319_v39  ;;  %v2506_v49 = vsel %vm2436_vm5, %v2319_v39, %v2321_v41 }
 0x271   : > { %v6106_v3 = vcombine.low %v2505_v57, %v2506_v49  ;;  %2434 = vrot.lane.b32.xlu1 %v8302_v1, %s6862_s13  ;;  %v2329_v21 = vpop.permute.xlu0 %2328  ;;  %v2933_v1 = vld [vmem:[#allocation2 + $0x520] sm:$0x33] }
 0x273   : > { %v2928_v22 = vsel %vm7206_vm6, %v6106_v3, %v2927_v55  ;;  %v2323_v25 = vpop.permute.xlu1 %2322  ;;  %v2954_v3 = vld [vmem:[#allocation2 + $0x558] sm:$0x33] }
 0x274   : > { %2929 = vst [vmem:[#allocation2 + $0x510] sm:$0x33] %v2928_v22  ;;  %v2507_v31 = vsel %vm2436_vm5, %v2321_v41, %v2323_v25  ;;  %v2508_v40 = vsel %vm2436_vm5, %v2323_v25, %v2325_v45 }
 0x275   : > { %v6107_v27 = vcombine.low %v2507_v31, %v2508_v40  ;;  %v2333_v5 = vpop.permute.xlu0 %2332 }
 0x277   : > { %v2931_v46 = vsel %vm7206_vm6, %v6107_v27, %v2930_v54  ;;  %v2327_v20 = vpop.permute.xlu1 %2326  ;;  %v2957_v27 = vld [vmem:[#allocation2 + $0x560] sm:$0x33] }
 0x278   : > { %2932 = vst [vmem:[#allocation2 + $0x518] sm:$0x33] %v2931_v46  ;;  %v2509_v52 = vsel %vm2436_vm5, %v2325_v45, %v2327_v20  ;;  %v2510_v37 = vsel %vm2436_vm5, %v2327_v20, %v2329_v21 }
 0x279   : > { %v6108_v0 = vcombine.low %v2509_v52, %v2510_v37  ;;  %v2337_v53 = vpop.permute.xlu0 %2336 }
 0x27b   : > { %v2934_v8 = vsel %vm7206_vm6, %v6108_v0, %v2933_v1  ;;  %v2331_v63 = vpop.permute.xlu1 %2330  ;;  %v2960_v0 = vld [vmem:[#allocation2 + $0x568] sm:$0x33] }
 0x27c   : > { %2935 = vst [vmem:[#allocation2 + $0x520] sm:$0x33] %v2934_v8  ;;  %v2511_v7 = vsel %vm2436_vm5, %v2329_v21, %v2331_v63  ;;  %v2512_v34 = vsel %vm2436_vm5, %v2331_v63, %v2333_v5 }
 0x27d   : > { %v6109_v18 = vcombine.low %v2511_v7, %v2512_v34  ;;  %v2341_v36 = vpop.permute.xlu0 %2340 }
 0x27f   : > { %v2937_v42 = vsel %vm7206_vm6, %v6109_v18, %v2936_v19  ;;  %v2335_v32 = vpop.permute.xlu1 %2334  ;;  %v2963_v18 = vld [vmem:[#allocation2 + $0x570] sm:$0x33] }
 0x280   : > { %2938 = vst [vmem:[#allocation2 + $0x528] sm:$0x33] %v2937_v42  ;;  %v2513_v30 = vsel %vm2436_vm5, %v2333_v5, %v2335_v32  ;;  %v2514_v33 = vsel %vm2436_vm5, %v2335_v32, %v2337_v53 }
 0x281   : > { %v6110_v14 = vcombine.low %v2513_v30, %v2514_v33  ;;  %v2345_v51 = vpop.permute.xlu0 %2344 }
 0x283   : > { %v2940_v58 = vsel %vm7206_vm6, %v6110_v14, %v2939_v10  ;;  %v2339_v50 = vpop.permute.xlu1 %2338  ;;  %v2966_v14 = vld [vmem:[#allocation2 + $0x578] sm:$0x33] }
 0x284   : > { %2941 = vst [vmem:[#allocation2 + $0x530] sm:$0x33] %v2940_v58  ;;  %v2515_v12 = vsel %vm2436_vm5, %v2337_v53, %v2339_v50  ;;  %v2516_v56 = vsel %vm2436_vm5, %v2339_v50, %v2341_v36 }
 0x285   : > { %v6111_v24 = vcombine.low %v2515_v12, %v2516_v56  ;;  %v2349_v48 = vpop.permute.xlu0 %2348 }
 0x287   : > { %v2943_v61 = vsel %vm7206_vm6, %v6111_v24, %v2942_v13  ;;  %v2343_v35 = vpop.permute.xlu1 %2342  ;;  %v2969_v24 = vld [vmem:[#allocation2 + $0x580] sm:$0x33] }
 0x288   : > { %2944 = vst [vmem:[#allocation2 + $0x538] sm:$0x33] %v2943_v61  ;;  %v2517_v38 = vsel %vm2436_vm5, %v2341_v36, %v2343_v35  ;;  %v2518_v29 = vsel %vm2436_vm5, %v2343_v35, %v2345_v51 }
 0x289   : > { %v6112_v11 = vcombine.low %v2517_v38, %v2518_v29  ;;  %v2353_v47 = vpop.permute.xlu0 %2352 }
 0x28b   : > { %v2946_v4 = vsel %vm7206_vm6, %v6112_v11, %v2945_v2  ;;  %v2347_v15 = vpop.permute.xlu1 %2346  ;;  %v2972_v11 = vld [vmem:[#allocation2 + $0x588] sm:$0x33] }
 0x28c   : > { %2947 = vst [vmem:[#allocation2 + $0x540] sm:$0x33] %v2946_v4  ;;  %v2519_v44 = vsel %vm2436_vm5, %v2345_v51, %v2347_v15  ;;  %v2520_v62 = vsel %vm2436_vm5, %v2347_v15, %v2349_v48 }
 0x28d   : > { %v6113_v16 = vcombine.low %v2519_v44, %v2520_v62  ;;  %v2357_v39 = vpop.permute.xlu0 %2356 }
 0x28f   : > { %v2949_v60 = vsel %vm7206_vm6, %v6113_v16, %v2948_v6  ;;  %v2351_v41 = vpop.permute.xlu1 %2350  ;;  %v2975_v16 = vld [vmem:[#allocation2 + $0x590] sm:$0x33] }
 0x290   : > { %2950 = vst [vmem:[#allocation2 + $0x548] sm:$0x33] %v2949_v60  ;;  %v2521_v9 = vsel %vm2436_vm5, %v2349_v48, %v2351_v41  ;;  %v2522_v17 = vsel %vm2436_vm5, %v2351_v41, %v2353_v47 }
 0x291   : > { %v6114_v57 = vcombine.low %v2521_v9, %v2522_v17  ;;  %v2361_v25 = vpop.permute.xlu0 %2360 }
 0x293   : > { %v2952_v55 = vsel %vm7206_vm6, %v6114_v57, %v2951_v59  ;;  %v2355_v49 = vpop.permute.xlu1 %2354  ;;  %v2978_v57 = vld [vmem:[#allocation2 + $0x598] sm:$0x33] }
 0x294   : > { %2953 = vst [vmem:[#allocation2 + $0x550] sm:$0x33] %v2952_v55  ;;  %v2523_v45 = vsel %vm2436_vm5, %v2353_v47, %v2355_v49  ;;  %v2524_v22 = vsel %vm2436_vm5, %v2355_v49, %v2357_v39 }
 0x295   : > { %v6115_v31 = vcombine.low %v2523_v45, %v2524_v22  ;;  %v2365_v20 = vpop.permute.xlu0 %2364 }
 0x297   : > { %v2955_v54 = vsel %vm7206_vm6, %v6115_v31, %v2954_v3  ;;  %v2359_v40 = vpop.permute.xlu1 %2358  ;;  %v2981_v31 = vld [vmem:[#allocation2 + $0x5a0] sm:$0x33] }
 0x298   : > { %2956 = vst [vmem:[#allocation2 + $0x558] sm:$0x33] %v2955_v54  ;;  %v2525_v21 = vsel %vm2436_vm5, %v2357_v39, %v2359_v40  ;;  %v2526_v46 = vsel %vm2436_vm5, %v2359_v40, %v2361_v25 }
 0x299   : > { %v6116_v52 = vcombine.low %v2525_v21, %v2526_v46  ;;  %v2369_v63 = vpop.permute.xlu0 %2368 }
 0x29b   : > { %v2958_v1 = vsel %vm7206_vm6, %v6116_v52, %v2957_v27  ;;  %v2363_v37 = vpop.permute.xlu1 %2362  ;;  %v2984_v52 = vld [vmem:[#allocation2 + $0x5a8] sm:$0x33] }
 0x29c   : > { %2959 = vst [vmem:[#allocation2 + $0x560] sm:$0x33] %v2958_v1  ;;  %v2527_v5 = vsel %vm2436_vm5, %v2361_v25, %v2363_v37  ;;  %v2528_v8 = vsel %vm2436_vm5, %v2363_v37, %v2365_v20 }
 0x29d   : > { %v6117_v7 = vcombine.low %v2527_v5, %v2528_v8  ;;  %v2373_v32 = vpop.permute.xlu0 %2372 }
 0x29f   : > { %v2961_v19 = vsel %vm7206_vm6, %v6117_v7, %v2960_v0  ;;  %v2367_v34 = vpop.permute.xlu1 %2366  ;;  %v2987_v7 = vld [vmem:[#allocation2 + $0x5b0] sm:$0x33] }
 0x2a0   : > { %2962 = vst [vmem:[#allocation2 + $0x568] sm:$0x33] %v2961_v19  ;;  %v2529_v53 = vsel %vm2436_vm5, %v2365_v20, %v2367_v34  ;;  %v2530_v42 = vsel %vm2436_vm5, %v2367_v34, %v2369_v63 }
 0x2a1   : > { %v6118_v30 = vcombine.low %v2529_v53, %v2530_v42  ;;  %v2377_v50 = vpop.permute.xlu0 %2376 }
 0x2a3   : > { %v2964_v10 = vsel %vm7206_vm6, %v6118_v30, %v2963_v18  ;;  %v2371_v33 = vpop.permute.xlu1 %2370  ;;  %v2990_v30 = vld [vmem:[#allocation2 + $0x5b8] sm:$0x33] }
 0x2a4   : > { %2965 = vst [vmem:[#allocation2 + $0x570] sm:$0x33] %v2964_v10  ;;  %v2531_v36 = vsel %vm2436_vm5, %v2369_v63, %v2371_v33  ;;  %v2532_v58 = vsel %vm2436_vm5, %v2371_v33, %v2373_v32 }
 0x2a5   : > { %v6119_v12 = vcombine.low %v2531_v36, %v2532_v58  ;;  %v2381_v35 = vpop.permute.xlu0 %2380 }
 0x2a7   : > { %v2967_v13 = vsel %vm7206_vm6, %v6119_v12, %v2966_v14  ;;  %v2375_v56 = vpop.permute.xlu1 %2374  ;;  %v2993_v12 = vld [vmem:[#allocation2 + $0x5c0] sm:$0x33] }
 0x2a8   : > { %2968 = vst [vmem:[#allocation2 + $0x578] sm:$0x33] %v2967_v13  ;;  %v2533_v51 = vsel %vm2436_vm5, %v2373_v32, %v2375_v56  ;;  %v2534_v61 = vsel %vm2436_vm5, %v2375_v56, %v2377_v50 }
 0x2a9   : > { %v6120_v38 = vcombine.low %v2533_v51, %v2534_v61  ;;  %v2385_v15 = vpop.permute.xlu0 %2384 }
 0x2ab   : > { %v2970_v2 = vsel %vm7206_vm6, %v6120_v38, %v2969_v24  ;;  %v2379_v29 = vpop.permute.xlu1 %2378  ;;  %v2996_v38 = vld [vmem:[#allocation2 + $0x5c8] sm:$0x33] }
 0x2ac   : > { %2971 = vst [vmem:[#allocation2 + $0x580] sm:$0x33] %v2970_v2  ;;  %v2535_v48 = vsel %vm2436_vm5, %v2377_v50, %v2379_v29  ;;  %v2536_v4 = vsel %vm2436_vm5, %v2379_v29, %v2381_v35 }
 0x2ad   : > { %v6121_v44 = vcombine.low %v2535_v48, %v2536_v4  ;;  %v2389_v41 = vpop.permute.xlu0 %2388 }
 0x2af   : > { %v2973_v6 = vsel %vm7206_vm6, %v6121_v44, %v2972_v11  ;;  %v2383_v62 = vpop.permute.xlu1 %2382  ;;  %v2999_v44 = vld [vmem:[#allocation2 + $0x5d0] sm:$0x33] }
 0x2b0   : > { %2974 = vst [vmem:[#allocation2 + $0x588] sm:$0x33] %v2973_v6  ;;  %v2537_v47 = vsel %vm2436_vm5, %v2381_v35, %v2383_v62  ;;  %v2538_v60 = vsel %vm2436_vm5, %v2383_v62, %v2385_v15 }
 0x2b1   : > { %v6122_v9 = vcombine.low %v2537_v47, %v2538_v60  ;;  %v2393_v49 = vpop.permute.xlu0 %2392 }
 0x2b3   : > { %v2976_v59 = vsel %vm7206_vm6, %v6122_v9, %v2975_v16  ;;  %v2387_v17 = vpop.permute.xlu1 %2386  ;;  %v3002_v9 = vld [vmem:[#allocation2 + $0x5d8] sm:$0x33] }
 0x2b4   : > { %2977 = vst [vmem:[#allocation2 + $0x590] sm:$0x33] %v2976_v59  ;;  %v2539_v39 = vsel %vm2436_vm5, %v2385_v15, %v2387_v17  ;;  %v2540_v55 = vsel %vm2436_vm5, %v2387_v17, %v2389_v41 }
 0x2b5   : > { %v6123_v45 = vcombine.low %v2539_v39, %v2540_v55  ;;  %v2397_v40 = vpop.permute.xlu0 %2396 }
 0x2b7   : > { %v2979_v3 = vsel %vm7206_vm6, %v6123_v45, %v2978_v57  ;;  %v2391_v22 = vpop.permute.xlu1 %2390  ;;  %v3005_v45 = vld [vmem:[#allocation2 + $0x5e0] sm:$0x33] }
 0x2b8   : > { %2980 = vst [vmem:[#allocation2 + $0x598] sm:$0x33] %v2979_v3  ;;  %v2541_v25 = vsel %vm2436_vm5, %v2389_v41, %v2391_v22  ;;  %v2542_v54 = vsel %vm2436_vm5, %v2391_v22, %v2393_v49 }
 0x2b9   : > { %v6124_v21 = vcombine.low %v2541_v25, %v2542_v54  ;;  %v2401_v37 = vpop.permute.xlu0 %2400 }
 0x2bb   : > { %v2982_v27 = vsel %vm7206_vm6, %v6124_v21, %v2981_v31  ;;  %v2395_v46 = vpop.permute.xlu1 %2394  ;;  %v3008_v21 = vld [vmem:[#allocation2 + $0x5e8] sm:$0x33] }
 0x2bc   : > { %2983 = vst [vmem:[#allocation2 + $0x5a0] sm:$0x33] %v2982_v27  ;;  %v2543_v20 = vsel %vm2436_vm5, %v2393_v49, %v2395_v46  ;;  %v2544_v1 = vsel %vm2436_vm5, %v2395_v46, %v2397_v40 }
 0x2bd   : > { %v6125_v5 = vcombine.low %v2543_v20, %v2544_v1  ;;  %v2405_v34 = vpop.permute.xlu0 %2404 }
 0x2bf   : > { %v2985_v0 = vsel %vm7206_vm6, %v6125_v5, %v2984_v52  ;;  %v2399_v8 = vpop.permute.xlu1 %2398  ;;  %v3011_v5 = vld [vmem:[#allocation2 + $0x5f0] sm:$0x33] }
 0x2c0   : > { %2986 = vst [vmem:[#allocation2 + $0x5a8] sm:$0x33] %v2985_v0  ;;  %v2545_v63 = vsel %vm2436_vm5, %v2397_v40, %v2399_v8  ;;  %v2546_v19 = vsel %vm2436_vm5, %v2399_v8, %v2401_v37 }
 0x2c1   : > { %v6126_v53 = vcombine.low %v2545_v63, %v2546_v19  ;;  %v2409_v33 = vpop.permute.xlu0 %2408  ;;  %v3014_v19 = vld [vmem:[#allocation2 + $0x5f8] sm:$0x33] }
 0x2c3   : > { %v2988_v18 = vsel %vm7206_vm6, %v6126_v53, %v2987_v7  ;;  %v2403_v42 = vpop.permute.xlu1 %2402 }
 0x2c4   : > { %2989 = vst [vmem:[#allocation2 + $0x5b0] sm:$0x33] %v2988_v18  ;;  %v2547_v32 = vsel %vm2436_vm5, %v2401_v37, %v2403_v42  ;;  %v2548_v10 = vsel %vm2436_vm5, %v2403_v42, %v2405_v34 }
 0x2c5   : > { %v6127_v36 = vcombine.low %v2547_v32, %v2548_v10  ;;  %v2413_v56 = vpop.permute.xlu0 %2412 }
 0x2c7   : > { %v2991_v14 = vsel %vm7206_vm6, %v6127_v36, %v2990_v30  ;;  %v2407_v58 = vpop.permute.xlu1 %2406 }
 0x2c8   : > { %2992 = vst [vmem:[#allocation2 + $0x5b8] sm:$0x33] %v2991_v14  ;;  %v2549_v50 = vsel %vm2436_vm5, %v2405_v34, %v2407_v58  ;;  %v2550_v13 = vsel %vm2436_vm5, %v2407_v58, %v2409_v33 }
 0x2c9   : > { %v6128_v51 = vcombine.low %v2549_v50, %v2550_v13  ;;  %v2417_v29 = vpop.permute.xlu0 %2416 }
 0x2cb   : > { %v2994_v24 = vsel %vm7206_vm6, %v6128_v51, %v2993_v12  ;;  %v2411_v61 = vpop.permute.xlu1 %2410 }
 0x2cc   : > { %2995 = vst [vmem:[#allocation2 + $0x5c0] sm:$0x33] %v2994_v24  ;;  %v2551_v35 = vsel %vm2436_vm5, %v2409_v33, %v2411_v61  ;;  %v2552_v2 = vsel %vm2436_vm5, %v2411_v61, %v2413_v56 }
 0x2cd   : > { %v6129_v48 = vcombine.low %v2551_v35, %v2552_v2  ;;  %v2421_v62 = vpop.permute.xlu0 %2420 }
 0x2cf   : > { %v2997_v11 = vsel %vm7206_vm6, %v6129_v48, %v2996_v38  ;;  %v2415_v4 = vpop.permute.xlu1 %2414 }
 0x2d0   : > { %2998 = vst [vmem:[#allocation2 + $0x5c8] sm:$0x33] %v2997_v11  ;;  %v2553_v15 = vsel %vm2436_vm5, %v2413_v56, %v2415_v4  ;;  %v2554_v6 = vsel %vm2436_vm5, %v2415_v4, %v2417_v29 }
 0x2d1   : > { %v6130_v47 = vcombine.low %v2553_v15, %v2554_v6  ;;  %v2425_v17 = vpop.permute.xlu0 %2424 }
 0x2d3   : > { %v3000_v16 = vsel %vm7206_vm6, %v6130_v47, %v2999_v44  ;;  %v2419_v60 = vpop.permute.xlu1 %2418 }
 0x2d4   : > { %3001 = vst [vmem:[#allocation2 + $0x5d0] sm:$0x33] %v3000_v16  ;;  %v2555_v41 = vsel %vm2436_vm5, %v2417_v29, %v2419_v60  ;;  %v2556_v59 = vsel %vm2436_vm5, %v2419_v60, %v2421_v62 }
 0x2d5   : > { %v6131_v39 = vcombine.low %v2555_v41, %v2556_v59  ;;  %v2429_v22 = vpop.permute.xlu0 %2428 }
 0x2d7   : > { %v3003_v57 = vsel %vm7206_vm6, %v6131_v39, %v3002_v9  ;;  %v2423_v55 = vpop.permute.xlu1 %2422 }
 0x2d8   : > { %3004 = vst [vmem:[#allocation2 + $0x5d8] sm:$0x33] %v3003_v57  ;;  %v2557_v49 = vsel %vm2436_vm5, %v2421_v62, %v2423_v55  ;;  %v2558_v3 = vsel %vm2436_vm5, %v2423_v55, %v2425_v17 }
 0x2d9   : > { %v6132_v25 = vcombine.low %v2557_v49, %v2558_v3  ;;  %v2433_v20 = vpop.permute.xlu0 %2432 }
 0x2db   : > { %v3006_v31 = vsel %vm7206_vm6, %v6132_v25, %v3005_v45  ;;  %v2427_v54 = vpop.permute.xlu1 %2426 }
 0x2dc   : > { %3007 = vst [vmem:[#allocation2 + $0x5e0] sm:$0x33] %v3006_v31  ;;  %v2559_v40 = vsel %vm2436_vm5, %v2425_v17, %v2427_v54  ;;  %v2560_v27 = vsel %vm2436_vm5, %v2427_v54, %v2429_v22 }
 0x2dd   : > { %v6133_v46 = vcombine.low %v2559_v40, %v2560_v27 }
 0x2df   : > { %v3009_v52 = vsel %vm7206_vm6, %v6133_v46, %v3008_v21  ;;  %v2431_v1 = vpop.permute.xlu1 %2430 }
 0x2e0   : > { %3010 = vst [vmem:[#allocation2 + $0x5e8] sm:$0x33] %v3009_v52  ;;  %v2561_v37 = vsel %vm2436_vm5, %v2429_v22, %v2431_v1  ;;  %v2562_v0 = vsel %vm2436_vm5, %v2431_v1, %v2433_v20 }
 0x2e1   : > { %v6134_v8 = vcombine.low %v2561_v37, %v2562_v0 }
 0x2e3   : > { %v3012_v63 = vsel %vm7206_vm6, %v6134_v8, %v3011_v5  ;;  %v2435_v7 = vpop.permute.xlu1 %2434 }
 0x2e4   : > { %3013 = vst [vmem:[#allocation2 + $0x5f0] sm:$0x33] %v3012_v63  ;;  %v2563_v34 = vsel %vm2436_vm5, %v2433_v20, %v2435_v7  ;;  %v2567_v53 = vsel %vm2436_vm5, %v2435_v7, %v8534_v43 }
 0x2e5   : > { %v6135_v18 = vcombine.low %v2563_v34, %v2567_v53 }
 0x2e7   : > { %v3015_v42 = vsel %vm7206_vm6, %v6135_v18, %v3014_v19 }
 0x2e8   : > { %3016 = vst [vmem:[#allocation2 + $0x5f8] sm:$0x33] %v3015_v42 }
 0x2e9 LB: >> { %v6863_v32 = vmov 0   ;;  %s8963_s19 = smul.u32 768, %s6849_s18  ;;  %vm3188_vm6 = vcmask 1043456   ;;  %v6718_v44 = vld [vmem:[%s9733_s1 + $0x8] sm:$0xff]   ;;  %vm3184_vm0 = vcmask 195584   ;;  %v6723_v31 = vld [vmem:[%s9733_s1] sm:$0xff]   ;;  %s6849_s18 = sphi %s8955_s18, %s3100_s18  }
 0x2ea   : >> { %3239 = vmatprep.mubr.bf16.mxu1 %v6863_v32  ;;  %3325 = vmatprep.mubr.bf16.mxu0 %v6863_v32  ;;  %s6864_s16 = smov 127   ;;  %s9051_s17 = smul.u32 384, %s6849_s18 }
 0x2eb   : >> { %6698 = vset.pattern.permute.xlu0 %v6863_v32  ;;  %s3117_s20 = sadd.s32 128, %s8963_s19  ;;  %s3102_s21 = sshra.s32 %s8963_s19, 7 }
 0x2ec   : >> { %3767 = vperm.xlu0 %6698, %v8813_v23   ;;  %s3118_s22 = sshra.s32 %s3117_s20, 7  ;;  %s6152_s23 = sshll.u32 %s3102_s21, 2 }
 0x2ed   : >> { %s6153_s25 = sshll.u32 %s3118_s22, 2  ;;  %s8980_s27 = scalar_lea.vmem [#allocation2], %s6152_s23 }
 0x2ee   : >> { %s8970_s26 = scalar_lea.vmem [#allocation2], %s6153_s25  ;;  %s3536_s30 = sadd.s32 256, %s8963_s19 }
 0x2ef   : >> { %v3122_v28 = vld [vmem:[%s8970_s26] sm:$0xff]  ;;  %v3124_v30 = vld [vmem:[%s8970_s26 + $0x10] sm:$0xff]  ;;  %v3123_v51 = vld [vmem:[%s8970_s26 + $0x8] sm:$0xff]  ;;  %s8996_s8 = sshra.s32 %s3536_s30, 7  ;;  %s3813_s19 = sshra.s32 %s9051_s17, 7 }
 0x2f0   : >> { %3772 = vperm.xlu0 %6698, %v8818_v26   ;;  %v3125_v43 = vld [vmem:[%s8970_s26 + $0x200] sm:$0xff]  ;;  %v3127_v33 = vld [vmem:[%s8970_s26 + $0x210] sm:$0xff]  ;;  %v3126_v24 = vld [vmem:[%s8970_s26 + $0x208] sm:$0xff]  ;;  %s6194_s9 = sshll.u32 %s8996_s8, 2  ;;  %s6216_s20 = sshll.u32 %s3813_s19, 3 }
 0x2f1   : >> { %v6158_v10 = vcombine.high %v3122_v28, %v3125_v43  ;;  %v6157_v36 = vcombine.low %v3122_v28, %v3125_v43  ;;  %v3128_v14 = vld [vmem:[%s8970_s26 + $0x400] sm:$0xff]  ;;  %v3130_v58 = vld [vmem:[%s8970_s26 + $0x410] sm:$0xff]  ;;  %v6162_v50 = vcombine.high %v3124_v30, %v3127_v33  ;;  %v6161_v12 = vcombine.low %v3124_v30, %v3127_v33  ;;  %v3129_v15 = vld [vmem:[%s8970_s26 + $0x408] sm:$0xff]  ;;  %s9014_s13 = scalar_lea.vmem [#allocation2], %s6194_s9  ;;  %s6865_s21 = smov 126  }
 0x2f2   : >> { %v6164_v13 = vcombine.high %v3128_v14, %v3128_v14  ;;  %v6168_v56 = vcombine.high %v3130_v58, %v3130_v58  ;;  %v6163_v61 = vcombine.low %v3128_v14, %v3128_v14  ;;  %v6167_v35 = vcombine.low %v3130_v58, %v3130_v58  ;;  %v3106_v38 = vld [vmem:[%s8980_s27] sm:$0xff]  ;;  %v3107_v59 = vld [vmem:[%s8980_s27 + $0x8] sm:$0xff]  ;;  %v3108_v39 = vld [vmem:[%s8980_s27 + $0x10] sm:$0xff]  ;;  %s6866_s22 = smov 124   ;;  %s3816_s23 = scalar_lea.vmem [#allocation3], %s6216_s20 }
 0x2f3   : >> { %3207 = vmatprep.subr.bf16.mxu1 %v6158_v10  ;;  %v3109_v2 = vld [vmem:[%s8980_s27 + $0x200] sm:$0xff]  ;;  %3293 = vmatprep.subr.bf16.mxu0 %v6162_v50  ;;  %v6160_v48 = vcombine.high %v3123_v51, %v3126_v24  ;;  %v6159_v62 = vcombine.low %v3123_v51, %v3126_v24  ;;  %v6166_v16 = vcombine.high %v3129_v15, %v3129_v15  ;;  %v3110_v17 = vld [vmem:[%s8980_s27 + $0x208] sm:$0xff]  ;;  %v3111_v57 = vld [vmem:[%s8980_s27 + $0x210] sm:$0xff]  ;;  %s6374_s25 = sadd.s32 128, %s9051_s17  ;;  %s3100_s18 = sadd.s32 1, %s6849_s18  }
 0x2f4   : >> { %3208 = vmatpush1.bf16.msra.mxu1 %v6157_v36  ;;  %3294 = vmatpush1.bf16.msra.mxu0 %v6161_v12  ;;  %v3190_v29 = vsel %vm3188_vm6, %v6163_v61, 0  ;;  %v3202_v11 = vsel %vm3188_vm6, %v6167_v35, 0  ;;  %v6177_v4 = vcombine.high %v3106_v38, %v3109_v2  ;;  %v3112_v6 = vld [vmem:[%s8980_s27 + $0x400] sm:$0xff]  ;;  %v6176_v47 = vcombine.low %v3106_v38, %v3109_v2  ;;  %v3113_v22 = vld [vmem:[%s8980_s27 + $0x408] sm:$0xff]  ;;  %v3114_v25 = vld [vmem:[%s8980_s27 + $0x410] sm:$0xff]  ;;  %s3845_s26 = sshra.s32 %s6374_s25, 7 }
 0x2f5   : >> { %6169 = vmatprep.subr.msk.bf16.mxu1 %vm3188_vm6, %v6164_v13  ;;  %6173 = vmatprep.subr.msk.bf16.mxu0 %vm3188_vm6, %v6168_v56  ;;  %v6165_v60 = vcombine.low %v3129_v15, %v3129_v15  ;;  %v6183_v41 = vcombine.high %v3112_v6, %v3112_v6  ;;  %v6182_v9 = vcombine.low %v3112_v6, %v3112_v6  ;;  %v3542_v52 = vld [vmem:[%s9014_s13 + $0x8] sm:$0xff]  ;;  %v3541_v37 = vld [vmem:[%s9014_s13] sm:$0xff]  ;;  %v3543_v28 = vld [vmem:[%s9014_s13 + $0x10] sm:$0xff]  ;;  %s6376_s27 = sadd.s32 256, %s9051_s17  ;;  %s6218_s28 = sshll.u32 %s3845_s26, 3 }
 0x2f6   : >> { %v6179_v49 = vcombine.high %v3107_v59, %v3110_v17  ;;  %v6181_v3 = vcombine.high %v3108_v39, %v3111_v57  ;;  %v6178_v54 = vcombine.low %v3107_v59, %v3110_v17  ;;  %v6180_v40 = vcombine.low %v3108_v39, %v3111_v57  ;;  %v3545_v1 = vld [vmem:[%s9014_s13 + $0x208] sm:$0xff]  ;;  %v3544_v5 = vld [vmem:[%s9014_s13 + $0x200] sm:$0xff]  ;;  %v3546_v43 = vld [vmem:[%s9014_s13 + $0x210] sm:$0xff]  ;;  %s3876_s29 = sshra.s32 %s6376_s27, 7  ;;  %s3848_s8 = scalar_lea.vmem [#allocation3], %s6218_s28 }
 0x2f7   : >> { %v3196_v55 = vsel %vm3188_vm6, %v6165_v60, 0  ;;  %v3390_v45 = vsel %vm3188_vm6, %v6182_v9, 0  ;;  %v6185_v21 = vcombine.high %v3113_v22, %v3113_v22  ;;  %v6184_v27 = vcombine.low %v3113_v22, %v3113_v22  ;;  %v3547_v19 = vld [vmem:[%s9014_s13 + $0x400] sm:$0xff]  ;;  %v3548_v42 = vld [vmem:[%s9014_s13 + $0x408] sm:$0xff]  ;;  %v3549_v58 = vld [vmem:[%s9014_s13 + $0x410] sm:$0xff]  ;;  %s6220_s30 = sshll.u32 %s3876_s29, 3 }
 0x2f8   : >> { %3210 = vmatpush1.bf16.msra.mxu1 %v3190_v29  ;;  %3296 = vmatpush1.bf16.msra.mxu0 %v3202_v11  ;;  %v6187_v46 = vcombine.high %v3114_v25, %v3114_v25  ;;  %v6186_v20 = vcombine.low %v3114_v25, %v3114_v25  ;;  %v6201_v8 = vcombine.high %v3542_v52, %v3545_v1  ;;  %v6730_v50 = vld [vmem:[%s9733_s1 + $0x10] sm:$0xff]   ;;  %s3879_s9 = scalar_lea.vmem [#allocation3], %s6220_s30  ;;  %p3097_p4 = scmp.ge.s32.totalorder %s3100_s18, 21  }
 0x2f9   : >> { %3250 = vmatprep.subr.bf16.mxu1 %v6160_v48  ;;  %3407 = vmatprep.subr.bf16.mxu0 %v6177_v4  ;;  %v3396_v0 = vsel %vm3188_vm6, %v6184_v27, 0  ;;  %v6199_v7 = vcombine.high %v3541_v37, %v3544_v5  ;;  %v6198_v34 = vcombine.low %v3541_v37, %v3544_v5  ;;  %v6205_v53 = vcombine.high %v3547_v19, %v3547_v19  ;;  %s9079_s18 = smov (%p3097_p4), 0  }
 0x2fa   : >> { %v3402_v63 = vsel %vm3188_vm6, %v6186_v20, 0  ;;  %v6204_v18 = vcombine.low %v3547_v19, %v3547_v19  ;;  %v6200_v30 = vcombine.low %v3542_v52, %v3545_v1  ;;  %v6207_v10 = vcombine.high %v3548_v42, %v3548_v42 }
 0x2fb   : >> { %6170 = vmatmul.mubr.msk.bf16.vlgmr.msra.gmra.mrb[0].mxu1 %vm3184_vm0, %v6718_v44  ;;  %6174 = vmatmul.mubr.msk.bf16.vlgmr.msra.gmra.mrb[0].mxu0 %vm3184_vm0, %v6718_v44  ;;  %v6206_v33 = vcombine.low %v3548_v42, %v3548_v42  ;;  %v6203_v14 = vcombine.high %v3543_v28, %v3546_v43  ;;  %v6202_v12 = vcombine.low %v3543_v28, %v3546_v43 }
 0x2fc   : >> { %3251 = vmatpush1.bf16.msra.mxu1 %v6159_v62  ;;  %3408 = vmatpush1.bf16.msra.mxu0 %v6176_v47  ;;  %v3607_v36 = vsel %vm3188_vm6, %v6204_v18, 0  ;;  %v6209_v56 = vcombine.high %v3549_v58, %v3549_v58  ;;  %v6208_v51 = vcombine.low %v3549_v58, %v3549_v58 }
 0x2fd   : >> { %6171 = vmatprep.subr.msk.bf16.mxu1 %vm3188_vm6, %v6166_v16  ;;  %6188 = vmatprep.subr.msk.bf16.mxu0 %vm3188_vm6, %v6183_v41  ;;  %v3613_v13 = vsel %vm3188_vm6, %v6206_v33, 0 }
 0x2fe   : >> { %3282 = vmatprep.mubr.bf16.mxu1 %v6863_v32  ;;  %3439 = vmatprep.mubr.bf16.mxu0 %v6863_v32  ;;  %v3619_v24 = vsel %vm3188_vm6, %v6208_v51, 0 }
 0x300   : >> { %3253 = vmatpush1.bf16.msra.mxu1 %v3196_v55  ;;  %3410 = vmatpush1.bf16.msra.mxu0 %v3390_v45 }
 0x301   : >> { %3450 = vmatprep.subr.bf16.mxu1 %v6179_v49  ;;  %3493 = vmatprep.subr.bf16.mxu0 %v6181_v3 }
 0x303   : >> { %6172 = vmatmul.mubr.msk.bf16.vlgmr.msra.gmra.mrb[4].mxu1 %vm3184_vm0, %v6718_v44  ;;  %6189 = vmatmul.mubr.msk.bf16.vlgmr.msra.gmra.mrb[4].mxu0 %vm3184_vm0, %v6723_v31 }
 0x304   : >> { %3451 = vmatpush1.bf16.msra.mxu1 %v6178_v54  ;;  %3494 = vmatpush1.bf16.msra.mxu0 %v6180_v40 }
 0x305   : >> { %6190 = vmatprep.subr.msk.bf16.mxu1 %vm3188_vm6, %v6185_v21  ;;  %6192 = vmatprep.subr.msk.bf16.mxu0 %vm3188_vm6, %v6187_v46 }
 0x306   : >> { %3525 = vmatprep.mubr.bf16.mxu0 %v6863_v32  ;;  %3482 = vmatprep.mubr.bf16.mxu1 %v6863_v32 }
 0x308   : >> { %3453 = vmatpush1.bf16.msra.mxu1 %v3396_v0  ;;  %3496 = vmatpush1.bf16.msra.mxu0 %v3402_v63 }
 0x309   : >> { %3667 = vmatprep.subr.bf16.mxu1 %v6201_v8  ;;  %3624 = vmatprep.subr.bf16.mxu0 %v6199_v7 }
 0x30b   : >> { %6193 = vmatmul.mubr.msk.bf16.vlgmr.msra.gmra.mrb[0].mxu0 %vm3184_vm0, %v6723_v31 }
 0x30c   : >> { %3625 = vmatpush1.bf16.msra.mxu0 %v6198_v34  ;;  %3656 = vmatprep.mubr.bf16.mxu0 %v6863_v32 }
 0x30d   : >> { %6210 = vmatprep.subr.msk.bf16.mxu0 %vm3188_vm6, %v6205_v53 }
 0x30f   : >> { %6191 = vmatmul.mubr.msk.bf16.vlgmr.msra.gmra.mrb[4].mxu1 %vm3184_vm0, %v6723_v31 }
 0x310   : >> { %3668 = vmatpush1.bf16.msra.mxu1 %v6200_v30  ;;  %3699 = vmatprep.mubr.bf16.mxu1 %v6863_v32 }
 0x311   : >> { %3627 = vmatpush1.bf16.msra.mxu0 %v3607_v36  ;;  %6212 = vmatprep.subr.msk.bf16.mxu1 %vm3188_vm6, %v6207_v10 }
 0x312   : >> { %3710 = vmatprep.subr.bf16.mxu0 %v6203_v14 }
 0x314   : >> { %6211 = vmatmul.mubr.msk.bf16.vlgmr.msra.gmra.mrb[4].mxu0 %vm3184_vm0, %v6730_v50  ;;  %3670 = vmatpush1.bf16.msra.mxu1 %v3613_v13 }
 0x315   : >> { %3711 = vmatpush1.bf16.msra.mxu0 %v6202_v12  ;;  %3742 = vmatprep.mubr.bf16.mxu0 %v6863_v32 }
 0x316   : >> { %6214 = vmatprep.subr.msk.bf16.mxu0 %vm3188_vm6, %v6209_v56 }
 0x319   : >> { %3713 = vmatpush1.bf16.msra.mxu0 %v3619_v24 }
 0x31b   : >> { %6213 = vmatmul.mubr.msk.bf16.vlgmr.msra.gmra.mrb[4].mxu1 %vm3184_vm0, %v6730_v50 }
 0x31c   : >> { %6215 = vmatmul.mubr.msk.bf16.vlgmr.msra.gmra.mrb[0].mxu0 %vm3184_vm0, %v6730_v50 }
 0x36b   : >> { %v3768_v29 = vpop.permute.xlu0 %3767 }
 0x36f   : >> { %v3773_v32 = vpop.permute.xlu0 %3772 }
 0x3ce   : >> { %v3241_v61 = vpop.f32.mrb[0].mxu1 }
 0x3cf   : >> { %v3243_v35 = vpop.f32.mrb[1].mxu1 }
 0x3d0   : >> { %v3245_v38 = vpop.f32.mrb[2].mxu1 }
 0x3d1   : >> { %v3247_v2 = vpop.f32.mrb[3].mxu1 }
 0x3e7   : >> { %v3658_v48 = vpop.f32.mrb[4].mxu0 }
 0x3e8   : >> { %v6476_v11 = vadd.f32 %v3658_v48, %v3241_v61  ;;  %v3660_v4 = vpop.f32.mrb[5].mxu0 }
 0x3e9   : >> { %v6477_v15 = vadd.f32 %v3660_v4, %v3243_v35  ;;  %v3662_v44 = vpop.f32.mrb[6].mxu0 }
 0x3ea   : >> { %v3775_v6 = vadd.f32 %v6476_v11, %v3768_v29  ;;  %v6478_v62 = vadd.f32 %v3662_v44, %v3245_v38  ;;  %v3664_v47 = vpop.f32.mrb[7].mxu0 }
 0x3eb   : >> { %v3776_v16 = vadd.f32 %v6477_v15, %v3768_v29  ;;  %v6479_v60 = vadd.f32 %v3664_v47, %v3247_v2 }
 0x3ec   : >> { %v3787_v41 = vmax.f32 %v3775_v6, 0.0  ;;  %v3781_v9 = vadd.f32 %v6478_v62, %v3773_v32 }
 0x3ed   : >> { %v3788_v59 = vmax.f32 %v3776_v16, 0.0  ;;  %v3782_v17 = vadd.f32 %v6479_v60, %v3773_v32 }
 0x3ee   : >> { %v3701_v39 = vpop.f32.mrb[4].mxu1  ;;  %v3793_v57 = vmax.f32 %v3781_v9, 0.0  ;;  %v9062_v9 = vld [vmem:[%s9736_s4] sm:$0xff] (%p3097_p4) }
 0x3ef   : >> { %v3777_v55 = vadd.f32 %v3768_v29, %v3701_v39  ;;  %v3744_v49 = vpop.f32.mrb[0].mxu0  ;;  %v3703_v45 = vpop.f32.mrb[5].mxu1  ;;  %v3794_v3 = vmax.f32 %v3782_v17, 0.0  ;;  %v3799_v22 = vmax.f32 %v3787_v41, %v3788_v59  ;;  %v9067_v59 = vld [vmem:[%s9736_s4 + $0x8] sm:$0xff] (%p3097_p4)  ;;  %v9072_v17 = vld [vmem:[%s9736_s4 + $0x10] sm:$0xff] (%p3097_p4)  ;;  %v9077_v39 = vld [vmem:[%s9736_s4 + $0x18] sm:$0xff] (%p3097_p4) }
 0x3f0   : >> { %v3779_v25 = vadd.f32 %v3768_v29, %v3744_v49  ;;  %v3778_v31 = vadd.f32 %v3768_v29, %v3703_v45  ;;  %v3746_v54 = vpop.f32.mrb[1].mxu0  ;;  %v3705_v40 = vpop.f32.mrb[6].mxu1 }
 0x3f1   : >> { %v3789_v21 = vmax.f32 %v3777_v55, 0.0  ;;  %v3780_v27 = vadd.f32 %v3768_v29, %v3746_v54  ;;  %v3783_v46 = vadd.f32 %v3773_v32, %v3705_v40  ;;  %v3748_v20 = vpop.f32.mrb[2].mxu0  ;;  %v3707_v52 = vpop.f32.mrb[7].mxu1  ;;  %v3800_v1 = vmax.f32 %v3793_v57, %v3794_v3 }
 0x3f2   : >> { %v3791_v37 = vmax.f32 %v3779_v25, 0.0  ;;  %v3790_v5 = vmax.f32 %v3778_v31, 0.0  ;;  %v3785_v0 = vadd.f32 %v3773_v32, %v3748_v20  ;;  %v3784_v8 = vadd.f32 %v3773_v32, %v3707_v52  ;;  %v3750_v63 = vpop.f32.mrb[3].mxu0 }
 0x3f3   : >> { %v3792_v7 = vmax.f32 %v3780_v27, 0.0  ;;  %v3795_v19 = vmax.f32 %v3783_v46, 0.0  ;;  %v3786_v34 = vadd.f32 %v3773_v32, %v3750_v63  ;;  %v6699_v53 = vpack.i.bf16 %v3800_v1, %v3799_v22 }
 0x3f4   : >> { %v3829_v18 = vmax.f32 %v3789_v21, %v3790_v5  ;;  %v3797_v42 = vmax.f32 %v3785_v0, 0.0  ;;  %v3796_v28 = vmax.f32 %v3784_v8, 0.0 }
 0x3f5   : >> { %v3861_v43 = vmax.f32 %v3791_v37, %v3792_v7  ;;  %v3798_v30 = vmax.f32 %v3786_v34, 0.0  ;;  %6700 = vrot.lane.b32.xlu1 %v6699_v53, %s6864_s16 }
 0x3f6   : >> { %v3830_v10 = vmax.f32 %v3795_v19, %v3796_v28 }
 0x3f7   : >> { %v3862_v33 = vmax.f32 %v3797_v42, %v3798_v30 }
 0x3f8   : >> { %v6704_v36 = vpack.i.bf16 %v3830_v10, %v3829_v18 }
 0x3f9   : >> { %v6709_v14 = vpack.i.bf16 %v3862_v33, %v3861_v43 }
 0x3fa   : >> { %6705 = vrot.lane.b32.xlu1 %v6704_v36, %s6864_s16 }
 0x3fb   : >> { %6710 = vrot.lane.b32.xlu0 %v6709_v14, %s6864_s16 }
 0x467   : >> { %v6701_v58 = vpop.permute.xlu1 %6700 }
 0x468   : >> { %v6703_v50 = vunpack.i.h.bf16 %v6701_v58  ;;  %v6702_v12 = vunpack.i.l.bf16 %v6701_v58 }
 0x46a   : >> { %v3810_v13 = vmax.f32 %v3800_v1, %v6703_v50  ;;  %v3809_v56 = vmax.f32 %v3799_v22, %v6702_v12 }
 0x46c   : >> { %v6706_v51 = vpop.permute.xlu1 %6705  ;;  %v3812_v24 = vpack.c.bf16 %v3810_v13, %v3809_v56 }
 0x46d   : >> { %v6708_v61 = vunpack.i.h.bf16 %v6706_v51  ;;  %v6707_v35 = vunpack.i.l.bf16 %v6706_v51  ;;  %v6711_v38 = vpop.permute.xlu0 %6710 }
 0x46e   : >> { %v6713_v2 = vunpack.i.h.bf16 %v6711_v38  ;;  %v6712_v29 = vunpack.i.l.bf16 %v6711_v38  ;;  %3819 = vrot.lane.b32.xlu1 %v3812_v24, %s6865_s21  ;;  %3824 = vrot.lane.b32.xlu0 %v3812_v24, %s6866_s22  ;;  %3817 = vst [vmem:[%s3816_s23] sm:$0xff] %v3812_v24 }
 0x46f   : >> { %v3840_v48 = vmax.f32 %v3830_v10, %v6708_v61  ;;  %v3839_v11 = vmax.f32 %v3829_v18, %v6707_v35 }
 0x470   : >> { %v3872_v4 = vmax.f32 %v3862_v33, %v6713_v2  ;;  %v3871_v15 = vmax.f32 %v3861_v43, %v6712_v29 }
 0x471   : >> { %v3844_v44 = vpack.c.bf16 %v3840_v48, %v3839_v11 }
 0x472   : >> { %v3875_v32 = vpack.c.bf16 %v3872_v4, %v3871_v15 }
 0x473   : >> { %3851 = vrot.lane.b32.xlu1 %v3844_v44, %s6865_s21  ;;  %3856 = vrot.lane.b32.xlu0 %v3844_v44, %s6866_s22 }
 0x477   : >> { %3887 = vrot.lane.b32.xlu0 %v3875_v32, %s6866_s22  ;;  %3882 = vrot.lane.b32.xlu1 %v3875_v32, %s6865_s21 }
 0x4e0   : >> { %v3820_v6 = vpop.permute.xlu1 %3819  ;;  %v3825_v62 = vpop.permute.xlu0 %3824 }
 0x4e1   : >> { %3823 = vst [vmem:[%s3816_s23 + $0x1f8] sm:$0xff] %v3820_v6  ;;  %3828 = vst [vmem:[%s3816_s23 + $0x3f0] sm:$0xff] %v3825_v62 }
 0x4e2   : >> { %3849 = vst [vmem:[%s3848_s8] sm:$0xff] %v3844_v44 }
 0x4e4   : > { %3099 = sbr.rel (!%p3097_p4) target bundleno = 745 (0x2e9), region = 122 }
 0x4e5   : >> { %v3852_v47 = vpop.permute.xlu1 %3851  ;;  %v3857_v16 = vpop.permute.xlu0 %3856 }
 0x4e6   : >> { %3855 = vst [vmem:[%s3848_s8 + $0x1f8] sm:$0xff] %v3852_v47  ;;  %3860 = vst [vmem:[%s3848_s8 + $0x3f0] sm:$0xff] %v3857_v16 }
 0x4e7   : >> { %3880 = vst [vmem:[%s3879_s9] sm:$0xff] %v3875_v32 }
 0x4e9   : >> { %v3888_v60 = vpop.permute.xlu0 %3887  ;;  %v3883_v41 = vpop.permute.xlu1 %3882 }
 0x4ea   : >> { %3891 = vst [vmem:[%s3879_s9 + $0x3f0] sm:$0xff] %v3888_v60  ;;  %3886 = vst [vmem:[%s3879_s9 + $0x1f8] sm:$0xff] %v3883_v41 }
 0x4eb LB: >> { %v6867_v23 = vmov 0   ;;  %s9087_s20 = smul.u32 768, %s6853_s18  ;;  %v6767_v20 = vld [vmem:[%s9735_s3 + $0x10] sm:$0xff]   ;;  %vm3967_vm5 = vcmask 392192   ;;  %v6768_v19 = vld [vmem:[%s9735_s3 + $0x18] sm:$0xff]   ;;  %v6769_v28 = vld [vmem:[%s9735_s3] sm:$0xff]   ;;  %s6853_s18 = sphi %s9079_s18, %s3901_s18  }
 0x4ec   : >> { %4006 = vmatprep.mubr.bf16.mxu1 %v6867_v23  ;;  %4112 = vmatprep.mubr.bf16.mxu0 %v6867_v23  ;;  %v6770_v12 = vld [vmem:[%s9735_s3 + $0x8] sm:$0xff]   ;;  %v6771_v6 = vld [vmem:[%s9735_s3 + $0x20] sm:$0xff]   ;;  %s6869_s29 = smov 124   ;;  %s6870_s30 = smov 120  }
 0x4ed   : >> { %6735 = vset.pattern.permute.xlu0 %v6867_v23  ;;  %6736 = vset.pattern.permute.xlu1 %v6867_v23  ;;  %s3929_s21 = sadd.s32 128, %s9087_s20  ;;  %s3903_s25 = sshra.s32 %s9087_s20, 7  ;;  %v6772_v41 = vld [vmem:[%s9735_s3 + $0x28] sm:$0xff]  }
 0x4ee   : >> { %4537 = vperm.xlu0 %6735, %v9062_v9   ;;  %4547 = vperm.xlu1 %6736, %v9072_v17   ;;  %s3930_s22 = sshra.s32 %s3929_s21, 7  ;;  %s6221_s27 = sshll.u32 %s3903_s25, 3 }
 0x4ef   : >> { %s6222_s23 = sshll.u32 %s3930_s22, 3  ;;  %s9112_s28 = scalar_lea.vmem [#allocation3], %s6221_s27 }
 0x4f0   : >> { %s9097_s26 = scalar_lea.vmem [#allocation3], %s6222_s23  ;;  %s4308_s13 = sadd.s32 256, %s9087_s20 }
 0x4f1   : >> { %v3935_v26 = vld [vmem:[%s9097_s26 + $0x8] sm:$0xff]  ;;  %v3934_v55 = vld [vmem:[%s9097_s26] sm:$0xff]  ;;  %v3940_v22 = vld [vmem:[%s9097_s26 + $0x1f8] sm:$0xff]  ;;  %s4309_s14 = sshra.s32 %s4308_s13, 7  ;;  %s6868_s25 = smov 126  }
 0x4f2   : >> { %4542 = vperm.xlu0 %6735, %v9067_v59   ;;  %4552 = vperm.xlu1 %6736, %v9077_v39   ;;  %v3939_v57 = vld [vmem:[%s9097_s26 + $0x28] sm:$0xff]  ;;  %v3938_v49 = vld [vmem:[%s9097_s26 + $0x20] sm:$0xff]  ;;  %v3944_v25 = vld [vmem:[%s9097_s26 + $0x218] sm:$0xff]  ;;  %s6243_s15 = sshll.u32 %s4309_s14, 3 }
 0x4f3   : >> { %3974 = vmatprep.subr.bf16.mxu1 %v3935_v26  ;;  %4080 = vmatprep.subr.bf16.mxu0 %v3939_v57  ;;  %v3941_v45 = vld [vmem:[%s9097_s26 + $0x200] sm:$0xff]  ;;  %v3947_v31 = vld [vmem:[%s9097_s26 + $0x3f8] sm:$0xff]  ;;  %v3946_v40 = vld [vmem:[%s9097_s26 + $0x3f0] sm:$0xff]  ;;  %s9164_s19 = scalar_lea.vmem [#allocation3], %s6243_s15 }
 0x4f4   : >> { %v3945_v3 = vld [vmem:[%s9097_s26 + $0x220] sm:$0xff]  ;;  %3975 = vmatpush1.bf16.msra.mxu1 %v3934_v55  ;;  %4081 = vmatpush1.bf16.msra.mxu0 %v3938_v49  ;;  %v3951_v54 = vld [vmem:[%s9097_s26 + $0x418] sm:$0xff]  ;;  %v3950_v21 = vld [vmem:[%s9097_s26 + $0x410] sm:$0xff] }
 0x4f5   : >> { %3976 = vmatprep.subr.bf16.mxu1 %v3941_v45  ;;  %4082 = vmatprep.subr.bf16.mxu0 %v3945_v3  ;;  %v3937_v27 = vld [vmem:[%s9097_s26 + $0x18] sm:$0xff]  ;;  %v3908_v46 = vld [vmem:[%s9112_s28 + $0x8] sm:$0xff]  ;;  %v3936_v52 = vld [vmem:[%s9097_s26 + $0x10] sm:$0xff] }
 0x4f6   : >> { %v3907_v1 = vld [vmem:[%s9112_s28] sm:$0xff]  ;;  %v3943_v37 = vld [vmem:[%s9097_s26 + $0x210] sm:$0xff]  ;;  %v3942_v0 = vld [vmem:[%s9097_s26 + $0x208] sm:$0xff] }
 0x4f7   : >> { %v3914_v5 = vld [vmem:[%s9112_s28 + $0x200] sm:$0xff]  ;;  %v3913_v8 = vld [vmem:[%s9112_s28 + $0x1f8] sm:$0xff]  ;;  %v3949_v63 = vld [vmem:[%s9097_s26 + $0x408] sm:$0xff] }
 0x4f8   : >> { %3977 = vmatpush1.bf16.msra.mxu1 %v3940_v22  ;;  %4083 = vmatpush1.bf16.msra.mxu0 %v3944_v25  ;;  %v3920_v7 = vld [vmem:[%s9112_s28 + $0x3f8] sm:$0xff]  ;;  %v3948_v34 = vld [vmem:[%s9097_s26 + $0x400] sm:$0xff]  ;;  %v3919_v53 = vld [vmem:[%s9112_s28 + $0x3f0] sm:$0xff]  ;;  %s9285_s26 = smul.u32 384, %s6853_s18  ;;  %s3901_s18 = sadd.s32 1, %s6853_s18  }
 0x4f9   : >> { %3978 = vmatprep.subr.bf16.mxu1 %v3947_v31  ;;  %4084 = vmatprep.subr.bf16.mxu0 %v3951_v54  ;;  %v3910_v18 = vld [vmem:[%s9112_s28 + $0x18] sm:$0xff]  ;;  %v3912_v42 = vld [vmem:[%s9112_s28 + $0x28] sm:$0xff]  ;;  %v3909_v43 = vld [vmem:[%s9112_s28 + $0x10] sm:$0xff]  ;;  %p3898_p5 = scmp.ge.s32.totalorder %s3901_s18, 10  }
 0x4fa   : >> { %v3911_v30 = vld [vmem:[%s9112_s28 + $0x20] sm:$0xff]  ;;  %v3916_v10 = vld [vmem:[%s9112_s28 + $0x210] sm:$0xff]  ;;  %v3915_v36 = vld [vmem:[%s9112_s28 + $0x208] sm:$0xff]  ;;  %s4630_s27 = sshra.s32 %s9285_s26, 7  ;;  %s6378_s9 = sadd.s32 128, %s9285_s26 }
 0x4fb   : >> { %v3918_v33 = vld [vmem:[%s9112_s28 + $0x220] sm:$0xff]  ;;  %v3917_v14 = vld [vmem:[%s9112_s28 + $0x218] sm:$0xff]  ;;  %v3922_v58 = vld [vmem:[%s9112_s28 + $0x408] sm:$0xff]  ;;  %s6380_s10 = sadd.s32 256, %s9285_s26  ;;  %s4687_s12 = sshra.s32 %s6378_s9, 7 }
 0x4fc   : >> { %3979 = vmatpush1.bf16.msra.mxu1 %v3946_v40  ;;  %4085 = vmatpush1.bf16.msra.mxu0 %v3950_v21  ;;  %v3924_v50 = vld [vmem:[%s9112_s28 + $0x418] sm:$0xff]  ;;  %v3921_v13 = vld [vmem:[%s9112_s28 + $0x400] sm:$0xff]  ;;  %v3923_v56 = vld [vmem:[%s9112_s28 + $0x410] sm:$0xff]  ;;  %s6256_s28 = sshll.u32 %s4630_s27, 3  ;;  %s4743_s13 = sshra.s32 %s6380_s10, 7 }
 0x4fd   : >> { %4027 = vmatprep.subr.bf16.mxu1 %v3937_v27  ;;  %4149 = vmatprep.subr.bf16.mxu0 %v3908_v46  ;;  %v4316_v51 = vld [vmem:[%s9164_s19 + $0x18] sm:$0xff]  ;;  %v4314_v24 = vld [vmem:[%s9164_s19 + $0x8] sm:$0xff]  ;;  %v4315_v61 = vld [vmem:[%s9164_s19 + $0x10] sm:$0xff]  ;;  %s9300_s8 = scalar_lea.vmem [#allocation4], %s6256_s28  ;;  %s6258_s14 = sshll.u32 %s4687_s12, 3 }
 0x4fe   : >> { %v4313_v35 = vld [vmem:[%s9164_s19] sm:$0xff]  ;;  %v4322_v38 = vld [vmem:[%s9164_s19 + $0x210] sm:$0xff]  ;;  %v4321_v29 = vld [vmem:[%s9164_s19 + $0x208] sm:$0xff]  ;;  %s6260_s15 = sshll.u32 %s4743_s13, 3  ;;  %s4690_s16 = scalar_lea.vmem [#allocation4], %s6258_s14 }
 0x4ff   : >> { %6229 = vmatmul.mubr.msk.bf16.vlgmr.msra.gmra.mrb[0].mxu1 %vm3967_vm5, %v6767_v20  ;;  %6233 = vmatmul.mubr.msk.bf16.vlgmr.msra.gmra.mrb[0].mxu0 %vm3967_vm5, %v6767_v20  ;;  %v4320_v2 = vld [vmem:[%s9164_s19 + $0x200] sm:$0xff]  ;;  %v4319_v48 = vld [vmem:[%s9164_s19 + $0x1f8] sm:$0xff]  ;;  %v4328_v11 = vld [vmem:[%s9164_s19 + $0x408] sm:$0xff]  ;;  %s4746_s17 = scalar_lea.vmem [#allocation4], %s6260_s15  ;;  %s9366_s13 = smov (%p3898_p5), 0  }
 0x500   : >> { %4028 = vmatpush1.bf16.msra.mxu1 %v3936_v52  ;;  %4150 = vmatpush1.bf16.msra.mxu0 %v3907_v1  ;;  %v4326_v4 = vld [vmem:[%s9164_s19 + $0x3f8] sm:$0xff]  ;;  %v4327_v15 = vld [vmem:[%s9164_s19 + $0x400] sm:$0xff]  ;;  %v4325_v44 = vld [vmem:[%s9164_s19 + $0x3f0] sm:$0xff] }
 0x501   : >> { %4029 = vmatprep.subr.bf16.mxu1 %v3943_v37  ;;  %4016 = vmatprep.mubr.bf16.mxu1 %v6867_v23  ;;  %v4318_v32 = vld [vmem:[%s9164_s19 + $0x28] sm:$0xff]  ;;  %v4317_v62 = vld [vmem:[%s9164_s19 + $0x20] sm:$0xff]  ;;  %v4323_v16 = vld [vmem:[%s9164_s19 + $0x218] sm:$0xff] }
 0x502   : >> { %4122 = vmatprep.mubr.bf16.mxu0 %v6867_v23  ;;  %4151 = vmatprep.subr.bf16.mxu0 %v3914_v5  ;;  %v4324_v47 = vld [vmem:[%s9164_s19 + $0x220] sm:$0xff]  ;;  %v4330_v60 = vld [vmem:[%s9164_s19 + $0x418] sm:$0xff]  ;;  %v4329_v26 = vld [vmem:[%s9164_s19 + $0x410] sm:$0xff] }
 0x503   : > { %v9349_v9 = vld [vmem:[%s9738_s6 + $0x20] sm:$0xff] (%p3898_p5)  ;;  %v9354_v59 = vld [vmem:[%s9738_s6 + $0x28] sm:$0xff] (%p3898_p5)  ;;  %v9359_v17 = vld [vmem:[%s9738_s6 + $0x30] sm:$0xff] (%p3898_p5) }
 0x504   : >> { %4030 = vmatpush1.bf16.msra.mxu1 %v3942_v0  ;;  %4152 = vmatpush1.bf16.msra.mxu0 %v3913_v8  ;;  %v9364_v39 = vld [vmem:[%s9738_s6 + $0x38] sm:$0xff] (%p3898_p5) }
 0x505   : >> { %4031 = vmatprep.subr.bf16.mxu1 %v3949_v63  ;;  %4153 = vmatprep.subr.bf16.mxu0 %v3920_v7 }
 0x507   : >> { %6230 = vmatmul.mubr.msk.bf16.gmra.mrb[4].mxu1 %vm3967_vm5, %v6768_v19  ;;  %6234 = vmatmul.mubr.msk.bf16.gmra.mrb[4].mxu0 %vm3967_vm5, %v6768_v19 }
 0x508   : >> { %4032 = vmatpush1.bf16.msra.mxu1 %v3948_v34  ;;  %4154 = vmatpush1.bf16.msra.mxu0 %v3919_v53 }
 0x509   : >> { %4059 = vmatprep.mubr.bf16.mxu1 %v6867_v23  ;;  %4181 = vmatprep.mubr.bf16.mxu0 %v6867_v23 }
 0x50a   : >> { %4202 = vmatprep.subr.bf16.mxu1 %v3910_v18  ;;  %4255 = vmatprep.subr.bf16.mxu0 %v3912_v42 }
 0x50f   : >> { %6231 = vmatmul.mubr.msk.bf16.vlgmr.msra.gmra.mrb[8].mxu1 %vm3967_vm5, %v6767_v20  ;;  %6237 = vmatmul.mubr.msk.bf16.vlgmr.msra.gmra.mrb[8].mxu0 %vm3967_vm5, %v6769_v28 }
 0x510   : >> { %4203 = vmatpush1.bf16.msra.mxu1 %v3909_v43  ;;  %4256 = vmatpush1.bf16.msra.mxu0 %v3911_v30 }
 0x511   : >> { %4204 = vmatprep.subr.bf16.mxu1 %v3916_v10  ;;  %4069 = vmatprep.mubr.bf16.mxu1 %v6867_v23 }
 0x512   : >> { %4191 = vmatprep.mubr.bf16.mxu0 %v6867_v23  ;;  %4257 = vmatprep.subr.bf16.mxu0 %v3918_v33 }
 0x514   : >> { %4205 = vmatpush1.bf16.msra.mxu1 %v3915_v36  ;;  %4258 = vmatpush1.bf16.msra.mxu0 %v3917_v14 }
 0x515   : >> { %4206 = vmatprep.subr.bf16.mxu1 %v3922_v58  ;;  %4259 = vmatprep.subr.bf16.mxu0 %v3924_v50 }
 0x517   : >> { %6232 = vmatmul.mubr.msk.bf16.gmra.mrb[12].mxu1 %vm3967_vm5, %v6768_v19  ;;  %6238 = vmatmul.mubr.msk.bf16.gmra.mrb[12].mxu0 %vm3967_vm5, %v6770_v12 }
 0x518   : >> { %4207 = vmatpush1.bf16.msra.mxu1 %v3921_v13  ;;  %4260 = vmatpush1.bf16.msra.mxu0 %v3923_v56 }
 0x519   : >> { %4234 = vmatprep.mubr.bf16.mxu1 %v6867_v23  ;;  %4287 = vmatprep.mubr.bf16.mxu0 %v6867_v23 }
 0x51a   : >> { %4405 = vmatprep.subr.bf16.mxu1 %v4316_v51  ;;  %4352 = vmatprep.subr.bf16.mxu0 %v4314_v24 }
 0x51f   : >> { %6239 = vmatmul.mubr.msk.bf16.vlgmr.msra.gmra.mrb[8].mxu1 %vm3967_vm5, %v6769_v28  ;;  %6241 = vmatmul.mubr.msk.bf16.vlgmr.msra.gmra.mrb[0].mxu0 %vm3967_vm5, %v6769_v28 }
 0x520   : >> { %4406 = vmatpush1.bf16.msra.mxu1 %v4315_v61  ;;  %4353 = vmatpush1.bf16.msra.mxu0 %v4313_v35 }
 0x521   : >> { %4407 = vmatprep.subr.bf16.mxu1 %v4322_v38  ;;  %4244 = vmatprep.mubr.bf16.mxu1 %v6867_v23 }
 0x522   : >> { %4297 = vmatprep.mubr.bf16.mxu0 %v6867_v23  ;;  %4354 = vmatprep.subr.bf16.mxu0 %v4320_v2 }
 0x524   : >> { %4408 = vmatpush1.bf16.msra.mxu1 %v4321_v29  ;;  %4355 = vmatpush1.bf16.msra.mxu0 %v4319_v48 }
 0x525   : >> { %4409 = vmatprep.subr.bf16.mxu1 %v4328_v11  ;;  %4356 = vmatprep.subr.bf16.mxu0 %v4326_v4 }
 0x527   : >> { %6240 = vmatmul.mubr.msk.bf16.gmra.mrb[12].mxu1 %vm3967_vm5, %v6770_v12  ;;  %6242 = vmatmul.mubr.msk.bf16.gmra.mrb[4].mxu0 %vm3967_vm5, %v6770_v12 }
 0x528   : >> { %4410 = vmatpush1.bf16.msra.mxu1 %v4327_v15  ;;  %4357 = vmatpush1.bf16.msra.mxu0 %v4325_v44 }
 0x529   : >> { %4384 = vmatprep.mubr.bf16.mxu0 %v6867_v23  ;;  %4437 = vmatprep.mubr.bf16.mxu1 %v6867_v23 }
 0x52a   : >> { %4458 = vmatprep.subr.bf16.mxu0 %v4318_v32  ;;  %6500 = vmatprep.subr.bf16.mxu1 %v4318_v32 }
 0x52f   : >> { %6250 = vmatmul.mubr.msk.bf16.vlgmr.msra.gmra.mrb[8].mxu0 %vm3967_vm5, %v6771_v6  ;;  %6252 = vmatmul.mubr.msk.bf16.vlgmr.msra.gmra.mrb[8].mxu1 %vm3967_vm5, %v6771_v6 }
 0x530   : >> { %4459 = vmatpush1.bf16.msra.mxu0 %v4317_v62  ;;  %6503 = vmatpush1.bf16.msra.mxu1 %v4317_v62 }
 0x531   : >> { %4394 = vmatprep.mubr.bf16.mxu0 %v6867_v23  ;;  %4447 = vmatprep.mubr.bf16.mxu1 %v6867_v23 }
 0x532   : >> { %4460 = vmatprep.subr.bf16.mxu0 %v4324_v47  ;;  %6501 = vmatprep.subr.bf16.mxu1 %v4324_v47 }
 0x534   : >> { %4461 = vmatpush1.bf16.msra.mxu0 %v4323_v16  ;;  %6504 = vmatpush1.bf16.msra.mxu1 %v4323_v16 }
 0x535   : >> { %4462 = vmatprep.subr.bf16.mxu0 %v4330_v60  ;;  %6502 = vmatprep.subr.bf16.mxu1 %v4330_v60 }
 0x537   : >> { %6251 = vmatmul.mubr.msk.bf16.gmra.mrb[12].mxu0 %vm3967_vm5, %v6772_v41  ;;  %6253 = vmatmul.mubr.msk.bf16.gmra.mrb[12].mxu1 %vm3967_vm5, %v6772_v41 }
 0x538   : >> { %4463 = vmatpush1.bf16.msra.mxu0 %v4329_v26  ;;  %6505 = vmatpush1.bf16.msra.mxu1 %v4329_v26 }
 0x539   : >> { %4490 = vmatprep.mubr.bf16.mxu0 %v6867_v23  ;;  %4500 = vmatprep.mubr.bf16.mxu1 %v6867_v23 }
 0x53f   : >> { %6254 = vmatmul.mubr.msk.bf16.vlgmr.msra.gmra.mrb[0].mxu0 %vm3967_vm5, %v6771_v6  ;;  %6255 = vmatmul.mubr.msk.bf16.vlgmr.msra.gmra.mrb[16].mxu1 %vm3967_vm5, %v6772_v41 }
 0x56d   : >> { %v9214_v21 = vpop.permute.xlu0 %4537  ;;  %v9222_v20 = vpop.permute.xlu1 %4547 }
 0x571   : >> { %v9220_v46 = vpop.permute.xlu0 %4542  ;;  %v9234_v35 = vpop.permute.xlu1 %4552 }
 0x5d2   : >> { %v4008_v57 = vpop.f32.mrb[0].mxu1 }
 0x5d3   : >> { %v4010_v55 = vpop.f32.mrb[1].mxu1 }
 0x5d4   : >> { %v4012_v49 = vpop.f32.mrb[2].mxu1 }
 0x5d5   : >> { %v4014_v45 = vpop.f32.mrb[3].mxu1 }
 0x5da   : >> { %v4018_v3 = vpop.f32.mrb[4].mxu1 }
 0x5db   : >> { %v4020_v22 = vpop.f32.mrb[5].mxu1 }
 0x5dc   : >> { %v4022_v25 = vpop.f32.mrb[6].mxu1 }
 0x5dd   : >> { %v4024_v31 = vpop.f32.mrb[7].mxu1 }
 0x5fa   : >> { %v9210_v54 = vpop.f32.mrb[4].mxu0 }
 0x5fb   : >> { %v9212_v40 = vpop.f32.mrb[5].mxu0 }
 0x5fc   : >> { %v9216_v27 = vpop.f32.mrb[6].mxu0 }
 0x5fd   : >> { %v9218_v23 = vpop.f32.mrb[7].mxu0 }
 0x602   : >> { %v4386_v52 = vpop.f32.mrb[8].mxu0  ;;  %v4439_v1 = vpop.f32.mrb[8].mxu1 }
 0x603   : >> { %v6506_v37 = vadd.f32 %v4386_v52, %v4008_v57  ;;  %v4557_v5 = vadd.f32 %v9214_v21, %v4439_v1  ;;  %v4388_v0 = vpop.f32.mrb[9].mxu0  ;;  %v4441_v8 = vpop.f32.mrb[9].mxu1 }
 0x604   : >> { %v6507_v63 = vadd.f32 %v4388_v0, %v4010_v55  ;;  %v4558_v7 = vadd.f32 %v9214_v21, %v4441_v8  ;;  %v4390_v19 = vpop.f32.mrb[10].mxu0  ;;  %v4443_v34 = vpop.f32.mrb[10].mxu1 }
 0x605   : >> { %v4555_v53 = vadd.f32 %v6506_v37, %v9214_v21  ;;  %v4581_v18 = vmax.f32 %v4557_v5, 0.0  ;;  %v6508_v42 = vadd.f32 %v4390_v19, %v4012_v49  ;;  %v4563_v28 = vadd.f32 %v9220_v46, %v4443_v34  ;;  %v4392_v43 = vpop.f32.mrb[11].mxu0  ;;  %v4445_v30 = vpop.f32.mrb[11].mxu1 }
 0x606   : >> { %v4556_v10 = vadd.f32 %v6507_v63, %v9214_v21  ;;  %v4582_v33 = vmax.f32 %v4558_v7, 0.0  ;;  %v6509_v36 = vadd.f32 %v4392_v43, %v4014_v45  ;;  %v4564_v14 = vadd.f32 %v9220_v46, %v4445_v30 }
 0x607   : >> { %v4579_v58 = vmax.f32 %v4555_v53, 0.0  ;;  %v4561_v50 = vadd.f32 %v6508_v42, %v9220_v46  ;;  %v4587_v12 = vmax.f32 %v4563_v28, 0.0 }
 0x608   : >> { %v4580_v13 = vmax.f32 %v4556_v10, 0.0  ;;  %v9231_v56 = vmax.f32 %v4581_v18, %v4582_v33  ;;  %v4562_v51 = vadd.f32 %v6509_v36, %v9220_v46  ;;  %v4588_v24 = vmax.f32 %v4564_v14, 0.0 }
 0x609   : >> { %v4585_v61 = vmax.f32 %v4561_v50, 0.0 }
 0x60a   : >> { %v9236_v38 = vmax.f32 %v4579_v58, %v4580_v13  ;;  %v4586_v2 = vmax.f32 %v4562_v51, 0.0  ;;  %v9238_v29 = vmax.f32 %v4587_v12, %v4588_v24  ;;  %v4396_v48 = vpop.f32.mrb[12].mxu0  ;;  %v4449_v11 = vpop.f32.mrb[12].mxu1 }
 0x60b   : >> { %v6510_v4 = vadd.f32 %v4396_v48, %v4018_v3  ;;  %v4569_v15 = vadd.f32 %v9222_v20, %v4449_v11  ;;  %v4398_v44 = vpop.f32.mrb[13].mxu0  ;;  %v4451_v32 = vpop.f32.mrb[13].mxu1 }
 0x60c   : >> { %v9241_v6 = vmax.f32 %v4585_v61, %v4586_v2  ;;  %v6511_v62 = vadd.f32 %v4398_v44, %v4020_v22  ;;  %v4570_v47 = vadd.f32 %v9222_v20, %v4451_v32  ;;  %v4400_v16 = vpop.f32.mrb[14].mxu0  ;;  %v4453_v60 = vpop.f32.mrb[14].mxu1  ;;  %v6737_v41 = vpack.i.bf16 %v9238_v29, %v9231_v56 }
 0x60d   : >> { %v4567_v26 = vadd.f32 %v6510_v4, %v9222_v20  ;;  %v4593_v57 = vmax.f32 %v4569_v15, 0.0  ;;  %v6512_v55 = vadd.f32 %v4400_v16, %v4022_v25  ;;  %v4575_v49 = vadd.f32 %v9234_v35, %v4453_v60  ;;  %v4402_v45 = vpop.f32.mrb[15].mxu0  ;;  %v4455_v3 = vpop.f32.mrb[15].mxu1 }
 0x60e   : >> { %v4568_v52 = vadd.f32 %v6511_v62, %v9222_v20  ;;  %v4594_v1 = vmax.f32 %v4570_v47, 0.0  ;;  %v6513_v37 = vadd.f32 %v4402_v45, %v4024_v31  ;;  %v4576_v22 = vadd.f32 %v9234_v35, %v4455_v3  ;;  %6738 = vrot.lane.b32.xlu0 %v6737_v41, %s6868_s25 }
 0x60f   : >> { %v4591_v5 = vmax.f32 %v4567_v26, 0.0  ;;  %v4573_v0 = vadd.f32 %v6512_v55, %v9234_v35  ;;  %v4599_v8 = vmax.f32 %v4575_v49, 0.0  ;;  %v6742_v25 = vpack.i.bf16 %v9241_v6, %v9236_v38 }
 0x610   : >> { %v4592_v63 = vmax.f32 %v4568_v52, 0.0  ;;  %v9254_v7 = vmax.f32 %v4593_v57, %v4594_v1  ;;  %v4574_v19 = vadd.f32 %v6513_v37, %v9234_v35  ;;  %v4600_v34 = vmax.f32 %v4576_v22, 0.0 }
 0x611   : >> { %v4597_v53 = vmax.f32 %v4573_v0, 0.0 }
 0x612   : >> { %v9257_v31 = vmax.f32 %v4591_v5, %v4592_v63  ;;  %v4598_v18 = vmax.f32 %v4574_v19, 0.0  ;;  %v9259_v42 = vmax.f32 %v4599_v8, %v4600_v34  ;;  %v4502_v28 = vpop.f32.mrb[16].mxu1  ;;  %6743 = vrot.lane.b32.xlu0 %v6742_v25, %s6868_s25  ;;  %v4492_v43 = vpop.f32.mrb[0].mxu0 }
 0x613   : >> { %v6514_v30 = vadd.f32 %v4502_v28, %v9210_v54  ;;  %v4559_v10 = vadd.f32 %v9214_v21, %v4492_v43  ;;  %v4494_v33 = vpop.f32.mrb[1].mxu0  ;;  %v4504_v36 = vpop.f32.mrb[17].mxu1 }
 0x614   : >> { %v9264_v14 = vmax.f32 %v4597_v53, %v4598_v18  ;;  %v4560_v58 = vadd.f32 %v9214_v21, %v4494_v33  ;;  %v6515_v50 = vadd.f32 %v4504_v36, %v9212_v40  ;;  %v4496_v12 = vpop.f32.mrb[2].mxu0  ;;  %v4506_v13 = vpop.f32.mrb[18].mxu1  ;;  %v6747_v51 = vpack.i.bf16 %v9259_v42, %v9254_v7 }
 0x615   : >> { %v4571_v24 = vadd.f32 %v6514_v30, %v9222_v20  ;;  %v4583_v61 = vmax.f32 %v4559_v10, 0.0  ;;  %v4565_v54 = vadd.f32 %v9220_v46, %v4496_v12  ;;  %v6516_v2 = vadd.f32 %v4506_v13, %v9216_v27  ;;  %v4498_v48 = vpop.f32.mrb[3].mxu0  ;;  %v4508_v11 = vpop.f32.mrb[19].mxu1 }
 0x616   : >> { %v4584_v4 = vmax.f32 %v4560_v58, 0.0  ;;  %v4572_v15 = vadd.f32 %v6515_v50, %v9222_v20  ;;  %v4566_v21 = vadd.f32 %v9220_v46, %v4498_v48  ;;  %v6517_v40 = vadd.f32 %v4508_v11, %v9218_v23  ;;  %6748 = vrot.lane.b32.xlu1 %v6747_v51, %s6868_s25 }
 0x617   : >> { %v4595_v44 = vmax.f32 %v4571_v24, 0.0  ;;  %v4589_v32 = vmax.f32 %v4565_v54, 0.0  ;;  %v4577_v62 = vadd.f32 %v6516_v2, %v9234_v35  ;;  %v6752_v47 = vpack.i.bf16 %v9264_v14, %v9257_v31 }
 0x618   : >> { %v4715_v27 = vmax.f32 %v4583_v61, %v4584_v4  ;;  %v4596_v16 = vmax.f32 %v4572_v15, 0.0  ;;  %v4590_v60 = vmax.f32 %v4566_v21, 0.0  ;;  %v4578_v41 = vadd.f32 %v6517_v40, %v9234_v35 }
 0x619   : >> { %v4601_v20 = vmax.f32 %v4577_v62, 0.0 }
 0x61a   : >> { %v4717_v26 = vmax.f32 %v4595_v44, %v4596_v16  ;;  %v4716_v46 = vmax.f32 %v4589_v32, %v4590_v60  ;;  %v4602_v57 = vmax.f32 %v4578_v41, 0.0  ;;  %6753 = vrot.lane.b32.xlu1 %v6752_v47, %s6868_s25  ;;  %v9329_v47 = vld [vmem:[%s9738_s6] sm:$0xff] (%p3898_p5)  ;;  %v9339_v16 = vld [vmem:[%s9738_s6 + $0x10] sm:$0xff] (%p3898_p5)  ;;  %v9344_v60 = vld [vmem:[%s9738_s6 + $0x18] sm:$0xff] (%p3898_p5) }
 0x61c   : >> { %v4718_v23 = vmax.f32 %v4601_v20, %v4602_v57  ;;  %v6757_v55 = vpack.i.bf16 %v4716_v46, %v4715_v27 }
 0x61e   : >> { %6758 = vrot.lane.b32.xlu0 %v6757_v55, %s6868_s25  ;;  %v6762_v49 = vpack.i.bf16 %v4718_v23, %v4717_v26 }
 0x620   : >> { %6763 = vrot.lane.b32.xlu1 %v6762_v49, %s6868_s25 }
 0x680   : >> { %v6739_v45 = vpop.permute.xlu0 %6738 }
 0x681   : >> { %v6741_v3 = vunpack.i.h.bf16 %v6739_v45  ;;  %v6740_v52 = vunpack.i.l.bf16 %v6739_v45 }
 0x683   : >> { %v4679_v35 = vmax.f32 %v9238_v29, %v6741_v3  ;;  %v4678_v1 = vmax.f32 %v9231_v56, %v6740_v52 }
 0x684   : >> { %v6744_v37 = vpop.permute.xlu0 %6743 }
 0x685   : >> { %v6746_v22 = vunpack.i.h.bf16 %v6744_v37  ;;  %v6745_v5 = vunpack.i.l.bf16 %v6744_v37  ;;  %v9290_v0 = vpack.c.bf16 %v4679_v35, %v4678_v1 }
 0x687   : >> { %v4624_v8 = vmax.f32 %v9241_v6, %v6746_v22  ;;  %v4623_v25 = vmax.f32 %v9236_v38, %v6745_v5  ;;  %4695 = vrot.lane.b32.xlu0 %v9290_v0, %s6869_s29 }
 0x688   : >> { %v6749_v63 = vpop.permute.xlu1 %6748 }
 0x689   : >> { %v6751_v19 = vunpack.i.h.bf16 %v6749_v63  ;;  %v6750_v34 = vunpack.i.l.bf16 %v6749_v63  ;;  %v4628_v29 = vpack.c.bf16 %v4624_v8, %v4623_v25 }
 0x68b   : >> { %v4681_v56 = vmax.f32 %v9259_v42, %v6751_v19  ;;  %v4680_v53 = vmax.f32 %v9254_v7, %v6750_v34  ;;  %4705 = vrot.lane.b32.xlu0 %v9290_v0, %s6870_s30  ;;  %4634 = vst [vmem:[%s9300_s8] sm:$0xff] %v4628_v29 }
 0x68c   : >> { %v6754_v38 = vpop.permute.xlu1 %6753 }
 0x68d   : >> { %v6756_v6 = vunpack.i.h.bf16 %v6754_v38  ;;  %v6755_v18 = vunpack.i.l.bf16 %v6754_v38  ;;  %v4686_v28 = vpack.c.bf16 %v4681_v56, %v4680_v53 }
 0x68f   : >> { %v4626_v43 = vmax.f32 %v9264_v14, %v6756_v6  ;;  %v4625_v30 = vmax.f32 %v9257_v31, %v6755_v18  ;;  %4697 = vrot.lane.b32.xlu1 %v4686_v28, %s6869_s29  ;;  %4638 = vrot.lane.b32.xlu0 %v4628_v29, %s6869_s29 }
 0x690   : >> { %v6759_v7 = vpop.permute.xlu0 %6758 }
 0x691   : >> { %v6761_v42 = vunpack.i.h.bf16 %v6759_v7  ;;  %v6760_v10 = vunpack.i.l.bf16 %v6759_v7  ;;  %v4629_v33 = vpack.c.bf16 %v4626_v43, %v4625_v30 }
 0x692   : >> { %v6764_v36 = vpop.permute.xlu1 %6763 }
 0x693   : >> { %v4736_v58 = vmax.f32 %v4716_v46, %v6761_v42  ;;  %v4735_v50 = vmax.f32 %v4715_v27, %v6760_v10  ;;  %4707 = vrot.lane.b32.xlu1 %v4686_v28, %s6870_s30  ;;  %4648 = vrot.lane.b32.xlu0 %v4628_v29, %s6870_s30  ;;  %4635 = vst [vmem:[%s9300_s8 + $0xf0] sm:$0xff] %v4629_v33  ;;  %v6766_v12 = vunpack.i.h.bf16 %v6764_v36  ;;  %v6765_v14 = vunpack.i.l.bf16 %v6764_v36  ;;  %v9334_v27 = vld [vmem:[%s9738_s6 + $0x8] sm:$0xff] (%p3898_p5) }
 0x695   : >> { %v4741_v31 = vpack.c.bf16 %v4736_v58, %v4735_v50  ;;  %v4738_v13 = vmax.f32 %v4718_v23, %v6766_v12  ;;  %v4737_v51 = vmax.f32 %v4717_v26, %v6765_v14 }
 0x697   : >> { %4640 = vrot.lane.b32.xlu1 %v4629_v33, %s6869_s29  ;;  %4751 = vrot.lane.b32.xlu0 %v4741_v31, %s6869_s29  ;;  %v4742_v24 = vpack.c.bf16 %v4738_v13, %v4737_v51 }
 0x69b   : >> { %4650 = vrot.lane.b32.xlu1 %v4629_v33, %s6870_s30  ;;  %4761 = vrot.lane.b32.xlu0 %v4741_v31, %s6870_s30 }
 0x69f   : >> { %4753 = vrot.lane.b32.xlu1 %v4742_v24, %s6869_s29 }
 0x6a3   : >> { %4763 = vrot.lane.b32.xlu1 %v4742_v24, %s6870_s30 }
 0x6f9   : >> { %v4696_v61 = vpop.permute.xlu0 %4695 }
 0x6fd   : >> { %v4706_v54 = vpop.permute.xlu0 %4705 }
 0x701   : >> { %v4698_v2 = vpop.permute.xlu1 %4697  ;;  %v4639_v48 = vpop.permute.xlu0 %4638 }
 0x702   : >> { %4646 = vst [vmem:[%s9300_s8 + $0x1e0] sm:$0xff] %v4639_v48 }
 0x705   : >> { %v4708_v11 = vpop.permute.xlu1 %4707  ;;  %v4649_v4 = vpop.permute.xlu0 %4648 }
 0x706   : >> { %4656 = vst [vmem:[%s9300_s8 + $0x3c0] sm:$0xff] %v4649_v4 }
 0x709   : >> { %v4641_v15 = vpop.permute.xlu1 %4640  ;;  %v4752_v21 = vpop.permute.xlu0 %4751 }
 0x70a   : >> { %4647 = vst [vmem:[%s9300_s8 + $0x2d0] sm:$0xff] %v4641_v15 }
 0x70d   : >> { %v4651_v40 = vpop.permute.xlu1 %4650  ;;  %v4762_v44 = vpop.permute.xlu0 %4761 }
 0x70e   : >> { %4657 = vst [vmem:[%s9300_s8 + $0x4b0] sm:$0xff] %v4651_v40 }
 0x70f   : >> { %4691 = vst [vmem:[%s4690_s16] sm:$0xff] %v9290_v0  ;;  %4692 = vst [vmem:[%s4690_s16 + $0xf0] sm:$0xff] %v4686_v28 }
 0x710   : >> { %4703 = vst [vmem:[%s4690_s16 + $0x1e0] sm:$0xff] %v4696_v61  ;;  %4704 = vst [vmem:[%s4690_s16 + $0x2d0] sm:$0xff] %v4698_v2  ;;  %3900 = sbr.rel (!%p3898_p5) target bundleno = 1259 (0x4eb), region = 133 }
 0x711   : >> { %4713 = vst [vmem:[%s4690_s16 + $0x3c0] sm:$0xff] %v4706_v54  ;;  %4714 = vst [vmem:[%s4690_s16 + $0x4b0] sm:$0xff] %v4708_v11  ;;  %v4754_v32 = vpop.permute.xlu1 %4753 }
 0x712   : >> { %4747 = vst [vmem:[%s4746_s17] sm:$0xff] %v4741_v31  ;;  %4748 = vst [vmem:[%s4746_s17 + $0xf0] sm:$0xff] %v4742_v24 }
 0x713   : >> { %4759 = vst [vmem:[%s4746_s17 + $0x1e0] sm:$0xff] %v4752_v21  ;;  %4769 = vst [vmem:[%s4746_s17 + $0x3c0] sm:$0xff] %v4762_v44 }
 0x714   : >> { %4760 = vst [vmem:[%s4746_s17 + $0x2d0] sm:$0xff] %v4754_v32 }
 0x715   : >> { %v4764_v62 = vpop.permute.xlu1 %4763 }
 0x716   : >> { %4770 = vst [vmem:[%s4746_s17 + $0x4b0] sm:$0xff] %v4764_v62 }
 0x717 LB: >> { %v6871_v41 = vmov 0   ;;  %s9374_s14 = sshll.u32 %s6857_s13, 9  ;;  %v6815_v18 = vld [vmem:[%s9737_s5 + $0x20] sm:$0xff]   ;;  %vm4880_vm6 = vcmask 785408   ;;  %v6816_v58 = vld [vmem:[%s9737_s5 + $0x28] sm:$0xff]   ;;  %v6817_v24 = vld [vmem:[%s9737_s5 + $0x30] sm:$0xff]   ;;  %s6857_s13 = sphi %s9366_s13, %s4784_s13  }
 0x718   : >> { %4925 = vmatprep.mubr.bf16.mxu0 %v6871_v41  ;;  %4998 = vmatprep.mubr.bf16.mxu1 %v6871_v41  ;;  %s4822_s15 = sadd.s32 128, %s9374_s14  ;;  %s4786_s20 = sshra.s32 %s9374_s14, 7  ;;  %v6818_v21 = vld [vmem:[%s9737_s5 + $0x38] sm:$0xff]   ;;  %v6819_v62 = vld [vmem:[%s9737_s5] sm:$0xff]   ;;  %vm6319_vm5 = vmpackc.low %vm3040_vm10, %vm3039_vm9 }
 0x719   : >> { %6773 = vset.pattern.permute.xlu0 %v6871_v41  ;;  %6774 = vset.pattern.permute.xlu1 %v6871_v41  ;;  %s4823_s16 = sshra.s32 %s4822_s15, 7  ;;  %s6262_s21 = sshll.u32 %s4786_s20, 3 }
 0x71a   : >> { %5467 = vperm.xlu0 %6773, %v9329_v47   ;;  %5477 = vperm.xlu1 %6774, %v9339_v16   ;;  %s6263_s17 = sshll.u32 %s4823_s16, 3  ;;  %s9414_s22 = scalar_lea.vmem [#allocation4], %s6262_s21 }
 0x71b   : >> { %s9381_s19 = scalar_lea.vmem [#allocation4], %s6263_s17  ;;  %s5217_s18 = sadd.s32 256, %s9374_s14 }
 0x71c   : >> { %s5218_s28 = sshra.s32 %s5217_s18, 7  ;;  %s6333_s9 = sshll.u32 %s6857_s13, 7 }
 0x71d   : >> { %v4828_v20 = vld [vmem:[%s9381_s19 + $0x8] sm:$0xff]  ;;  %v4830_v26 = vld [vmem:[%s9381_s19 + $0x18] sm:$0xff]  ;;  %v4827_v46 = vld [vmem:[%s9381_s19] sm:$0xff]  ;;  %s6296_s8 = sshll.u32 %s5218_s28, 3  ;;  %s5719_s10 = sshra.s32 %s6333_s9, 3 }
 0x71e   : >> { %5472 = vperm.xlu0 %6773, %v9334_v27   ;;  %5482 = vperm.xlu1 %6774, %v9344_v60   ;;  %v4829_v57 = vld [vmem:[%s9381_s19 + $0x10] sm:$0xff]  ;;  %v4832_v23 = vld [vmem:[%s9381_s19 + $0xf8] sm:$0xff]  ;;  %v4834_v55 = vld [vmem:[%s9381_s19 + $0x108] sm:$0xff]  ;;  %s9465_s12 = scalar_lea.vmem [#allocation4], %s6296_s8  ;;  %s6873_s8 = smov 124  }
 0x71f   : >> { %4893 = vmatprep.subr.bf16.mxu0 %v4828_v20  ;;  %4966 = vmatprep.subr.bf16.mxu1 %v4830_v26  ;;  %v4831_v49 = vld [vmem:[%s9381_s19 + $0xf0] sm:$0xff]  ;;  %v4833_v45 = vld [vmem:[%s9381_s19 + $0x100] sm:$0xff]  ;;  %v4836_v3 = vld [vmem:[%s9381_s19 + $0x1e8] sm:$0xff]  ;;  %s6390_s15 = sadd.s32 64, %s6333_s9  ;;  %s4784_s13 = sadd.s32 1, %s6857_s13  }
 0x720   : >> { %4894 = vmatpush1.bf16.msra.mxu0 %v4827_v46  ;;  %4967 = vmatpush1.bf16.msra.mxu1 %v4829_v57  ;;  %v4838_v52 = vld [vmem:[%s9381_s19 + $0x1f8] sm:$0xff]  ;;  %v4835_v35 = vld [vmem:[%s9381_s19 + $0x1e0] sm:$0xff]  ;;  %v4837_v1 = vld [vmem:[%s9381_s19 + $0x1f0] sm:$0xff]  ;;  %s5884_s16 = sshra.s32 %s6390_s15, 3  ;;  %p4781_p6 = scmp.ge.s32.totalorder %s4784_s13, 7  }
 0x721   : >> { %4895 = vmatprep.subr.bf16.mxu0 %v4832_v23  ;;  %4968 = vmatprep.subr.bf16.mxu1 %v4834_v55  ;;  %v4840_v37 = vld [vmem:[%s9381_s19 + $0x2d8] sm:$0xff]  ;;  %v4842_v22 = vld [vmem:[%s9381_s19 + $0x2e8] sm:$0xff]  ;;  %v4839_v5 = vld [vmem:[%s9381_s19 + $0x2d0] sm:$0xff]  ;;  %s6369_s17 = sshll.u32 %s5884_s16, 2 }
 0x722   : >> { %5487 = vperm.xlu0 %6773, %v9349_v9   ;;  %5492 = vperm.xlu1 %6774, %v9354_v59   ;;  %v4841_v0 = vld [vmem:[%s9381_s19 + $0x2e0] sm:$0xff]  ;;  %v4844_v8 = vld [vmem:[%s9381_s19 + $0x3c8] sm:$0xff]  ;;  %v4846_v25 = vld [vmem:[%s9381_s19 + $0x3d8] sm:$0xff] }
 0x723   : >> { %v4843_v63 = vld [vmem:[%s9381_s19 + $0x3c0] sm:$0xff]  ;;  %v4845_v19 = vld [vmem:[%s9381_s19 + $0x3d0] sm:$0xff]  ;;  %v4848_v34 = vld [vmem:[%s9381_s19 + $0x4b8] sm:$0xff] }
 0x724   : >> { %4896 = vmatpush1.bf16.msra.mxu0 %v4831_v49  ;;  %4969 = vmatpush1.bf16.msra.mxu1 %v4833_v45  ;;  %v4850_v29 = vld [vmem:[%s9381_s19 + $0x4c8] sm:$0xff]  ;;  %v4847_v56 = vld [vmem:[%s9381_s19 + $0x4b0] sm:$0xff]  ;;  %v4849_v53 = vld [vmem:[%s9381_s19 + $0x4c0] sm:$0xff]  ;;  %s5887_s19 = scalar_lea.vmem %s7173_s11, %s6369_s17 }
 0x725   : >> { %4897 = vmatprep.subr.bf16.mxu0 %v4836_v3  ;;  %4970 = vmatprep.subr.bf16.mxu1 %v4838_v52  ;;  %v4791_v38 = vld [vmem:[%s9414_s22 + $0x8] sm:$0xff]  ;;  %v4793_v6 = vld [vmem:[%s9414_s22 + $0x18] sm:$0xff]  ;;  %v4790_v28 = vld [vmem:[%s9414_s22] sm:$0xff] }
 0x726   : >> { %5497 = vperm.xlu0 %6773, %v9359_v17   ;;  %5502 = vperm.xlu1 %6774, %v9364_v39   ;;  %v4792_v43 = vld [vmem:[%s9414_s22 + $0x10] sm:$0xff]  ;;  %v4795_v30 = vld [vmem:[%s9414_s22 + $0xf8] sm:$0xff]  ;;  %v4797_v42 = vld [vmem:[%s9414_s22 + $0x108] sm:$0xff] }
 0x727   : >> { %v4794_v7 = vld [vmem:[%s9414_s22 + $0xf0] sm:$0xff]  ;;  %v4799_v10 = vld [vmem:[%s9414_s22 + $0x1e8] sm:$0xff]  ;;  %v4796_v33 = vld [vmem:[%s9414_s22 + $0x100] sm:$0xff] }
 0x728   : >> { %4898 = vmatpush1.bf16.msra.mxu0 %v4835_v35  ;;  %4971 = vmatpush1.bf16.msra.mxu1 %v4837_v1  ;;  %v4801_v36 = vld [vmem:[%s9414_s22 + $0x1f8] sm:$0xff]  ;;  %v4798_v50 = vld [vmem:[%s9414_s22 + $0x1e0] sm:$0xff]  ;;  %v4800_v14 = vld [vmem:[%s9414_s22 + $0x1f0] sm:$0xff] }
 0x729   : >> { %4899 = vmatprep.subr.bf16.mxu0 %v4840_v37  ;;  %4972 = vmatprep.subr.bf16.mxu1 %v4842_v22  ;;  %v4803_v12 = vld [vmem:[%s9414_s22 + $0x2d8] sm:$0xff]  ;;  %v4805_v31 = vld [vmem:[%s9414_s22 + $0x2e8] sm:$0xff]  ;;  %v4802_v13 = vld [vmem:[%s9414_s22 + $0x2d0] sm:$0xff] }
 0x72a   : >> { %v4807_v51 = vld [vmem:[%s9414_s22 + $0x3c8] sm:$0xff]  ;;  %v4804_v61 = vld [vmem:[%s9414_s22 + $0x2e0] sm:$0xff]  ;;  %v4809_v2 = vld [vmem:[%s9414_s22 + $0x3d8] sm:$0xff] }
 0x72b   : >> { %v4806_v54 = vld [vmem:[%s9414_s22 + $0x3c0] sm:$0xff]  ;;  %v4808_v48 = vld [vmem:[%s9414_s22 + $0x3d0] sm:$0xff]  ;;  %v4811_v11 = vld [vmem:[%s9414_s22 + $0x4b8] sm:$0xff] }
 0x72c   : >> { %4900 = vmatpush1.bf16.msra.mxu0 %v4839_v5  ;;  %4973 = vmatpush1.bf16.msra.mxu1 %v4841_v0  ;;  %v4813_v4 = vld [vmem:[%s9414_s22 + $0x4c8] sm:$0xff]  ;;  %v4810_v15 = vld [vmem:[%s9414_s22 + $0x4b0] sm:$0xff]  ;;  %v4812_v40 = vld [vmem:[%s9414_s22 + $0x4c0] sm:$0xff] }
 0x72d   : >> { %4901 = vmatprep.subr.bf16.mxu0 %v4844_v8  ;;  %4974 = vmatprep.subr.bf16.mxu1 %v4846_v25  ;;  %v5223_v44 = vld [vmem:[%s9465_s12 + $0x8] sm:$0xff]  ;;  %v5225_v32 = vld [vmem:[%s9465_s12 + $0x18] sm:$0xff]  ;;  %v5222_v20 = vld [vmem:[%s9465_s12] sm:$0xff] }
 0x72e   : >> { %v5224_v26 = vld [vmem:[%s9465_s12 + $0x10] sm:$0xff]  ;;  %v5227_v46 = vld [vmem:[%s9465_s12 + $0xf8] sm:$0xff]  ;;  %v5229_v57 = vld [vmem:[%s9465_s12 + $0x108] sm:$0xff] }
 0x72f   : >> { %v5226_v23 = vld [vmem:[%s9465_s12 + $0xf0] sm:$0xff]  ;;  %v5228_v55 = vld [vmem:[%s9465_s12 + $0x100] sm:$0xff]  ;;  %v5231_v49 = vld [vmem:[%s9465_s12 + $0x1e8] sm:$0xff] }
 0x730   : >> { %4902 = vmatpush1.bf16.msra.mxu0 %v4843_v63  ;;  %4975 = vmatpush1.bf16.msra.mxu1 %v4845_v19  ;;  %v5233_v45 = vld [vmem:[%s9465_s12 + $0x1f8] sm:$0xff]  ;;  %v6820_v3 = vld [vmem:[%s9737_s5 + $0x8] sm:$0xff]   ;;  %v5230_v52 = vld [vmem:[%s9465_s12 + $0x1e0] sm:$0xff] }
 0x731   : >> { %4903 = vmatprep.subr.bf16.mxu0 %v4848_v34  ;;  %4976 = vmatprep.subr.bf16.mxu1 %v4850_v29  ;;  %v5235_v35 = vld [vmem:[%s9465_s12 + $0x2d8] sm:$0xff]  ;;  %v5232_v1 = vld [vmem:[%s9465_s12 + $0x1f0] sm:$0xff]  ;;  %v5237_v37 = vld [vmem:[%s9465_s12 + $0x2e8] sm:$0xff] }
 0x732   : >> { %v5234_v22 = vld [vmem:[%s9465_s12 + $0x2d0] sm:$0xff]  ;;  %v5239_v5 = vld [vmem:[%s9465_s12 + $0x3c8] sm:$0xff]  ;;  %v5236_v8 = vld [vmem:[%s9465_s12 + $0x2e0] sm:$0xff] }
 0x733   : >> { %v6821_v0 = vld [vmem:[%s9737_s5 + $0x10] sm:$0xff]   ;;  %v5238_v25 = vld [vmem:[%s9465_s12 + $0x3c0] sm:$0xff]  ;;  %v5241_v63 = vld [vmem:[%s9465_s12 + $0x3d8] sm:$0xff] }
 0x734   : >> { %4904 = vmatpush1.bf16.msra.mxu0 %v4847_v56  ;;  %4977 = vmatpush1.bf16.msra.mxu1 %v4849_v53  ;;  %v5240_v19 = vld [vmem:[%s9465_s12 + $0x3d0] sm:$0xff]  ;;  %v5243_v34 = vld [vmem:[%s9465_s12 + $0x4b8] sm:$0xff]  ;;  %v5245_v29 = vld [vmem:[%s9465_s12 + $0x4c8] sm:$0xff] }
 0x735   : >> { %5071 = vmatprep.subr.bf16.mxu0 %v4791_v38  ;;  %5144 = vmatprep.subr.bf16.mxu1 %v4793_v6  ;;  %v5242_v56 = vld [vmem:[%s9465_s12 + $0x4b0] sm:$0xff]  ;;  %v6822_v53 = vld [vmem:[%s9737_s5 + $0x18] sm:$0xff]   ;;  %v5244_v38 = vld [vmem:[%s9465_s12 + $0x4c0] sm:$0xff]  ;;  %s6342_s12 = sshll.u32 %s5719_s10, 2 }
 0x736   : >> { %v6823_v6 = vld [vmem:[%s9737_s5 + $0x40] sm:$0xff]   ;;  %s9699_s14 = scalar_lea.vmem %s7173_s11, %s6342_s12 }
 0x737   : >> { %6276 = vmatmul.mubr.msk.bf16.vlgmr.msra.gmra.mrb[0].mxu0 %vm4880_vm6, %v6815_v18  ;;  %6280 = vmatmul.mubr.msk.bf16.vlgmr.msra.gmra.mrb[0].mxu1 %vm4880_vm6, %v6815_v18  ;;  %v6824_v18 = vld [vmem:[%s9737_s5 + $0x48] sm:$0xff]  }
 0x738   : >> { %5072 = vmatpush1.bf16.msra.mxu0 %v4790_v28  ;;  %5145 = vmatpush1.bf16.msra.mxu1 %v4792_v43  ;;  %v6825_v28 = vld [vmem:[%s9737_s5 + $0x50] sm:$0xff]   ;;  %v6826_v43 = vld [vmem:[%s9737_s5 + $0x58] sm:$0xff]  }
 0x739   : >> { %5073 = vmatprep.subr.bf16.mxu0 %v4795_v30  ;;  %4935 = vmatprep.mubr.bf16.mxu0 %v6871_v41  ;;  %v10016_v30 = vld [vmem:[#allocation5_spill] sm:$0xff] }
 0x73a   : >> { %5008 = vmatprep.mubr.bf16.mxu1 %v6871_v41  ;;  %5146 = vmatprep.subr.bf16.mxu1 %v4797_v42 }
 0x73c   : >> { %5074 = vmatpush1.bf16.msra.mxu0 %v4794_v7  ;;  %5147 = vmatpush1.bf16.msra.mxu1 %v4796_v33  ;;  %v10017_v7 = vld [vmem:[#allocation21_spill] sm:$0xff] }
 0x73d   : >> { %5075 = vmatprep.subr.bf16.mxu0 %v4799_v10  ;;  %5148 = vmatprep.subr.bf16.mxu1 %v4801_v36  ;;  %vm10018_vm7 = vcmp.eq.s32.totalorder %v10016_v30, %v10017_v7  ;;  %v6872_v10 = vmov 1.0|1.0  }
 0x73e   : >> { %vm6317_vm0 = vmpackc.low %vm3038_vm8, %vm10018_vm7 }
 0x73f   : >> { %6277 = vmatmul.mubr.msk.bf16.gmra.mrb[4].mxu0 %vm4880_vm6, %v6816_v58  ;;  %6281 = vmatmul.mubr.msk.bf16.gmra.mrb[4].mxu1 %vm4880_vm6, %v6816_v58 }
 0x740   : >> { %5076 = vmatpush1.bf16.msra.mxu0 %v4798_v50  ;;  %4945 = vmatprep.mubr.bf16.mxu0 %v6871_v41 }
 0x741   : >> { %5018 = vmatprep.mubr.bf16.mxu1 %v6871_v41  ;;  %5077 = vmatprep.subr.bf16.mxu0 %v4803_v12 }
 0x742   : >> { %5149 = vmatpush1.bf16.msra.mxu1 %v4800_v14 }
 0x743   : >> { %5150 = vmatprep.subr.bf16.mxu1 %v4805_v31  ;;  %v10027_v31 = vld [vmem:[#allocation14_spill] sm:$0xff] }
 0x744   : >> { %5078 = vmatpush1.bf16.msra.mxu0 %v4802_v13 }
 0x745   : >> { %5079 = vmatprep.subr.bf16.mxu0 %v4807_v51 }
 0x746   : >> { %5151 = vmatpush1.bf16.msra.mxu1 %v4804_v61 }
 0x747   : >> { %6278 = vmatmul.mubr.msk.bf16.gmra.mrb[8].mxu0 %vm4880_vm6, %v6817_v24  ;;  %6282 = vmatmul.mubr.msk.bf16.gmra.mrb[8].mxu1 %vm4880_vm6, %v6817_v24 }
 0x748   : >> { %4955 = vmatprep.mubr.bf16.mxu0 %v6871_v41  ;;  %5028 = vmatprep.mubr.bf16.mxu1 %v6871_v41 }
 0x749   : >> { %5080 = vmatpush1.bf16.msra.mxu0 %v4806_v54  ;;  %5152 = vmatprep.subr.bf16.mxu1 %v4809_v2 }
 0x74a   : >> { %5153 = vmatpush1.bf16.msra.mxu1 %v4808_v48  ;;  %5081 = vmatprep.subr.bf16.mxu0 %v4811_v11 }
 0x74b   : >> { %5154 = vmatprep.subr.bf16.mxu1 %v4813_v4 }
 0x74d   : >> { %5082 = vmatpush1.bf16.msra.mxu0 %v4810_v15 }
 0x74e   : >> { %5155 = vmatpush1.bf16.msra.mxu1 %v4812_v40  ;;  %5287 = vmatprep.subr.bf16.mxu0 %v5223_v44 }
 0x74f   : >> { %6279 = vmatmul.mubr.msk.bf16.gmra.mrb[12].mxu0 %vm4880_vm6, %v6818_v21  ;;  %6283 = vmatmul.mubr.msk.bf16.gmra.mrb[12].mxu1 %vm4880_vm6, %v6818_v21 }
 0x750   : >> { %5103 = vmatprep.mubr.bf16.mxu0 %v6871_v41  ;;  %5176 = vmatprep.mubr.bf16.mxu1 %v6871_v41 }
 0x751   : >> { %5360 = vmatprep.subr.bf16.mxu1 %v5225_v32 }
 0x757   : >> { %6288 = vmatmul.mubr.msk.bf16.vlgmr.msra.gmra.mrb[0].mxu0 %vm4880_vm6, %v6819_v62  ;;  %6292 = vmatmul.mubr.msk.bf16.vlgmr.msra.gmra.mrb[0].mxu1 %vm4880_vm6, %v6819_v62 }
 0x758   : >> { %5288 = vmatpush1.bf16.msra.mxu0 %v5222_v20  ;;  %5361 = vmatpush1.bf16.msra.mxu1 %v5224_v26 }
 0x759   : >> { %5289 = vmatprep.subr.bf16.mxu0 %v5227_v46  ;;  %5113 = vmatprep.mubr.bf16.mxu0 %v6871_v41 }
 0x75a   : >> { %5186 = vmatprep.mubr.bf16.mxu1 %v6871_v41  ;;  %5362 = vmatprep.subr.bf16.mxu1 %v5229_v57 }
 0x75c   : >> { %5290 = vmatpush1.bf16.msra.mxu0 %v5226_v23  ;;  %5363 = vmatpush1.bf16.msra.mxu1 %v5228_v55 }
 0x75d   : >> { %5291 = vmatprep.subr.bf16.mxu0 %v5231_v49  ;;  %5364 = vmatprep.subr.bf16.mxu1 %v5233_v45 }
 0x75f   : >> { %6289 = vmatmul.mubr.msk.bf16.gmra.mrb[4].mxu0 %vm4880_vm6, %v6820_v3  ;;  %6293 = vmatmul.mubr.msk.bf16.gmra.mrb[4].mxu1 %vm4880_vm6, %v6820_v3 }
 0x760   : >> { %5292 = vmatpush1.bf16.msra.mxu0 %v5230_v52  ;;  %5123 = vmatprep.mubr.bf16.mxu0 %v6871_v41 }
 0x761   : >> { %5196 = vmatprep.mubr.bf16.mxu1 %v6871_v41  ;;  %5293 = vmatprep.subr.bf16.mxu0 %v5235_v35 }
 0x762   : >> { %5365 = vmatpush1.bf16.msra.mxu1 %v5232_v1 }
 0x763   : >> { %5366 = vmatprep.subr.bf16.mxu1 %v5237_v37 }
 0x764   : >> { %5294 = vmatpush1.bf16.msra.mxu0 %v5234_v22 }
 0x765   : >> { %5295 = vmatprep.subr.bf16.mxu0 %v5239_v5 }
 0x766   : >> { %5367 = vmatpush1.bf16.msra.mxu1 %v5236_v8 }
 0x767   : >> { %6290 = vmatmul.mubr.msk.bf16.gmra.mrb[8].mxu0 %vm4880_vm6, %v6821_v0  ;;  %6294 = vmatmul.mubr.msk.bf16.gmra.mrb[8].mxu1 %vm4880_vm6, %v6821_v0 }
 0x768   : >> { %5133 = vmatprep.mubr.bf16.mxu0 %v6871_v41  ;;  %5206 = vmatprep.mubr.bf16.mxu1 %v6871_v41 }
 0x769   : >> { %5296 = vmatpush1.bf16.msra.mxu0 %v5238_v25  ;;  %5368 = vmatprep.subr.bf16.mxu1 %v5241_v63 }
 0x76a   : >> { %5369 = vmatpush1.bf16.msra.mxu1 %v5240_v19  ;;  %5297 = vmatprep.subr.bf16.mxu0 %v5243_v34 }
 0x76b   : >> { %5370 = vmatprep.subr.bf16.mxu1 %v5245_v29 }
 0x76d   : >> { %5298 = vmatpush1.bf16.msra.mxu0 %v5242_v56 }
 0x76e   : >> { %5371 = vmatpush1.bf16.msra.mxu1 %v5244_v38  ;;  %6428 = vmatprep.subr.msk.bf16.mxu0 %vm6317_vm0, %v6872_v10  ;;  %v10035_v38 = vld [vmem:[#allocation20_spill] sm:$0xff] }
 0x76f   : >> { %6291 = vmatmul.mubr.msk.bf16.gmra.mrb[12].mxu0 %vm4880_vm6, %v6822_v53  ;;  %6295 = vmatmul.mubr.msk.bf16.gmra.mrb[12].mxu1 %vm4880_vm6, %v6822_v53  ;;  %v10033_v53 = vld [vmem:[#allocation19_spill] sm:$0xff] }
 0x770   : >> { %5319 = vmatprep.mubr.bf16.mxu0 %v6871_v41  ;;  %5392 = vmatprep.mubr.bf16.mxu1 %v6871_v41 }
 0x771   : >> { %6452 = vmatprep.subr.msk.bf16.mxu1 %vm6317_vm0, %v6872_v10 }
 0x777   : >> { %6309 = vmatmul.mubr.msk.bf16.vlgmr.msra.gmra.mrb[0].mxu0 %vm4880_vm6, %v6823_v6  ;;  %6313 = vmatmul.mubr.msk.bf16.vlgmr.msra.gmra.mrb[0].mxu1 %vm4880_vm6, %v6823_v6 }
 0x778   : >> { %5329 = vmatprep.mubr.bf16.mxu0 %v6871_v41  ;;  %5402 = vmatprep.mubr.bf16.mxu1 %v6871_v41 }
 0x779   : >> { %6429 = vmatpush3.bf16.msk.msra.mxu0 %vm6317_vm0, %v6872_v10  ;;  %6453 = vmatpush3.bf16.msk.msra.mxu1 %vm6317_vm0, %v6872_v10  ;;  %vm6323_vm0 = vmpackc.low %vm3044_vm14, %vm3043_vm13 }
 0x77a   : >> { %6430 = vmatprep.subr.msk.bf16.mxu0 %vm6319_vm5, %v6872_v10  ;;  %6454 = vmatprep.subr.msk.bf16.mxu1 %vm6319_vm5, %v6872_v10 }
 0x77d   : >> { %6431 = vmatpush3.bf16.msk.msra.mxu0 %vm6319_vm5, %v6872_v10  ;;  %6455 = vmatpush3.bf16.msk.msra.mxu1 %vm6319_vm5, %v6872_v10  ;;  %vm10028_vm5 = vcmp.eq.s32.totalorder %v10027_v31, %v10017_v7 }
 0x77e   : >> { %vm6325_vm7 = vmpackc.low %vm10028_vm5, %vm3045_vm15  ;;  %vm10036_vm5 = vcmp.eq.s32.totalorder %v10035_v38, %v10017_v7 }
 0x77f   : >> { %6310 = vmatmul.mubr.msk.bf16.gmra.mrb[4].mxu0 %vm4880_vm6, %v6824_v18  ;;  %6314 = vmatmul.mubr.msk.bf16.gmra.mrb[4].mxu1 %vm4880_vm6, %v6824_v18 }
 0x780   : >> { %5339 = vmatprep.mubr.bf16.mxu0 %v6871_v41  ;;  %5412 = vmatprep.mubr.bf16.mxu1 %v6871_v41 }
 0x787   : >> { %6311 = vmatmul.mubr.msk.bf16.gmra.mrb[8].mxu0 %vm4880_vm6, %v6825_v28  ;;  %6315 = vmatmul.mubr.msk.bf16.gmra.mrb[8].mxu1 %vm4880_vm6, %v6825_v28 }
 0x788   : >> { %5349 = vmatprep.mubr.bf16.mxu0 %v6871_v41  ;;  %5422 = vmatprep.mubr.bf16.mxu1 %v6871_v41 }
 0x78f   : >> { %6312 = vmatmul.mubr.msk.bf16.gmra.mrb[12].mxu0 %vm4880_vm6, %v6826_v43  ;;  %6316 = vmatmul.mubr.msk.bf16.gmra.mrb[12].mxu1 %vm4880_vm6, %v6826_v43  ;;  %vm6321_vm6 = vmpackc.low %vm3042_vm12, %vm3041_vm11 }
 0x790   : >> { %6432 = vmatprep.subr.msk.bf16.mxu0 %vm6321_vm6, %v6872_v10  ;;  %6456 = vmatprep.subr.msk.bf16.mxu1 %vm6321_vm6, %v6872_v10 }
 0x791   : >> { %6433 = vmatpush3.bf16.msk.msra.mxu0 %vm6321_vm6, %v6872_v10  ;;  %6457 = vmatpush3.bf16.msk.msra.mxu1 %vm6321_vm6, %v6872_v10  ;;  %vm6327_vm6 = vmpackc.low %vm3048_vm2, %vm3047_vm1 }
 0x792   : >> { %6434 = vmatprep.subr.msk.bf16.mxu0 %vm6323_vm0, %v6872_v10  ;;  %6458 = vmatprep.subr.msk.bf16.mxu1 %vm6323_vm0, %v6872_v10 }
 0x795   : >> { %6435 = vmatpush3.bf16.msk.msra.mxu0 %vm6323_vm0, %v6872_v10  ;;  %6459 = vmatpush3.bf16.msk.msra.mxu1 %vm6323_vm0, %v6872_v10  ;;  %vm10034_vm0 = vcmp.eq.s32.totalorder %v10033_v53, %v10017_v7 }
 0x796   : >> { %6436 = vmatprep.subr.msk.bf16.mxu0 %vm6325_vm7, %v6872_v10  ;;  %6460 = vmatprep.subr.msk.bf16.mxu1 %vm6325_vm7, %v6872_v10 }
 0x799   : >> { %6437 = vmatpush3.bf16.msk.msra.mxu0 %vm6325_vm7, %v6872_v10  ;;  %6461 = vmatpush3.bf16.msk.msra.mxu1 %vm6325_vm7, %v6872_v10  ;;  %v5468_v13 = vpop.permute.xlu0 %5467  ;;  %v5478_v24 = vpop.permute.xlu1 %5477  ;;  %vm6329_vm7 = vmpackc.low %vm3050_vm4, %vm3049_vm3 }
 0x79a   : >> { %6438 = vmatprep.subr.msk.bf16.mxu0 %vm6327_vm6, %v6872_v10  ;;  %6462 = vmatprep.subr.msk.bf16.mxu1 %vm6327_vm6, %v6872_v10 }
 0x79d   : >> { %v5473_v51 = vpop.permute.xlu0 %5472  ;;  %6439 = vmatpush3.bf16.msk.msra.mxu0 %vm6327_vm6, %v6872_v10  ;;  %6463 = vmatpush3.bf16.msk.msra.mxu1 %vm6327_vm6, %v6872_v10  ;;  %v5483_v63 = vpop.permute.xlu1 %5482  ;;  %vm9633_vm6 = vmpackc.low %vm10036_vm5, %vm10034_vm0 }
 0x79e   : >> { %6440 = vmatprep.subr.msk.bf16.mxu0 %vm6329_vm7, %v6872_v10  ;;  %6464 = vmatprep.subr.msk.bf16.mxu1 %vm6329_vm7, %v6872_v10 }
 0x7a1   : >> { %6441 = vmatpush3.bf16.msk.msra.mxu0 %vm6329_vm7, %v6872_v10  ;;  %6465 = vmatpush3.bf16.msk.msra.mxu1 %vm6329_vm7, %v6872_v10  ;;  %vm5723_vm7 = vcmask 109568  }
 0x7a2   : >> { %6442 = vmatprep.subr.msk.bf16.mxu0 %vm9633_vm6, %v6872_v10  ;;  %6466 = vmatprep.subr.msk.bf16.mxu1 %vm9633_vm6, %v6872_v10 }
 0x7a5   : >> { %6443 = vmatpush3.bf16.msk.msra.mxu0 %vm9633_vm6, %v6872_v10  ;;  %6467 = vmatpush3.bf16.msk.msra.mxu1 %vm9633_vm6, %v6872_v10  ;;  %v5493_v10 = vpop.permute.xlu1 %5492 }
 0x84a   : >> { %v5321_v61 = vpop.f32.mrb[0].mxu0  ;;  %v5394_v54 = vpop.f32.mrb[0].mxu1 }
 0x84b   : >> { %v5505_v11 = vadd.f32 %v5468_v13, %v5321_v61  ;;  %v5507_v4 = vadd.f32 %v5468_v13, %v5394_v54  ;;  %v5323_v15 = vpop.f32.mrb[1].mxu0  ;;  %v5396_v21 = vpop.f32.mrb[1].mxu1 }
 0x84c   : >> { %v5506_v40 = vadd.f32 %v5468_v13, %v5323_v15  ;;  %v5508_v44 = vadd.f32 %v5468_v13, %v5396_v21  ;;  %v5325_v32 = vpop.f32.mrb[2].mxu0  ;;  %v5398_v62 = vpop.f32.mrb[2].mxu1 }
 0x84d   : >> { %v5537_v20 = vmax.f32 %v5505_v11, 0.0  ;;  %v5539_v26 = vmax.f32 %v5507_v4, 0.0  ;;  %v5509_v46 = vadd.f32 %v5473_v51, %v5325_v32  ;;  %v5511_v57 = vadd.f32 %v5473_v51, %v5398_v62  ;;  %v5327_v23 = vpop.f32.mrb[3].mxu0  ;;  %v5400_v55 = vpop.f32.mrb[3].mxu1 }
 0x84e   : >> { %v5538_v49 = vmax.f32 %v5506_v40, 0.0  ;;  %v5540_v45 = vmax.f32 %v5508_v44, 0.0  ;;  %v5510_v3 = vadd.f32 %v5473_v51, %v5327_v23  ;;  %v5512_v52 = vadd.f32 %v5473_v51, %v5400_v55  ;;  %v5488_v32 = vpop.permute.xlu0 %5487 }
 0x84f   : >> { %v5541_v37 = vmax.f32 %v5509_v46, 0.0  ;;  %v5543_v22 = vmax.f32 %v5511_v57, 0.0 }
 0x850   : >> { %v9617_v5 = vmax.f32 %v5537_v20, %v5538_v49  ;;  %v9619_v0 = vmax.f32 %v5539_v26, %v5540_v45  ;;  %v5542_v8 = vmax.f32 %v5510_v3, 0.0  ;;  %v5544_v25 = vmax.f32 %v5512_v52, 0.0 }
 0x852   : >> { %v9623_v19 = vmax.f32 %v5541_v37, %v5542_v8  ;;  %v9625_v34 = vmax.f32 %v5543_v22, %v5544_v25  ;;  %v5331_v29 = vpop.f32.mrb[4].mxu0  ;;  %v5404_v56 = vpop.f32.mrb[4].mxu1 }
 0x853   : >> { %v5513_v18 = vadd.f32 %v5478_v24, %v5331_v29  ;;  %v5515_v28 = vadd.f32 %v5478_v24, %v5404_v56  ;;  %v5333_v43 = vpop.f32.mrb[5].mxu0  ;;  %v5406_v30 = vpop.f32.mrb[5].mxu1 }
 0x854   : >> { %v5514_v42 = vadd.f32 %v5478_v24, %v5333_v43  ;;  %v5516_v33 = vadd.f32 %v5478_v24, %v5406_v30  ;;  %v5335_v41 = vpop.f32.mrb[6].mxu0  ;;  %v5408_v36 = vpop.f32.mrb[6].mxu1  ;;  %v6775_v58 = vpack.i.bf16 %v9623_v19, %v9617_v5  ;;  %v6780_v4 = vpack.i.bf16 %v9625_v34, %v9619_v0 }
 0x855   : >> { %v5545_v50 = vmax.f32 %v5513_v18, 0.0  ;;  %v5547_v12 = vmax.f32 %v5515_v28, 0.0  ;;  %v5517_v14 = vadd.f32 %v5483_v63, %v5335_v41  ;;  %v5519_v31 = vadd.f32 %v5483_v63, %v5408_v36  ;;  %v5337_v13 = vpop.f32.mrb[7].mxu0  ;;  %v5410_v51 = vpop.f32.mrb[7].mxu1 }
 0x856   : >> { %v5546_v24 = vmax.f32 %v5514_v42, 0.0  ;;  %v5548_v61 = vmax.f32 %v5516_v33, 0.0  ;;  %v5518_v54 = vadd.f32 %v5483_v63, %v5337_v13  ;;  %v5520_v2 = vadd.f32 %v5483_v63, %v5410_v51  ;;  %6776 = vrot.lane.b32.xlu0 %v6775_v58, %s6873_s8  ;;  %v5498_v36 = vpop.permute.xlu0 %5497  ;;  %v5503_v58 = vpop.permute.xlu1 %5502 }
 0x857   : >> { %v5549_v48 = vmax.f32 %v5517_v14, 0.0  ;;  %v5551_v11 = vmax.f32 %v5519_v31, 0.0 }
 0x858   : >> { %v9654_v15 = vmax.f32 %v5545_v50, %v5546_v24  ;;  %v9656_v21 = vmax.f32 %v5547_v12, %v5548_v61  ;;  %v5550_v40 = vmax.f32 %v5518_v54, 0.0  ;;  %v5552_v44 = vmax.f32 %v5520_v2, 0.0 }
 0x85a   : >> { %v9658_v62 = vmax.f32 %v5549_v48, %v5550_v40  ;;  %v9660_v20 = vmax.f32 %v5551_v11, %v5552_v44  ;;  %v5414_v26 = vpop.f32.mrb[8].mxu1  ;;  %6781 = vrot.lane.b32.xlu0 %v6780_v4, %s6873_s8  ;;  %v5341_v46 = vpop.f32.mrb[8].mxu0 }
 0x85b   : >> { %v5523_v57 = vadd.f32 %v5488_v32, %v5414_v26  ;;  %v5521_v23 = vadd.f32 %v5488_v32, %v5341_v46  ;;  %v5343_v55 = vpop.f32.mrb[9].mxu0  ;;  %v5416_v49 = vpop.f32.mrb[9].mxu1 }
 0x85c   : >> { %v5522_v45 = vadd.f32 %v5488_v32, %v5343_v55  ;;  %v5524_v3 = vadd.f32 %v5488_v32, %v5416_v49  ;;  %v5345_v52 = vpop.f32.mrb[10].mxu0  ;;  %v5418_v35 = vpop.f32.mrb[10].mxu1  ;;  %v6785_v1 = vpack.i.bf16 %v9658_v62, %v9654_v15  ;;  %v6790_v43 = vpack.i.bf16 %v9660_v20, %v9656_v21 }
 0x85d   : >> { %v5555_v37 = vmax.f32 %v5523_v57, 0.0  ;;  %v5553_v22 = vmax.f32 %v5521_v23, 0.0  ;;  %v5525_v8 = vadd.f32 %v5493_v10, %v5345_v52  ;;  %v5527_v25 = vadd.f32 %v5493_v10, %v5418_v35  ;;  %v5347_v63 = vpop.f32.mrb[11].mxu0  ;;  %v5420_v29 = vpop.f32.mrb[11].mxu1 }
 0x85e   : >> { %v5554_v56 = vmax.f32 %v5522_v45, 0.0  ;;  %v5556_v53 = vmax.f32 %v5524_v3, 0.0  ;;  %v5526_v38 = vadd.f32 %v5493_v10, %v5347_v63  ;;  %v5528_v6 = vadd.f32 %v5493_v10, %v5420_v29  ;;  %6786 = vrot.lane.b32.xlu1 %v6785_v1, %s6873_s8 }
 0x85f   : >> { %v5557_v18 = vmax.f32 %v5525_v8, 0.0  ;;  %v5559_v28 = vmax.f32 %v5527_v25, 0.0 }
 0x860   : >> { %v9668_v30 = vmax.f32 %v5553_v22, %v5554_v56  ;;  %v9670_v42 = vmax.f32 %v5555_v37, %v5556_v53  ;;  %v5558_v33 = vmax.f32 %v5526_v38, 0.0  ;;  %v5560_v41 = vmax.f32 %v5528_v6, 0.0 }
 0x862   : >> { %v9672_v50 = vmax.f32 %v5557_v18, %v5558_v33  ;;  %v9674_v12 = vmax.f32 %v5559_v28, %v5560_v41  ;;  %v5424_v14 = vpop.f32.mrb[12].mxu1  ;;  %6791 = vrot.lane.b32.xlu1 %v6790_v43, %s6873_s8  ;;  %v5351_v31 = vpop.f32.mrb[12].mxu0 }
 0x863   : >> { %v5531_v13 = vadd.f32 %v5498_v36, %v5424_v14  ;;  %v5529_v51 = vadd.f32 %v5498_v36, %v5351_v31  ;;  %v5353_v24 = vpop.f32.mrb[13].mxu0  ;;  %v5426_v61 = vpop.f32.mrb[13].mxu1 }
 0x864   : >> { %v5530_v54 = vadd.f32 %v5498_v36, %v5353_v24  ;;  %v5532_v2 = vadd.f32 %v5498_v36, %v5426_v61  ;;  %v5355_v48 = vpop.f32.mrb[14].mxu0  ;;  %v5428_v11 = vpop.f32.mrb[14].mxu1  ;;  %v6795_v4 = vpack.i.bf16 %v9672_v50, %v9668_v30  ;;  %v6805_v52 = vpack.i.bf16 %v9674_v12, %v9670_v42 }
 0x865   : >> { %v5563_v40 = vmax.f32 %v5531_v13, 0.0  ;;  %v5561_v44 = vmax.f32 %v5529_v51, 0.0  ;;  %v5533_v32 = vadd.f32 %v5503_v58, %v5355_v48  ;;  %v5535_v10 = vadd.f32 %v5503_v58, %v5428_v11  ;;  %v5357_v26 = vpop.f32.mrb[15].mxu0  ;;  %v5430_v46 = vpop.f32.mrb[15].mxu1 }
 0x866   : >> { %v5562_v57 = vmax.f32 %v5530_v54, 0.0  ;;  %v5564_v23 = vmax.f32 %v5532_v2, 0.0  ;;  %v5534_v55 = vadd.f32 %v5503_v58, %v5357_v26  ;;  %v5536_v49 = vadd.f32 %v5503_v58, %v5430_v46  ;;  %6796 = vrot.lane.b32.xlu0 %v6795_v4, %s6873_s8 }
 0x867   : >> { %v5565_v45 = vmax.f32 %v5533_v32, 0.0  ;;  %v5567_v3 = vmax.f32 %v5535_v10, 0.0 }
 0x868   : >> { %v5575_v35 = vmax.f32 %v5561_v44, %v5562_v57  ;;  %v5738_v1 = vmax.f32 %v5563_v40, %v5564_v23  ;;  %v5566_v37 = vmax.f32 %v5534_v55, 0.0  ;;  %v5568_v22 = vmax.f32 %v5536_v49, 0.0 }
 0x86a   : >> { %v5576_v8 = vmax.f32 %v5565_v45, %v5566_v37  ;;  %v5739_v25 = vmax.f32 %v5567_v3, %v5568_v22  ;;  %6806 = vrot.lane.b32.xlu0 %v6805_v52, %s6873_s8 }
 0x86c   : >> { %v6800_v63 = vpack.i.bf16 %v5576_v8, %v5575_v35  ;;  %v6810_v29 = vpack.i.bf16 %v5739_v25, %v5738_v1 }
 0x86e   : >> { %6801 = vrot.lane.b32.xlu1 %v6800_v63, %s6873_s8 }
 0x872   : >> { %6811 = vrot.lane.b32.xlu1 %v6810_v29, %s6873_s8 }
 0x8c8   : >> { %v6777_v56 = vpop.permute.xlu0 %6776 }
 0x8c9   : >> { %v6779_v53 = vunpack.i.h.bf16 %v6777_v56  ;;  %v6778_v38 = vunpack.i.l.bf16 %v6777_v56 }
 0x8cb   : >> { %v5610_v6 = vmax.f32 %v9623_v19, %v6779_v53  ;;  %v5609_v18 = vmax.f32 %v9617_v5, %v6778_v38 }
 0x8cc   : >> { %v6782_v28 = vpop.permute.xlu0 %6781 }
 0x8cd   : >> { %v6784_v43 = vunpack.i.h.bf16 %v6782_v28  ;;  %v6783_v33 = vunpack.i.l.bf16 %v6782_v28  ;;  %v5617_v41 = vpack.c.bf16 %v5610_v6, %v5609_v18 }
 0x8cf   : >> { %v5773_v36 = vmax.f32 %v9625_v34, %v6784_v43  ;;  %v5772_v58 = vmax.f32 %v9619_v0, %v6783_v33  ;;  %6444 = vmatprep.mubr.bf16.mxu0 %v5617_v41 }
 0x8d0   : >> { %v6787_v14 = vpop.permute.xlu1 %6786 }
 0x8d1   : >> { %v6789_v31 = vunpack.i.h.bf16 %v6787_v14  ;;  %v6788_v13 = vunpack.i.l.bf16 %v6787_v14  ;;  %v5782_v51 = vpack.c.bf16 %v5773_v36, %v5772_v58 }
 0x8d3   : >> { %v5612_v24 = vmax.f32 %v9658_v62, %v6789_v31  ;;  %v5611_v61 = vmax.f32 %v9654_v15, %v6788_v13  ;;  %6468 = vmatprep.mubr.bf16.mxu1 %v5782_v51 }
 0x8d4   : >> { %v6792_v19 = vpop.permute.xlu1 %6791 }
 0x8d5   : >> { %v5618_v5 = vpack.c.bf16 %v5612_v24, %v5611_v61  ;;  %v6794_v54 = vunpack.i.h.bf16 %v6792_v19  ;;  %v6793_v2 = vunpack.i.l.bf16 %v6792_v19 }
 0x8d7   : >> { %v5775_v48 = vmax.f32 %v9660_v20, %v6794_v54  ;;  %v5774_v34 = vmax.f32 %v9656_v21, %v6793_v2  ;;  %6445 = vmatmul.mubr.bf16.vlgmr.msra.gmra.mrb[16].mxu0 %v5618_v5 }
 0x8d8   : >> { %v6797_v0 = vpop.permute.xlu0 %6796 }
 0x8d9   : >> { %v5783_v11 = vpack.c.bf16 %v5775_v48, %v5774_v34  ;;  %v6799_v4 = vunpack.i.h.bf16 %v6797_v0  ;;  %v6798_v40 = vunpack.i.l.bf16 %v6797_v0 }
 0x8db   : >> { %v5614_v44 = vmax.f32 %v9672_v50, %v6799_v4  ;;  %v5613_v62 = vmax.f32 %v9668_v30, %v6798_v40  ;;  %6469 = vmatmul.mubr.bf16.vlgmr.msra.gmra.mrb[16].mxu1 %v5783_v11 }
 0x8dc   : >> { %v6807_v15 = vpop.permute.xlu0 %6806 }
 0x8dd   : >> { %v6809_v32 = vunpack.i.h.bf16 %v6807_v15  ;;  %v6808_v10 = vunpack.i.l.bf16 %v6807_v15  ;;  %v5619_v26 = vpack.c.bf16 %v5614_v44, %v5613_v62 }
 0x8df   : >> { %v5777_v46 = vmax.f32 %v9674_v12, %v6809_v32  ;;  %v5776_v20 = vmax.f32 %v9670_v42, %v6808_v10  ;;  %6448 = vmatprep.mubr.bf16.mxu0 %v5619_v26 }
 0x8e0   : >> { %v6802_v21 = vpop.permute.xlu1 %6801 }
 0x8e1   : >> { %v6804_v57 = vunpack.i.h.bf16 %v6802_v21  ;;  %v6803_v23 = vunpack.i.l.bf16 %v6802_v21  ;;  %v5784_v55 = vpack.c.bf16 %v5777_v46, %v5776_v20 }
 0x8e3   : >> { %v5616_v49 = vmax.f32 %v5576_v8, %v6804_v57  ;;  %v5615_v50 = vmax.f32 %v5575_v35, %v6803_v23  ;;  %6472 = vmatprep.mubr.bf16.mxu1 %v5784_v55 }
 0x8e4   : >> { %v6812_v30 = vpop.permute.xlu1 %6811 }
 0x8e5   : >> { %v6814_v45 = vunpack.i.h.bf16 %v6812_v30  ;;  %v6813_v3 = vunpack.i.l.bf16 %v6812_v30  ;;  %v5620_v52 = vpack.c.bf16 %v5616_v49, %v5615_v50 }
 0x8e7   : >> { %v5779_v37 = vmax.f32 %v5739_v25, %v6814_v45  ;;  %v5778_v22 = vmax.f32 %v5738_v1, %v6813_v3  ;;  %6449 = vmatmul.mubr.bf16.gmra.mrb[20].mxu0 %v5620_v52 }
 0x8e9   : >> { %v5785_v12 = vpack.c.bf16 %v5779_v37, %v5778_v22 }
 0x8eb   : >> { %6473 = vmatmul.mubr.bf16.gmra.mrb[20].mxu1 %v5785_v12 }
 0x9aa   : >> { %v6446_v42 = vpop.f32.mrb[16].mxu0 }
 0x9ab   : >> { %v6383_v35 = vpack.c.bf16 %v6446_v42, %v6446_v42  ;;  %v5655_v8 = vpop.f32.mrb[17].mxu0 }
 0x9ac   : >> { %v6381_v63 = vpack.c.bf16 %v5655_v8, %v5655_v8  ;;  %v6447_v29 = vpop.f32.mrb[18].mxu0 }
 0x9ad   : >> { %5726 = vst.msk [vmem:[%s9699_s14 + $0x8] sm:$0xf] %vm5723_vm7, %v6383_v35  ;;  %v6384_v1 = vpack.c.bf16 %v6447_v29, %v6447_v29  ;;  %v5658_v25 = vpop.f32.mrb[19].mxu0 }
 0x9ae   : >> { %5724 = vst.msk [vmem:[%s9699_s14] sm:$0xf] %vm5723_vm7, %v6381_v63  ;;  %v6382_v56 = vpack.c.bf16 %v5658_v25, %v5658_v25  ;;  %v6470_v53 = vpop.f32.mrb[16].mxu1 }
 0x9af   : >> { %5727 = vst.msk [vmem:[%s9699_s14 + $0xc] sm:$0xf] %vm5723_vm7, %v6384_v1  ;;  %v5820_v38 = vpop.f32.mrb[17].mxu1  ;;  %v6393_v31 = vpack.c.bf16 %v6470_v53, %v6470_v53 }
 0x9b0   : >> { %5725 = vst.msk [vmem:[%s9699_s14 + $0x4] sm:$0xf] %vm5723_vm7, %v6382_v56  ;;  %v6471_v6 = vpop.f32.mrb[18].mxu1  ;;  %v6391_v24 = vpack.c.bf16 %v5820_v38, %v5820_v38 }
 0x9b1   : >> { %v5823_v18 = vpop.f32.mrb[19].mxu1  ;;  %v6394_v61 = vpack.c.bf16 %v6471_v6, %v6471_v6 }
 0x9b2   : >> { %v6392_v19 = vpack.c.bf16 %v5823_v18, %v5823_v18 }
 0x9ba   : >> { %v6450_v28 = vpop.f32.mrb[20].mxu0 }
 0x9bb   : >> { %v6387_v43 = vpack.c.bf16 %v6450_v28, %v6450_v28  ;;  %v5671_v33 = vpop.f32.mrb[21].mxu0 }
 0x9bc   : >> { %v6385_v41 = vpack.c.bf16 %v5671_v33, %v5671_v33  ;;  %v6451_v36 = vpop.f32.mrb[22].mxu0 }
 0x9bd   : >> { %5730 = vst.msk [vmem:[%s9699_s14 + $0x18] sm:$0xf] %vm5723_vm7, %v6387_v43  ;;  %v6388_v58 = vpack.c.bf16 %v6451_v36, %v6451_v36  ;;  %v5674_v14 = vpop.f32.mrb[23].mxu0 }
 0x9be   : >> { %5728 = vst.msk [vmem:[%s9699_s14 + $0x10] sm:$0xf] %vm5723_vm7, %v6385_v41  ;;  %v6386_v13 = vpack.c.bf16 %v5674_v14, %v5674_v14  ;;  %v6474_v51 = vpop.f32.mrb[20].mxu1  ;;  %4783 = sbr.rel (!%p4781_p6) target bundleno = 1815 (0x717), region = 144 }
 0x9bf   : >> { %5731 = vst.msk [vmem:[%s9699_s14 + $0x1c] sm:$0xf] %vm5723_vm7, %v6388_v58  ;;  %v6397_v5 = vpack.c.bf16 %v6474_v51, %v6474_v51  ;;  %v5836_v54 = vpop.f32.mrb[21].mxu1 }
 0x9c0   : >> { %5729 = vst.msk [vmem:[%s9699_s14 + $0x14] sm:$0xf] %vm5723_vm7, %v6386_v13  ;;  %v6395_v2 = vpack.c.bf16 %v5836_v54, %v5836_v54  ;;  %v6475_v48 = vpop.f32.mrb[22].mxu1 }
 0x9c1   : >> { %5888 = vst.msk [vmem:[%s5887_s19] sm:$0xf] %vm5723_vm7, %v6391_v24  ;;  %5889 = vst.msk [vmem:[%s5887_s19 + $0x4] sm:$0xf] %vm5723_vm7, %v6392_v19  ;;  %v6398_v34 = vpack.c.bf16 %v6475_v48, %v6475_v48  ;;  %v5839_v0 = vpop.f32.mrb[23].mxu1 }
 0x9c2   : >> { %5890 = vst.msk [vmem:[%s5887_s19 + $0x8] sm:$0xf] %vm5723_vm7, %v6393_v31  ;;  %5891 = vst.msk [vmem:[%s5887_s19 + $0xc] sm:$0xf] %vm5723_vm7, %v6394_v61  ;;  %v6396_v11 = vpack.c.bf16 %v5839_v0, %v5839_v0 }
 0x9c3   : >> { %5894 = vst.msk [vmem:[%s5887_s19 + $0x18] sm:$0xf] %vm5723_vm7, %v6397_v5  ;;  %5892 = vst.msk [vmem:[%s5887_s19 + $0x10] sm:$0xf] %vm5723_vm7, %v6395_v2 }
 0x9c4   : >> { %5895 = vst.msk [vmem:[%s5887_s19 + $0x1c] sm:$0xf] %vm5723_vm7, %v6398_v34  ;;  %5893 = vst.msk [vmem:[%s5887_s19 + $0x14] sm:$0xf] %vm5723_vm7, %v6396_v11 }
 0x9c5 PF: > { %s17_s24 = sadd.s32 1, %s6845_s24  }
 0x9c6   : > { %p14_p7 = scmp.ge.s32.totalorder %s17_s24, 4  }
 0x9c8   :  { %16 = sbr.rel (!%p14_p7) target bundleno = 1 (0x1), region = 155 }

// kernel: net_forward.3
= control target key start
LH: loop header
LB: loop body
LE: loop exit
PB: predicated region body
PF: predicated region fallthrough
CT: control target
= control target key end

     0   :  { %v1633_v27 = vlaneseq  ;;  %v11915_v35 = vmov 1966171168   ;;  %s14576_s0 = inlined_call_operand.vmem [shape: bf16[2,12544], index: 0, kind: input, shape index: {}]   ;;  %s14577_s1 = inlined_call_operand.vmem [shape: bf16[12544,32], index: 1, kind: input, shape index: {}]   ;;  %s14578_s2 = inlined_call_operand.vmem [shape: f32[1,32], index: 2, kind: input, shape index: {}]   ;;  %s14579_s3 = inlined_call_operand.vmem [shape: f32[32,16], index: 3, kind: input, shape index: {}]   ;;  %s14580_s4 = inlined_call_operand.vmem [shape: f32[1,16], index: 4, kind: input, shape index: {}]   ;;  %s14581_s5 = inlined_call_operand.vmem [shape: f32[16,8], index: 5, kind: input, shape index: {}]   ;;  %s14582_s6 = inlined_call_operand.vmem [shape: f32[1,8], index: 6, kind: input, shape index: {}]   ;;  %s14583_s7 = inlined_call_operand.hbm [shape: f32[2,8], index: 7, kind: output, shape index: {}]  }
   0x1   :  { %v11095_v0 = vld [vmem:[%s14577_s1 + $0x40] sm:$0xff]   ;;  %v11099_v4 = vld [vmem:[%s14577_s1 + $0x48] sm:$0xff]   ;;  %v11103_v8 = vld [vmem:[%s14577_s1 + $0x50] sm:$0xff]   ;;  %v1631_v36 = vunpack.c.l.s4 %v11915_v35 }
   0x2   :  { %v11096_v1 = vld [vmem:[%s14577_s1] sm:$0xff]   ;;  %9977 = vmatprep.subr.bf16.mxu0 %v11095_v0  ;;  %v11100_v5 = vld [vmem:[%s14577_s1 + $0x8] sm:$0xff]   ;;  %v11104_v9 = vld [vmem:[%s14577_s1 + $0x10] sm:$0xff]   ;;  %v1634_v32 = vshrl.u32 %v1633_v27, 7 }
   0x3   :  { %v11097_v2 = vld [vmem:[%s14577_s1 + $0xc0] sm:$0xff]   ;;  %9978 = vmatpush3.bf16.msra.mxu0 %v11096_v1  ;;  %v11101_v6 = vld [vmem:[%s14577_s1 + $0xc8] sm:$0xff]   ;;  %v11105_v10 = vld [vmem:[%s14577_s1 + $0xd0] sm:$0xff]   ;;  %v1632_v39 = vunpack.c.0.s8 %v1631_v36 }
   0x4   :  { %v11098_v3 = vld [vmem:[%s14577_s1 + $0x80] sm:$0xff]   ;;  %9999 = vmatprep.subr.bf16.mxu1 %v11097_v2  ;;  %9979 = vmatprep.subr.bf16.mxu0 %v11099_v4  ;;  %v11102_v7 = vld [vmem:[%s14577_s1 + $0x88] sm:$0xff]   ;;  %v11106_v11 = vld [vmem:[%s14577_s1 + $0x90] sm:$0xff]  }
   0x5   :  { %10000 = vmatpush3.bf16.msra.mxu1 %v11098_v3  ;;  %v11107_v12 = vld [vmem:[%s14577_s1 + $0x58] sm:$0xff]   ;;  %v11111_v16 = vld [vmem:[%s14577_s1 + $0x60] sm:$0xff]   ;;  %v11115_v20 = vld [vmem:[%s14577_s1 + $0x68] sm:$0xff]   ;;  %v12065_v41 = vsub.s32 %v1632_v39, %v1634_v32 }
   0x6   :  { %10001 = vmatprep.subr.bf16.mxu1 %v11101_v6  ;;  %v11108_v13 = vld [vmem:[%s14577_s1 + $0x18] sm:$0xff]   ;;  %v11112_v17 = vld [vmem:[%s14577_s1 + $0x20] sm:$0xff]   ;;  %v11116_v21 = vld [vmem:[%s14577_s1 + $0x28] sm:$0xff]  }
   0x7   :  { %9980 = vmatpush3.bf16.msra.mxu0 %v11100_v5  ;;  %v11109_v14 = vld [vmem:[%s14577_s1 + $0xd8] sm:$0xff]   ;;  %v11113_v18 = vld [vmem:[%s14577_s1 + $0xe0] sm:$0xff]   ;;  %v11117_v22 = vld [vmem:[%s14577_s1 + $0xe8] sm:$0xff]  }
   0x8   :  { %9981 = vmatprep.subr.bf16.mxu0 %v11103_v8  ;;  %v11110_v15 = vld [vmem:[%s14577_s1 + $0x98] sm:$0xff]   ;;  %v11114_v19 = vld [vmem:[%s14577_s1 + $0xa0] sm:$0xff]   ;;  %v11118_v23 = vld [vmem:[%s14577_s1 + $0xa8] sm:$0xff]  }
   0x9   :  { %10002 = vmatpush3.bf16.msra.mxu1 %v11102_v7  ;;  %v11119_v24 = vld [vmem:[%s14577_s1 + $0x70] sm:$0xff]   ;;  %v11123_v29 = vld [vmem:[%s14577_s1 + $0x78] sm:$0xff]   ;;  %v28_v33 = vld [vmem:[%s14576_s0] sm:$0xff] }
   0xa   :  { %10003 = vmatprep.subr.bf16.mxu1 %v11105_v10  ;;  %v11120_v25 = vld [vmem:[%s14577_s1 + $0x30] sm:$0xff]   ;;  %v11124_v30 = vld [vmem:[%s14577_s1 + $0x38] sm:$0xff]   ;;  %v11128_v37 = vld [vmem:[%s14577_s1 + $0x140] sm:$0xff]   ;;  %v1629_v38 = vcombine.high %v28_v33, %v28_v33  ;;  %v1636_v42 = vrot.slane %v28_v33, %v12065_v41 }
   0xb   :  { %9982 = vmatpush3.bf16.msra.mxu0 %v11104_v9  ;;  %v11121_v26 = vld [vmem:[%s14577_s1 + $0xf0] sm:$0xff]   ;;  %v11125_v31 = vld [vmem:[%s14577_s1 + $0xf8] sm:$0xff]   ;;  %v11130_v40 = vld [vmem:[%s14577_s1 + $0x1c0] sm:$0xff]  }
   0xc   :  { %9983 = vmatprep.subr.bf16.mxu0 %v11107_v12  ;;  %v11122_v28 = vld [vmem:[%s14577_s1 + $0xb0] sm:$0xff]   ;;  %v11127_v34 = vld [vmem:[%s14577_s1 + $0xb8] sm:$0xff]   ;;  %v12069_v43 = vrot.slane %v1629_v38, %v12065_v41  ;;  %v1644_v44 = vcombine.high %v1636_v42, %v1636_v42  ;;  %v1652_v45 = vrot.slane %v1636_v42, %v12065_v41  ;;  %v11129_v47 = vld [vmem:[%s14577_s1 + $0x100] sm:$0xff]  }
   0xd   :  { %10004 = vmatpush3.bf16.msra.mxu1 %v11106_v11  ;;  %v11131_v49 = vld [vmem:[%s14577_s1 + $0x180] sm:$0xff]   ;;  %v11132_v52 = vld [vmem:[%s14577_s1 + $0x148] sm:$0xff]   ;;  %v11136_v58 = vld [vmem:[%s14577_s1 + $0x150] sm:$0xff]  }
   0xe   :  { %10005 = vmatprep.subr.bf16.mxu1 %v11109_v14  ;;  %v1645_v46 = vcombine.high %v12069_v43, %v12069_v43  ;;  %v1666_v48 = vrot.slane %v1644_v44, %v12065_v41  ;;  %v1674_v51 = vcombine.high %v1652_v45, %v1652_v45  ;;  %v11133_v54 = vld [vmem:[%s14577_s1 + $0x108] sm:$0xff]   ;;  %v11137_v59 = vld [vmem:[%s14577_s1 + $0x110] sm:$0xff]   ;;  %v11140_v62 = vld [vmem:[%s14577_s1 + $0x158] sm:$0xff]  }
   0xf   :  { %9984 = vmatpush3.bf16.msra.mxu0 %v11108_v13  ;;  %v11134_v55 = vld [vmem:[%s14577_s1 + $0x1c8] sm:$0xff]   ;;  %v11138_v60 = vld [vmem:[%s14577_s1 + $0x1d0] sm:$0xff]   ;;  %v11141_v63 = vld [vmem:[%s14577_s1 + $0x118] sm:$0xff]  }
  0x10   :  { %9985 = vmatprep.subr.bf16.mxu0 %v11111_v16  ;;  %v1673_v50 = vrot.slane %v1645_v46, %v12065_v41  ;;  %7073 = vmatprep.mubr.bf16.mxu0 %v1666_v48  ;;  %v1676_v53 = vcombine.high %v1666_v48, %v1666_v48  ;;  %v11135_v57 = vld [vmem:[%s14577_s1 + $0x188] sm:$0xff]   ;;  %v11139_v61 = vld [vmem:[%s14577_s1 + $0x190] sm:$0xff]   ;;  %v11142_v0 = vld [vmem:[%s14577_s1 + $0x1d8] sm:$0xff]  }
  0x11   :  { %10006 = vmatpush3.bf16.msra.mxu1 %v11110_v15  ;;  %v11143_v1 = vld [vmem:[%s14577_s1 + $0x198] sm:$0xff]   ;;  %v11144_v2 = vld [vmem:[%s14577_s1 + $0x160] sm:$0xff]   ;;  %v11148_v6 = vld [vmem:[%s14577_s1 + $0x168] sm:$0xff]  }
  0x12   :  { %10007 = vmatprep.subr.bf16.mxu1 %v11113_v18  ;;  %v1677_v56 = vcombine.high %v1673_v50, %v1673_v50  ;;  %7113 = vmatprep.mubr.bf16.mxu1 %v1676_v53  ;;  %v11145_v3 = vld [vmem:[%s14577_s1 + $0x120] sm:$0xff]   ;;  %v11149_v7 = vld [vmem:[%s14577_s1 + $0x128] sm:$0xff]   ;;  %v11152_v10 = vld [vmem:[%s14577_s1 + $0x170] sm:$0xff]   ;;  %v1659_v18 = vrot.slane %v12069_v43, %v12065_v41 }
  0x13   :  { %9986 = vmatpush3.bf16.msra.mxu0 %v11112_v17  ;;  %v11146_v4 = vld [vmem:[%s14577_s1 + $0x1e0] sm:$0xff]   ;;  %v11150_v8 = vld [vmem:[%s14577_s1 + $0x1e8] sm:$0xff]   ;;  %v11153_v11 = vld [vmem:[%s14577_s1 + $0x130] sm:$0xff]  }
  0x14   :  { %9987 = vmatprep.subr.bf16.mxu0 %v11115_v20  ;;  %v11147_v5 = vld [vmem:[%s14577_s1 + $0x1a0] sm:$0xff]   ;;  %v11151_v9 = vld [vmem:[%s14577_s1 + $0x1a8] sm:$0xff]   ;;  %v11154_v12 = vld [vmem:[%s14577_s1 + $0x1f0] sm:$0xff]  }
  0x15   :  { %10008 = vmatpush3.bf16.msra.mxu1 %v11114_v19  ;;  %v11155_v13 = vld [vmem:[%s14577_s1 + $0x1b0] sm:$0xff]   ;;  %v11156_v14 = vld [vmem:[%s14577_s1 + $0x178] sm:$0xff]   ;;  %v11160_v19 = vld [vmem:[%s14577_s1 + $0x240] sm:$0xff]  }
  0x16   :  { %10009 = vmatprep.subr.bf16.mxu1 %v11117_v22  ;;  %v11157_v15 = vld [vmem:[%s14577_s1 + $0x138] sm:$0xff]   ;;  %v11161_v20 = vld [vmem:[%s14577_s1 + $0x200] sm:$0xff]   ;;  %v11167_v27 = vld [vmem:[%s14577_s1 + $0x288] sm:$0xff]  }
  0x17   :  { %9988 = vmatpush3.bf16.msra.mxu0 %v11116_v21  ;;  %v11158_v16 = vld [vmem:[%s14577_s1 + $0x1f8] sm:$0xff]   ;;  %v11162_v21 = vld [vmem:[%s14577_s1 + $0x2c0] sm:$0xff]   ;;  %v11181_v42 = vld [vmem:[%s14577_s1 + $0x228] sm:$0xff]  }
  0x18   :  { %9989 = vmatprep.subr.bf16.mxu0 %v11119_v24  ;;  %v11159_v17 = vld [vmem:[%s14577_s1 + $0x1b8] sm:$0xff]   ;;  %v11163_v22 = vld [vmem:[%s14577_s1 + $0x280] sm:$0xff]   ;;  %v11164_v24 = vld [vmem:[%s14577_s1 + $0x248] sm:$0xff]  }
  0x19   :  { %10010 = vmatpush3.bf16.msra.mxu1 %v11118_v23  ;;  %v1675_v23 = vcombine.high %v1659_v18, %v1659_v18  ;;  %v11172_v32 = vld [vmem:[%s14577_s1 + $0x258] sm:$0xff]   ;;  %v11176_v36 = vld [vmem:[%s14577_s1 + $0x260] sm:$0xff]   ;;  %v11182_v43 = vld [vmem:[%s14577_s1 + $0x2e8] sm:$0xff]  }
  0x1a   :  { %10011 = vmatprep.subr.bf16.mxu1 %v11121_v26  ;;  %v11166_v26 = vld [vmem:[%s14577_s1 + $0x2c8] sm:$0xff]   ;;  %v11173_v33 = vld [vmem:[%s14577_s1 + $0x218] sm:$0xff]   ;;  %v11178_v38 = vld [vmem:[%s14577_s1 + $0x2e0] sm:$0xff]  }
  0x1b   :  { %9990 = vmatpush3.bf16.msra.mxu0 %v11120_v25  ;;  %v11165_v25 = vld [vmem:[%s14577_s1 + $0x208] sm:$0xff]   ;;  %v11175_v35 = vld [vmem:[%s14577_s1 + $0x298] sm:$0xff]   ;;  %v11179_v39 = vld [vmem:[%s14577_s1 + $0x2a0] sm:$0xff]  }
  0x1c   :  { %9991 = vmatprep.subr.bf16.mxu0 %v11123_v29  ;;  %v11169_v29 = vld [vmem:[%s14577_s1 + $0x210] sm:$0xff]   ;;  %v11183_v44 = vld [vmem:[%s14577_s1 + $0x2a8] sm:$0xff]  }
  0x1d   :  { %10012 = vmatpush3.bf16.msra.mxu1 %v11122_v28  ;;  %v11168_v28 = vld [vmem:[%s14577_s1 + $0x250] sm:$0xff]   ;;  %v29_v46 = vld [vmem:[%s14576_s0 + $0x8] sm:$0xff] }
  0x1e   :  { %10013 = vmatprep.subr.bf16.mxu1 %v11125_v31  ;;  %v11171_v31 = vld [vmem:[%s14577_s1 + $0x290] sm:$0xff]   ;;  %v1685_v48 = vrot.slane %v29_v46, %v12065_v41 }
  0x1f   :  { %9992 = vmatpush3.bf16.msra.mxu0 %v11124_v30  ;;  %v11170_v30 = vld [vmem:[%s14577_s1 + $0x2d0] sm:$0xff]  }
  0x20   :  { %10021 = vmatprep.subr.bf16.mxu0 %v11128_v37  ;;  %v11177_v37 = vld [vmem:[%s14577_s1 + $0x220] sm:$0xff]  }
  0x21   :  { %10014 = vmatpush3.bf16.msra.mxu1 %v11127_v34  ;;  %v11174_v34 = vld [vmem:[%s14577_s1 + $0x2d8] sm:$0xff]  }
  0x22   :  { %10043 = vmatprep.subr.bf16.mxu1 %v11130_v40  ;;  %7074 = vmatmul.mubr.bf16.vlgmr.msra.gmra.mrb[0].mxu0 %v1652_v45  ;;  %v11180_v40 = vld [vmem:[%s14577_s1 + $0x268] sm:$0xff]   ;;  %v11184_v45 = vld [vmem:[%s14577_s1 + $0x270] sm:$0xff]  }
  0x23   :  { %10022 = vmatpush3.bf16.msra.mxu0 %v11129_v47  ;;  %7153 = vmatprep.mubr.bf16.mxu0 %v1673_v50  ;;  %v11185_v47 = vld [vmem:[%s14577_s1 + $0x230] sm:$0xff]  }
  0x24   :  { %7114 = vmatmul.mubr.bf16.vlgmr.msra.gmra.mrb[0].mxu1 %v1674_v51  ;;  %10023 = vmatprep.subr.bf16.mxu0 %v11132_v52  ;;  %v11186_v50 = vld [vmem:[%s14577_s1 + $0x2f0] sm:$0xff]   ;;  %v1693_v52 = vcombine.high %v1685_v48, %v1685_v48 }
  0x25   :  { %10044 = vmatpush3.bf16.msra.mxu1 %v11131_v49  ;;  %7193 = vmatprep.mubr.bf16.mxu1 %v1677_v56  ;;  %v1678_v49 = vcombine.high %v29_v46, %v29_v46  ;;  %v11187_v51 = vld [vmem:[%s14577_s1 + $0x2b0] sm:$0xff]  }
  0x26   :  { %10045 = vmatprep.subr.bf16.mxu1 %v11134_v55  ;;  %v11189_v55 = vld [vmem:[%s14577_s1 + $0x238] sm:$0xff]   ;;  %v1715_v56 = vrot.slane %v1693_v52, %v12065_v41  ;;  %v11235_v46 = vld [vmem:[%s14577_s1 + $0x4d0] sm:$0xff]   ;;  %v11241_v52 = vld [vmem:[%s14577_s1 + $0x460] sm:$0xff]  }
  0x27   :  { %10024 = vmatpush3.bf16.msra.mxu0 %v11133_v54  ;;  %v12257_v53 = vrot.slane %v1678_v49, %v12065_v41  ;;  %v11188_v54 = vld [vmem:[%s14577_s1 + $0x278] sm:$0xff]  }
  0x28   :  { %10025 = vmatprep.subr.bf16.mxu0 %v11136_v58  ;;  %v11190_v58 = vld [vmem:[%s14577_s1 + $0x2f8] sm:$0xff]  }
  0x29   :  { %10046 = vmatpush3.bf16.msra.mxu1 %v11135_v57  ;;  %v1694_v57 = vcombine.high %v12257_v53, %v12257_v53  ;;  %v11238_v49 = vld [vmem:[%s14577_s1 + $0x418] sm:$0xff]  }
  0x2a   :  { %10047 = vmatprep.subr.bf16.mxu1 %v11138_v60  ;;  %v1725_v60 = vcombine.high %v1715_v56, %v1715_v56 }
  0x2b   :  { %10026 = vmatpush3.bf16.msra.mxu0 %v11137_v59  ;;  %v11191_v59 = vld [vmem:[%s14577_s1 + $0x2b8] sm:$0xff]  }
  0x2c   :  { %10027 = vmatprep.subr.bf16.mxu0 %v11140_v62  ;;  %v11192_v62 = vld [vmem:[%s14577_s1 + $0x340] sm:$0xff]  }
  0x2d   :  { %10048 = vmatpush3.bf16.msra.mxu1 %v11139_v61  ;;  %v1701_v61 = vrot.slane %v1685_v48, %v12065_v41  ;;  %v11237_v48 = vld [vmem:[%s14577_s1 + $0x458] sm:$0xff]  }
  0x2e   :  { %10049 = vmatprep.subr.bf16.mxu1 %v11142_v0  ;;  %v1722_v0 = vrot.slane %v1694_v57, %v12065_v41  ;;  %v11246_v57 = vld [vmem:[%s14577_s1 + $0x428] sm:$0xff]  }
  0x2f   :  { %10028 = vmatpush3.bf16.msra.mxu0 %v11141_v63  ;;  %v11193_v63 = vld [vmem:[%s14577_s1 + $0x300] sm:$0xff]  }
  0x30   :  { %10029 = vmatprep.subr.bf16.mxu0 %v11144_v2  ;;  %v11195_v2 = vld [vmem:[%s14577_s1 + $0x380] sm:$0xff]  }
  0x31   :  { %10050 = vmatpush3.bf16.msra.mxu1 %v11143_v1  ;;  %v11194_v1 = vld [vmem:[%s14577_s1 + $0x3c0] sm:$0xff]  }
  0x32   :  { %10051 = vmatprep.subr.bf16.mxu1 %v11146_v4  ;;  %v11196_v4 = vld [vmem:[%s14577_s1 + $0x348] sm:$0xff]  }
  0x33   :  { %10030 = vmatpush3.bf16.msra.mxu0 %v11145_v3  ;;  %v1723_v3 = vcombine.high %v1701_v61, %v1701_v61 }
  0x34   :  { %10031 = vmatprep.subr.bf16.mxu0 %v11148_v6  ;;  %v1726_v6 = vcombine.high %v1722_v0, %v1722_v0 }
  0x35   :  { %10052 = vmatpush3.bf16.msra.mxu1 %v11147_v5  ;;  %v11197_v5 = vld [vmem:[%s14577_s1 + $0x308] sm:$0xff]  }
  0x36   :  { %10053 = vmatprep.subr.bf16.mxu1 %v11150_v8  ;;  %v11199_v8 = vld [vmem:[%s14577_s1 + $0x388] sm:$0xff]  }
  0x37   :  { %10032 = vmatpush3.bf16.msra.mxu0 %v11149_v7  ;;  %v11198_v7 = vld [vmem:[%s14577_s1 + $0x3c8] sm:$0xff]  }
  0x38   :  { %10033 = vmatprep.subr.bf16.mxu0 %v11152_v10  ;;  %v11201_v10 = vld [vmem:[%s14577_s1 + $0x310] sm:$0xff]  }
  0x39   :  { %10054 = vmatpush3.bf16.msra.mxu1 %v11151_v9  ;;  %v11200_v9 = vld [vmem:[%s14577_s1 + $0x350] sm:$0xff]  }
  0x3a   :  { %10055 = vmatprep.subr.bf16.mxu1 %v11154_v12  ;;  %v11203_v12 = vld [vmem:[%s14577_s1 + $0x390] sm:$0xff]  }
  0x3b   :  { %10034 = vmatpush3.bf16.msra.mxu0 %v11153_v11  ;;  %v11202_v11 = vld [vmem:[%s14577_s1 + $0x3d0] sm:$0xff]  }
  0x3c   :  { %10035 = vmatprep.subr.bf16.mxu0 %v11156_v14  ;;  %v11205_v14 = vld [vmem:[%s14577_s1 + $0x318] sm:$0xff]  }
  0x3d   :  { %10056 = vmatpush3.bf16.msra.mxu1 %v11155_v13  ;;  %v11204_v13 = vld [vmem:[%s14577_s1 + $0x358] sm:$0xff]  }
  0x3e   :  { %10057 = vmatprep.subr.bf16.mxu1 %v11158_v16  ;;  %v11207_v16 = vld [vmem:[%s14577_s1 + $0x398] sm:$0xff]  }
  0x3f   :  { %10036 = vmatpush3.bf16.msra.mxu0 %v11157_v15  ;;  %v11206_v15 = vld [vmem:[%s14577_s1 + $0x3d8] sm:$0xff]  }
  0x40   :  { %10065 = vmatprep.subr.bf16.mxu0 %v11160_v19  ;;  %v11210_v19 = vld [vmem:[%s14577_s1 + $0x3e0] sm:$0xff]  }
  0x41   :  { %10058 = vmatpush3.bf16.msra.mxu1 %v11159_v17  ;;  %v11208_v17 = vld [vmem:[%s14577_s1 + $0x360] sm:$0xff]  }
  0x42   :  { %7154 = vmatmul.mubr.bf16.vlgmr.msra.gmra.mrb[4].mxu0 %v1659_v18  ;;  %10087 = vmatprep.subr.bf16.mxu1 %v11162_v21  ;;  %v11209_v18 = vld [vmem:[%s14577_s1 + $0x320] sm:$0xff]   ;;  %v11212_v21 = vld [vmem:[%s14577_s1 + $0x368] sm:$0xff]  }
  0x43   :  { %10066 = vmatpush3.bf16.msra.mxu0 %v11161_v20  ;;  %7233 = vmatprep.mubr.bf16.mxu0 %v1715_v56  ;;  %v11211_v20 = vld [vmem:[%s14577_s1 + $0x3a0] sm:$0xff]   ;;  %v11245_v56 = vld [vmem:[%s14577_s1 + $0x468] sm:$0xff]  }
  0x44   :  { %7194 = vmatmul.mubr.bf16.vlgmr.msra.gmra.mrb[4].mxu1 %v1675_v23  ;;  %10067 = vmatprep.subr.bf16.mxu0 %v11164_v24  ;;  %v11214_v23 = vld [vmem:[%s14577_s1 + $0x3e8] sm:$0xff]  }
  0x45   :  { %10088 = vmatpush3.bf16.msra.mxu1 %v11163_v22  ;;  %7273 = vmatprep.mubr.bf16.mxu1 %v1725_v60  ;;  %v11213_v22 = vld [vmem:[%s14577_s1 + $0x328] sm:$0xff]   ;;  %v11249_v60 = vld [vmem:[%s14577_s1 + $0x470] sm:$0xff]  }
  0x46   :  { %10089 = vmatprep.subr.bf16.mxu1 %v11166_v26  ;;  %v11215_v24 = vld [vmem:[%s14577_s1 + $0x3a8] sm:$0xff]   ;;  %v11217_v26 = vld [vmem:[%s14577_s1 + $0x330] sm:$0xff]  }
  0x47   :  { %10068 = vmatpush3.bf16.msra.mxu0 %v11165_v25  ;;  %v11216_v25 = vld [vmem:[%s14577_s1 + $0x370] sm:$0xff]  }
  0x48   :  { %10069 = vmatprep.subr.bf16.mxu0 %v11168_v28  ;;  %v11219_v28 = vld [vmem:[%s14577_s1 + $0x3b0] sm:$0xff]  }
  0x49   :  { %10090 = vmatpush3.bf16.msra.mxu1 %v11167_v27  ;;  %v11218_v27 = vld [vmem:[%s14577_s1 + $0x3f0] sm:$0xff]  }
  0x4a   :  { %10091 = vmatprep.subr.bf16.mxu1 %v11170_v30  ;;  %v11221_v30 = vld [vmem:[%s14577_s1 + $0x338] sm:$0xff]  }
  0x4b   :  { %10070 = vmatpush3.bf16.msra.mxu0 %v11169_v29  ;;  %v11220_v29 = vld [vmem:[%s14577_s1 + $0x378] sm:$0xff]  }
  0x4c   :  { %10071 = vmatprep.subr.bf16.mxu0 %v11172_v32  ;;  %v11224_v32 = vld [vmem:[%s14577_s1 + $0x3b8] sm:$0xff]  }
  0x4d   :  { %10092 = vmatpush3.bf16.msra.mxu1 %v11171_v31  ;;  %v11222_v31 = vld [vmem:[%s14577_s1 + $0x3f8] sm:$0xff]  }
  0x4e   :  { %10093 = vmatprep.subr.bf16.mxu1 %v11174_v34  ;;  %v11225_v34 = vld [vmem:[%s14577_s1 + $0x440] sm:$0xff]  }
  0x4f   :  { %10072 = vmatpush3.bf16.msra.mxu0 %v11173_v33  ;;  %v1708_v33 = vrot.slane %v12257_v53, %v12065_v41  ;;  %v11242_v53 = vld [vmem:[%s14577_s1 + $0x420] sm:$0xff]  }
  0x50   :  { %10073 = vmatprep.subr.bf16.mxu0 %v11176_v36  ;;  %v11227_v36 = vld [vmem:[%s14577_s1 + $0x4c0] sm:$0xff]  }
  0x51   :  { %10094 = vmatpush3.bf16.msra.mxu1 %v11175_v35  ;;  %v11226_v35 = vld [vmem:[%s14577_s1 + $0x400] sm:$0xff]  }
  0x52   :  { %10095 = vmatprep.subr.bf16.mxu1 %v11178_v38  ;;  %v1724_v38 = vcombine.high %v1708_v33, %v1708_v33 }
  0x53   :  { %10074 = vmatpush3.bf16.msra.mxu0 %v11177_v37  ;;  %v11228_v37 = vld [vmem:[%s14577_s1 + $0x480] sm:$0xff]  }
  0x54   :  { %10075 = vmatprep.subr.bf16.mxu0 %v11180_v40  ;;  %v11230_v40 = vld [vmem:[%s14577_s1 + $0x408] sm:$0xff]  }
  0x55   :  { %10096 = vmatpush3.bf16.msra.mxu1 %v11179_v39  ;;  %v11229_v39 = vld [vmem:[%s14577_s1 + $0x448] sm:$0xff]  }
  0x56   :  { %10097 = vmatprep.subr.bf16.mxu1 %v11182_v43  ;;  %v11232_v43 = vld [vmem:[%s14577_s1 + $0x488] sm:$0xff]  }
  0x57   :  { %10076 = vmatpush3.bf16.msra.mxu0 %v11181_v42  ;;  %v11231_v42 = vld [vmem:[%s14577_s1 + $0x4c8] sm:$0xff]  }
  0x58   :  { %10077 = vmatprep.subr.bf16.mxu0 %v11184_v45  ;;  %v11234_v45 = vld [vmem:[%s14577_s1 + $0x410] sm:$0xff]  }
  0x59   :  { %10098 = vmatpush3.bf16.msra.mxu1 %v11183_v44  ;;  %v11233_v44 = vld [vmem:[%s14577_s1 + $0x450] sm:$0xff]  }
  0x5a   :  { %10099 = vmatprep.subr.bf16.mxu1 %v11186_v50  ;;  %v11239_v50 = vld [vmem:[%s14577_s1 + $0x4d8] sm:$0xff]  }
  0x5b   :  { %10078 = vmatpush3.bf16.msra.mxu0 %v11185_v47  ;;  %v11236_v47 = vld [vmem:[%s14577_s1 + $0x490] sm:$0xff]  }
  0x5c   :  { %10079 = vmatprep.subr.bf16.mxu0 %v11188_v54  ;;  %v11243_v54 = vld [vmem:[%s14577_s1 + $0x4e0] sm:$0xff]  }
  0x5d   :  { %10100 = vmatpush3.bf16.msra.mxu1 %v11187_v51  ;;  %v11240_v51 = vld [vmem:[%s14577_s1 + $0x498] sm:$0xff]  }
  0x5e   :  { %10101 = vmatprep.subr.bf16.mxu1 %v11190_v58  ;;  %v11247_v58 = vld [vmem:[%s14577_s1 + $0x4e8] sm:$0xff]  }
  0x5f   :  { %10080 = vmatpush3.bf16.msra.mxu0 %v11189_v55  ;;  %v11244_v55 = vld [vmem:[%s14577_s1 + $0x4a0] sm:$0xff]  }
  0x60   :  { %10109 = vmatprep.subr.bf16.mxu0 %v11192_v62  ;;  %v11250_v62 = vld [vmem:[%s14577_s1 + $0x430] sm:$0xff]  }
  0x61   :  { %10102 = vmatpush3.bf16.msra.mxu1 %v11191_v59  ;;  %v11248_v59 = vld [vmem:[%s14577_s1 + $0x4a8] sm:$0xff]  }
  0x62   :  { %7234 = vmatmul.mubr.bf16.vlgmr.msra.gmra.mrb[8].mxu0 %v1701_v61  ;;  %10131 = vmatprep.subr.bf16.mxu1 %v11194_v1  ;;  %v30_v61 = vld [vmem:[%s14576_s0 + $0x10] sm:$0xff] }
  0x63   :  { %10110 = vmatpush3.bf16.msra.mxu0 %v11193_v63  ;;  %7313 = vmatprep.mubr.bf16.mxu0 %v1722_v0  ;;  %v1734_v63 = vrot.slane %v30_v61, %v12065_v41  ;;  %v1727_v0 = vcombine.high %v30_v61, %v30_v61  ;;  %v11251_v1 = vld [vmem:[%s14577_s1 + $0x4f0] sm:$0xff]  }
  0x64   :  { %7274 = vmatmul.mubr.bf16.vlgmr.msra.gmra.mrb[8].mxu1 %v1723_v3  ;;  %10111 = vmatprep.subr.bf16.mxu0 %v11196_v4  ;;  %v11300_v61 = vld [vmem:[%s14577_s1 + $0x6d0] sm:$0xff]  }
  0x65   :  { %10132 = vmatpush3.bf16.msra.mxu1 %v11195_v2  ;;  %7353 = vmatprep.mubr.bf16.mxu1 %v1726_v6  ;;  %v11252_v2 = vld [vmem:[%s14577_s1 + $0x4b0] sm:$0xff]   ;;  %v1742_v3 = vcombine.high %v1734_v63, %v1734_v63  ;;  %v12463_v4 = vrot.slane %v1727_v0, %v12065_v41  ;;  %v11254_v6 = vld [vmem:[%s14577_s1 + $0x438] sm:$0xff]  }
  0x66   :  { %10133 = vmatprep.subr.bf16.mxu1 %v11198_v7  ;;  %v11303_v0 = vld [vmem:[%s14577_s1 + $0x618] sm:$0xff]  }
  0x67   :  { %10112 = vmatpush3.bf16.msra.mxu0 %v11197_v5  ;;  %v11253_v5 = vld [vmem:[%s14577_s1 + $0x478] sm:$0xff]   ;;  %v1764_v7 = vrot.slane %v1742_v3, %v12065_v41  ;;  %v11306_v3 = vld [vmem:[%s14577_s1 + $0x660] sm:$0xff]  }
  0x68   :  { %10113 = vmatprep.subr.bf16.mxu0 %v11200_v9  ;;  %v11255_v9 = vld [vmem:[%s14577_s1 + $0x4f8] sm:$0xff]  }
  0x69   :  { %10134 = vmatpush3.bf16.msra.mxu1 %v11199_v8  ;;  %v1743_v8 = vcombine.high %v12463_v4, %v12463_v4 }
  0x6a   :  { %10135 = vmatprep.subr.bf16.mxu1 %v11202_v11  ;;  %v1774_v11 = vcombine.high %v1764_v7, %v1764_v7 }
  0x6b   :  { %10114 = vmatpush3.bf16.msra.mxu0 %v11201_v10  ;;  %v11256_v10 = vld [vmem:[%s14577_s1 + $0x4b8] sm:$0xff]  }
  0x6c   :  { %10115 = vmatprep.subr.bf16.mxu0 %v11204_v13  ;;  %v11257_v13 = vld [vmem:[%s14577_s1 + $0x540] sm:$0xff]  }
  0x6d   :  { %10136 = vmatpush3.bf16.msra.mxu1 %v11203_v12  ;;  %v1750_v12 = vrot.slane %v1734_v63, %v12065_v41  ;;  %v11302_v63 = vld [vmem:[%s14577_s1 + $0x658] sm:$0xff]  }
  0x6e   :  { %10137 = vmatprep.subr.bf16.mxu1 %v11206_v15  ;;  %v1771_v15 = vrot.slane %v1743_v8, %v12065_v41  ;;  %v11311_v8 = vld [vmem:[%s14577_s1 + $0x628] sm:$0xff]  }
  0x6f   :  { %10116 = vmatpush3.bf16.msra.mxu0 %v11205_v14  ;;  %v11258_v14 = vld [vmem:[%s14577_s1 + $0x500] sm:$0xff]  }
  0x70   :  { %10117 = vmatprep.subr.bf16.mxu0 %v11208_v17  ;;  %v11260_v17 = vld [vmem:[%s14577_s1 + $0x580] sm:$0xff]  }
  0x71   :  { %10138 = vmatpush3.bf16.msra.mxu1 %v11207_v16  ;;  %v11259_v16 = vld [vmem:[%s14577_s1 + $0x5c0] sm:$0xff]  }
  0x72   :  { %10139 = vmatprep.subr.bf16.mxu1 %v11210_v19  ;;  %v11261_v19 = vld [vmem:[%s14577_s1 + $0x548] sm:$0xff]  }
  0x73   :  { %10118 = vmatpush3.bf16.msra.mxu0 %v11209_v18  ;;  %v1772_v18 = vcombine.high %v1750_v12, %v1750_v12 }
  0x74   :  { %10119 = vmatprep.subr.bf16.mxu0 %v11212_v21  ;;  %v1775_v21 = vcombine.high %v1771_v15, %v1771_v15 }
  0x75   :  { %10140 = vmatpush3.bf16.msra.mxu1 %v11211_v20  ;;  %v11262_v20 = vld [vmem:[%s14577_s1 + $0x508] sm:$0xff]  }
  0x76   :  { %10141 = vmatprep.subr.bf16.mxu1 %v11214_v23  ;;  %v11264_v23 = vld [vmem:[%s14577_s1 + $0x588] sm:$0xff]  }
  0x77   :  { %10120 = vmatpush3.bf16.msra.mxu0 %v11213_v22  ;;  %v11263_v22 = vld [vmem:[%s14577_s1 + $0x5c8] sm:$0xff]  }
  0x78   :  { %10121 = vmatprep.subr.bf16.mxu0 %v11216_v25  ;;  %v11266_v25 = vld [vmem:[%s14577_s1 + $0x510] sm:$0xff]  }
  0x79   :  { %10142 = vmatpush3.bf16.msra.mxu1 %v11215_v24  ;;  %v11265_v24 = vld [vmem:[%s14577_s1 + $0x550] sm:$0xff]  }
  0x7a   :  { %10143 = vmatprep.subr.bf16.mxu1 %v11218_v27  ;;  %v11268_v27 = vld [vmem:[%s14577_s1 + $0x590] sm:$0xff]  }
  0x7b   :  { %10122 = vmatpush3.bf16.msra.mxu0 %v11217_v26  ;;  %v11267_v26 = vld [vmem:[%s14577_s1 + $0x5d0] sm:$0xff]  }
  0x7c   :  { %10123 = vmatprep.subr.bf16.mxu0 %v11220_v29  ;;  %v11270_v29 = vld [vmem:[%s14577_s1 + $0x518] sm:$0xff]  }
  0x7d   :  { %10144 = vmatpush3.bf16.msra.mxu1 %v11219_v28  ;;  %v11269_v28 = vld [vmem:[%s14577_s1 + $0x558] sm:$0xff]  }
  0x7e   :  { %10145 = vmatprep.subr.bf16.mxu1 %v11222_v31  ;;  %v11272_v31 = vld [vmem:[%s14577_s1 + $0x598] sm:$0xff]  }
  0x7f   :  { %10124 = vmatpush3.bf16.msra.mxu0 %v11221_v30  ;;  %v11271_v30 = vld [vmem:[%s14577_s1 + $0x5d8] sm:$0xff]  }
  0x80   :  { %10153 = vmatprep.subr.bf16.mxu0 %v11225_v34  ;;  %v11275_v34 = vld [vmem:[%s14577_s1 + $0x5e0] sm:$0xff]  }
  0x81   :  { %10146 = vmatpush3.bf16.msra.mxu1 %v11224_v32  ;;  %v11273_v32 = vld [vmem:[%s14577_s1 + $0x560] sm:$0xff]  }
  0x82   :  { %7314 = vmatmul.mubr.bf16.vlgmr.msra.gmra.mrb[12].mxu0 %v1708_v33  ;;  %10175 = vmatprep.subr.bf16.mxu1 %v11227_v36  ;;  %v11274_v33 = vld [vmem:[%s14577_s1 + $0x520] sm:$0xff]   ;;  %v11277_v36 = vld [vmem:[%s14577_s1 + $0x568] sm:$0xff]  }
  0x83   :  { %10154 = vmatpush3.bf16.msra.mxu0 %v11226_v35  ;;  %7393 = vmatprep.mubr.bf16.mxu0 %v1764_v7  ;;  %v11276_v35 = vld [vmem:[%s14577_s1 + $0x5a0] sm:$0xff]   ;;  %v11310_v7 = vld [vmem:[%s14577_s1 + $0x668] sm:$0xff]  }
  0x84   :  { %7354 = vmatmul.mubr.bf16.vlgmr.msra.gmra.mrb[12].mxu1 %v1724_v38  ;;  %10155 = vmatprep.subr.bf16.mxu0 %v11229_v39  ;;  %v11279_v38 = vld [vmem:[%s14577_s1 + $0x5e8] sm:$0xff]  }
  0x85   :  { %10176 = vmatpush3.bf16.msra.mxu1 %v11228_v37  ;;  %7433 = vmatprep.mubr.bf16.mxu1 %v1774_v11  ;;  %v11278_v37 = vld [vmem:[%s14577_s1 + $0x528] sm:$0xff]   ;;  %v11314_v11 = vld [vmem:[%s14577_s1 + $0x670] sm:$0xff]  }
  0x86   :  { %10177 = vmatprep.subr.bf16.mxu1 %v11231_v42  ;;  %v11280_v39 = vld [vmem:[%s14577_s1 + $0x5a8] sm:$0xff]   ;;  %v11282_v42 = vld [vmem:[%s14577_s1 + $0x530] sm:$0xff]  }
  0x87   :  { %10156 = vmatpush3.bf16.msra.mxu0 %v11230_v40  ;;  %v11281_v40 = vld [vmem:[%s14577_s1 + $0x570] sm:$0xff]  }
  0x88   :  { %10157 = vmatprep.subr.bf16.mxu0 %v11233_v44  ;;  %v11284_v44 = vld [vmem:[%s14577_s1 + $0x5b0] sm:$0xff]  }
  0x89   :  { %10178 = vmatpush3.bf16.msra.mxu1 %v11232_v43  ;;  %v11283_v43 = vld [vmem:[%s14577_s1 + $0x5f0] sm:$0xff]  }
  0x8a   :  { %10179 = vmatprep.subr.bf16.mxu1 %v11235_v46  ;;  %v11286_v46 = vld [vmem:[%s14577_s1 + $0x538] sm:$0xff]  }
  0x8b   :  { %10158 = vmatpush3.bf16.msra.mxu0 %v11234_v45  ;;  %v11285_v45 = vld [vmem:[%s14577_s1 + $0x578] sm:$0xff]  }
  0x8c   :  { %10159 = vmatprep.subr.bf16.mxu0 %v11237_v48  ;;  %v11289_v48 = vld [vmem:[%s14577_s1 + $0x5b8] sm:$0xff]  }
  0x8d   :  { %10180 = vmatpush3.bf16.msra.mxu1 %v11236_v47  ;;  %v11287_v47 = vld [vmem:[%s14577_s1 + $0x5f8] sm:$0xff]  }
  0x8e   :  { %10181 = vmatprep.subr.bf16.mxu1 %v11239_v50  ;;  %v11290_v50 = vld [vmem:[%s14577_s1 + $0x640] sm:$0xff]  }
  0x8f   :  { %10160 = vmatpush3.bf16.msra.mxu0 %v11238_v49  ;;  %v1757_v49 = vrot.slane %v12463_v4, %v12065_v41  ;;  %v11307_v4 = vld [vmem:[%s14577_s1 + $0x620] sm:$0xff]  }
  0x90   :  { %10161 = vmatprep.subr.bf16.mxu0 %v11241_v52  ;;  %v11292_v52 = vld [vmem:[%s14577_s1 + $0x6c0] sm:$0xff]  }
  0x91   :  { %10182 = vmatpush3.bf16.msra.mxu1 %v11240_v51  ;;  %v11291_v51 = vld [vmem:[%s14577_s1 + $0x600] sm:$0xff]  }
  0x92   :  { %10183 = vmatprep.subr.bf16.mxu1 %v11243_v54  ;;  %v1773_v54 = vcombine.high %v1757_v49, %v1757_v49 }
  0x93   :  { %10162 = vmatpush3.bf16.msra.mxu0 %v11242_v53  ;;  %v11293_v53 = vld [vmem:[%s14577_s1 + $0x680] sm:$0xff]  }
  0x94   :  { %10163 = vmatprep.subr.bf16.mxu0 %v11245_v56  ;;  %v11295_v56 = vld [vmem:[%s14577_s1 + $0x608] sm:$0xff]  }
  0x95   :  { %10184 = vmatpush3.bf16.msra.mxu1 %v11244_v55  ;;  %v11294_v55 = vld [vmem:[%s14577_s1 + $0x648] sm:$0xff]  }
  0x96   :  { %10185 = vmatprep.subr.bf16.mxu1 %v11247_v58  ;;  %v11297_v58 = vld [vmem:[%s14577_s1 + $0x688] sm:$0xff]  }
  0x97   :  { %10164 = vmatpush3.bf16.msra.mxu0 %v11246_v57  ;;  %v11296_v57 = vld [vmem:[%s14577_s1 + $0x6c8] sm:$0xff]  }
  0x98   :  { %10165 = vmatprep.subr.bf16.mxu0 %v11249_v60  ;;  %v11299_v60 = vld [vmem:[%s14577_s1 + $0x610] sm:$0xff]  }
  0x99   :  { %10186 = vmatpush3.bf16.msra.mxu1 %v11248_v59  ;;  %v11298_v59 = vld [vmem:[%s14577_s1 + $0x650] sm:$0xff]  }
  0x9a   :  { %10187 = vmatprep.subr.bf16.mxu1 %v11251_v1  ;;  %v11304_v1 = vld [vmem:[%s14577_s1 + $0x6d8] sm:$0xff]  }
  0x9b   :  { %10166 = vmatpush3.bf16.msra.mxu0 %v11250_v62  ;;  %v11301_v62 = vld [vmem:[%s14577_s1 + $0x690] sm:$0xff]  }
  0x9c   :  { %10167 = vmatprep.subr.bf16.mxu0 %v11253_v5  ;;  %v11308_v5 = vld [vmem:[%s14577_s1 + $0x6e0] sm:$0xff]  }
  0x9d   :  { %10188 = vmatpush3.bf16.msra.mxu1 %v11252_v2  ;;  %v11305_v2 = vld [vmem:[%s14577_s1 + $0x698] sm:$0xff]  }
  0x9e   :  { %10189 = vmatprep.subr.bf16.mxu1 %v11255_v9  ;;  %v11312_v9 = vld [vmem:[%s14577_s1 + $0x6e8] sm:$0xff]  }
  0x9f   :  { %10168 = vmatpush3.bf16.msra.mxu0 %v11254_v6  ;;  %v11309_v6 = vld [vmem:[%s14577_s1 + $0x6a0] sm:$0xff]  }
  0xa0   :  { %10197 = vmatprep.subr.bf16.mxu0 %v11257_v13  ;;  %v11316_v13 = vld [vmem:[%s14577_s1 + $0x6f0] sm:$0xff]  }
  0xa1   :  { %10190 = vmatpush3.bf16.msra.mxu1 %v11256_v10  ;;  %v11313_v10 = vld [vmem:[%s14577_s1 + $0x6a8] sm:$0xff]  }
  0xa2   :  { %7394 = vmatmul.mubr.bf16.vlgmr.msra.gmra.mrb[16].mxu0 %v1750_v12  ;;  %10219 = vmatprep.subr.bf16.mxu1 %v11259_v16  ;;  %v31_v12 = vld [vmem:[%s14576_s0 + $0x18] sm:$0xff]  ;;  %v11315_v16 = vld [vmem:[%s14577_s1 + $0x630] sm:$0xff]  }
  0xa3   :  { %10198 = vmatpush3.bf16.msra.mxu0 %v11258_v14  ;;  %7473 = vmatprep.mubr.bf16.mxu0 %v1771_v15  ;;  %v1783_v14 = vrot.slane %v31_v12, %v12065_v41  ;;  %v1776_v15 = vcombine.high %v31_v12, %v31_v12  ;;  %v11354_v12 = vld [vmem:[%s14577_s1 + $0x7b8] sm:$0xff]  }
  0xa4   :  { %7434 = vmatmul.mubr.bf16.vlgmr.msra.gmra.mrb[16].mxu1 %v1772_v18  ;;  %10199 = vmatprep.subr.bf16.mxu0 %v11261_v19 }
  0xa5   :  { %10220 = vmatpush3.bf16.msra.mxu1 %v11260_v17  ;;  %7513 = vmatprep.mubr.bf16.mxu1 %v1775_v21  ;;  %v11318_v17 = vld [vmem:[%s14577_s1 + $0x678] sm:$0xff]   ;;  %v1791_v18 = vcombine.high %v1783_v14, %v1783_v14  ;;  %v12669_v19 = vrot.slane %v1776_v15, %v12065_v41  ;;  %v11356_v15 = vld [vmem:[%s14577_s1 + $0x800] sm:$0xff]  }
  0xa6   :  { %10221 = vmatprep.subr.bf16.mxu1 %v11263_v22  ;;  %v11320_v21 = vld [vmem:[%s14577_s1 + $0x6f8] sm:$0xff]  }
  0xa7   :  { %10200 = vmatpush3.bf16.msra.mxu0 %v11262_v20  ;;  %v11317_v20 = vld [vmem:[%s14577_s1 + $0x6b0] sm:$0xff]   ;;  %v1813_v22 = vrot.slane %v1791_v18, %v12065_v41 }
  0xa8   :  { %10201 = vmatprep.subr.bf16.mxu0 %v11265_v24  ;;  %v11319_v24 = vld [vmem:[%s14577_s1 + $0x638] sm:$0xff]  }
  0xa9   :  { %10222 = vmatpush3.bf16.msra.mxu1 %v11264_v23  ;;  %v1792_v23 = vcombine.high %v12669_v19, %v12669_v19 }
  0xaa   :  { %10223 = vmatprep.subr.bf16.mxu1 %v11267_v26  ;;  %v11322_v26 = vld [vmem:[%s14577_s1 + $0x740] sm:$0xff]  }
  0xab   :  { %10202 = vmatpush3.bf16.msra.mxu0 %v11266_v25  ;;  %v1799_v25 = vrot.slane %v1783_v14, %v12065_v41  ;;  %v11355_v14 = vld [vmem:[%s14577_s1 + $0x840] sm:$0xff]  }
  0xac   :  { %10203 = vmatprep.subr.bf16.mxu0 %v11269_v28  ;;  %v11321_v28 = vld [vmem:[%s14577_s1 + $0x6b8] sm:$0xff]  }
  0xad   :  { %10224 = vmatpush3.bf16.msra.mxu1 %v11268_v27  ;;  %v1823_v27 = vcombine.high %v1813_v22, %v1813_v22 }
  0xae   :  { %10225 = vmatprep.subr.bf16.mxu1 %v11271_v30  ;;  %v11324_v30 = vld [vmem:[%s14577_s1 + $0x7c0] sm:$0xff]  }
  0xaf   :  { %10204 = vmatpush3.bf16.msra.mxu0 %v11270_v29  ;;  %v1820_v29 = vrot.slane %v1792_v23, %v12065_v41  ;;  %v11363_v23 = vld [vmem:[%s14577_s1 + $0x850] sm:$0xff]  }
  0xb0   :  { %10205 = vmatprep.subr.bf16.mxu0 %v11273_v32  ;;  %v1821_v32 = vcombine.high %v1799_v25, %v1799_v25 }
  0xb1   :  { %10226 = vmatpush3.bf16.msra.mxu1 %v11272_v31  ;;  %v11323_v31 = vld [vmem:[%s14577_s1 + $0x700] sm:$0xff]  }
  0xb2   :  { %10227 = vmatprep.subr.bf16.mxu1 %v11275_v34  ;;  %v11325_v34 = vld [vmem:[%s14577_s1 + $0x780] sm:$0xff]  }
  0xb3   :  { %10206 = vmatpush3.bf16.msra.mxu0 %v11274_v33  ;;  %v11326_v33 = vld [vmem:[%s14577_s1 + $0x748] sm:$0xff]  }
  0xb4   :  { %10207 = vmatprep.subr.bf16.mxu0 %v11277_v36  ;;  %v11328_v36 = vld [vmem:[%s14577_s1 + $0x7c8] sm:$0xff]  }
  0xb5   :  { %10228 = vmatpush3.bf16.msra.mxu1 %v11276_v35  ;;  %v1824_v35 = vcombine.high %v1820_v29, %v1820_v29 }
  0xb6   :  { %10229 = vmatprep.subr.bf16.mxu1 %v11279_v38  ;;  %v11330_v38 = vld [vmem:[%s14577_s1 + $0x750] sm:$0xff]  }
  0xb7   :  { %10208 = vmatpush3.bf16.msra.mxu0 %v11278_v37  ;;  %v11327_v37 = vld [vmem:[%s14577_s1 + $0x708] sm:$0xff]  }
  0xb8   :  { %10209 = vmatprep.subr.bf16.mxu0 %v11281_v40  ;;  %v11332_v40 = vld [vmem:[%s14577_s1 + $0x7d0] sm:$0xff]  }
  0xb9   :  { %10230 = vmatpush3.bf16.msra.mxu1 %v11280_v39  ;;  %v11329_v39 = vld [vmem:[%s14577_s1 + $0x788] sm:$0xff]  }
  0xba   :  { %10231 = vmatprep.subr.bf16.mxu1 %v11283_v43  ;;  %v11334_v43 = vld [vmem:[%s14577_s1 + $0x758] sm:$0xff]  }
  0xbb   :  { %10210 = vmatpush3.bf16.msra.mxu0 %v11282_v42  ;;  %v11331_v42 = vld [vmem:[%s14577_s1 + $0x710] sm:$0xff]  }
  0xbc   :  { %10211 = vmatprep.subr.bf16.mxu0 %v11285_v45  ;;  %v11335_v45 = vld [vmem:[%s14577_s1 + $0x718] sm:$0xff]  }
  0xbd   :  { %10232 = vmatpush3.bf16.msra.mxu1 %v11284_v44  ;;  %v11333_v44 = vld [vmem:[%s14577_s1 + $0x790] sm:$0xff]  }
  0xbe   :  { %10233 = vmatprep.subr.bf16.mxu1 %v11287_v47  ;;  %v11337_v47 = vld [vmem:[%s14577_s1 + $0x798] sm:$0xff]  }
  0xbf   :  { %10212 = vmatpush3.bf16.msra.mxu0 %v11286_v46  ;;  %v11336_v46 = vld [vmem:[%s14577_s1 + $0x7d8] sm:$0xff]  }
  0xc0   :  { %10241 = vmatprep.subr.bf16.mxu0 %v11290_v50  ;;  %v11340_v50 = vld [vmem:[%s14577_s1 + $0x7e0] sm:$0xff]  }
  0xc1   :  { %10234 = vmatpush3.bf16.msra.mxu1 %v11289_v48  ;;  %v11338_v48 = vld [vmem:[%s14577_s1 + $0x760] sm:$0xff]  }
  0xc2   :  { %7474 = vmatmul.mubr.bf16.vlgmr.msra.gmra.mrb[20].mxu0 %v1757_v49  ;;  %10263 = vmatprep.subr.bf16.mxu1 %v11292_v52  ;;  %v11339_v49 = vld [vmem:[%s14577_s1 + $0x720] sm:$0xff]   ;;  %v11342_v52 = vld [vmem:[%s14577_s1 + $0x768] sm:$0xff]  }
  0xc3   :  { %10242 = vmatpush3.bf16.msra.mxu0 %v11291_v51  ;;  %7553 = vmatprep.mubr.bf16.mxu0 %v1813_v22  ;;  %v11341_v51 = vld [vmem:[%s14577_s1 + $0x7a0] sm:$0xff]   ;;  %v11362_v22 = vld [vmem:[%s14577_s1 + $0x888] sm:$0xff]  }
  0xc4   :  { %7514 = vmatmul.mubr.bf16.vlgmr.msra.gmra.mrb[20].mxu1 %v1773_v54  ;;  %10243 = vmatprep.subr.bf16.mxu0 %v11294_v55  ;;  %v11344_v54 = vld [vmem:[%s14577_s1 + $0x7e8] sm:$0xff]  }
  0xc5   :  { %10264 = vmatpush3.bf16.msra.mxu1 %v11293_v53  ;;  %7593 = vmatprep.mubr.bf16.mxu1 %v1823_v27  ;;  %v11343_v53 = vld [vmem:[%s14577_s1 + $0x728] sm:$0xff]   ;;  %v11367_v27 = vld [vmem:[%s14577_s1 + $0x858] sm:$0xff]  }
  0xc6   :  { %10265 = vmatprep.subr.bf16.mxu1 %v11296_v57  ;;  %v11345_v55 = vld [vmem:[%s14577_s1 + $0x7a8] sm:$0xff]   ;;  %v11346_v57 = vld [vmem:[%s14577_s1 + $0x770] sm:$0xff]  }
  0xc7   :  { %10244 = vmatpush3.bf16.msra.mxu0 %v11295_v56  ;;  %v9187_v56 = vld [vmem:[%s14578_s2] ss:$0 sm:$0xff] }
  0xc8   :  { %10245 = vmatprep.subr.bf16.mxu0 %v11298_v59  ;;  %v11347_v59 = vld [vmem:[%s14577_s1 + $0x730] sm:$0xff]  }
  0xc9   :  { %10266 = vmatpush3.bf16.msra.mxu1 %v11297_v58 }
  0xca   :  { %10267 = vmatprep.subr.bf16.mxu1 %v11300_v61  ;;  %v11348_v61 = vld [vmem:[%s14577_s1 + $0x7f0] sm:$0xff]  }
  0xcb   :  { %10246 = vmatpush3.bf16.msra.mxu0 %v11299_v60 }
  0xcc   :  { %10247 = vmatprep.subr.bf16.mxu0 %v11302_v63 }
  0xcd   :  { %10268 = vmatpush3.bf16.msra.mxu1 %v11301_v62 }
  0xce   :  { %10269 = vmatprep.subr.bf16.mxu1 %v11304_v1  ;;  %v11349_v1 = vld [vmem:[%s14577_s1 + $0x7b0] sm:$0xff]  }
  0xcf   :  { %10248 = vmatpush3.bf16.msra.mxu0 %v11303_v0 }
  0xd0   :  { %10249 = vmatprep.subr.bf16.mxu0 %v11306_v3 }
  0xd1   :  { %10270 = vmatpush3.bf16.msra.mxu1 %v11305_v2  ;;  %v11350_v2 = vld [vmem:[%s14577_s1 + $0x778] sm:$0xff]  }
  0xd2   :  { %10271 = vmatprep.subr.bf16.mxu1 %v11308_v5 }
  0xd3   :  { %10250 = vmatpush3.bf16.msra.mxu0 %v11307_v4 }
  0xd4   :  { %10251 = vmatprep.subr.bf16.mxu0 %v11310_v7  ;;  %v11351_v7 = vld [vmem:[%s14577_s1 + $0x738] sm:$0xff]  }
  0xd5   :  { %10272 = vmatpush3.bf16.msra.mxu1 %v11309_v6 }
  0xd6   :  { %10273 = vmatprep.subr.bf16.mxu1 %v11312_v9  ;;  %v11352_v9 = vld [vmem:[%s14577_s1 + $0x7f8] sm:$0xff]  }
  0xd7   :  { %10252 = vmatpush3.bf16.msra.mxu0 %v11311_v8 }
  0xd8   :  { %10253 = vmatprep.subr.bf16.mxu0 %v11314_v11 }
  0xd9   :  { %10274 = vmatpush3.bf16.msra.mxu1 %v11313_v10 }
  0xda   :  { %10275 = vmatprep.subr.bf16.mxu1 %v11316_v13  ;;  %v1806_v13 = vrot.slane %v12669_v19, %v12065_v41  ;;  %v11359_v19 = vld [vmem:[%s14577_s1 + $0x848] sm:$0xff]  }
  0xdb   :  { %10254 = vmatpush3.bf16.msra.mxu0 %v11315_v16  ;;  %v11357_v16 = vld [vmem:[%s14577_s1 + $0x8c0] sm:$0xff]  }
  0xdc   :  { %10255 = vmatprep.subr.bf16.mxu0 %v11318_v17  ;;  %v11358_v17 = vld [vmem:[%s14577_s1 + $0x880] sm:$0xff]   ;;  %v1822_v18 = vcombine.high %v1806_v13, %v1806_v13 }
  0xdd   :  { %10276 = vmatpush3.bf16.msra.mxu1 %v11317_v20  ;;  %v11360_v20 = vld [vmem:[%s14577_s1 + $0x808] sm:$0xff]  }
  0xde   :  { %10277 = vmatprep.subr.bf16.mxu1 %v11320_v21  ;;  %v11361_v21 = vld [vmem:[%s14577_s1 + $0x8c8] sm:$0xff]  }
  0xdf   :  { %10256 = vmatpush3.bf16.msra.mxu0 %v11319_v24  ;;  %v11364_v24 = vld [vmem:[%s14577_s1 + $0x810] sm:$0xff]  }
  0xe0   :  { %10285 = vmatprep.subr.bf16.mxu0 %v11322_v26  ;;  %v11366_v26 = vld [vmem:[%s14577_s1 + $0x890] sm:$0xff]  }
  0xe1   :  { %10278 = vmatpush3.bf16.msra.mxu1 %v11321_v28  ;;  %v11368_v28 = vld [vmem:[%s14577_s1 + $0x818] sm:$0xff]  }
  0xe2   :  { %7554 = vmatmul.mubr.bf16.vlgmr.msra.gmra.mrb[24].mxu0 %v1799_v25  ;;  %10307 = vmatprep.subr.bf16.mxu1 %v11324_v30  ;;  %v11365_v25 = vld [vmem:[%s14577_s1 + $0x8d0] sm:$0xff]   ;;  %v11370_v30 = vld [vmem:[%s14577_s1 + $0x898] sm:$0xff]  }
  0xe3   :  { %10286 = vmatpush3.bf16.msra.mxu0 %v11323_v31  ;;  %7633 = vmatprep.mubr.bf16.mxu0 %v1820_v29  ;;  %v11369_v29 = vld [vmem:[%s14577_s1 + $0x8d8] sm:$0xff]   ;;  %v11371_v31 = vld [vmem:[%s14577_s1 + $0x860] sm:$0xff]  }
  0xe4   :  { %7594 = vmatmul.mubr.bf16.vlgmr.msra.gmra.mrb[24].mxu1 %v1821_v32  ;;  %10287 = vmatprep.subr.bf16.mxu0 %v11326_v33  ;;  %v11372_v32 = vld [vmem:[%s14577_s1 + $0x820] sm:$0xff]  }
  0xe5   :  { %10308 = vmatpush3.bf16.msra.mxu1 %v11325_v34  ;;  %7673 = vmatprep.mubr.bf16.mxu1 %v1824_v35  ;;  %v11373_v33 = vld [vmem:[%s14577_s1 + $0x8e0] sm:$0xff]   ;;  %v11375_v35 = vld [vmem:[%s14577_s1 + $0x868] sm:$0xff]  }
  0xe6   :  { %10309 = vmatprep.subr.bf16.mxu1 %v11328_v36  ;;  %v11374_v34 = vld [vmem:[%s14577_s1 + $0x8a0] sm:$0xff]   ;;  %v11376_v36 = vld [vmem:[%s14577_s1 + $0x828] sm:$0xff]  }
  0xe7   :  { %10288 = vmatpush3.bf16.msra.mxu0 %v11327_v37  ;;  %v11377_v37 = vld [vmem:[%s14577_s1 + $0x8e8] sm:$0xff]  }
  0xe8   :  { %10289 = vmatprep.subr.bf16.mxu0 %v11330_v38  ;;  %v11378_v38 = vld [vmem:[%s14577_s1 + $0x8a8] sm:$0xff]  }
  0xe9   :  { %10310 = vmatpush3.bf16.msra.mxu1 %v11329_v39  ;;  %v11379_v39 = vld [vmem:[%s14577_s1 + $0x870] sm:$0xff]  }
  0xea   :  { %10311 = vmatprep.subr.bf16.mxu1 %v11332_v40 }
  0xeb   :  { %10290 = vmatpush3.bf16.msra.mxu0 %v11331_v42  ;;  %v11380_v42 = vld [vmem:[%s14577_s1 + $0x830] sm:$0xff]  }
  0xec   :  { %10291 = vmatprep.subr.bf16.mxu0 %v11334_v43  ;;  %v11381_v43 = vld [vmem:[%s14577_s1 + $0x8f0] sm:$0xff]  }
  0xed   :  { %10312 = vmatpush3.bf16.msra.mxu1 %v11333_v44 }
  0xee   :  { %10313 = vmatprep.subr.bf16.mxu1 %v11336_v46 }
  0xef   :  { %10292 = vmatpush3.bf16.msra.mxu0 %v11335_v45  ;;  %v32_v45 = vld [vmem:[%s14576_s0 + $0x20] sm:$0xff] }
  0xf0   :  { %10293 = vmatprep.subr.bf16.mxu0 %v11338_v48 }
  0xf1   :  { %10314 = vmatpush3.bf16.msra.mxu1 %v11337_v47 }
  0xf2   :  { %10315 = vmatprep.subr.bf16.mxu1 %v11340_v50  ;;  %v11383_v50 = vld [vmem:[%s14577_s1 + $0x878] sm:$0xff]  }
  0xf3   :  { %10294 = vmatpush3.bf16.msra.mxu0 %v11339_v49  ;;  %v11382_v49 = vld [vmem:[%s14577_s1 + $0x8b0] sm:$0xff]  }
  0xf4   :  { %10295 = vmatprep.subr.bf16.mxu0 %v11342_v52  ;;  %v1825_v52 = vcombine.high %v32_v45, %v32_v45 }
  0xf5   :  { %v9993_v58 = vpop.f32.mrb[0].mxu0  ;;  %10316 = vmatpush3.bf16.msra.mxu1 %v11341_v51  ;;  %v1832_v51 = vrot.slane %v32_v45, %v12065_v41 }
  0xf6   :  { %v9994_v60 = vpop.f32.mrb[1].mxu0  ;;  %10317 = vmatprep.subr.bf16.mxu1 %v11344_v54 }
  0xf7   :  { %v9995_v62 = vadd.f32 %v9994_v60, %v9993_v58  ;;  %v9996_v63 = vpop.f32.mrb[2].mxu0  ;;  %v10015_v0 = vpop.f32.mrb[0].mxu1  ;;  %10296 = vmatpush3.bf16.msra.mxu0 %v11343_v53  ;;  %v1840_v58 = vcombine.high %v1832_v51, %v1832_v51  ;;  %v11385_v60 = vld [vmem:[%s14577_s1 + $0x8f8] sm:$0xff]  }
  0xf8   :  { %v9997_v3 = vpop.f32.mrb[3].mxu0  ;;  %v10016_v4 = vpop.f32.mrb[1].mxu1  ;;  %10297 = vmatprep.subr.bf16.mxu0 %v11346_v57  ;;  %v11384_v57 = vld [vmem:[%s14577_s1 + $0x838] sm:$0xff]  }
  0xf9   :  { %v7076_v5 = vadd.f32 %v9995_v62, %v9187_v56  ;;  %v10017_v6 = vadd.f32 %v10016_v4, %v10015_v0  ;;  %10318 = vmatpush3.bf16.msra.mxu1 %v11345_v55  ;;  %v10018_v8 = vpop.f32.mrb[2].mxu1  ;;  %v12890_v62 = vrot.slane %v1825_v52, %v12065_v41  ;;  %v1862_v0 = vrot.slane %v1840_v58, %v12065_v41  ;;  %v11387_v3 = vld [vmem:[%s14577_s1 + $0x940] sm:$0xff]   ;;  %v11419_v52 = vld [vmem:[%s14577_s1 + $0x9b8] sm:$0xff]  }
  0xfa   :  { %10319 = vmatprep.subr.bf16.mxu1 %v11348_v61  ;;  %v10019_v10 = vpop.f32.mrb[3].mxu1 }
  0xfb   :  { %v12784_v11 = vadd.f32 %v10017_v6, %v7076_v5  ;;  %10298 = vmatpush3.bf16.msra.mxu0 %v11347_v59  ;;  %v1841_v4 = vcombine.high %v12890_v62, %v12890_v62  ;;  %v1872_v5 = vcombine.high %v1862_v0, %v1862_v0  ;;  %v11388_v6 = vld [vmem:[%s14577_s1 + $0x900] sm:$0xff]  }
  0xfc   :  { %10299 = vmatprep.subr.bf16.mxu0 %v11350_v2  ;;  %v1848_v2 = vrot.slane %v1832_v51, %v12065_v41 }
  0xfd   :  { %10320 = vmatpush3.bf16.msra.mxu1 %v11349_v1  ;;  %v11386_v1 = vld [vmem:[%s14577_s1 + $0x8b8] sm:$0xff]   ;;  %v1869_v8 = vrot.slane %v1841_v4, %v12065_v41 }
  0xfe   :  { %10321 = vmatprep.subr.bf16.mxu1 %v11352_v9  ;;  %v11390_v9 = vld [vmem:[%s14577_s1 + $0x980] sm:$0xff]   ;;  %v1870_v10 = vcombine.high %v1848_v2, %v1848_v2  ;;  %v11433_v4 = vld [vmem:[%s14577_s1 + $0xa18] sm:$0xff]  }
  0xff   :  { %10300 = vmatpush3.bf16.msra.mxu0 %v11351_v7  ;;  %v11389_v7 = vld [vmem:[%s14577_s1 + $0x9c0] sm:$0xff]  }
 0x100   :  { %10329 = vmatprep.subr.bf16.mxu0 %v11355_v14  ;;  %v11393_v14 = vld [vmem:[%s14577_s1 + $0x9c8] sm:$0xff]  }
 0x101   :  { %10322 = vmatpush3.bf16.msra.mxu1 %v11354_v12  ;;  %v11392_v12 = vld [vmem:[%s14577_s1 + $0x908] sm:$0xff]  }
 0x102   :  { %7634 = vmatmul.mubr.bf16.vlgmr.msra.gmra.mrb[28].mxu0 %v1806_v13  ;;  %10351 = vmatprep.subr.bf16.mxu1 %v11357_v16  ;;  %v1873_v13 = vcombine.high %v1869_v8, %v1869_v8  ;;  %v11395_v16 = vld [vmem:[%s14577_s1 + $0x950] sm:$0xff]  }
 0x103   :  { %10330 = vmatpush3.bf16.msra.mxu0 %v11356_v15  ;;  %7713 = vmatprep.mubr.bf16.mxu0 %v1862_v0  ;;  %v11394_v15 = vld [vmem:[%s14577_s1 + $0x988] sm:$0xff]   ;;  %v11429_v0 = vld [vmem:[%s14577_s1 + $0xa10] sm:$0xff]  }
 0x104   :  { %7674 = vmatmul.mubr.bf16.vlgmr.msra.gmra.mrb[28].mxu1 %v1822_v18  ;;  %10331 = vmatprep.subr.bf16.mxu0 %v11359_v19  ;;  %v11397_v18 = vld [vmem:[%s14577_s1 + $0x9d0] sm:$0xff]  }
 0x105   :  { %10352 = vmatpush3.bf16.msra.mxu1 %v11358_v17  ;;  %7753 = vmatprep.mubr.bf16.mxu1 %v1872_v5  ;;  %v11396_v17 = vld [vmem:[%s14577_s1 + $0x910] sm:$0xff]   ;;  %v11434_v5 = vld [vmem:[%s14577_s1 + $0xad8] sm:$0xff]  }
 0x106   :  { %10353 = vmatprep.subr.bf16.mxu1 %v11361_v21  ;;  %v11398_v19 = vld [vmem:[%s14577_s1 + $0x990] sm:$0xff]   ;;  %v11400_v21 = vld [vmem:[%s14577_s1 + $0x918] sm:$0xff]  }
 0x107   :  { %10332 = vmatpush3.bf16.msra.mxu0 %v11360_v20  ;;  %v11399_v20 = vld [vmem:[%s14577_s1 + $0x958] sm:$0xff]  }
 0x108   :  { %10333 = vmatprep.subr.bf16.mxu0 %v11363_v23  ;;  %v11402_v23 = vld [vmem:[%s14577_s1 + $0x998] sm:$0xff]  }
 0x109   :  { %10354 = vmatpush3.bf16.msra.mxu1 %v11362_v22  ;;  %v11401_v22 = vld [vmem:[%s14577_s1 + $0x9d8] sm:$0xff]  }
 0x10a   :  { %10355 = vmatprep.subr.bf16.mxu1 %v11365_v25  ;;  %v11404_v25 = vld [vmem:[%s14577_s1 + $0x920] sm:$0xff]  }
 0x10b   :  { %10334 = vmatpush3.bf16.msra.mxu0 %v11364_v24  ;;  %v11403_v24 = vld [vmem:[%s14577_s1 + $0x960] sm:$0xff]  }
 0x10c   :  { %10335 = vmatprep.subr.bf16.mxu0 %v11367_v27  ;;  %v11406_v27 = vld [vmem:[%s14577_s1 + $0x9a0] sm:$0xff]  }
 0x10d   :  { %10356 = vmatpush3.bf16.msra.mxu1 %v11366_v26  ;;  %v11405_v26 = vld [vmem:[%s14577_s1 + $0x9e0] sm:$0xff]  }
 0x10e   :  { %10357 = vmatprep.subr.bf16.mxu1 %v11369_v29  ;;  %v11408_v29 = vld [vmem:[%s14577_s1 + $0x928] sm:$0xff]  }
 0x10f   :  { %10336 = vmatpush3.bf16.msra.mxu0 %v11368_v28  ;;  %v11407_v28 = vld [vmem:[%s14577_s1 + $0x968] sm:$0xff]  }
 0x110   :  { %10337 = vmatprep.subr.bf16.mxu0 %v11371_v31  ;;  %v11410_v31 = vld [vmem:[%s14577_s1 + $0x9a8] sm:$0xff]  }
 0x111   :  { %10358 = vmatpush3.bf16.msra.mxu1 %v11370_v30  ;;  %v11409_v30 = vld [vmem:[%s14577_s1 + $0x9e8] sm:$0xff]  }
 0x112   :  { %10359 = vmatprep.subr.bf16.mxu1 %v11373_v33 }
 0x113   :  { %10338 = vmatpush3.bf16.msra.mxu0 %v11372_v32  ;;  %v11411_v32 = vld [vmem:[%s14577_s1 + $0x970] sm:$0xff]  }
 0x114   :  { %10339 = vmatprep.subr.bf16.mxu0 %v11375_v35 }
 0x115   :  { %v10037_v40 = vpop.f32.mrb[4].mxu0  ;;  %10360 = vmatpush3.bf16.msra.mxu1 %v11374_v34  ;;  %v11412_v34 = vld [vmem:[%s14577_s1 + $0x930] sm:$0xff]  }
 0x116   :  { %v10038_v44 = vpop.f32.mrb[5].mxu0  ;;  %10361 = vmatprep.subr.bf16.mxu1 %v11377_v37 }
 0x117   :  { %v10039_v46 = vadd.f32 %v10038_v44, %v10037_v40  ;;  %v10040_v47 = vpop.f32.mrb[6].mxu0  ;;  %v10059_v48 = vpop.f32.mrb[4].mxu1  ;;  %10340 = vmatpush3.bf16.msra.mxu0 %v11376_v36  ;;  %v11413_v36 = vld [vmem:[%s14577_s1 + $0x9f0] sm:$0xff]  }
 0x118   :  { %v10041_v53 = vpop.f32.mrb[7].mxu0  ;;  %v10060_v54 = vpop.f32.mrb[5].mxu1  ;;  %10341 = vmatprep.subr.bf16.mxu0 %v11379_v39  ;;  %v11414_v40 = vld [vmem:[%s14577_s1 + $0x9b0] sm:$0xff]   ;;  %v11416_v47 = vld [vmem:[%s14577_s1 + $0x938] sm:$0xff]  }
 0x119   :  { %v7156_v55 = vadd.f32 %v10039_v46, %v12784_v11  ;;  %v10061_v56 = vadd.f32 %v10060_v54, %v10059_v48  ;;  %10362 = vmatpush3.bf16.msra.mxu1 %v11378_v38  ;;  %v10062_v59 = vpop.f32.mrb[6].mxu1  ;;  %v11391_v11 = vld [vmem:[%s14577_s1 + $0x948] sm:$0xff]   ;;  %v1855_v53 = vrot.slane %v12890_v62, %v12065_v41  ;;  %v11420_v54 = vld [vmem:[%s14577_s1 + $0xa40] sm:$0xff]  }
 0x11a   :  { %10363 = vmatprep.subr.bf16.mxu1 %v11381_v43  ;;  %v10063_v61 = vpop.f32.mrb[7].mxu1  ;;  %v11424_v59 = vld [vmem:[%s14577_s1 + $0xa48] sm:$0xff]  }
 0x11b   :  { %v12892_v63 = vadd.f32 %v10061_v56, %v7156_v55  ;;  %10342 = vmatpush3.bf16.msra.mxu0 %v11380_v42  ;;  %v11415_v42 = vld [vmem:[%s14577_s1 + $0x978] sm:$0xff]   ;;  %v11421_v55 = vld [vmem:[%s14577_s1 + $0xa00] sm:$0xff]   ;;  %v1871_v58 = vcombine.high %v1855_v53, %v1855_v53  ;;  %v11426_v61 = vld [vmem:[%s14577_s1 + $0xac8] sm:$0xff]  }
 0x11c   :  { %10343 = vmatprep.subr.bf16.mxu0 %v11383_v50  ;;  %v11422_v56 = vld [vmem:[%s14577_s1 + $0xac0] sm:$0xff]   ;;  %v11427_v62 = vld [vmem:[%s14577_s1 + $0xa88] sm:$0xff]  }
 0x11d   :  { %10364 = vmatpush3.bf16.msra.mxu1 %v11382_v49  ;;  %v11417_v49 = vld [vmem:[%s14577_s1 + $0x9f8] sm:$0xff]  }
 0x11e   :  { %10365 = vmatprep.subr.bf16.mxu1 %v11385_v60  ;;  %v11425_v60 = vld [vmem:[%s14577_s1 + $0xa08] sm:$0xff]  }
 0x11f   :  { %10344 = vmatpush3.bf16.msra.mxu0 %v11384_v57  ;;  %v11423_v57 = vld [vmem:[%s14577_s1 + $0xa80] sm:$0xff]  }
 0x120   :  { %10373 = vmatprep.subr.bf16.mxu0 %v11387_v3  ;;  %v11432_v3 = vld [vmem:[%s14577_s1 + $0xa58] sm:$0xff]  }
 0x121   :  { %10366 = vmatpush3.bf16.msra.mxu1 %v11386_v1  ;;  %v11430_v1 = vld [vmem:[%s14577_s1 + $0xad0] sm:$0xff]  }
 0x122   :  { %7714 = vmatmul.mubr.bf16.vlgmr.msra.gmra.mrb[32].mxu0 %v1848_v2  ;;  %10395 = vmatprep.subr.bf16.mxu1 %v11389_v7  ;;  %v11431_v2 = vld [vmem:[%s14577_s1 + $0xa90] sm:$0xff]   ;;  %v11436_v7 = vld [vmem:[%s14577_s1 + $0xa60] sm:$0xff]  }
 0x123   :  { %10374 = vmatpush3.bf16.msra.mxu0 %v11388_v6  ;;  %7793 = vmatprep.mubr.bf16.mxu0 %v1869_v8  ;;  %v11435_v6 = vld [vmem:[%s14577_s1 + $0xa98] sm:$0xff]   ;;  %v11437_v8 = vld [vmem:[%s14577_s1 + $0xa20] sm:$0xff]  }
 0x124   :  { %7754 = vmatmul.mubr.bf16.vlgmr.msra.gmra.mrb[32].mxu1 %v1870_v10  ;;  %10375 = vmatprep.subr.bf16.mxu0 %v11391_v11  ;;  %v11439_v10 = vld [vmem:[%s14577_s1 + $0xaa0] sm:$0xff]   ;;  %v11440_v11 = vld [vmem:[%s14577_s1 + $0xa68] sm:$0xff]  }
 0x125   :  { %10396 = vmatpush3.bf16.msra.mxu1 %v11390_v9  ;;  %7833 = vmatprep.mubr.bf16.mxu1 %v1873_v13  ;;  %v11438_v9 = vld [vmem:[%s14577_s1 + $0xae0] sm:$0xff]   ;;  %v11442_v13 = vld [vmem:[%s14577_s1 + $0xae8] sm:$0xff]  }
 0x126   :  { %10397 = vmatprep.subr.bf16.mxu1 %v11393_v14  ;;  %v11443_v14 = vld [vmem:[%s14577_s1 + $0xaa8] sm:$0xff]  }
 0x127   :  { %10376 = vmatpush3.bf16.msra.mxu0 %v11392_v12  ;;  %v11441_v12 = vld [vmem:[%s14577_s1 + $0xa28] sm:$0xff]  }
 0x128   :  { %10377 = vmatprep.subr.bf16.mxu0 %v11395_v16 }
 0x129   :  { %10398 = vmatpush3.bf16.msra.mxu1 %v11394_v15  ;;  %v11444_v15 = vld [vmem:[%s14577_s1 + $0xa70] sm:$0xff]  }
 0x12a   :  { %10399 = vmatprep.subr.bf16.mxu1 %v11397_v18 }
 0x12b   :  { %10378 = vmatpush3.bf16.msra.mxu0 %v11396_v17  ;;  %v11445_v17 = vld [vmem:[%s14577_s1 + $0xa30] sm:$0xff]  }
 0x12c   :  { %10379 = vmatprep.subr.bf16.mxu0 %v11399_v20 }
 0x12d   :  { %10400 = vmatpush3.bf16.msra.mxu1 %v11398_v19  ;;  %v11446_v19 = vld [vmem:[%s14577_s1 + $0xaf0] sm:$0xff]  }
 0x12e   :  { %10401 = vmatprep.subr.bf16.mxu1 %v11401_v22 }
 0x12f   :  { %10380 = vmatpush3.bf16.msra.mxu0 %v11400_v21 }
 0x130   :  { %10381 = vmatprep.subr.bf16.mxu0 %v11403_v24  ;;  %v11448_v24 = vld [vmem:[%s14577_s1 + $0xa78] sm:$0xff]  }
 0x131   :  { %10402 = vmatpush3.bf16.msra.mxu1 %v11402_v23  ;;  %v11447_v23 = vld [vmem:[%s14577_s1 + $0xab0] sm:$0xff]  }
 0x132   :  { %10403 = vmatprep.subr.bf16.mxu1 %v11405_v26 }
 0x133   :  { %10382 = vmatpush3.bf16.msra.mxu0 %v11404_v25  ;;  %v33_v25 = vld [vmem:[%s14576_s0 + $0x28] sm:$0xff] }
 0x134   :  { %10383 = vmatprep.subr.bf16.mxu0 %v11407_v28  ;;  %v1881_v28 = vrot.slane %v33_v25, %v12065_v41 }
 0x135   :  { %v10081_v33 = vpop.f32.mrb[8].mxu0  ;;  %10404 = vmatpush3.bf16.msra.mxu1 %v11406_v27 }
 0x136   :  { %v10082_v35 = vpop.f32.mrb[9].mxu0  ;;  %10405 = vmatprep.subr.bf16.mxu1 %v11409_v30 }
 0x137   :  { %v10083_v37 = vadd.f32 %v10082_v35, %v10081_v33  ;;  %v10084_v38 = vpop.f32.mrb[10].mxu0  ;;  %v10103_v39 = vpop.f32.mrb[8].mxu1  ;;  %10384 = vmatpush3.bf16.msra.mxu0 %v11408_v29  ;;  %v1874_v29 = vcombine.high %v33_v25, %v33_v25  ;;  %v1889_v35 = vcombine.high %v1881_v28, %v1881_v28 }
 0x138   :  { %v10085_v43 = vpop.f32.mrb[11].mxu0  ;;  %v10104_v44 = vpop.f32.mrb[9].mxu1  ;;  %10385 = vmatprep.subr.bf16.mxu0 %v11411_v32  ;;  %v11449_v32 = vld [vmem:[%s14577_s1 + $0xa38] sm:$0xff]  }
 0x139   :  { %v7236_v45 = vadd.f32 %v10083_v37, %v12892_v63  ;;  %v10105_v46 = vadd.f32 %v10104_v44, %v10103_v39  ;;  %10406 = vmatpush3.bf16.msra.mxu1 %v11410_v31  ;;  %v10106_v48 = vpop.f32.mrb[10].mxu1  ;;  %v11428_v63 = vld [vmem:[%s14577_s1 + $0xa50] sm:$0xff]   ;;  %v13102_v37 = vrot.slane %v1874_v29, %v12065_v41  ;;  %v11451_v39 = vld [vmem:[%s14577_s1 + $0xab8] sm:$0xff]   ;;  %v11452_v43 = vld [vmem:[%s14577_s1 + $0xb40] sm:$0xff]  }
 0x13a   :  { %10407 = vmatprep.subr.bf16.mxu1 %v11413_v36  ;;  %v10107_v50 = vpop.f32.mrb[11].mxu1  ;;  %v11485_v29 = vld [vmem:[%s14577_s1 + $0xc40] sm:$0xff]  }
 0x13b   :  { %v12996_v51 = vadd.f32 %v10105_v46, %v7236_v45  ;;  %10386 = vmatpush3.bf16.msra.mxu0 %v11412_v34  ;;  %v11450_v34 = vld [vmem:[%s14577_s1 + $0xaf8] sm:$0xff]   ;;  %v1890_v44 = vcombine.high %v13102_v37, %v13102_v37  ;;  %v11453_v45 = vld [vmem:[%s14577_s1 + $0xb00] sm:$0xff]  }
 0x13c   :  { %10387 = vmatprep.subr.bf16.mxu0 %v11415_v42  ;;  %v1897_v42 = vrot.slane %v1881_v28, %v12065_v41  ;;  %v1904_v28 = vrot.slane %v13102_v37, %v12065_v41  ;;  %v11492_v37 = vld [vmem:[%s14577_s1 + $0xc88] sm:$0xff]  }
 0x13d   :  { %10408 = vmatpush3.bf16.msra.mxu1 %v11414_v40  ;;  %v1911_v40 = vrot.slane %v1889_v35, %v12065_v41  ;;  %v1918_v48 = vrot.slane %v1890_v44, %v12065_v41  ;;  %v11490_v35 = vld [vmem:[%s14577_s1 + $0xc08] sm:$0xff]   ;;  %v11498_v44 = vld [vmem:[%s14577_s1 + $0xc18] sm:$0xff]  }
 0x13e   :  { %10409 = vmatprep.subr.bf16.mxu1 %v11417_v49  ;;  %v11455_v49 = vld [vmem:[%s14577_s1 + $0xb80] sm:$0xff]   ;;  %v1919_v50 = vcombine.high %v1897_v42, %v1897_v42 }
 0x13f   :  { %10388 = vmatpush3.bf16.msra.mxu0 %v11416_v47  ;;  %v1921_v46 = vcombine.high %v1911_v40, %v1911_v40  ;;  %v11454_v47 = vld [vmem:[%s14577_s1 + $0xbc0] sm:$0xff]  }
 0x140   :  { %10417 = vmatprep.subr.bf16.mxu0 %v11420_v54  ;;  %v11458_v54 = vld [vmem:[%s14577_s1 + $0xbc8] sm:$0xff]  }
 0x141   :  { %10410 = vmatpush3.bf16.msra.mxu1 %v11419_v52  ;;  %v11457_v52 = vld [vmem:[%s14577_s1 + $0xb08] sm:$0xff]  }
 0x142   :  { %7794 = vmatmul.mubr.bf16.vlgmr.msra.gmra.mrb[36].mxu0 %v1855_v53  ;;  %10439 = vmatprep.subr.bf16.mxu1 %v11422_v56  ;;  %v1922_v53 = vcombine.high %v1918_v48, %v1918_v48  ;;  %v11460_v56 = vld [vmem:[%s14577_s1 + $0xb50] sm:$0xff]  }
 0x143   :  { %10418 = vmatpush3.bf16.msra.mxu0 %v11421_v55  ;;  %7873 = vmatprep.mubr.bf16.mxu0 %v1911_v40  ;;  %v11459_v55 = vld [vmem:[%s14577_s1 + $0xb88] sm:$0xff]   ;;  %v11495_v40 = vld [vmem:[%s14577_s1 + $0xcd0] sm:$0xff]  }
 0x144   :  { %7834 = vmatmul.mubr.bf16.vlgmr.msra.gmra.mrb[36].mxu1 %v1871_v58  ;;  %10419 = vmatprep.subr.bf16.mxu0 %v11424_v59  ;;  %v11462_v58 = vld [vmem:[%s14577_s1 + $0xbd0] sm:$0xff]  }
 0x145   :  { %10440 = vmatpush3.bf16.msra.mxu1 %v11423_v57  ;;  %7913 = vmatprep.mubr.bf16.mxu1 %v1921_v46  ;;  %v11461_v57 = vld [vmem:[%s14577_s1 + $0xb10] sm:$0xff]   ;;  %v11500_v46 = vld [vmem:[%s14577_s1 + $0xc98] sm:$0xff]  }
 0x146   :  { %10441 = vmatprep.subr.bf16.mxu1 %v11426_v61  ;;  %v11463_v59 = vld [vmem:[%s14577_s1 + $0xb90] sm:$0xff]   ;;  %v11465_v61 = vld [vmem:[%s14577_s1 + $0xb18] sm:$0xff]  }
 0x147   :  { %10420 = vmatpush3.bf16.msra.mxu0 %v11425_v60  ;;  %v11464_v60 = vld [vmem:[%s14577_s1 + $0xb58] sm:$0xff]  }
 0x148   :  { %10421 = vmatprep.subr.bf16.mxu0 %v11428_v63  ;;  %v11467_v63 = vld [vmem:[%s14577_s1 + $0xb98] sm:$0xff]  }
 0x149   :  { %10442 = vmatpush3.bf16.msra.mxu1 %v11427_v62  ;;  %v11466_v62 = vld [vmem:[%s14577_s1 + $0xbd8] sm:$0xff]  }
 0x14a   :  { %10443 = vmatprep.subr.bf16.mxu1 %v11430_v1  ;;  %v11469_v1 = vld [vmem:[%s14577_s1 + $0xb20] sm:$0xff]  }
 0x14b   :  { %10422 = vmatpush3.bf16.msra.mxu0 %v11429_v0  ;;  %v11468_v0 = vld [vmem:[%s14577_s1 + $0xb60] sm:$0xff]  }
 0x14c   :  { %10423 = vmatprep.subr.bf16.mxu0 %v11432_v3  ;;  %v11471_v3 = vld [vmem:[%s14577_s1 + $0xba0] sm:$0xff]  }
 0x14d   :  { %10444 = vmatpush3.bf16.msra.mxu1 %v11431_v2  ;;  %v11470_v2 = vld [vmem:[%s14577_s1 + $0xbe0] sm:$0xff]  }
 0x14e   :  { %10445 = vmatprep.subr.bf16.mxu1 %v11434_v5  ;;  %v11473_v5 = vld [vmem:[%s14577_s1 + $0xb28] sm:$0xff]  }
 0x14f   :  { %10424 = vmatpush3.bf16.msra.mxu0 %v11433_v4  ;;  %v11472_v4 = vld [vmem:[%s14577_s1 + $0xb68] sm:$0xff]  }
 0x150   :  { %10425 = vmatprep.subr.bf16.mxu0 %v11436_v7  ;;  %v11475_v7 = vld [vmem:[%s14577_s1 + $0xba8] sm:$0xff]  }
 0x151   :  { %10446 = vmatpush3.bf16.msra.mxu1 %v11435_v6  ;;  %v11474_v6 = vld [vmem:[%s14577_s1 + $0xbe8] sm:$0xff]  }
 0x152   :  { %10447 = vmatprep.subr.bf16.mxu1 %v11438_v9 }
 0x153   :  { %10426 = vmatpush3.bf16.msra.mxu0 %v11437_v8  ;;  %v11476_v8 = vld [vmem:[%s14577_s1 + $0xb70] sm:$0xff]  }
 0x154   :  { %10427 = vmatprep.subr.bf16.mxu0 %v11440_v11 }
 0x155   :  { %v10125_v16 = vpop.f32.mrb[12].mxu0  ;;  %10448 = vmatpush3.bf16.msra.mxu1 %v11439_v10  ;;  %v11477_v10 = vld [vmem:[%s14577_s1 + $0xb30] sm:$0xff]  }
 0x156   :  { %v10126_v18 = vpop.f32.mrb[13].mxu0  ;;  %10449 = vmatprep.subr.bf16.mxu1 %v11442_v13 }
 0x157   :  { %v10127_v20 = vadd.f32 %v10126_v18, %v10125_v16  ;;  %v10128_v21 = vpop.f32.mrb[14].mxu0  ;;  %v10147_v22 = vpop.f32.mrb[12].mxu1  ;;  %10428 = vmatpush3.bf16.msra.mxu0 %v11441_v12  ;;  %v11478_v12 = vld [vmem:[%s14577_s1 + $0xbf0] sm:$0xff]  }
 0x158   :  { %v10129_v26 = vpop.f32.mrb[15].mxu0  ;;  %v10148_v27 = vpop.f32.mrb[13].mxu1  ;;  %10429 = vmatprep.subr.bf16.mxu0 %v11444_v15  ;;  %v11479_v16 = vld [vmem:[%s14577_s1 + $0xbb0] sm:$0xff]  }
 0x159   :  { %v7316_v30 = vadd.f32 %v10127_v20, %v12996_v51  ;;  %v10149_v31 = vadd.f32 %v10148_v27, %v10147_v22  ;;  %10450 = vmatpush3.bf16.msra.mxu1 %v11443_v14  ;;  %v10150_v33 = vpop.f32.mrb[14].mxu1  ;;  %v11456_v51 = vld [vmem:[%s14577_s1 + $0xb48] sm:$0xff]   ;;  %v11481_v22 = vld [vmem:[%s14577_s1 + $0xb38] sm:$0xff]  }
 0x15a   :  { %10451 = vmatprep.subr.bf16.mxu1 %v11446_v19  ;;  %v10151_v36 = vpop.f32.mrb[15].mxu1  ;;  %v11484_v27 = vld [vmem:[%s14577_s1 + $0xbb8] sm:$0xff]   ;;  %v1920_v33 = vcombine.high %v1904_v28, %v1904_v28 }
 0x15b   :  { %v13104_v38 = vadd.f32 %v10149_v31, %v7316_v30  ;;  %10430 = vmatpush3.bf16.msra.mxu0 %v11445_v17  ;;  %v11480_v17 = vld [vmem:[%s14577_s1 + $0xb78] sm:$0xff]   ;;  %v11486_v30 = vld [vmem:[%s14577_s1 + $0xc00] sm:$0xff]   ;;  %v11491_v36 = vld [vmem:[%s14577_s1 + $0xcc8] sm:$0xff]  }
 0x15c   :  { %10431 = vmatprep.subr.bf16.mxu0 %v11448_v24  ;;  %v11482_v24 = vld [vmem:[%s14577_s1 + $0xbf8] sm:$0xff]   ;;  %v11487_v31 = vld [vmem:[%s14577_s1 + $0xcc0] sm:$0xff]  }
 0x15d   :  { %10452 = vmatpush3.bf16.msra.mxu1 %v11447_v23 }
 0x15e   :  { %10453 = vmatprep.subr.bf16.mxu1 %v11450_v34  ;;  %v11489_v34 = vld [vmem:[%s14577_s1 + $0xc48] sm:$0xff]  }
 0x15f   :  { %10432 = vmatpush3.bf16.msra.mxu0 %v11449_v32  ;;  %v11488_v32 = vld [vmem:[%s14577_s1 + $0xc80] sm:$0xff]  }
 0x160   :  { %10461 = vmatprep.subr.bf16.mxu0 %v11452_v43  ;;  %v11497_v43 = vld [vmem:[%s14577_s1 + $0xc58] sm:$0xff]  }
 0x161   :  { %10454 = vmatpush3.bf16.msra.mxu1 %v11451_v39  ;;  %v11494_v39 = vld [vmem:[%s14577_s1 + $0xc10] sm:$0xff]  }
 0x162   :  { %7874 = vmatmul.mubr.bf16.vlgmr.msra.gmra.mrb[40].mxu0 %v1897_v42  ;;  %10483 = vmatprep.subr.bf16.mxu1 %v11454_v47  ;;  %v11496_v42 = vld [vmem:[%s14577_s1 + $0xc90] sm:$0xff]   ;;  %v11501_v47 = vld [vmem:[%s14577_s1 + $0xc60] sm:$0xff]  }
 0x163   :  { %10462 = vmatpush3.bf16.msra.mxu0 %v11453_v45  ;;  %7953 = vmatprep.mubr.bf16.mxu0 %v1918_v48  ;;  %v11499_v45 = vld [vmem:[%s14577_s1 + $0xcd8] sm:$0xff]   ;;  %v11502_v48 = vld [vmem:[%s14577_s1 + $0xc20] sm:$0xff]  }
 0x164   :  { %7914 = vmatmul.mubr.bf16.vlgmr.msra.gmra.mrb[40].mxu1 %v1919_v50  ;;  %10463 = vmatprep.subr.bf16.mxu0 %v11456_v51  ;;  %v11504_v50 = vld [vmem:[%s14577_s1 + $0xca0] sm:$0xff]   ;;  %v11505_v51 = vld [vmem:[%s14577_s1 + $0xc68] sm:$0xff]  }
 0x165   :  { %10484 = vmatpush3.bf16.msra.mxu1 %v11455_v49  ;;  %7993 = vmatprep.mubr.bf16.mxu1 %v1922_v53  ;;  %v11503_v49 = vld [vmem:[%s14577_s1 + $0xce0] sm:$0xff]   ;;  %v11507_v53 = vld [vmem:[%s14577_s1 + $0xce8] sm:$0xff]  }
 0x166   :  { %10485 = vmatprep.subr.bf16.mxu1 %v11458_v54  ;;  %v11508_v54 = vld [vmem:[%s14577_s1 + $0xca8] sm:$0xff]  }
 0x167   :  { %10464 = vmatpush3.bf16.msra.mxu0 %v11457_v52  ;;  %v11506_v52 = vld [vmem:[%s14577_s1 + $0xc28] sm:$0xff]  }
 0x168   :  { %10465 = vmatprep.subr.bf16.mxu0 %v11460_v56 }
 0x169   :  { %10486 = vmatpush3.bf16.msra.mxu1 %v11459_v55  ;;  %v11509_v55 = vld [vmem:[%s14577_s1 + $0xc70] sm:$0xff]  }
 0x16a   :  { %10487 = vmatprep.subr.bf16.mxu1 %v11462_v58 }
 0x16b   :  { %10466 = vmatpush3.bf16.msra.mxu0 %v11461_v57  ;;  %v11510_v57 = vld [vmem:[%s14577_s1 + $0xc30] sm:$0xff]  }
 0x16c   :  { %10467 = vmatprep.subr.bf16.mxu0 %v11464_v60 }
 0x16d   :  { %10488 = vmatpush3.bf16.msra.mxu1 %v11463_v59  ;;  %v11511_v59 = vld [vmem:[%s14577_s1 + $0xcf0] sm:$0xff]  }
 0x16e   :  { %10489 = vmatprep.subr.bf16.mxu1 %v11466_v62 }
 0x16f   :  { %10468 = vmatpush3.bf16.msra.mxu0 %v11465_v61 }
 0x170   :  { %10469 = vmatprep.subr.bf16.mxu0 %v11468_v0 }
 0x171   :  { %10490 = vmatpush3.bf16.msra.mxu1 %v11467_v63  ;;  %v11512_v63 = vld [vmem:[%s14577_s1 + $0xcb0] sm:$0xff]  }
 0x172   :  { %10491 = vmatprep.subr.bf16.mxu1 %v11470_v2  ;;  %v11513_v2 = vld [vmem:[%s14577_s1 + $0xc78] sm:$0xff]  }
 0x173   :  { %10470 = vmatpush3.bf16.msra.mxu0 %v11469_v1 }
 0x174   :  { %10471 = vmatprep.subr.bf16.mxu0 %v11472_v4 }
 0x175   :  { %v10169_v9 = vpop.f32.mrb[16].mxu0  ;;  %10492 = vmatpush3.bf16.msra.mxu1 %v11471_v3  ;;  %v34_v3 = vld [vmem:[%s14576_s0 + $0x30] sm:$0xff] }
 0x176   :  { %v10170_v11 = vpop.f32.mrb[17].mxu0  ;;  %10493 = vmatprep.subr.bf16.mxu1 %v11474_v6  ;;  %v11514_v6 = vld [vmem:[%s14577_s1 + $0xc38] sm:$0xff]  }
 0x177   :  { %v10171_v13 = vadd.f32 %v10170_v11, %v10169_v9  ;;  %v10172_v14 = vpop.f32.mrb[18].mxu0  ;;  %v10191_v15 = vpop.f32.mrb[16].mxu1  ;;  %10472 = vmatpush3.bf16.msra.mxu0 %v11473_v5  ;;  %v1923_v9 = vcombine.high %v34_v3, %v34_v3 }
 0x178   :  { %v10173_v18 = vpop.f32.mrb[19].mxu0  ;;  %v10192_v19 = vpop.f32.mrb[17].mxu1  ;;  %10473 = vmatprep.subr.bf16.mxu0 %v11476_v8  ;;  %v11516_v14 = vld [vmem:[%s14577_s1 + $0xcb8] sm:$0xff]  }
 0x179   :  { %v7396_v20 = vadd.f32 %v10171_v13, %v13104_v38  ;;  %v10193_v21 = vadd.f32 %v10192_v19, %v10191_v15  ;;  %10494 = vmatpush3.bf16.msra.mxu1 %v11475_v7  ;;  %v10194_v23 = vpop.f32.mrb[18].mxu1  ;;  %v11493_v38 = vld [vmem:[%s14577_s1 + $0xc50] sm:$0xff]   ;;  %v1930_v7 = vrot.slane %v34_v3, %v12065_v41  ;;  %v13319_v15 = vrot.slane %v1923_v9, %v12065_v41  ;;  %v11518_v19 = vld [vmem:[%s14577_s1 + $0xd00] sm:$0xff]   ;;  %v11549_v3 = vld [vmem:[%s14577_s1 + $0xdb8] sm:$0xff]  }
 0x17a   :  { %10495 = vmatprep.subr.bf16.mxu1 %v11478_v12  ;;  %v10195_v25 = vpop.f32.mrb[19].mxu1  ;;  %v11520_v23 = vld [vmem:[%s14577_s1 + $0xd80] sm:$0xff]  }
 0x17b   :  { %v13208_v26 = vadd.f32 %v10193_v21, %v7396_v20  ;;  %10474 = vmatpush3.bf16.msra.mxu0 %v11477_v10  ;;  %v11515_v10 = vld [vmem:[%s14577_s1 + $0xcf8] sm:$0xff]   ;;  %v1938_v13 = vcombine.high %v1930_v7, %v1930_v7  ;;  %v1939_v20 = vcombine.high %v13319_v15, %v13319_v15  ;;  %v11519_v21 = vld [vmem:[%s14577_s1 + $0xdc0] sm:$0xff]  }
 0x17c   :  { %10475 = vmatprep.subr.bf16.mxu0 %v11480_v17  ;;  %v11517_v17 = vld [vmem:[%s14577_s1 + $0xd40] sm:$0xff]  }
 0x17d   :  { %10496 = vmatpush3.bf16.msra.mxu1 %v11479_v16  ;;  %v1946_v16 = vrot.slane %v1930_v7, %v12065_v41  ;;  %v1960_v18 = vrot.slane %v1938_v13, %v12065_v41  ;;  %v11552_v7 = vld [vmem:[%s14577_s1 + $0xec0] sm:$0xff]   ;;  %v11557_v13 = vld [vmem:[%s14577_s1 + $0xe88] sm:$0xff]  }
 0x17e   :  { %10497 = vmatprep.subr.bf16.mxu1 %v11482_v24  ;;  %v1967_v24 = vrot.slane %v1939_v20, %v12065_v41  ;;  %v11564_v20 = vld [vmem:[%s14577_s1 + $0xed8] sm:$0xff]  }
 0x17f   :  { %10476 = vmatpush3.bf16.msra.mxu0 %v11481_v22  ;;  %v1970_v22 = vcombine.high %v1960_v18, %v1960_v18  ;;  %v1968_v25 = vcombine.high %v1946_v16, %v1946_v16 }
 0x180   :  { %10505 = vmatprep.subr.bf16.mxu0 %v11485_v29  ;;  %v11523_v29 = vld [vmem:[%s14577_s1 + $0xdc8] sm:$0xff]  }
 0x181   :  { %10498 = vmatpush3.bf16.msra.mxu1 %v11484_v27  ;;  %v11522_v27 = vld [vmem:[%s14577_s1 + $0xd08] sm:$0xff]  }
 0x182   :  { %7954 = vmatmul.mubr.bf16.vlgmr.msra.gmra.mrb[44].mxu0 %v1904_v28  ;;  %10527 = vmatprep.subr.bf16.mxu1 %v11487_v31  ;;  %v1971_v28 = vcombine.high %v1967_v24, %v1967_v24  ;;  %v11525_v31 = vld [vmem:[%s14577_s1 + $0xd50] sm:$0xff]  }
 0x183   :  { %10506 = vmatpush3.bf16.msra.mxu0 %v11486_v30  ;;  %8033 = vmatprep.mubr.bf16.mxu0 %v1960_v18  ;;  %v11524_v30 = vld [vmem:[%s14577_s1 + $0xd88] sm:$0xff]   ;;  %v11562_v18 = vld [vmem:[%s14577_s1 + $0xe58] sm:$0xff]  }
 0x184   :  { %7994 = vmatmul.mubr.bf16.vlgmr.msra.gmra.mrb[44].mxu1 %v1920_v33  ;;  %10507 = vmatprep.subr.bf16.mxu0 %v11489_v34  ;;  %v11527_v33 = vld [vmem:[%s14577_s1 + $0xdd0] sm:$0xff]  }
 0x185   :  { %10528 = vmatpush3.bf16.msra.mxu1 %v11488_v32  ;;  %8073 = vmatprep.mubr.bf16.mxu1 %v1970_v22  ;;  %v11526_v32 = vld [vmem:[%s14577_s1 + $0xd10] sm:$0xff]   ;;  %v11566_v22 = vld [vmem:[%s14577_s1 + $0xe60] sm:$0xff]  }
 0x186   :  { %10529 = vmatprep.subr.bf16.mxu1 %v11491_v36  ;;  %v11528_v34 = vld [vmem:[%s14577_s1 + $0xd90] sm:$0xff]   ;;  %v11530_v36 = vld [vmem:[%s14577_s1 + $0xd18] sm:$0xff]  }
 0x187   :  { %10508 = vmatpush3.bf16.msra.mxu0 %v11490_v35  ;;  %v11529_v35 = vld [vmem:[%s14577_s1 + $0xd58] sm:$0xff]  }
 0x188   :  { %10509 = vmatprep.subr.bf16.mxu0 %v11493_v38  ;;  %v11532_v38 = vld [vmem:[%s14577_s1 + $0xd98] sm:$0xff]  }
 0x189   :  { %10530 = vmatpush3.bf16.msra.mxu1 %v11492_v37  ;;  %v11531_v37 = vld [vmem:[%s14577_s1 + $0xdd8] sm:$0xff]  }
 0x18a   :  { %10531 = vmatprep.subr.bf16.mxu1 %v11495_v40  ;;  %v11534_v40 = vld [vmem:[%s14577_s1 + $0xd20] sm:$0xff]  }
 0x18b   :  { %10510 = vmatpush3.bf16.msra.mxu0 %v11494_v39  ;;  %v11533_v39 = vld [vmem:[%s14577_s1 + $0xd60] sm:$0xff]  }
 0x18c   :  { %10511 = vmatprep.subr.bf16.mxu0 %v11497_v43  ;;  %v11536_v43 = vld [vmem:[%s14577_s1 + $0xda0] sm:$0xff]  }
 0x18d   :  { %10532 = vmatpush3.bf16.msra.mxu1 %v11496_v42  ;;  %v11535_v42 = vld [vmem:[%s14577_s1 + $0xde0] sm:$0xff]  }
 0x18e   :  { %10533 = vmatprep.subr.bf16.mxu1 %v11499_v45  ;;  %v11538_v45 = vld [vmem:[%s14577_s1 + $0xd28] sm:$0xff]  }
 0x18f   :  { %10512 = vmatpush3.bf16.msra.mxu0 %v11498_v44  ;;  %v11537_v44 = vld [vmem:[%s14577_s1 + $0xd68] sm:$0xff]  }
 0x190   :  { %10513 = vmatprep.subr.bf16.mxu0 %v11501_v47  ;;  %v11540_v47 = vld [vmem:[%s14577_s1 + $0xda8] sm:$0xff]  }
 0x191   :  { %10534 = vmatpush3.bf16.msra.mxu1 %v11500_v46  ;;  %v11539_v46 = vld [vmem:[%s14577_s1 + $0xde8] sm:$0xff]  }
 0x192   :  { %10535 = vmatprep.subr.bf16.mxu1 %v11503_v49 }
 0x193   :  { %10514 = vmatpush3.bf16.msra.mxu0 %v11502_v48  ;;  %v11541_v48 = vld [vmem:[%s14577_s1 + $0xd70] sm:$0xff]  }
 0x194   :  { %10515 = vmatprep.subr.bf16.mxu0 %v11505_v51 }
 0x195   :  { %v10213_v56 = vpop.f32.mrb[20].mxu0  ;;  %10536 = vmatpush3.bf16.msra.mxu1 %v11504_v50  ;;  %v11542_v50 = vld [vmem:[%s14577_s1 + $0xd30] sm:$0xff]  }
 0x196   :  { %v10214_v58 = vpop.f32.mrb[21].mxu0  ;;  %10537 = vmatprep.subr.bf16.mxu1 %v11507_v53 }
 0x197   :  { %v10215_v60 = vadd.f32 %v10214_v58, %v10213_v56  ;;  %v10216_v61 = vpop.f32.mrb[22].mxu0  ;;  %v10235_v62 = vpop.f32.mrb[20].mxu1  ;;  %10516 = vmatpush3.bf16.msra.mxu0 %v11506_v52  ;;  %v11543_v52 = vld [vmem:[%s14577_s1 + $0xdf0] sm:$0xff]  }
 0x198   :  { %v10217_v0 = vpop.f32.mrb[23].mxu0  ;;  %v10236_v1 = vpop.f32.mrb[21].mxu1  ;;  %10517 = vmatprep.subr.bf16.mxu0 %v11509_v55  ;;  %v11544_v56 = vld [vmem:[%s14577_s1 + $0xdb0] sm:$0xff]  }
 0x199   :  { %v7476_v4 = vadd.f32 %v10215_v60, %v13208_v26  ;;  %v10237_v5 = vadd.f32 %v10236_v1, %v10235_v62  ;;  %10538 = vmatpush3.bf16.msra.mxu1 %v11508_v54  ;;  %v10238_v8 = vpop.f32.mrb[22].mxu1  ;;  %v11521_v26 = vld [vmem:[%s14577_s1 + $0xd48] sm:$0xff]   ;;  %v11546_v62 = vld [vmem:[%s14577_s1 + $0xd38] sm:$0xff]  }
 0x19a   :  { %10539 = vmatprep.subr.bf16.mxu1 %v11511_v59  ;;  %v10239_v11 = vpop.f32.mrb[23].mxu1  ;;  %v11547_v0 = vld [vmem:[%s14577_s1 + $0xdf8] sm:$0xff]   ;;  %v11553_v8 = vld [vmem:[%s14577_s1 + $0xe80] sm:$0xff]  }
 0x19b   :  { %v13313_v12 = vadd.f32 %v10237_v5, %v7476_v4  ;;  %10518 = vmatpush3.bf16.msra.mxu0 %v11510_v57  ;;  %v11545_v57 = vld [vmem:[%s14577_s1 + $0xd78] sm:$0xff]   ;;  %v1953_v4 = vrot.slane %v13319_v15, %v12065_v41  ;;  %v11550_v5 = vld [vmem:[%s14577_s1 + $0xe40] sm:$0xff]   ;;  %v11555_v11 = vld [vmem:[%s14577_s1 + $0xe08] sm:$0xff]  }
 0x19c   :  { %10519 = vmatprep.subr.bf16.mxu0 %v11513_v2  ;;  %v11559_v15 = vld [vmem:[%s14577_s1 + $0xe10] sm:$0xff]  }
 0x19d   :  { %10540 = vmatpush3.bf16.msra.mxu1 %v11512_v63  ;;  %v1969_v9 = vcombine.high %v1953_v4, %v1953_v4 }
 0x19e   :  { %10541 = vmatprep.subr.bf16.mxu1 %v11515_v10  ;;  %v11554_v10 = vld [vmem:[%s14577_s1 + $0xe48] sm:$0xff]  }
 0x19f   :  { %10520 = vmatpush3.bf16.msra.mxu0 %v11514_v6  ;;  %v11551_v6 = vld [vmem:[%s14577_s1 + $0xe00] sm:$0xff]  }
 0x1a0   :  { %10549 = vmatprep.subr.bf16.mxu0 %v11517_v17  ;;  %v11561_v17 = vld [vmem:[%s14577_s1 + $0xe90] sm:$0xff]  }
 0x1a1   :  { %10542 = vmatpush3.bf16.msra.mxu1 %v11516_v14  ;;  %v11558_v14 = vld [vmem:[%s14577_s1 + $0xe50] sm:$0xff]  }
 0x1a2   :  { %8034 = vmatmul.mubr.bf16.vlgmr.msra.gmra.mrb[48].mxu0 %v1946_v16  ;;  %10571 = vmatprep.subr.bf16.mxu1 %v11519_v21  ;;  %v11560_v16 = vld [vmem:[%s14577_s1 + $0xed0] sm:$0xff]   ;;  %v11565_v21 = vld [vmem:[%s14577_s1 + $0xe98] sm:$0xff]  }
 0x1a3   :  { %10550 = vmatpush3.bf16.msra.mxu0 %v11518_v19  ;;  %8113 = vmatprep.mubr.bf16.mxu0 %v1967_v24  ;;  %v11563_v19 = vld [vmem:[%s14577_s1 + $0xe18] sm:$0xff]   ;;  %v11568_v24 = vld [vmem:[%s14577_s1 + $0xee0] sm:$0xff]  }
 0x1a4   :  { %8074 = vmatmul.mubr.bf16.vlgmr.msra.gmra.mrb[48].mxu1 %v1968_v25  ;;  %10551 = vmatprep.subr.bf16.mxu0 %v11521_v26  ;;  %v11569_v25 = vld [vmem:[%s14577_s1 + $0xea0] sm:$0xff]   ;;  %v11570_v26 = vld [vmem:[%s14577_s1 + $0xe68] sm:$0xff]  }
 0x1a5   :  { %10572 = vmatpush3.bf16.msra.mxu1 %v11520_v23  ;;  %8153 = vmatprep.mubr.bf16.mxu1 %v1971_v28  ;;  %v11567_v23 = vld [vmem:[%s14577_s1 + $0xe20] sm:$0xff]   ;;  %v11572_v28 = vld [vmem:[%s14577_s1 + $0xee8] sm:$0xff]  }
 0x1a6   :  { %10573 = vmatprep.subr.bf16.mxu1 %v11523_v29  ;;  %v11573_v29 = vld [vmem:[%s14577_s1 + $0xea8] sm:$0xff]  }
 0x1a7   :  { %10552 = vmatpush3.bf16.msra.mxu0 %v11522_v27  ;;  %v11571_v27 = vld [vmem:[%s14577_s1 + $0xe28] sm:$0xff]  }
 0x1a8   :  { %10553 = vmatprep.subr.bf16.mxu0 %v11525_v31 }
 0x1a9   :  { %10574 = vmatpush3.bf16.msra.mxu1 %v11524_v30  ;;  %v11574_v30 = vld [vmem:[%s14577_s1 + $0xe70] sm:$0xff]  }
 0x1aa   :  { %10575 = vmatprep.subr.bf16.mxu1 %v11527_v33 }
 0x1ab   :  { %10554 = vmatpush3.bf16.msra.mxu0 %v11526_v32  ;;  %v11575_v32 = vld [vmem:[%s14577_s1 + $0xe30] sm:$0xff]  }
 0x1ac   :  { %10555 = vmatprep.subr.bf16.mxu0 %v11529_v35 }
 0x1ad   :  { %10576 = vmatpush3.bf16.msra.mxu1 %v11528_v34  ;;  %v11576_v34 = vld [vmem:[%s14577_s1 + $0xef0] sm:$0xff]  }
 0x1ae   :  { %10577 = vmatprep.subr.bf16.mxu1 %v11531_v37 }
 0x1af   :  { %10556 = vmatpush3.bf16.msra.mxu0 %v11530_v36 }
 0x1b0   :  { %10557 = vmatprep.subr.bf16.mxu0 %v11533_v39 }
 0x1b1   :  { %10578 = vmatpush3.bf16.msra.mxu1 %v11532_v38 }
 0x1b2   :  { %10579 = vmatprep.subr.bf16.mxu1 %v11535_v42  ;;  %v11578_v42 = vld [vmem:[%s14577_s1 + $0xe78] sm:$0xff]  }
 0x1b3   :  { %10558 = vmatpush3.bf16.msra.mxu0 %v11534_v40  ;;  %v11577_v40 = vld [vmem:[%s14577_s1 + $0xeb0] sm:$0xff]  }
 0x1b4   :  { %10559 = vmatprep.subr.bf16.mxu0 %v11537_v44 }
 0x1b5   :  { %v10257_v49 = vpop.f32.mrb[24].mxu0  ;;  %10580 = vmatpush3.bf16.msra.mxu1 %v11536_v43 }
 0x1b6   :  { %v10258_v51 = vpop.f32.mrb[25].mxu0  ;;  %10581 = vmatprep.subr.bf16.mxu1 %v11539_v46  ;;  %v35_v46 = vld [vmem:[%s14576_s0 + $0x38] sm:$0xff] }
 0x1b7   :  { %v10259_v53 = vadd.f32 %v10258_v51, %v10257_v49  ;;  %v10260_v54 = vpop.f32.mrb[26].mxu0  ;;  %v10279_v55 = vpop.f32.mrb[24].mxu1  ;;  %10560 = vmatpush3.bf16.msra.mxu0 %v11538_v45  ;;  %v11579_v45 = vld [vmem:[%s14577_s1 + $0xe38] sm:$0xff]   ;;  %v1979_v49 = vrot.slane %v35_v46, %v12065_v41  ;;  %v1972_v51 = vcombine.high %v35_v46, %v35_v46  ;;  %v11616_v46 = vld [vmem:[%s14577_s1 + $0x1000] sm:$0xff]  }
 0x1b8   :  { %v10261_v58 = vpop.f32.mrb[27].mxu0  ;;  %v10280_v59 = vpop.f32.mrb[25].mxu1  ;;  %10561 = vmatprep.subr.bf16.mxu0 %v11541_v48  ;;  %v11580_v48 = vld [vmem:[%s14577_s1 + $0xef8] sm:$0xff]  }
 0x1b9   :  { %v7556_v60 = vadd.f32 %v10259_v53, %v13313_v12  ;;  %v10281_v61 = vadd.f32 %v10280_v59, %v10279_v55  ;;  %10582 = vmatpush3.bf16.msra.mxu1 %v11540_v47  ;;  %v10282_v63 = vpop.f32.mrb[26].mxu1  ;;  %v11556_v12 = vld [vmem:[%s14577_s1 + $0xec8] sm:$0xff]   ;;  %v11581_v53 = vld [vmem:[%s14577_s1 + $0xeb8] sm:$0xff]   ;;  %v1987_v54 = vcombine.high %v1979_v49, %v1979_v49  ;;  %v1995_v55 = vrot.slane %v1979_v49, %v12065_v41  ;;  %v11583_v58 = vld [vmem:[%s14577_s1 + $0xf00] sm:$0xff]  }
 0x1ba   :  { %10583 = vmatprep.subr.bf16.mxu1 %v11543_v52  ;;  %v10283_v1 = vpop.f32.mrb[27].mxu1 }
 0x1bb   :  { %v13420_v2 = vadd.f32 %v10281_v61, %v7556_v60  ;;  %10562 = vmatpush3.bf16.msra.mxu0 %v11542_v50  ;;  %v2009_v59 = vrot.slane %v1987_v54, %v12065_v41  ;;  %v11584_v60 = vld [vmem:[%s14577_s1 + $0xfc0] sm:$0xff]   ;;  %v11586_v1 = vld [vmem:[%s14577_s1 + $0xf48] sm:$0xff]   ;;  %v11623_v54 = vld [vmem:[%s14577_s1 + $0x1050] sm:$0xff]  }
 0x1bc   :  { %10563 = vmatprep.subr.bf16.mxu0 %v11545_v57  ;;  %v13535_v57 = vrot.slane %v1972_v51, %v12065_v41  ;;  %v11620_v51 = vld [vmem:[%s14577_s1 + $0x1008] sm:$0xff]  }
 0x1bd   :  { %10584 = vmatpush3.bf16.msra.mxu1 %v11544_v56  ;;  %v11582_v56 = vld [vmem:[%s14577_s1 + $0xf40] sm:$0xff]   ;;  %v2019_v63 = vcombine.high %v2009_v59, %v2009_v59 }
 0x1be   :  { %10585 = vmatprep.subr.bf16.mxu1 %v11547_v0  ;;  %v1988_v61 = vcombine.high %v13535_v57, %v13535_v57  ;;  %v2017_v0 = vcombine.high %v1995_v55, %v1995_v55 }
 0x1bf   :  { %10564 = vmatpush3.bf16.msra.mxu0 %v11546_v62  ;;  %v11585_v62 = vld [vmem:[%s14577_s1 + $0xf80] sm:$0xff]  }
 0x1c0   :  { %10593 = vmatprep.subr.bf16.mxu0 %v11550_v5 }
 0x1c1   :  { %10586 = vmatpush3.bf16.msra.mxu1 %v11549_v3  ;;  %v11587_v3 = vld [vmem:[%s14577_s1 + $0xf08] sm:$0xff]  }
 0x1c2   :  { %8114 = vmatmul.mubr.bf16.vlgmr.msra.gmra.mrb[52].mxu0 %v1953_v4  ;;  %10615 = vmatprep.subr.bf16.mxu1 %v11552_v7  ;;  %v11588_v4 = vld [vmem:[%s14577_s1 + $0xfc8] sm:$0xff]   ;;  %v11590_v7 = vld [vmem:[%s14577_s1 + $0xf50] sm:$0xff]  }
 0x1c3   :  { %10594 = vmatpush3.bf16.msra.mxu0 %v11551_v6  ;;  %8193 = vmatprep.mubr.bf16.mxu0 %v2009_v59  ;;  %v11589_v6 = vld [vmem:[%s14577_s1 + $0xf88] sm:$0xff]   ;;  %v11628_v59 = vld [vmem:[%s14577_s1 + $0x1018] sm:$0xff]  }
 0x1c4   :  { %8154 = vmatmul.mubr.bf16.vlgmr.msra.gmra.mrb[52].mxu1 %v1969_v9  ;;  %10595 = vmatprep.subr.bf16.mxu0 %v11554_v10  ;;  %v11592_v9 = vld [vmem:[%s14577_s1 + $0xfd0] sm:$0xff]  }
 0x1c5   :  { %10616 = vmatpush3.bf16.msra.mxu1 %v11553_v8  ;;  %8233 = vmatprep.mubr.bf16.mxu1 %v2019_v63  ;;  %v11591_v8 = vld [vmem:[%s14577_s1 + $0xf10] sm:$0xff]   ;;  %v11632_v63 = vld [vmem:[%s14577_s1 + $0x1020] sm:$0xff]  }
 0x1c6   :  { %10617 = vmatprep.subr.bf16.mxu1 %v11556_v12  ;;  %v11593_v10 = vld [vmem:[%s14577_s1 + $0xf90] sm:$0xff]   ;;  %v11595_v12 = vld [vmem:[%s14577_s1 + $0xf18] sm:$0xff]  }
 0x1c7   :  { %10596 = vmatpush3.bf16.msra.mxu0 %v11555_v11  ;;  %v11594_v11 = vld [vmem:[%s14577_s1 + $0xf58] sm:$0xff]  }
 0x1c8   :  { %10597 = vmatprep.subr.bf16.mxu0 %v11558_v14  ;;  %v11597_v14 = vld [vmem:[%s14577_s1 + $0xf98] sm:$0xff]  }
 0x1c9   :  { %10618 = vmatpush3.bf16.msra.mxu1 %v11557_v13  ;;  %v11596_v13 = vld [vmem:[%s14577_s1 + $0xfd8] sm:$0xff]  }
 0x1ca   :  { %10619 = vmatprep.subr.bf16.mxu1 %v11560_v16  ;;  %v11599_v16 = vld [vmem:[%s14577_s1 + $0xf20] sm:$0xff]  }
 0x1cb   :  { %10598 = vmatpush3.bf16.msra.mxu0 %v11559_v15  ;;  %v11598_v15 = vld [vmem:[%s14577_s1 + $0xf60] sm:$0xff]  }
 0x1cc   :  { %10599 = vmatprep.subr.bf16.mxu0 %v11562_v18  ;;  %v11601_v18 = vld [vmem:[%s14577_s1 + $0xfa0] sm:$0xff]  }
 0x1cd   :  { %10620 = vmatpush3.bf16.msra.mxu1 %v11561_v17  ;;  %v11600_v17 = vld [vmem:[%s14577_s1 + $0xfe0] sm:$0xff]  }
 0x1ce   :  { %10621 = vmatprep.subr.bf16.mxu1 %v11564_v20  ;;  %v11603_v20 = vld [vmem:[%s14577_s1 + $0xf28] sm:$0xff]  }
 0x1cf   :  { %10600 = vmatpush3.bf16.msra.mxu0 %v11563_v19  ;;  %v11602_v19 = vld [vmem:[%s14577_s1 + $0xf68] sm:$0xff]  }
 0x1d0   :  { %10601 = vmatprep.subr.bf16.mxu0 %v11566_v22  ;;  %v11605_v22 = vld [vmem:[%s14577_s1 + $0xfa8] sm:$0xff]  }
 0x1d1   :  { %10622 = vmatpush3.bf16.msra.mxu1 %v11565_v21  ;;  %v11604_v21 = vld [vmem:[%s14577_s1 + $0xfe8] sm:$0xff]  }
 0x1d2   :  { %10623 = vmatprep.subr.bf16.mxu1 %v11568_v24 }
 0x1d3   :  { %10602 = vmatpush3.bf16.msra.mxu0 %v11567_v23  ;;  %v11606_v23 = vld [vmem:[%s14577_s1 + $0xf70] sm:$0xff]  }
 0x1d4   :  { %10603 = vmatprep.subr.bf16.mxu0 %v11570_v26 }
 0x1d5   :  { %v10301_v31 = vpop.f32.mrb[28].mxu0  ;;  %10624 = vmatpush3.bf16.msra.mxu1 %v11569_v25  ;;  %v11607_v25 = vld [vmem:[%s14577_s1 + $0xf30] sm:$0xff]  }
 0x1d6   :  { %v10302_v33 = vpop.f32.mrb[29].mxu0  ;;  %10625 = vmatprep.subr.bf16.mxu1 %v11572_v28 }
 0x1d7   :  { %v10303_v35 = vadd.f32 %v10302_v33, %v10301_v31  ;;  %v10304_v36 = vpop.f32.mrb[30].mxu0  ;;  %v10323_v37 = vpop.f32.mrb[28].mxu1  ;;  %10604 = vmatpush3.bf16.msra.mxu0 %v11571_v27  ;;  %v11608_v27 = vld [vmem:[%s14577_s1 + $0xff0] sm:$0xff]  }
 0x1d8   :  { %v10305_v38 = vpop.f32.mrb[31].mxu0  ;;  %v10324_v39 = vpop.f32.mrb[29].mxu1  ;;  %10605 = vmatprep.subr.bf16.mxu0 %v11574_v30  ;;  %v11609_v31 = vld [vmem:[%s14577_s1 + $0xfb0] sm:$0xff]  }
 0x1d9   :  { %v7636_v43 = vadd.f32 %v10303_v35, %v13420_v2  ;;  %v10325_v44 = vadd.f32 %v10324_v39, %v10323_v37  ;;  %10626 = vmatpush3.bf16.msra.mxu1 %v11573_v29  ;;  %v10326_v47 = vpop.f32.mrb[30].mxu1  ;;  %v2016_v2 = vrot.slane %v1988_v61, %v12065_v41  ;;  %v11611_v37 = vld [vmem:[%s14577_s1 + $0xf38] sm:$0xff]  }
 0x1da   :  { %10627 = vmatprep.subr.bf16.mxu1 %v11576_v34  ;;  %v10327_v50 = vpop.f32.mrb[31].mxu1  ;;  %v11612_v39 = vld [vmem:[%s14577_s1 + $0xff8] sm:$0xff]   ;;  %v11617_v47 = vld [vmem:[%s14577_s1 + $0x10c0] sm:$0xff]  }
 0x1db   :  { %v13525_v52 = vadd.f32 %v10325_v44, %v7636_v43  ;;  %10606 = vmatpush3.bf16.msra.mxu0 %v11575_v32  ;;  %v2020_v5 = vcombine.high %v2016_v2, %v2016_v2  ;;  %v11610_v32 = vld [vmem:[%s14577_s1 + $0xf78] sm:$0xff]   ;;  %v2002_v44 = vrot.slane %v13535_v57, %v12065_v41  ;;  %v11619_v50 = vld [vmem:[%s14577_s1 + $0x1048] sm:$0xff]   ;;  %v11626_v57 = vld [vmem:[%s14577_s1 + $0x1090] sm:$0xff]  }
 0x1dc   :  { %10607 = vmatprep.subr.bf16.mxu0 %v11578_v42  ;;  %v11614_v43 = vld [vmem:[%s14577_s1 + $0xfb8] sm:$0xff]  }
 0x1dd   :  { %10628 = vmatpush3.bf16.msra.mxu1 %v11577_v40  ;;  %v2018_v49 = vcombine.high %v2002_v44, %v2002_v44  ;;  %v11630_v61 = vld [vmem:[%s14577_s1 + $0x1098] sm:$0xff]  }
 0x1de   :  { %10629 = vmatprep.subr.bf16.mxu1 %v11580_v48  ;;  %v11618_v48 = vld [vmem:[%s14577_s1 + $0x1080] sm:$0xff]  }
 0x1df   :  { %10608 = vmatpush3.bf16.msra.mxu0 %v11579_v45  ;;  %v11615_v45 = vld [vmem:[%s14577_s1 + $0x1040] sm:$0xff]  }
 0x1e0   :  { %10637 = vmatprep.subr.bf16.mxu0 %v11582_v56  ;;  %v11625_v56 = vld [vmem:[%s14577_s1 + $0x10d0] sm:$0xff]  }
 0x1e1   :  { %10630 = vmatpush3.bf16.msra.mxu1 %v11581_v53  ;;  %v11622_v53 = vld [vmem:[%s14577_s1 + $0x1088] sm:$0xff]  }
 0x1e2   :  { %8194 = vmatmul.mubr.bf16.vlgmr.msra.gmra.mrb[56].mxu0 %v1995_v55  ;;  %10659 = vmatprep.subr.bf16.mxu1 %v11584_v60  ;;  %v11624_v55 = vld [vmem:[%s14577_s1 + $0x1010] sm:$0xff]   ;;  %v11629_v60 = vld [vmem:[%s14577_s1 + $0x10d8] sm:$0xff]  }
 0x1e3   :  { %10638 = vmatpush3.bf16.msra.mxu0 %v11583_v58  ;;  %8273 = vmatprep.mubr.bf16.mxu0 %v2016_v2  ;;  %v11627_v58 = vld [vmem:[%s14577_s1 + $0x1058] sm:$0xff]   ;;  %v11635_v2 = vld [vmem:[%s14577_s1 + $0x1068] sm:$0xff]  }
 0x1e4   :  { %8234 = vmatmul.mubr.bf16.vlgmr.msra.gmra.mrb[56].mxu1 %v2017_v0  ;;  %10639 = vmatprep.subr.bf16.mxu0 %v11586_v1  ;;  %v11633_v0 = vld [vmem:[%s14577_s1 + $0x10e0] sm:$0xff]  }
 0x1e5   :  { %10660 = vmatpush3.bf16.msra.mxu1 %v11585_v62  ;;  %8313 = vmatprep.mubr.bf16.mxu1 %v2020_v5  ;;  %v11631_v62 = vld [vmem:[%s14577_s1 + $0x1060] sm:$0xff]   ;;  %v11638_v5 = vld [vmem:[%s14577_s1 + $0x10a8] sm:$0xff]  }
 0x1e6   :  { %10661 = vmatprep.subr.bf16.mxu1 %v11588_v4  ;;  %v11634_v1 = vld [vmem:[%s14577_s1 + $0x10a0] sm:$0xff]   ;;  %v11637_v4 = vld [vmem:[%s14577_s1 + $0x10e8] sm:$0xff]  }
 0x1e7   :  { %10640 = vmatpush3.bf16.msra.mxu0 %v11587_v3  ;;  %v11636_v3 = vld [vmem:[%s14577_s1 + $0x1028] sm:$0xff]  }
 0x1e8   :  { %10641 = vmatprep.subr.bf16.mxu0 %v11590_v7 }
 0x1e9   :  { %10662 = vmatpush3.bf16.msra.mxu1 %v11589_v6  ;;  %v11639_v6 = vld [vmem:[%s14577_s1 + $0x1070] sm:$0xff]  }
 0x1ea   :  { %10663 = vmatprep.subr.bf16.mxu1 %v11592_v9 }
 0x1eb   :  { %10642 = vmatpush3.bf16.msra.mxu0 %v11591_v8  ;;  %v11640_v8 = vld [vmem:[%s14577_s1 + $0x1030] sm:$0xff]  }
 0x1ec   :  { %10643 = vmatprep.subr.bf16.mxu0 %v11594_v11 }
 0x1ed   :  { %10664 = vmatpush3.bf16.msra.mxu1 %v11593_v10  ;;  %v11641_v10 = vld [vmem:[%s14577_s1 + $0x10f0] sm:$0xff]  }
 0x1ee   :  { %10665 = vmatprep.subr.bf16.mxu1 %v11596_v13 }
 0x1ef   :  { %10644 = vmatpush3.bf16.msra.mxu0 %v11595_v12 }
 0x1f0   :  { %10645 = vmatprep.subr.bf16.mxu0 %v11598_v15 }
 0x1f1   :  { %10666 = vmatpush3.bf16.msra.mxu1 %v11597_v14 }
 0x1f2   :  { %10667 = vmatprep.subr.bf16.mxu1 %v11600_v17  ;;  %v11643_v17 = vld [vmem:[%s14577_s1 + $0x1078] sm:$0xff]  }
 0x1f3   :  { %10646 = vmatpush3.bf16.msra.mxu0 %v11599_v16  ;;  %v11642_v16 = vld [vmem:[%s14577_s1 + $0x10b0] sm:$0xff]  }
 0x1f4   :  { %10647 = vmatprep.subr.bf16.mxu0 %v11602_v19 }
 0x1f5   :  { %v10345_v24 = vpop.f32.mrb[32].mxu0  ;;  %10668 = vmatpush3.bf16.msra.mxu1 %v11601_v18 }
 0x1f6   :  { %v10346_v26 = vpop.f32.mrb[33].mxu0  ;;  %10669 = vmatprep.subr.bf16.mxu1 %v11604_v21  ;;  %v11645_v21 = vld [vmem:[%s14577_s1 + $0x10f8] sm:$0xff]  }
 0x1f7   :  { %v10347_v28 = vadd.f32 %v10346_v26, %v10345_v24  ;;  %v10348_v29 = vpop.f32.mrb[34].mxu0  ;;  %v10367_v30 = vpop.f32.mrb[32].mxu1  ;;  %10648 = vmatpush3.bf16.msra.mxu0 %v11603_v20  ;;  %v11644_v20 = vld [vmem:[%s14577_s1 + $0x1038] sm:$0xff]  }
 0x1f8   :  { %v10349_v33 = vpop.f32.mrb[35].mxu0  ;;  %v10368_v34 = vpop.f32.mrb[33].mxu1  ;;  %10649 = vmatprep.subr.bf16.mxu0 %v11606_v23  ;;  %v11646_v26 = vld [vmem:[%s14577_s1 + $0x10b8] sm:$0xff]   ;;  %v11647_v29 = vld [vmem:[%s14577_s1 + $0x1140] sm:$0xff]  }
 0x1f9   :  { %v7716_v35 = vadd.f32 %v10347_v28, %v13525_v52  ;;  %v10369_v36 = vadd.f32 %v10368_v34, %v10367_v30  ;;  %10670 = vmatpush3.bf16.msra.mxu1 %v11605_v22  ;;  %v10370_v38 = vpop.f32.mrb[34].mxu1  ;;  %v11621_v52 = vld [vmem:[%s14577_s1 + $0x10c8] sm:$0xff]   ;;  %v36_v22 = vld [vmem:[%s14576_s0 + $0x40] sm:$0xff] }
 0x1fa   :  { %10671 = vmatprep.subr.bf16.mxu1 %v11608_v27  ;;  %v10371_v40 = vpop.f32.mrb[35].mxu1  ;;  %v2021_v28 = vcombine.high %v36_v22, %v36_v22  ;;  %v11649_v34 = vld [vmem:[%s14577_s1 + $0x11c0] sm:$0xff]  }
 0x1fb   :  { %v13632_v42 = vadd.f32 %v10369_v36, %v7716_v35  ;;  %10650 = vmatpush3.bf16.msra.mxu0 %v11607_v25  ;;  %v2028_v25 = vrot.slane %v36_v22, %v12065_v41  ;;  %v11650_v36 = vld [vmem:[%s14577_s1 + $0x1180] sm:$0xff]  }
 0x1fc   :  { %10651 = vmatprep.subr.bf16.mxu0 %v11610_v32  ;;  %v11648_v32 = vld [vmem:[%s14577_s1 + $0x1100] sm:$0xff]   ;;  %v13750_v33 = vrot.slane %v2021_v28, %v12065_v41  ;;  %v11687_v28 = vld [vmem:[%s14577_s1 + $0x1288] sm:$0xff]  }
 0x1fd   :  { %10672 = vmatpush3.bf16.msra.mxu1 %v11609_v31  ;;  %v2036_v30 = vcombine.high %v2028_v25, %v2028_v25  ;;  %v2044_v31 = vrot.slane %v2028_v25, %v12065_v41  ;;  %v11682_v22 = vld [vmem:[%s14577_s1 + $0x12c0] sm:$0xff]   ;;  %v11684_v25 = vld [vmem:[%s14577_s1 + $0x1248] sm:$0xff]  }
 0x1fe   :  { %10673 = vmatprep.subr.bf16.mxu1 %v11612_v39  ;;  %v11651_v39 = vld [vmem:[%s14577_s1 + $0x1148] sm:$0xff]  }
 0x1ff   :  { %10652 = vmatpush3.bf16.msra.mxu0 %v11611_v37  ;;  %v2058_v35 = vrot.slane %v2036_v30, %v12065_v41  ;;  %v2037_v37 = vcombine.high %v13750_v33, %v13750_v33  ;;  %v2066_v38 = vcombine.high %v2044_v31, %v2044_v31  ;;  %v11689_v30 = vld [vmem:[%s14577_s1 + $0x1210] sm:$0xff]  }
 0x200   :  { %10681 = vmatprep.subr.bf16.mxu0 %v11615_v45  ;;  %v11654_v45 = vld [vmem:[%s14577_s1 + $0x1188] sm:$0xff]  }
 0x201   :  { %10674 = vmatpush3.bf16.msra.mxu1 %v11614_v43  ;;  %v2068_v40 = vcombine.high %v2058_v35, %v2058_v35  ;;  %v2065_v43 = vrot.slane %v2037_v37, %v12065_v41  ;;  %v11696_v37 = vld [vmem:[%s14577_s1 + $0x1260] sm:$0xff]  }
 0x202   :  { %8274 = vmatmul.mubr.bf16.vlgmr.msra.gmra.mrb[60].mxu0 %v2002_v44  ;;  %10703 = vmatprep.subr.bf16.mxu1 %v11617_v47  ;;  %v11653_v44 = vld [vmem:[%s14577_s1 + $0x11c8] sm:$0xff]   ;;  %v11655_v47 = vld [vmem:[%s14577_s1 + $0x1150] sm:$0xff]  }
 0x203   :  { %10682 = vmatpush3.bf16.msra.mxu0 %v11616_v46  ;;  %8353 = vmatprep.mubr.bf16.mxu0 %v2058_v35  ;;  %v2069_v46 = vcombine.high %v2065_v43, %v2065_v43  ;;  %v11694_v35 = vld [vmem:[%s14577_s1 + $0x12d8] sm:$0xff]  }
 0x204   :  { %8314 = vmatmul.mubr.bf16.vlgmr.msra.gmra.mrb[60].mxu1 %v2018_v49  ;;  %10683 = vmatprep.subr.bf16.mxu0 %v11619_v50  ;;  %v11657_v49 = vld [vmem:[%s14577_s1 + $0x11d0] sm:$0xff]  }
 0x205   :  { %10704 = vmatpush3.bf16.msra.mxu1 %v11618_v48  ;;  %8393 = vmatprep.mubr.bf16.mxu1 %v2068_v40  ;;  %v11656_v48 = vld [vmem:[%s14577_s1 + $0x1110] sm:$0xff]   ;;  %v11699_v40 = vld [vmem:[%s14577_s1 + $0x12a0] sm:$0xff]  }
 0x206   :  { %10705 = vmatprep.subr.bf16.mxu1 %v11621_v52  ;;  %v11658_v50 = vld [vmem:[%s14577_s1 + $0x1190] sm:$0xff]   ;;  %v11660_v52 = vld [vmem:[%s14577_s1 + $0x1118] sm:$0xff]  }
 0x207   :  { %10684 = vmatpush3.bf16.msra.mxu0 %v11620_v51  ;;  %v11659_v51 = vld [vmem:[%s14577_s1 + $0x1158] sm:$0xff]  }
 0x208   :  { %10685 = vmatprep.subr.bf16.mxu0 %v11623_v54  ;;  %v11662_v54 = vld [vmem:[%s14577_s1 + $0x1198] sm:$0xff]  }
 0x209   :  { %10706 = vmatpush3.bf16.msra.mxu1 %v11622_v53  ;;  %v11661_v53 = vld [vmem:[%s14577_s1 + $0x11d8] sm:$0xff]  }
 0x20a   :  { %10707 = vmatprep.subr.bf16.mxu1 %v11625_v56  ;;  %v11664_v56 = vld [vmem:[%s14577_s1 + $0x1120] sm:$0xff]  }
 0x20b   :  { %10686 = vmatpush3.bf16.msra.mxu0 %v11624_v55  ;;  %v11663_v55 = vld [vmem:[%s14577_s1 + $0x1160] sm:$0xff]  }
 0x20c   :  { %10687 = vmatprep.subr.bf16.mxu0 %v11627_v58  ;;  %v11666_v58 = vld [vmem:[%s14577_s1 + $0x11a0] sm:$0xff]  }
 0x20d   :  { %10708 = vmatpush3.bf16.msra.mxu1 %v11626_v57  ;;  %v11665_v57 = vld [vmem:[%s14577_s1 + $0x11e0] sm:$0xff]  }
 0x20e   :  { %10709 = vmatprep.subr.bf16.mxu1 %v11629_v60  ;;  %v11668_v60 = vld [vmem:[%s14577_s1 + $0x1128] sm:$0xff]  }
 0x20f   :  { %10688 = vmatpush3.bf16.msra.mxu0 %v11628_v59  ;;  %v11667_v59 = vld [vmem:[%s14577_s1 + $0x1168] sm:$0xff]  }
 0x210   :  { %10689 = vmatprep.subr.bf16.mxu0 %v11631_v62  ;;  %v11670_v62 = vld [vmem:[%s14577_s1 + $0x11a8] sm:$0xff]  }
 0x211   :  { %10710 = vmatpush3.bf16.msra.mxu1 %v11630_v61  ;;  %v11669_v61 = vld [vmem:[%s14577_s1 + $0x11e8] sm:$0xff]  }
 0x212   :  { %10711 = vmatprep.subr.bf16.mxu1 %v11633_v0 }
 0x213   :  { %10690 = vmatpush3.bf16.msra.mxu0 %v11632_v63  ;;  %v11671_v63 = vld [vmem:[%s14577_s1 + $0x1170] sm:$0xff]  }
 0x214   :  { %10691 = vmatprep.subr.bf16.mxu0 %v11635_v2 }
 0x215   :  { %v10389_v7 = vpop.f32.mrb[36].mxu0  ;;  %10712 = vmatpush3.bf16.msra.mxu1 %v11634_v1  ;;  %v11672_v1 = vld [vmem:[%s14577_s1 + $0x1130] sm:$0xff]  }
 0x216   :  { %v10390_v9 = vpop.f32.mrb[37].mxu0  ;;  %10713 = vmatprep.subr.bf16.mxu1 %v11637_v4 }
 0x217   :  { %v10391_v11 = vadd.f32 %v10390_v9, %v10389_v7  ;;  %v10392_v12 = vpop.f32.mrb[38].mxu0  ;;  %v10411_v13 = vpop.f32.mrb[36].mxu1  ;;  %10692 = vmatpush3.bf16.msra.mxu0 %v11636_v3  ;;  %v11673_v3 = vld [vmem:[%s14577_s1 + $0x11f0] sm:$0xff]  }
 0x218   :  { %v10393_v14 = vpop.f32.mrb[39].mxu0  ;;  %v10412_v15 = vpop.f32.mrb[37].mxu1  ;;  %10693 = vmatprep.subr.bf16.mxu0 %v11639_v6  ;;  %v11674_v7 = vld [vmem:[%s14577_s1 + $0x11b0] sm:$0xff]  }
 0x219   :  { %v7796_v18 = vadd.f32 %v10391_v11, %v13632_v42  ;;  %v10413_v19 = vadd.f32 %v10412_v15, %v10411_v13  ;;  %10714 = vmatpush3.bf16.msra.mxu1 %v11638_v5  ;;  %v10414_v23 = vpop.f32.mrb[38].mxu1  ;;  %v11652_v42 = vld [vmem:[%s14577_s1 + $0x1108] sm:$0xff]   ;;  %v11676_v13 = vld [vmem:[%s14577_s1 + $0x1138] sm:$0xff]  }
 0x21a   :  { %10715 = vmatprep.subr.bf16.mxu1 %v11641_v10  ;;  %v10415_v27 = vpop.f32.mrb[39].mxu1  ;;  %v11677_v15 = vld [vmem:[%s14577_s1 + $0x11f8] sm:$0xff]   ;;  %v11683_v23 = vld [vmem:[%s14577_s1 + $0x1280] sm:$0xff]  }
 0x21b   :  { %v13736_v24 = vadd.f32 %v10413_v19, %v7796_v18  ;;  %10694 = vmatpush3.bf16.msra.mxu0 %v11640_v8  ;;  %v11675_v8 = vld [vmem:[%s14577_s1 + $0x1178] sm:$0xff]   ;;  %v2051_v19 = vrot.slane %v13750_v33, %v12065_v41  ;;  %v11686_v27 = vld [vmem:[%s14577_s1 + $0x12c8] sm:$0xff]  }
 0x21c   :  { %10695 = vmatprep.subr.bf16.mxu0 %v11643_v17  ;;  %v11679_v18 = vld [vmem:[%s14577_s1 + $0x11b8] sm:$0xff]  }
 0x21d   :  { %10716 = vmatpush3.bf16.msra.mxu1 %v11642_v16  ;;  %v11692_v33 = vld [vmem:[%s14577_s1 + $0x1258] sm:$0xff]  }
 0x21e   :  { %10717 = vmatprep.subr.bf16.mxu1 %v11645_v21  ;;  %v11681_v21 = vld [vmem:[%s14577_s1 + $0x1200] sm:$0xff]  }
 0x21f   :  { %10696 = vmatpush3.bf16.msra.mxu0 %v11644_v20  ;;  %v11680_v20 = vld [vmem:[%s14577_s1 + $0x1240] sm:$0xff]  }
 0x220   :  { %10725 = vmatprep.subr.bf16.mxu0 %v11647_v29  ;;  %v11688_v29 = vld [vmem:[%s14577_s1 + $0x1250] sm:$0xff]  }
 0x221   :  { %10718 = vmatpush3.bf16.msra.mxu1 %v11646_v26  ;;  %v11685_v26 = vld [vmem:[%s14577_s1 + $0x1208] sm:$0xff]  }
 0x222   :  { %8354 = vmatmul.mubr.bf16.vlgmr.msra.gmra.mrb[64].mxu0 %v2044_v31  ;;  %10747 = vmatprep.subr.bf16.mxu1 %v11649_v34  ;;  %v11690_v31 = vld [vmem:[%s14577_s1 + $0x12d0] sm:$0xff]   ;;  %v11693_v34 = vld [vmem:[%s14577_s1 + $0x1218] sm:$0xff]  }
 0x223   :  { %10726 = vmatpush3.bf16.msra.mxu0 %v11648_v32  ;;  %8433 = vmatprep.mubr.bf16.mxu0 %v2065_v43  ;;  %v11691_v32 = vld [vmem:[%s14577_s1 + $0x1290] sm:$0xff]   ;;  %v11701_v43 = vld [vmem:[%s14577_s1 + $0x1228] sm:$0xff]  }
 0x224   :  { %8394 = vmatmul.mubr.bf16.vlgmr.msra.gmra.mrb[64].mxu1 %v2066_v38  ;;  %10727 = vmatprep.subr.bf16.mxu0 %v11651_v39  ;;  %v11697_v38 = vld [vmem:[%s14577_s1 + $0x1220] sm:$0xff]  }
 0x225   :  { %10748 = vmatpush3.bf16.msra.mxu1 %v11650_v36  ;;  %8473 = vmatprep.mubr.bf16.mxu1 %v2069_v46  ;;  %v11695_v36 = vld [vmem:[%s14577_s1 + $0x1298] sm:$0xff]   ;;  %v11698_v39 = vld [vmem:[%s14577_s1 + $0x12e0] sm:$0xff]   ;;  %v11704_v46 = vld [vmem:[%s14577_s1 + $0x1270] sm:$0xff]  }
 0x226   :  { %10749 = vmatprep.subr.bf16.mxu1 %v11653_v44  ;;  %v11702_v44 = vld [vmem:[%s14577_s1 + $0x12e8] sm:$0xff]  }
 0x227   :  { %10728 = vmatpush3.bf16.msra.mxu0 %v11652_v42  ;;  %v11700_v42 = vld [vmem:[%s14577_s1 + $0x1268] sm:$0xff]  }
 0x228   :  { %10729 = vmatprep.subr.bf16.mxu0 %v11655_v47 }
 0x229   :  { %10750 = vmatpush3.bf16.msra.mxu1 %v11654_v45  ;;  %v11703_v45 = vld [vmem:[%s14577_s1 + $0x12a8] sm:$0xff]  }
 0x22a   :  { %10751 = vmatprep.subr.bf16.mxu1 %v11657_v49 }
 0x22b   :  { %10730 = vmatpush3.bf16.msra.mxu0 %v11656_v48  ;;  %v11705_v48 = vld [vmem:[%s14577_s1 + $0x1230] sm:$0xff]  }
 0x22c   :  { %10731 = vmatprep.subr.bf16.mxu0 %v11659_v51 }
 0x22d   :  { %10752 = vmatpush3.bf16.msra.mxu1 %v11658_v50  ;;  %v11706_v50 = vld [vmem:[%s14577_s1 + $0x12f0] sm:$0xff]  }
 0x22e   :  { %10753 = vmatprep.subr.bf16.mxu1 %v11661_v53 }
 0x22f   :  { %10732 = vmatpush3.bf16.msra.mxu0 %v11660_v52 }
 0x230   :  { %10733 = vmatprep.subr.bf16.mxu0 %v11663_v55 }
 0x231   :  { %10754 = vmatpush3.bf16.msra.mxu1 %v11662_v54 }
 0x232   :  { %10755 = vmatprep.subr.bf16.mxu1 %v11665_v57  ;;  %v11708_v57 = vld [vmem:[%s14577_s1 + $0x1278] sm:$0xff]  }
 0x233   :  { %10734 = vmatpush3.bf16.msra.mxu0 %v11664_v56  ;;  %v11707_v56 = vld [vmem:[%s14577_s1 + $0x12b0] sm:$0xff]  }
 0x234   :  { %10735 = vmatprep.subr.bf16.mxu0 %v11667_v59 }
 0x235   :  { %v10433_v0 = vpop.f32.mrb[40].mxu0  ;;  %10756 = vmatpush3.bf16.msra.mxu1 %v11666_v58 }
 0x236   :  { %v10434_v2 = vpop.f32.mrb[41].mxu0  ;;  %10757 = vmatprep.subr.bf16.mxu1 %v11669_v61 }
 0x237   :  { %v10435_v4 = vadd.f32 %v10434_v2, %v10433_v0  ;;  %v10436_v5 = vpop.f32.mrb[42].mxu0  ;;  %v10455_v6 = vpop.f32.mrb[40].mxu1  ;;  %10736 = vmatpush3.bf16.msra.mxu0 %v11668_v60  ;;  %v11709_v60 = vld [vmem:[%s14577_s1 + $0x1238] sm:$0xff]   ;;  %v37_v0 = vld [vmem:[%s14576_s0 + $0x48] sm:$0xff] }
 0x238   :  { %v10437_v9 = vpop.f32.mrb[43].mxu0  ;;  %v10456_v10 = vpop.f32.mrb[41].mxu1  ;;  %10737 = vmatprep.subr.bf16.mxu0 %v11671_v63  ;;  %v11710_v63 = vld [vmem:[%s14577_s1 + $0x12f8] sm:$0xff]   ;;  %v2077_v2 = vrot.slane %v37_v0, %v12065_v41  ;;  %v11712_v5 = vld [vmem:[%s14577_s1 + $0x1340] sm:$0xff]  }
 0x239   :  { %v7876_v11 = vadd.f32 %v10435_v4, %v13736_v24  ;;  %v10457_v12 = vadd.f32 %v10456_v10, %v10455_v6  ;;  %10758 = vmatpush3.bf16.msra.mxu1 %v11670_v62  ;;  %v10458_v14 = vpop.f32.mrb[42].mxu1  ;;  %v2067_v24 = vcombine.high %v2051_v19, %v2051_v19  ;;  %v2070_v4 = vcombine.high %v37_v0, %v37_v0  ;;  %v11714_v9 = vld [vmem:[%s14577_s1 + $0x13c0] sm:$0xff]  }
 0x23a   :  { %10759 = vmatprep.subr.bf16.mxu1 %v11673_v3  ;;  %v10459_v16 = vpop.f32.mrb[43].mxu1  ;;  %v11711_v3 = vld [vmem:[%s14577_s1 + $0x12b8] sm:$0xff]   ;;  %v2085_v6 = vcombine.high %v2077_v2, %v2077_v2  ;;  %v11716_v14 = vld [vmem:[%s14577_s1 + $0x1348] sm:$0xff]  }
 0x23b   :  { %v13844_v17 = vadd.f32 %v10457_v12, %v7876_v11  ;;  %10738 = vmatpush3.bf16.msra.mxu0 %v11672_v1  ;;  %v11713_v11 = vld [vmem:[%s14577_s1 + $0x1300] sm:$0xff]  }
 0x23c   :  { %10739 = vmatprep.subr.bf16.mxu0 %v11675_v8  ;;  %v13959_v8 = vrot.slane %v2070_v4, %v12065_v41  ;;  %v2107_v10 = vrot.slane %v2085_v6, %v12065_v41  ;;  %v11715_v16 = vld [vmem:[%s14577_s1 + $0x1380] sm:$0xff]   ;;  %v11752_v4 = vld [vmem:[%s14577_s1 + $0x1488] sm:$0xff]   ;;  %v11754_v6 = vld [vmem:[%s14577_s1 + $0x1410] sm:$0xff]  }
 0x23d   :  { %10760 = vmatpush3.bf16.msra.mxu1 %v11674_v7  ;;  %v2093_v7 = vrot.slane %v2077_v2, %v12065_v41  ;;  %v11750_v2 = vld [vmem:[%s14577_s1 + $0x1408] sm:$0xff]  }
 0x23e   :  { %10761 = vmatprep.subr.bf16.mxu1 %v11677_v15  ;;  %v2086_v12 = vcombine.high %v13959_v8, %v13959_v8  ;;  %v2117_v15 = vcombine.high %v2107_v10, %v2107_v10 }
 0x23f   :  { %10740 = vmatpush3.bf16.msra.mxu0 %v11676_v13  ;;  %v2115_v13 = vcombine.high %v2093_v7, %v2093_v7 }
 0x240   :  { %10769 = vmatprep.subr.bf16.mxu0 %v11680_v20 }
 0x241   :  { %10762 = vmatpush3.bf16.msra.mxu1 %v11679_v18  ;;  %v11718_v18 = vld [vmem:[%s14577_s1 + $0x13c8] sm:$0xff]  }
 0x242   :  { %8434 = vmatmul.mubr.bf16.vlgmr.msra.gmra.mrb[68].mxu0 %v2051_v19  ;;  %10791 = vmatprep.subr.bf16.mxu1 %v11682_v22  ;;  %v11717_v19 = vld [vmem:[%s14577_s1 + $0x1308] sm:$0xff]  }
 0x243   :  { %10770 = vmatpush3.bf16.msra.mxu0 %v11681_v21  ;;  %8513 = vmatprep.mubr.bf16.mxu0 %v2107_v10  ;;  %v11720_v21 = vld [vmem:[%s14577_s1 + $0x1350] sm:$0xff]   ;;  %v11719_v22 = vld [vmem:[%s14577_s1 + $0x1388] sm:$0xff]   ;;  %v11758_v10 = vld [vmem:[%s14577_s1 + $0x1418] sm:$0xff]  }
 0x244   :  { %8474 = vmatmul.mubr.bf16.vlgmr.msra.gmra.mrb[68].mxu1 %v2067_v24  ;;  %10771 = vmatprep.subr.bf16.mxu0 %v11684_v25  ;;  %v11721_v24 = vld [vmem:[%s14577_s1 + $0x1310] sm:$0xff]   ;;  %v11724_v25 = vld [vmem:[%s14577_s1 + $0x1358] sm:$0xff]  }
 0x245   :  { %10792 = vmatpush3.bf16.msra.mxu1 %v11683_v23  ;;  %8553 = vmatprep.mubr.bf16.mxu1 %v2117_v15  ;;  %v11722_v23 = vld [vmem:[%s14577_s1 + $0x13d0] sm:$0xff]   ;;  %v11763_v15 = vld [vmem:[%s14577_s1 + $0x14e0] sm:$0xff]  }
 0x246   :  { %10793 = vmatprep.subr.bf16.mxu1 %v11686_v27  ;;  %v11726_v27 = vld [vmem:[%s14577_s1 + $0x13d8] sm:$0xff]  }
 0x247   :  { %10772 = vmatpush3.bf16.msra.mxu0 %v11685_v26  ;;  %v11723_v26 = vld [vmem:[%s14577_s1 + $0x1390] sm:$0xff]  }
 0x248   :  { %10773 = vmatprep.subr.bf16.mxu0 %v11688_v29  ;;  %v11728_v29 = vld [vmem:[%s14577_s1 + $0x1360] sm:$0xff]  }
 0x249   :  { %10794 = vmatpush3.bf16.msra.mxu1 %v11687_v28  ;;  %v11725_v28 = vld [vmem:[%s14577_s1 + $0x1318] sm:$0xff]  }
 0x24a   :  { %10795 = vmatprep.subr.bf16.mxu1 %v11690_v31  ;;  %v11730_v31 = vld [vmem:[%s14577_s1 + $0x13e0] sm:$0xff]  }
 0x24b   :  { %10774 = vmatpush3.bf16.msra.mxu0 %v11689_v30  ;;  %v11727_v30 = vld [vmem:[%s14577_s1 + $0x1398] sm:$0xff]  }
 0x24c   :  { %10775 = vmatprep.subr.bf16.mxu0 %v11692_v33  ;;  %v11732_v33 = vld [vmem:[%s14577_s1 + $0x1368] sm:$0xff]  }
 0x24d   :  { %10796 = vmatpush3.bf16.msra.mxu1 %v11691_v32  ;;  %v11729_v32 = vld [vmem:[%s14577_s1 + $0x1320] sm:$0xff]  }
 0x24e   :  { %10797 = vmatprep.subr.bf16.mxu1 %v11694_v35  ;;  %v11734_v35 = vld [vmem:[%s14577_s1 + $0x13e8] sm:$0xff]  }
 0x24f   :  { %10776 = vmatpush3.bf16.msra.mxu0 %v11693_v34  ;;  %v11731_v34 = vld [vmem:[%s14577_s1 + $0x13a0] sm:$0xff]  }
 0x250   :  { %10777 = vmatprep.subr.bf16.mxu0 %v11696_v37 }
 0x251   :  { %10798 = vmatpush3.bf16.msra.mxu1 %v11695_v36  ;;  %v11733_v36 = vld [vmem:[%s14577_s1 + $0x1328] sm:$0xff]  }
 0x252   :  { %10799 = vmatprep.subr.bf16.mxu1 %v11698_v39 }
 0x253   :  { %10778 = vmatpush3.bf16.msra.mxu0 %v11697_v38  ;;  %v11736_v38 = vld [vmem:[%s14577_s1 + $0x1370] sm:$0xff]  }
 0x254   :  { %10779 = vmatprep.subr.bf16.mxu0 %v11700_v42 }
 0x255   :  { %v10477_v47 = vpop.f32.mrb[44].mxu0  ;;  %10800 = vmatpush3.bf16.msra.mxu1 %v11699_v40  ;;  %v11735_v40 = vld [vmem:[%s14577_s1 + $0x13a8] sm:$0xff]  }
 0x256   :  { %v10478_v49 = vpop.f32.mrb[45].mxu0  ;;  %10801 = vmatprep.subr.bf16.mxu1 %v11702_v44 }
 0x257   :  { %v10479_v51 = vadd.f32 %v10478_v49, %v10477_v47  ;;  %v10480_v52 = vpop.f32.mrb[46].mxu0  ;;  %v10499_v53 = vpop.f32.mrb[44].mxu1  ;;  %10780 = vmatpush3.bf16.msra.mxu0 %v11701_v43  ;;  %v11739_v49 = vld [vmem:[%s14577_s1 + $0x13b0] sm:$0xff]  }
 0x258   :  { %v10481_v54 = vpop.f32.mrb[47].mxu0  ;;  %v10500_v55 = vpop.f32.mrb[45].mxu1  ;;  %10781 = vmatprep.subr.bf16.mxu0 %v11704_v46  ;;  %v11738_v46 = vld [vmem:[%s14577_s1 + $0x13f0] sm:$0xff]   ;;  %v11740_v52 = vld [vmem:[%s14577_s1 + $0x1378] sm:$0xff]  }
 0x259   :  { %v7956_v58 = vadd.f32 %v10479_v51, %v13844_v17  ;;  %v10501_v59 = vadd.f32 %v10500_v55, %v10499_v53  ;;  %10802 = vmatpush3.bf16.msra.mxu1 %v11703_v45  ;;  %v10502_v61 = vpop.f32.mrb[46].mxu1  ;;  %v2114_v17 = vrot.slane %v2086_v12, %v12065_v41  ;;  %v11737_v45 = vld [vmem:[%s14577_s1 + $0x1330] sm:$0xff]   ;;  %v11741_v54 = vld [vmem:[%s14577_s1 + $0x1338] sm:$0xff]  }
 0x25a   :  { %10803 = vmatprep.subr.bf16.mxu1 %v11706_v50  ;;  %v10503_v1 = vpop.f32.mrb[47].mxu1  ;;  %v11746_v61 = vld [vmem:[%s14577_s1 + $0x1400] sm:$0xff]   ;;  %v11760_v12 = vld [vmem:[%s14577_s1 + $0x1498] sm:$0xff]  }
 0x25b   :  { %v13942_v62 = vadd.f32 %v10501_v59, %v7956_v58  ;;  %10782 = vmatpush3.bf16.msra.mxu0 %v11705_v48  ;;  %v2118_v20 = vcombine.high %v2114_v17, %v2114_v17  ;;  %v11744_v58 = vld [vmem:[%s14577_s1 + $0x13b8] sm:$0xff]   ;;  %v2100_v59 = vrot.slane %v13959_v8, %v12065_v41  ;;  %v11749_v1 = vld [vmem:[%s14577_s1 + $0x1448] sm:$0xff]   ;;  %v11756_v8 = vld [vmem:[%s14577_s1 + $0x1490] sm:$0xff]  }
 0x25c   :  { %10783 = vmatprep.subr.bf16.mxu0 %v11708_v57  ;;  %v11742_v57 = vld [vmem:[%s14577_s1 + $0x13f8] sm:$0xff]  }
 0x25d   :  { %10804 = vmatpush3.bf16.msra.mxu1 %v11707_v56  ;;  %v2116_v0 = vcombine.high %v2100_v59, %v2100_v59 }
 0x25e   :  { %10805 = vmatprep.subr.bf16.mxu1 %v11710_v63  ;;  %v11748_v63 = vld [vmem:[%s14577_s1 + $0x1480] sm:$0xff]  }
 0x25f   :  { %10784 = vmatpush3.bf16.msra.mxu0 %v11709_v60  ;;  %v11745_v60 = vld [vmem:[%s14577_s1 + $0x1440] sm:$0xff]  }
 0x260   :  { %10813 = vmatprep.subr.bf16.mxu0 %v11712_v5  ;;  %v11753_v5 = vld [vmem:[%s14577_s1 + $0x1450] sm:$0xff]  }
 0x261   :  { %10806 = vmatpush3.bf16.msra.mxu1 %v11711_v3  ;;  %v11751_v3 = vld [vmem:[%s14577_s1 + $0x14c8] sm:$0xff]  }
 0x262   :  { %10835 = vmatprep.subr.bf16.mxu1 %v11714_v9  ;;  %8514 = vmatmul.mubr.bf16.vlgmr.msra.gmra.mrb[72].mxu0 %v2093_v7  ;;  %v11755_v7 = vld [vmem:[%s14577_s1 + $0x14d0] sm:$0xff]   ;;  %v11757_v9 = vld [vmem:[%s14577_s1 + $0x1458] sm:$0xff]  }
 0x263   :  { %10814 = vmatpush3.bf16.msra.mxu0 %v11713_v11  ;;  %8593 = vmatprep.mubr.bf16.mxu0 %v2114_v17  ;;  %v11759_v11 = vld [vmem:[%s14577_s1 + $0x14d8] sm:$0xff]   ;;  %v11765_v17 = vld [vmem:[%s14577_s1 + $0x1468] sm:$0xff]  }
 0x264   :  { %8554 = vmatmul.mubr.bf16.vlgmr.msra.gmra.mrb[72].mxu1 %v2115_v13  ;;  %10815 = vmatprep.subr.bf16.mxu0 %v11716_v14  ;;  %v11761_v13 = vld [vmem:[%s14577_s1 + $0x1460] sm:$0xff]  }
 0x265   :  { %10836 = vmatpush3.bf16.msra.mxu1 %v11715_v16  ;;  %8633 = vmatprep.mubr.bf16.mxu1 %v2118_v20  ;;  %v11762_v14 = vld [vmem:[%s14577_s1 + $0x1420] sm:$0xff]   ;;  %v11768_v20 = vld [vmem:[%s14577_s1 + $0x14a8] sm:$0xff]  }
 0x266   :  { %10837 = vmatprep.subr.bf16.mxu1 %v11718_v18  ;;  %v11764_v16 = vld [vmem:[%s14577_s1 + $0x14a0] sm:$0xff]   ;;  %v11766_v18 = vld [vmem:[%s14577_s1 + $0x1428] sm:$0xff]  }
 0x267   :  { %10816 = vmatpush3.bf16.msra.mxu0 %v11717_v19  ;;  %v11767_v19 = vld [vmem:[%s14577_s1 + $0x14e8] sm:$0xff]  }
 0x268   :  { %10817 = vmatprep.subr.bf16.mxu0 %v11720_v21 }
 0x269   :  { %10838 = vmatpush3.bf16.msra.mxu1 %v11719_v22  ;;  %v11769_v22 = vld [vmem:[%s14577_s1 + $0x1470] sm:$0xff]  }
 0x26a   :  { %10839 = vmatprep.subr.bf16.mxu1 %v11722_v23 }
 0x26b   :  { %10818 = vmatpush3.bf16.msra.mxu0 %v11721_v24  ;;  %v11770_v24 = vld [vmem:[%s14577_s1 + $0x1430] sm:$0xff]  }
 0x26c   :  { %10819 = vmatprep.subr.bf16.mxu0 %v11724_v25 }
 0x26d   :  { %10840 = vmatpush3.bf16.msra.mxu1 %v11723_v26 }
 0x26e   :  { %10841 = vmatprep.subr.bf16.mxu1 %v11726_v27 }
 0x26f   :  { %10820 = vmatpush3.bf16.msra.mxu0 %v11725_v28 }
 0x270   :  { %10821 = vmatprep.subr.bf16.mxu0 %v11728_v29 }
 0x271   :  { %10842 = vmatpush3.bf16.msra.mxu1 %v11727_v30  ;;  %v11771_v30 = vld [vmem:[%s14577_s1 + $0x14f0] sm:$0xff]  }
 0x272   :  { %10843 = vmatprep.subr.bf16.mxu1 %v11730_v31  ;;  %v11772_v31 = vld [vmem:[%s14577_s1 + $0x14b0] sm:$0xff]  }
 0x273   :  { %10822 = vmatpush3.bf16.msra.mxu0 %v11729_v32 }
 0x274   :  { %10823 = vmatprep.subr.bf16.mxu0 %v11732_v33 }
 0x275   :  { %v10521_v37 = vpop.f32.mrb[48].mxu0  ;;  %10844 = vmatpush3.bf16.msra.mxu1 %v11731_v34  ;;  %v11773_v34 = vld [vmem:[%s14577_s1 + $0x1478] sm:$0xff]  }
 0x276   :  { %v10522_v39 = vpop.f32.mrb[49].mxu0  ;;  %10845 = vmatprep.subr.bf16.mxu1 %v11734_v35 }
 0x277   :  { %v10523_v42 = vadd.f32 %v10522_v39, %v10521_v37  ;;  %v10524_v43 = vpop.f32.mrb[50].mxu0  ;;  %v10543_v44 = vpop.f32.mrb[48].mxu1  ;;  %10824 = vmatpush3.bf16.msra.mxu0 %v11733_v36  ;;  %v11774_v37 = vld [vmem:[%s14577_s1 + $0x1438] sm:$0xff]  }
 0x278   :  { %v10525_v47 = vpop.f32.mrb[51].mxu0  ;;  %v10544_v48 = vpop.f32.mrb[49].mxu1  ;;  %10825 = vmatprep.subr.bf16.mxu0 %v11736_v38  ;;  %v11775_v39 = vld [vmem:[%s14577_s1 + $0x14f8] sm:$0xff]  }
 0x279   :  { %v8036_v50 = vadd.f32 %v10523_v42, %v13942_v62  ;;  %v10545_v51 = vadd.f32 %v10544_v48, %v10543_v44  ;;  %v10546_v53 = vpop.f32.mrb[50].mxu1  ;;  %10846 = vmatpush3.bf16.msra.mxu1 %v11735_v40  ;;  %v11747_v62 = vld [vmem:[%s14577_s1 + $0x14c0] sm:$0xff]   ;;  %v38_v40 = vld [vmem:[%s14576_s0 + $0x50] sm:$0xff]  ;;  %v11776_v43 = vld [vmem:[%s14577_s1 + $0x14b8] sm:$0xff]  }
 0x27a   :  { %v10547_v55 = vpop.f32.mrb[51].mxu1  ;;  %10847 = vmatprep.subr.bf16.mxu1 %v11738_v46  ;;  %v2126_v42 = vrot.slane %v38_v40, %v12065_v41  ;;  %v2119_v44 = vcombine.high %v38_v40, %v38_v40  ;;  %v11778_v48 = vld [vmem:[%s14577_s1 + $0x1500] sm:$0xff]   ;;  %v11814_v40 = vld [vmem:[%s14577_s1 + $0x1648] sm:$0xff]  }
 0x27b   :  { %v14053_v56 = vadd.f32 %v10545_v51, %v8036_v50  ;;  %10826 = vmatpush3.bf16.msra.mxu0 %v11737_v45  ;;  %v11777_v45 = vld [vmem:[%s14577_s1 + $0x1540] sm:$0xff]   ;;  %v11781_v55 = vld [vmem:[%s14577_s1 + $0x1548] sm:$0xff]  }
 0x27c   :  { %10827 = vmatprep.subr.bf16.mxu0 %v11740_v52  ;;  %v2134_v46 = vcombine.high %v2126_v42, %v2126_v42  ;;  %v2142_v47 = vrot.slane %v2126_v42, %v12065_v41  ;;  %v11779_v50 = vld [vmem:[%s14577_s1 + $0x15c0] sm:$0xff]   ;;  %v11815_v42 = vld [vmem:[%s14577_s1 + $0x1608] sm:$0xff]  }
 0x27d   :  { %10848 = vmatpush3.bf16.msra.mxu1 %v11739_v49  ;;  %v14174_v49 = vrot.slane %v2119_v44, %v12065_v41  ;;  %v11780_v52 = vld [vmem:[%s14577_s1 + $0x1580] sm:$0xff]   ;;  %v11817_v44 = vld [vmem:[%s14577_s1 + $0x1688] sm:$0xff]  }
 0x27e   :  { %10849 = vmatprep.subr.bf16.mxu1 %v11742_v57  ;;  %v2156_v51 = vrot.slane %v2134_v46, %v12065_v41  ;;  %v11782_v57 = vld [vmem:[%s14577_s1 + $0x1508] sm:$0xff]   ;;  %v11819_v46 = vld [vmem:[%s14577_s1 + $0x1610] sm:$0xff]  }
 0x27f   :  { %10828 = vmatpush3.bf16.msra.mxu0 %v11741_v54  ;;  %v2135_v53 = vcombine.high %v14174_v49, %v14174_v49  ;;  %v2164_v54 = vcombine.high %v2142_v47, %v2142_v47 }
 0x280   :  { %10857 = vmatprep.subr.bf16.mxu0 %v11745_v60  ;;  %v11784_v60 = vld [vmem:[%s14577_s1 + $0x1588] sm:$0xff]  }
 0x281   :  { %10850 = vmatpush3.bf16.msra.mxu1 %v11744_v58  ;;  %v2163_v58 = vrot.slane %v2135_v53, %v12065_v41  ;;  %v11826_v53 = vld [vmem:[%s14577_s1 + $0x1660] sm:$0xff]  }
 0x282   :  { %8594 = vmatmul.mubr.bf16.vlgmr.msra.gmra.mrb[76].mxu0 %v2100_v59  ;;  %10879 = vmatprep.subr.bf16.mxu1 %v11747_v62  ;;  %v11783_v59 = vld [vmem:[%s14577_s1 + $0x15c8] sm:$0xff]   ;;  %v11785_v62 = vld [vmem:[%s14577_s1 + $0x1550] sm:$0xff]  }
 0x283   :  { %10858 = vmatpush3.bf16.msra.mxu0 %v11746_v61  ;;  %8673 = vmatprep.mubr.bf16.mxu0 %v2156_v51  ;;  %v2167_v61 = vcombine.high %v2163_v58, %v2163_v58 }
 0x284   :  { %8634 = vmatmul.mubr.bf16.vlgmr.msra.gmra.mrb[76].mxu1 %v2116_v0  ;;  %10859 = vmatprep.subr.bf16.mxu0 %v11749_v1  ;;  %v11787_v0 = vld [vmem:[%s14577_s1 + $0x15d0] sm:$0xff]  }
 0x285   :  { %10880 = vmatpush3.bf16.msra.mxu1 %v11748_v63  ;;  %v11786_v63 = vld [vmem:[%s14577_s1 + $0x1510] sm:$0xff]  }
 0x286   :  { %10881 = vmatprep.subr.bf16.mxu1 %v11751_v3  ;;  %v11788_v1 = vld [vmem:[%s14577_s1 + $0x1590] sm:$0xff]   ;;  %v11790_v3 = vld [vmem:[%s14577_s1 + $0x1518] sm:$0xff]  }
 0x287   :  { %10860 = vmatpush3.bf16.msra.mxu0 %v11750_v2  ;;  %v11789_v2 = vld [vmem:[%s14577_s1 + $0x1558] sm:$0xff]  }
 0x288   :  { %10861 = vmatprep.subr.bf16.mxu0 %v11753_v5  ;;  %v11792_v5 = vld [vmem:[%s14577_s1 + $0x1598] sm:$0xff]  }
 0x289   :  { %10882 = vmatpush3.bf16.msra.mxu1 %v11752_v4  ;;  %v11791_v4 = vld [vmem:[%s14577_s1 + $0x15d8] sm:$0xff]  }
 0x28a   :  { %10883 = vmatprep.subr.bf16.mxu1 %v11755_v7  ;;  %v11794_v7 = vld [vmem:[%s14577_s1 + $0x1520] sm:$0xff]  }
 0x28b   :  { %10862 = vmatpush3.bf16.msra.mxu0 %v11754_v6  ;;  %v11793_v6 = vld [vmem:[%s14577_s1 + $0x1560] sm:$0xff]  }
 0x28c   :  { %10863 = vmatprep.subr.bf16.mxu0 %v11757_v9  ;;  %v11796_v9 = vld [vmem:[%s14577_s1 + $0x15a0] sm:$0xff]  }
 0x28d   :  { %10884 = vmatpush3.bf16.msra.mxu1 %v11756_v8  ;;  %v11795_v8 = vld [vmem:[%s14577_s1 + $0x15e0] sm:$0xff]  }
 0x28e   :  { %10885 = vmatprep.subr.bf16.mxu1 %v11759_v11  ;;  %v11798_v11 = vld [vmem:[%s14577_s1 + $0x1528] sm:$0xff]  }
 0x28f   :  { %10864 = vmatpush3.bf16.msra.mxu0 %v11758_v10  ;;  %v11797_v10 = vld [vmem:[%s14577_s1 + $0x1568] sm:$0xff]  }
 0x290   :  { %10865 = vmatprep.subr.bf16.mxu0 %v11761_v13 }
 0x291   :  { %10886 = vmatpush3.bf16.msra.mxu1 %v11760_v12  ;;  %v11799_v12 = vld [vmem:[%s14577_s1 + $0x15e8] sm:$0xff]  }
 0x292   :  { %10887 = vmatprep.subr.bf16.mxu1 %v11763_v15 }
 0x293   :  { %10866 = vmatpush3.bf16.msra.mxu0 %v11762_v14  ;;  %v11800_v14 = vld [vmem:[%s14577_s1 + $0x15a8] sm:$0xff]  }
 0x294   :  { %10867 = vmatprep.subr.bf16.mxu0 %v11765_v17 }
 0x295   :  { %v10565_v21 = vpop.f32.mrb[52].mxu0  ;;  %10888 = vmatpush3.bf16.msra.mxu1 %v11764_v16  ;;  %v11801_v16 = vld [vmem:[%s14577_s1 + $0x1570] sm:$0xff]  }
 0x296   :  { %v10566_v23 = vpop.f32.mrb[53].mxu0  ;;  %10889 = vmatprep.subr.bf16.mxu1 %v11767_v19 }
 0x297   :  { %v10567_v25 = vadd.f32 %v10566_v23, %v10565_v21  ;;  %v10568_v26 = vpop.f32.mrb[54].mxu0  ;;  %v10587_v27 = vpop.f32.mrb[52].mxu1  ;;  %10868 = vmatpush3.bf16.msra.mxu0 %v11766_v18  ;;  %v11803_v21 = vld [vmem:[%s14577_s1 + $0x15f0] sm:$0xff]  }
 0x298   :  { %v10569_v28 = vpop.f32.mrb[55].mxu0  ;;  %v10588_v29 = vpop.f32.mrb[53].mxu1  ;;  %10869 = vmatprep.subr.bf16.mxu0 %v11769_v22  ;;  %v11804_v26 = vld [vmem:[%s14577_s1 + $0x15b0] sm:$0xff]  }
 0x299   :  { %v8116_v32 = vadd.f32 %v10567_v25, %v14053_v56  ;;  %v10589_v33 = vadd.f32 %v10588_v29, %v10587_v27  ;;  %10890 = vmatpush3.bf16.msra.mxu1 %v11768_v20  ;;  %v10590_v35 = vpop.f32.mrb[54].mxu1  ;;  %v2166_v56 = vcombine.high %v2156_v51, %v2156_v51  ;;  %v11802_v20 = vld [vmem:[%s14577_s1 + $0x1530] sm:$0xff]   ;;  %v11805_v28 = vld [vmem:[%s14577_s1 + $0x1578] sm:$0xff]  }
 0x29a   :  { %10891 = vmatprep.subr.bf16.mxu1 %v11771_v30  ;;  %v10591_v38 = vpop.f32.mrb[55].mxu1  ;;  %v11810_v35 = vld [vmem:[%s14577_s1 + $0x1640] sm:$0xff]   ;;  %v11824_v51 = vld [vmem:[%s14577_s1 + $0x16d8] sm:$0xff]  }
 0x29b   :  { %v14151_v36 = vadd.f32 %v10589_v33, %v8116_v32  ;;  %10870 = vmatpush3.bf16.msra.mxu0 %v11770_v24  ;;  %8713 = vmatprep.mubr.bf16.mxu1 %v2166_v56  ;;  %v11807_v32 = vld [vmem:[%s14577_s1 + $0x15f8] sm:$0xff]   ;;  %v11813_v38 = vld [vmem:[%s14577_s1 + $0x1680] sm:$0xff]  }
 0x29c   :  { %10871 = vmatprep.subr.bf16.mxu0 %v11773_v34  ;;  %v11809_v33 = vld [vmem:[%s14577_s1 + $0x15b8] sm:$0xff]   ;;  %v2149_v34 = vrot.slane %v14174_v49, %v12065_v41  ;;  %v11829_v56 = vld [vmem:[%s14577_s1 + $0x16a0] sm:$0xff]  }
 0x29d   :  { %10892 = vmatpush3.bf16.msra.mxu1 %v11772_v31  ;;  %v11806_v31 = vld [vmem:[%s14577_s1 + $0x1538] sm:$0xff]  }
 0x29e   :  { %10893 = vmatprep.subr.bf16.mxu1 %v11775_v39  ;;  %v2165_v39 = vcombine.high %v2149_v34, %v2149_v34  ;;  %v11822_v49 = vld [vmem:[%s14577_s1 + $0x1658] sm:$0xff]  }
 0x29f   :  { %10872 = vmatpush3.bf16.msra.mxu0 %v11774_v37  ;;  %v11812_v37 = vld [vmem:[%s14577_s1 + $0x16c0] sm:$0xff]  }
 0x2a0   :  { %10901 = vmatprep.subr.bf16.mxu0 %v11777_v45  ;;  %v11818_v45 = vld [vmem:[%s14577_s1 + $0x1650] sm:$0xff]  }
 0x2a1   :  { %10894 = vmatpush3.bf16.msra.mxu1 %v11776_v43  ;;  %v11816_v43 = vld [vmem:[%s14577_s1 + $0x16c8] sm:$0xff]  }
 0x2a2   :  { %10923 = vmatprep.subr.bf16.mxu1 %v11779_v50  ;;  %8674 = vmatmul.mubr.bf16.vlgmr.msra.gmra.mrb[80].mxu0 %v2142_v47  ;;  %v11820_v47 = vld [vmem:[%s14577_s1 + $0x16d0] sm:$0xff]   ;;  %v11823_v50 = vld [vmem:[%s14577_s1 + $0x1618] sm:$0xff]  }
 0x2a3   :  { %10902 = vmatpush3.bf16.msra.mxu0 %v11778_v48  ;;  %8753 = vmatprep.mubr.bf16.mxu0 %v2163_v58  ;;  %v11821_v48 = vld [vmem:[%s14577_s1 + $0x1690] sm:$0xff]   ;;  %v11831_v58 = vld [vmem:[%s14577_s1 + $0x1628] sm:$0xff]  }
 0x2a4   :  { %8714 = vmatmul.mubr.bf16.vlgmr.msra.gmra.mrb[80].mxu1 %v2164_v54  ;;  %10903 = vmatprep.subr.bf16.mxu0 %v11781_v55  ;;  %v11827_v54 = vld [vmem:[%s14577_s1 + $0x1620] sm:$0xff]  }
 0x2a5   :  { %10924 = vmatpush3.bf16.msra.mxu1 %v11780_v52  ;;  %8793 = vmatprep.mubr.bf16.mxu1 %v2167_v61  ;;  %v11825_v52 = vld [vmem:[%s14577_s1 + $0x1698] sm:$0xff]   ;;  %v11828_v55 = vld [vmem:[%s14577_s1 + $0x16e0] sm:$0xff]   ;;  %v11833_v61 = vld [vmem:[%s14577_s1 + $0x16a8] sm:$0xff]  }
 0x2a6   :  { %10925 = vmatprep.subr.bf16.mxu1 %v11783_v59  ;;  %v11832_v59 = vld [vmem:[%s14577_s1 + $0x16e8] sm:$0xff]  }
 0x2a7   :  { %10904 = vmatpush3.bf16.msra.mxu0 %v11782_v57  ;;  %v11830_v57 = vld [vmem:[%s14577_s1 + $0x1668] sm:$0xff]  }
 0x2a8   :  { %10905 = vmatprep.subr.bf16.mxu0 %v11785_v62 }
 0x2a9   :  { %10926 = vmatpush3.bf16.msra.mxu1 %v11784_v60 }
 0x2aa   :  { %10927 = vmatprep.subr.bf16.mxu1 %v11787_v0 }
 0x2ab   :  { %10906 = vmatpush3.bf16.msra.mxu0 %v11786_v63  ;;  %v11834_v63 = vld [vmem:[%s14577_s1 + $0x1670] sm:$0xff]  }
 0x2ac   :  { %10907 = vmatprep.subr.bf16.mxu0 %v11789_v2 }
 0x2ad   :  { %10928 = vmatpush3.bf16.msra.mxu1 %v11788_v1 }
 0x2ae   :  { %10929 = vmatprep.subr.bf16.mxu1 %v11791_v4 }
 0x2af   :  { %10908 = vmatpush3.bf16.msra.mxu0 %v11790_v3 }
 0x2b0   :  { %10909 = vmatprep.subr.bf16.mxu0 %v11793_v6  ;;  %v11836_v6 = vld [vmem:[%s14577_s1 + $0x16f0] sm:$0xff]  }
 0x2b1   :  { %10930 = vmatpush3.bf16.msra.mxu1 %v11792_v5  ;;  %v11835_v5 = vld [vmem:[%s14577_s1 + $0x1630] sm:$0xff]  }
 0x2b2   :  { %10931 = vmatprep.subr.bf16.mxu1 %v11795_v8 }
 0x2b3   :  { %10910 = vmatpush3.bf16.msra.mxu0 %v11794_v7 }
 0x2b4   :  { %10911 = vmatprep.subr.bf16.mxu0 %v11797_v10 }
 0x2b5   :  { %v10609_v13 = vpop.f32.mrb[56].mxu0  ;;  %10932 = vmatpush3.bf16.msra.mxu1 %v11796_v9  ;;  %v11837_v9 = vld [vmem:[%s14577_s1 + $0x16b0] sm:$0xff]  }
 0x2b6   :  { %v10610_v15 = vpop.f32.mrb[57].mxu0  ;;  %10933 = vmatprep.subr.bf16.mxu1 %v11799_v12  ;;  %v11838_v12 = vld [vmem:[%s14577_s1 + $0x1678] sm:$0xff]  }
 0x2b7   :  { %v10611_v17 = vadd.f32 %v10610_v15, %v10609_v13  ;;  %v10612_v18 = vpop.f32.mrb[58].mxu0  ;;  %v10631_v19 = vpop.f32.mrb[56].mxu1  ;;  %10912 = vmatpush3.bf16.msra.mxu0 %v11798_v11  ;;  %v11840_v15 = vld [vmem:[%s14577_s1 + $0x16f8] sm:$0xff]  }
 0x2b8   :  { %v10613_v22 = vpop.f32.mrb[59].mxu0  ;;  %v10632_v23 = vpop.f32.mrb[57].mxu1  ;;  %10913 = vmatprep.subr.bf16.mxu0 %v11801_v16  ;;  %v39_v16 = vld [vmem:[%s14576_s0 + $0x58] sm:$0xff] }
 0x2b9   :  { %v8196_v24 = vadd.f32 %v10611_v17, %v14151_v36  ;;  %v10633_v25 = vadd.f32 %v10632_v23, %v10631_v19  ;;  %v10634_v27 = vpop.f32.mrb[58].mxu1  ;;  %10934 = vmatpush3.bf16.msra.mxu1 %v11800_v14  ;;  %v11811_v36 = vld [vmem:[%s14577_s1 + $0x1600] sm:$0xff]   ;;  %v11839_v14 = vld [vmem:[%s14577_s1 + $0x1638] sm:$0xff]   ;;  %v2175_v17 = vrot.slane %v39_v16, %v12065_v41  ;;  %v2168_v19 = vcombine.high %v39_v16, %v39_v16  ;;  %v11879_v16 = vld [vmem:[%s14577_s1 + $0x1850] sm:$0xff]  }
 0x2ba   :  { %v10635_v29 = vpop.f32.mrb[59].mxu1  ;;  %10935 = vmatprep.subr.bf16.mxu1 %v11803_v21  ;;  %v11841_v18 = vld [vmem:[%s14577_s1 + $0x16b8] sm:$0xff]  }
 0x2bb   :  { %v14262_v30 = vadd.f32 %v10633_v25, %v8196_v24  ;;  %10914 = vmatpush3.bf16.msra.mxu0 %v11802_v20  ;;  %v11842_v20 = vld [vmem:[%s14577_s1 + $0x1740] sm:$0xff]   ;;  %v2183_v21 = vcombine.high %v2175_v17, %v2175_v17  ;;  %v2191_v22 = vrot.slane %v2175_v17, %v12065_v41  ;;  %v14383_v23 = vrot.slane %v2168_v19, %v12065_v41  ;;  %v11846_v29 = vld [vmem:[%s14577_s1 + $0x1748] sm:$0xff]   ;;  %v11880_v17 = vld [vmem:[%s14577_s1 + $0x1810] sm:$0xff]  }
 0x2bc   :  { %10915 = vmatprep.subr.bf16.mxu0 %v11805_v28  ;;  %v11844_v24 = vld [vmem:[%s14577_s1 + $0x17c0] sm:$0xff]   ;;  %v11882_v19 = vld [vmem:[%s14577_s1 + $0x1818] sm:$0xff]  }
 0x2bd   :  { %10936 = vmatpush3.bf16.msra.mxu1 %v11804_v26  ;;  %v2205_v25 = vrot.slane %v2183_v21, %v12065_v41  ;;  %v11843_v26 = vld [vmem:[%s14577_s1 + $0x1700] sm:$0xff]   ;;  %v2184_v27 = vcombine.high %v14383_v23, %v14383_v23  ;;  %v2213_v28 = vcombine.high %v2191_v22, %v2191_v22 }
 0x2be   :  { %10937 = vmatprep.subr.bf16.mxu1 %v11807_v32  ;;  %v9188_v21 = vld.sshfl [vmem:[%s14576_s0 + $0x60] sm:$0x11 pattern:$0x75316420] }
 0x2bf   :  { %10916 = vmatpush3.bf16.msra.mxu0 %v11806_v31  ;;  %v11845_v31 = vld [vmem:[%s14577_s1 + $0x1780] sm:$0xff]   ;;  %v2212_v32 = vrot.slane %v2184_v27, %v12065_v41 }
 0x2c0   :  { %10945 = vmatprep.subr.bf16.mxu0 %v11810_v35 }
 0x2c1   :  { %10938 = vmatpush3.bf16.msra.mxu1 %v11809_v33  ;;  %v11848_v33 = vld [vmem:[%s14577_s1 + $0x17c8] sm:$0xff]   ;;  %v2216_v35 = vcombine.high %v2212_v32, %v2212_v32 }
 0x2c2   :  { %8754 = vmatmul.mubr.bf16.vlgmr.msra.gmra.mrb[84].mxu0 %v2149_v34  ;;  %10967 = vmatprep.subr.bf16.mxu1 %v11812_v37  ;;  %v11847_v34 = vld [vmem:[%s14577_s1 + $0x1708] sm:$0xff]  }
 0x2c3   :  { %10946 = vmatpush3.bf16.msra.mxu0 %v11811_v36  ;;  %8833 = vmatprep.mubr.bf16.mxu0 %v2205_v25  ;;  %v11850_v36 = vld [vmem:[%s14577_s1 + $0x1750] sm:$0xff]   ;;  %v11849_v37 = vld [vmem:[%s14577_s1 + $0x1788] sm:$0xff]  }
 0x2c4   :  { %8794 = vmatmul.mubr.bf16.vlgmr.msra.gmra.mrb[84].mxu1 %v2165_v39  ;;  %10947 = vmatprep.subr.bf16.mxu0 %v11814_v40  ;;  %v11851_v39 = vld [vmem:[%s14577_s1 + $0x1710] sm:$0xff]   ;;  %v11854_v40 = vld [vmem:[%s14577_s1 + $0x1758] sm:$0xff]  }
 0x2c5   :  { %10968 = vmatpush3.bf16.msra.mxu1 %v11813_v38  ;;  %v11852_v38 = vld [vmem:[%s14577_s1 + $0x17d0] sm:$0xff]  }
 0x2c6   :  { %10969 = vmatprep.subr.bf16.mxu1 %v11816_v43  ;;  %v11856_v43 = vld [vmem:[%s14577_s1 + $0x17d8] sm:$0xff]  }
 0x2c7   :  { %10948 = vmatpush3.bf16.msra.mxu0 %v11815_v42  ;;  %v11853_v42 = vld [vmem:[%s14577_s1 + $0x1790] sm:$0xff]  }
 0x2c8   :  { %10949 = vmatprep.subr.bf16.mxu0 %v11818_v45  ;;  %v11858_v45 = vld [vmem:[%s14577_s1 + $0x1760] sm:$0xff]  }
 0x2c9   :  { %10970 = vmatpush3.bf16.msra.mxu1 %v11817_v44  ;;  %v11855_v44 = vld [vmem:[%s14577_s1 + $0x1718] sm:$0xff]  }
 0x2ca   :  { %10971 = vmatprep.subr.bf16.mxu1 %v11820_v47  ;;  %v11860_v47 = vld [vmem:[%s14577_s1 + $0x17e0] sm:$0xff]  }
 0x2cb   :  { %10950 = vmatpush3.bf16.msra.mxu0 %v11819_v46  ;;  %v11857_v46 = vld [vmem:[%s14577_s1 + $0x1798] sm:$0xff]  }
 0x2cc   :  { %10951 = vmatprep.subr.bf16.mxu0 %v11822_v49  ;;  %v11862_v49 = vld [vmem:[%s14577_s1 + $0x1768] sm:$0xff]  }
 0x2cd   :  { %10972 = vmatpush3.bf16.msra.mxu1 %v11821_v48  ;;  %v11859_v48 = vld [vmem:[%s14577_s1 + $0x1720] sm:$0xff]  }
 0x2ce   :  { %10973 = vmatprep.subr.bf16.mxu1 %v11824_v51 }
 0x2cf   :  { %10952 = vmatpush3.bf16.msra.mxu0 %v11823_v50  ;;  %v11861_v50 = vld [vmem:[%s14577_s1 + $0x17a0] sm:$0xff]  }
 0x2d0   :  { %10953 = vmatprep.subr.bf16.mxu0 %v11826_v53 }
 0x2d1   :  { %10974 = vmatpush3.bf16.msra.mxu1 %v11825_v52  ;;  %v11864_v52 = vld [vmem:[%s14577_s1 + $0x17e8] sm:$0xff]  }
 0x2d2   :  { %10975 = vmatprep.subr.bf16.mxu1 %v11828_v55 }
 0x2d3   :  { %10954 = vmatpush3.bf16.msra.mxu0 %v11827_v54  ;;  %v11863_v54 = vld [vmem:[%s14577_s1 + $0x1728] sm:$0xff]  }
 0x2d4   :  { %10955 = vmatprep.subr.bf16.mxu0 %v11830_v57 }
 0x2d5   :  { %v10653_v60 = vpop.f32.mrb[60].mxu0  ;;  %10976 = vmatpush3.bf16.msra.mxu1 %v11829_v56 }
 0x2d6   :  { %v10654_v62 = vpop.f32.mrb[61].mxu0  ;;  %10977 = vmatprep.subr.bf16.mxu1 %v11832_v59  ;;  %v11866_v59 = vld [vmem:[%s14577_s1 + $0x1770] sm:$0xff]  }
 0x2d7   :  { %v10655_v0 = vadd.f32 %v10654_v62, %v10653_v60  ;;  %v10656_v1 = vpop.f32.mrb[62].mxu0  ;;  %v10675_v2 = vpop.f32.mrb[60].mxu1  ;;  %10956 = vmatpush3.bf16.msra.mxu0 %v11831_v58  ;;  %v11865_v58 = vld [vmem:[%s14577_s1 + $0x17a8] sm:$0xff]  }
 0x2d8   :  { %v10657_v3 = vpop.f32.mrb[63].mxu0  ;;  %v10676_v4 = vpop.f32.mrb[61].mxu1  ;;  %10957 = vmatprep.subr.bf16.mxu0 %v11834_v63 }
 0x2d9   :  { %v8276_v7 = vadd.f32 %v10655_v0, %v14262_v30  ;;  %v10677_v8 = vadd.f32 %v10676_v4, %v10675_v2  ;;  %v10678_v10 = vpop.f32.mrb[62].mxu1  ;;  %10978 = vmatpush3.bf16.msra.mxu1 %v11833_v61  ;;  %v2215_v30 = vcombine.high %v2205_v25, %v2205_v25  ;;  %v11868_v0 = vld [vmem:[%s14577_s1 + $0x17f0] sm:$0xff]  }
 0x2da   :  { %v10679_v13 = vpop.f32.mrb[63].mxu1  ;;  %10979 = vmatprep.subr.bf16.mxu1 %v11836_v6  ;;  %v11867_v2 = vld [vmem:[%s14577_s1 + $0x1730] sm:$0xff]   ;;  %v11875_v10 = vld [vmem:[%s14577_s1 + $0x1840] sm:$0xff]  }
 0x2db   :  { %v14360_v11 = vadd.f32 %v10677_v8, %v8276_v7  ;;  %10958 = vmatpush3.bf16.msra.mxu0 %v11835_v5  ;;  %8873 = vmatprep.mubr.bf16.mxu1 %v2215_v30  ;;  %v11870_v5 = vld [vmem:[%s14577_s1 + $0x1778] sm:$0xff]   ;;  %v11869_v6 = vld [vmem:[%s14577_s1 + $0x17b0] sm:$0xff]  }
 0x2dc   :  { %10959 = vmatprep.subr.bf16.mxu0 %v11838_v12  ;;  %v11872_v7 = vld [vmem:[%s14577_s1 + $0x17f8] sm:$0xff]   ;;  %v11876_v12 = vld [vmem:[%s14577_s1 + $0x1800] sm:$0xff]  }
 0x2dd   :  { %10980 = vmatpush3.bf16.msra.mxu1 %v11837_v9  ;;  %v11871_v8 = vld [vmem:[%s14577_s1 + $0x1738] sm:$0xff]   ;;  %v2198_v9 = vrot.slane %v14383_v23, %v12065_v41 }
 0x2de   :  { %10981 = vmatprep.subr.bf16.mxu1 %v11840_v15  ;;  %v11878_v15 = vld [vmem:[%s14577_s1 + $0x1808] sm:$0xff]  }
 0x2df   :  { %10960 = vmatpush3.bf16.msra.mxu0 %v11839_v14  ;;  %v2214_v13 = vcombine.high %v2198_v9, %v2198_v9  ;;  %v11877_v14 = vld [vmem:[%s14577_s1 + $0x1848] sm:$0xff]  }
 0x2e0   :  { %10989 = vmatprep.subr.bf16.mxu0 %v11842_v20  ;;  %v11883_v20 = vld [vmem:[%s14577_s1 + $0x1860] sm:$0xff]  }
 0x2e1   :  { %10982 = vmatpush3.bf16.msra.mxu1 %v11841_v18  ;;  %v11881_v18 = vld [vmem:[%s14577_s1 + $0x1858] sm:$0xff]  }
 0x2e2   :  { %11011 = vmatprep.subr.bf16.mxu1 %v11844_v24  ;;  %8834 = vmatmul.mubr.bf16.vlgmr.msra.gmra.mrb[88].mxu0 %v2191_v22 }
 0x2e3   :  { %10990 = vmatpush3.bf16.msra.mxu0 %v11843_v26  ;;  %8913 = vmatprep.mubr.bf16.mxu0 %v2212_v32 }
 0x2e4   :  { %8874 = vmatmul.mubr.bf16.vlgmr.msra.gmra.mrb[88].mxu1 %v2213_v28  ;;  %10991 = vmatprep.subr.bf16.mxu0 %v11846_v29 }
 0x2e5   :  { %11012 = vmatpush3.bf16.msra.mxu1 %v11845_v31  ;;  %8953 = vmatprep.mubr.bf16.mxu1 %v2216_v35 }
 0x2e6   :  { %11013 = vmatprep.subr.bf16.mxu1 %v11848_v33 }
 0x2e7   :  { %10992 = vmatpush3.bf16.msra.mxu0 %v11847_v34 }
 0x2e8   :  { %10993 = vmatprep.subr.bf16.mxu0 %v11850_v36 }
 0x2e9   :  { %11014 = vmatpush3.bf16.msra.mxu1 %v11849_v37 }
 0x2ea   :  { %11015 = vmatprep.subr.bf16.mxu1 %v11852_v38 }
 0x2eb   :  { %10994 = vmatpush3.bf16.msra.mxu0 %v11851_v39 }
 0x2ec   :  { %10995 = vmatprep.subr.bf16.mxu0 %v11854_v40 }
 0x2ed   :  { %11016 = vmatpush3.bf16.msra.mxu1 %v11853_v42 }
 0x2ee   :  { %11017 = vmatprep.subr.bf16.mxu1 %v11856_v43 }
 0x2ef   :  { %10996 = vmatpush3.bf16.msra.mxu0 %v11855_v44 }
 0x2f0   :  { %10997 = vmatprep.subr.bf16.mxu0 %v11858_v45 }
 0x2f1   :  { %11018 = vmatpush3.bf16.msra.mxu1 %v11857_v46 }
 0x2f2   :  { %11019 = vmatprep.subr.bf16.mxu1 %v11860_v47 }
 0x2f3   :  { %10998 = vmatpush3.bf16.msra.mxu0 %v11859_v48 }
 0x2f4   :  { %10999 = vmatprep.subr.bf16.mxu0 %v11862_v49 }
 0x2f5   :  { %v10697_v51 = vpop.f32.mrb[64].mxu0  ;;  %11020 = vmatpush3.bf16.msra.mxu1 %v11861_v50 }
 0x2f6   :  { %v10698_v53 = vpop.f32.mrb[65].mxu0  ;;  %11021 = vmatprep.subr.bf16.mxu1 %v11864_v52 }
 0x2f7   :  { %v10699_v55 = vadd.f32 %v10698_v53, %v10697_v51  ;;  %v10700_v56 = vpop.f32.mrb[66].mxu0  ;;  %v10719_v57 = vpop.f32.mrb[64].mxu1  ;;  %11000 = vmatpush3.bf16.msra.mxu0 %v11863_v54 }
 0x2f8   :  { %v10701_v60 = vpop.f32.mrb[67].mxu0  ;;  %v10720_v61 = vpop.f32.mrb[65].mxu1  ;;  %11001 = vmatprep.subr.bf16.mxu0 %v11866_v59 }
 0x2f9   :  { %v8356_v62 = vadd.f32 %v10699_v55, %v14360_v11  ;;  %v10721_v63 = vadd.f32 %v10720_v61, %v10719_v57  ;;  %v10722_v1 = vpop.f32.mrb[66].mxu1  ;;  %11022 = vmatpush3.bf16.msra.mxu1 %v11865_v58  ;;  %v11874_v11 = vld [vmem:[%s14577_s1 + $0x17b8] sm:$0xff]  }
 0x2fa   :  { %v10723_v3 = vpop.f32.mrb[67].mxu1  ;;  %11023 = vmatprep.subr.bf16.mxu1 %v11868_v0 }
 0x2fb   :  { %v8396_v4 = vadd.f32 %v10721_v63, %v8356_v62  ;;  %11002 = vmatpush3.bf16.msra.mxu0 %v11867_v2 }
 0x2fc   :  { %11003 = vmatprep.subr.bf16.mxu0 %v11870_v5 }
 0x2fd   :  { %11024 = vmatpush3.bf16.msra.mxu1 %v11869_v6 }
 0x2fe   :  { %11025 = vmatprep.subr.bf16.mxu1 %v11872_v7 }
 0x2ff   :  { %11004 = vmatpush3.bf16.msra.mxu0 %v11871_v8 }
 0x300   :  { %11033 = vmatprep.subr.bf16.mxu0 %v11875_v10 }
 0x301   :  { %11026 = vmatpush3.bf16.msra.mxu1 %v11874_v11 }
 0x302   :  { %8914 = vmatmul.mubr.bf16.vlgmr.msra.gmra.mrb[92].mxu0 %v2198_v9 }
 0x303   :  { %11034 = vmatpush3.bf16.msra.mxu0 %v11876_v12 }
 0x304   :  { %8954 = vmatmul.mubr.bf16.vlgmr.msra.gmra.mrb[92].mxu1 %v2214_v13  ;;  %11035 = vmatprep.subr.bf16.mxu0 %v11877_v14 }
 0x307   :  { %11036 = vmatpush3.bf16.msra.mxu0 %v11878_v15 }
 0x308   :  { %11037 = vmatprep.subr.bf16.mxu0 %v11879_v16 }
 0x30b   :  { %11038 = vmatpush3.bf16.msra.mxu0 %v11880_v17 }
 0x30c   :  { %11039 = vmatprep.subr.bf16.mxu0 %v11881_v18 }
 0x30d   :  { %12 = vsyncpa [#allocation3], 0  ;;  %v2224_v22 = vcombine.high %v9188_v21, %v9188_v21  ;;  %v11884_v23 = vld [vmem:[%s14577_s1 + $0x1820] sm:$0xff]   ;;  %v11885_v25 = vld [vmem:[%s14577_s1 + $0x1868] sm:$0xff]   ;;  %v2231_v44 = vrot.slane %v9188_v21, %v12065_v41  ;;  %vm11917_vm0 = vmmov 0   ;;  %vm9013_vm1 = vcmask 261120  }
 0x30e   :  { %v11886_v28 = vld [vmem:[%s14577_s1 + $0x1828] sm:$0xff]   ;;  %v11887_v32 = vld [vmem:[%s14577_s1 + $0x1870] sm:$0xff]   ;;  %v11889_v42 = vld [vmem:[%s14577_s1 + $0x1878] sm:$0xff]   ;;  %vm9097_vm2 = vcmask 130048   ;;  %s11919_s23 = smov [#allocation2]   ;;  %vm9171_vm3 = vcmask 58368  }
 0x30f   :  { %11040 = vmatpush3.bf16.msra.mxu0 %v11882_v19  ;;  %v2238_v24 = vrot.slane %v2224_v22, %v12065_v41  ;;  %v11888_v38 = vld [vmem:[%s14577_s1 + $0x1830] sm:$0xff]   ;;  %v11890_v43 = vld [vmem:[%s14577_s1 + $0x1838] sm:$0xff]   ;;  %v9002_v5 = vld [vmem:[%s14579_s3] sm:$0xff]  ;;  %s9179_s24 = sshll.u32 %s11919_s23, 4  ;;  %s9180_s24 = int_to_ptr.vmem [resolvable:$true] %s9179_s24 }
 0x310   :  { %11041 = vmatprep.subr.bf16.mxu0 %v11883_v20  ;;  %v9003_v6 = vld [vmem:[%s14579_s3 + $0x8] sm:$0xff]  ;;  %v9004_v15 = vld [vmem:[%s14579_s3 + $0x10] sm:$0xff]  ;;  %v9005_v16 = vld [vmem:[%s14579_s3 + $0x18] sm:$0xff]  ;;  %p11896_p1 = scmp.lt.s32.totalorder %s9180_s24, %s9180_s24 }
 0x311   :  { %8993 = vmatprep.mubr.bf16.mxu0 %v2238_v24  ;;  %v11082_v8 = vpack.c.bf16 %v9003_v6, %v9002_v5  ;;  %v11085_v20 = vpack.c.bf16 %v9005_v16, %v9004_v15  ;;  %v9973_v6 = vld [vmem:[%s14580_s4] ss:$0 sm:$0xff] }
 0x313   :  { %11042 = vmatpush3.bf16.msra.mxu0 %v11884_v23  ;;  %v11918_v23 = vmov 0.0  }
 0x314   :  { %11043 = vmatprep.subr.bf16.mxu0 %v11885_v25  ;;  %11071 = vmatprep.mubr.msk.f32.mxu1 %vm11917_vm0, %v11918_v23 }
 0x315   :  { %v10741_v26 = vpop.f32.mrb[68].mxu0 }
 0x316   :  { %v10742_v27 = vpop.f32.mrb[69].mxu0 }
 0x317   :  { %v10743_v29 = vadd.f32 %v10742_v27, %v10741_v26  ;;  %v10744_v30 = vpop.f32.mrb[70].mxu0  ;;  %v10763_v31 = vpop.f32.mrb[68].mxu1  ;;  %11044 = vmatpush3.bf16.msra.mxu0 %v11886_v28 }
 0x318   :  { %v10745_v33 = vpop.f32.mrb[71].mxu0  ;;  %v10764_v34 = vpop.f32.mrb[69].mxu1  ;;  %11045 = vmatprep.subr.bf16.mxu0 %v11887_v32 }
 0x319   :  { %v8436_v35 = vadd.f32 %v10743_v29, %v8396_v4  ;;  %v10765_v36 = vadd.f32 %v10764_v34, %v10763_v31  ;;  %v10766_v37 = vpop.f32.mrb[70].mxu1  ;;  %v11916_v4 = vmov 0.0|0.0  }
 0x31a   :  { %v10767_v39 = vpop.f32.mrb[71].mxu1  ;;  %11081 = vmatprep.subr.bf16.mxu1 %v11916_v4 }
 0x31b   :  { %v8476_v40 = vadd.f32 %v10765_v36, %v8436_v35  ;;  %11046 = vmatpush3.bf16.msra.mxu0 %v11888_v38  ;;  %11083 = vmatpush3.bf16.msra.mxu1 %v11082_v8 }
 0x31c   :  { %11047 = vmatprep.subr.bf16.mxu0 %v11889_v42  ;;  %11084 = vmatprep.subr.bf16.mxu1 %v11916_v4 }
 0x31f   :  { %11048 = vmatpush3.bf16.msra.mxu0 %v11890_v43  ;;  %11086 = vmatpush3.bf16.msra.mxu1 %v11085_v20 }
 0x320   :  { %11087 = vmatprep.subr.bf16.mxu1 %v11916_v4  ;;  %v9089_v4 = vld [vmem:[%s14581_s5 + $0x8] sm:$0xff] }
 0x322   :  { %8994 = vmatmul.mubr.bf16.vlgmr.msra.gmra.mrb[96].mxu0 %v2231_v44 }
 0x335   :  { %v10785_v45 = vpop.f32.mrb[72].mxu0 }
 0x336   :  { %v10786_v46 = vpop.f32.mrb[73].mxu0 }
 0x337   :  { %v10787_v47 = vadd.f32 %v10786_v46, %v10785_v45  ;;  %v10788_v48 = vpop.f32.mrb[74].mxu0  ;;  %v10807_v49 = vpop.f32.mrb[72].mxu1 }
 0x338   :  { %v10789_v50 = vpop.f32.mrb[75].mxu0  ;;  %v10808_v51 = vpop.f32.mrb[73].mxu1 }
 0x339   :  { %v8516_v52 = vadd.f32 %v10787_v47, %v8476_v40  ;;  %v10809_v53 = vadd.f32 %v10808_v51, %v10807_v49  ;;  %v10810_v54 = vpop.f32.mrb[74].mxu1 }
 0x33a   :  { %v10811_v55 = vpop.f32.mrb[75].mxu1 }
 0x33b   :  { %v8556_v56 = vadd.f32 %v10809_v53, %v8516_v52 }
 0x355   :  { %v10829_v57 = vpop.f32.mrb[76].mxu0 }
 0x356   :  { %v10830_v58 = vpop.f32.mrb[77].mxu0 }
 0x357   :  { %v10831_v59 = vadd.f32 %v10830_v58, %v10829_v57  ;;  %v10832_v60 = vpop.f32.mrb[78].mxu0  ;;  %v10851_v61 = vpop.f32.mrb[76].mxu1 }
 0x358   :  { %v10833_v41 = vpop.f32.mrb[79].mxu0  ;;  %v10852_v62 = vpop.f32.mrb[77].mxu1 }
 0x359   :  { %v8596_v63 = vadd.f32 %v10831_v59, %v8556_v56  ;;  %v10853_v0 = vadd.f32 %v10852_v62, %v10851_v61  ;;  %v10854_v1 = vpop.f32.mrb[78].mxu1 }
 0x35a   :  { %v10855_v2 = vpop.f32.mrb[79].mxu1 }
 0x35b   :  { %v8636_v3 = vadd.f32 %v10853_v0, %v8596_v63 }
 0x375   :  { %v10873_v7 = vpop.f32.mrb[80].mxu0 }
 0x376   :  { %v10874_v9 = vpop.f32.mrb[81].mxu0 }
 0x377   :  { %v10875_v10 = vadd.f32 %v10874_v9, %v10873_v7  ;;  %v10876_v11 = vpop.f32.mrb[82].mxu0  ;;  %v10895_v12 = vpop.f32.mrb[80].mxu1 }
 0x378   :  { %v10877_v13 = vpop.f32.mrb[83].mxu0  ;;  %v10896_v14 = vpop.f32.mrb[81].mxu1  ;;  %v9975_v11 = vld [vmem:[%s14582_s6] ss:$0 sm:$0xff] }
 0x379   :  { %v8676_v17 = vadd.f32 %v10875_v10, %v8636_v3  ;;  %v10897_v18 = vadd.f32 %v10896_v14, %v10895_v12  ;;  %v10898_v19 = vpop.f32.mrb[82].mxu1  ;;  %v9088_v3 = vld [vmem:[%s14581_s5] sm:$0xff]  ;;  %s11891_s5 = scalar_lea.vmem %s9180_s24, 32 }
 0x37a   :  { %v10899_v21 = vpop.f32.mrb[83].mxu1  ;;  %v11088_v5 = vpack.c.bf16 %v9089_v4, %v9088_v3  ;;  %p11892_p0 = scmp.ne.s32.totalorder %s9180_s24, %s11891_s5  ;;  %p11897_p2 = scmp.lt.s32.totalorder %s11891_s5, %s11891_s5 }
 0x37b   :  { %v8716_v22 = vadd.f32 %v10897_v18, %v8676_v17 }
 0x37c   :  { %p11898_p3 = por %p11897_p2, %p11896_p1 }
 0x37e   :  { %p11899_p4 = pnand %p11898_p3, %p11892_p0 }
 0x395   :  { %v10917_v24 = vpop.f32.mrb[84].mxu0 }
 0x396   :  { %v10918_v25 = vpop.f32.mrb[85].mxu0 }
 0x397   :  { %v10919_v26 = vadd.f32 %v10918_v25, %v10917_v24  ;;  %v10920_v27 = vpop.f32.mrb[86].mxu0  ;;  %v10939_v28 = vpop.f32.mrb[84].mxu1 }
 0x398   :  { %v10921_v29 = vpop.f32.mrb[87].mxu0  ;;  %v10940_v30 = vpop.f32.mrb[85].mxu1 }
 0x399   :  { %v8756_v31 = vadd.f32 %v10919_v26, %v8716_v22  ;;  %v10941_v32 = vadd.f32 %v10940_v30, %v10939_v28  ;;  %v10942_v33 = vpop.f32.mrb[86].mxu1 }
 0x39a   :  { %v10943_v34 = vpop.f32.mrb[87].mxu1 }
 0x39b   :  { %v8796_v35 = vadd.f32 %v10941_v32, %v8756_v31 }
 0x3b5   :  { %v10961_v36 = vpop.f32.mrb[88].mxu0 }
 0x3b6   :  { %v10962_v37 = vpop.f32.mrb[89].mxu0 }
 0x3b7   :  { %v10963_v38 = vadd.f32 %v10962_v37, %v10961_v36  ;;  %v10964_v39 = vpop.f32.mrb[90].mxu0  ;;  %v10983_v40 = vpop.f32.mrb[88].mxu1 }
 0x3b8   :  { %v10965_v42 = vpop.f32.mrb[91].mxu0  ;;  %v10984_v43 = vpop.f32.mrb[89].mxu1 }
 0x3b9   :  { %v8836_v44 = vadd.f32 %v10963_v38, %v8796_v35  ;;  %v10985_v45 = vadd.f32 %v10984_v43, %v10983_v40  ;;  %v10986_v46 = vpop.f32.mrb[90].mxu1 }
 0x3ba   :  { %v10987_v47 = vpop.f32.mrb[91].mxu1 }
 0x3bb   :  { %v8876_v48 = vadd.f32 %v10985_v45, %v8836_v44 }
 0x3d5   :  { %v11005_v49 = vpop.f32.mrb[92].mxu0 }
 0x3d6   :  { %v11006_v50 = vpop.f32.mrb[93].mxu0 }
 0x3d7   :  { %v11007_v51 = vadd.f32 %v11006_v50, %v11005_v49  ;;  %v11008_v52 = vpop.f32.mrb[94].mxu0  ;;  %v11027_v53 = vpop.f32.mrb[92].mxu1 }
 0x3d8   :  { %v11009_v54 = vpop.f32.mrb[95].mxu0  ;;  %v11028_v55 = vpop.f32.mrb[93].mxu1 }
 0x3d9   :  { %v8916_v56 = vadd.f32 %v11007_v51, %v8876_v48  ;;  %v11029_v57 = vadd.f32 %v11028_v55, %v11027_v53  ;;  %v11030_v58 = vpop.f32.mrb[94].mxu1 }
 0x3da   :  { %v11031_v59 = vpop.f32.mrb[95].mxu1 }
 0x3db   :  { %v8956_v60 = vadd.f32 %v11029_v57, %v8916_v56 }
 0x3f5   :  { %v11049_v61 = vpop.f32.mrb[96].mxu0 }
 0x3f6   :  { %v11050_v41 = vpop.f32.mrb[97].mxu0 }
 0x3f7   :  { %v11051_v62 = vadd.f32 %v11050_v41, %v11049_v61  ;;  %v11052_v63 = vpop.f32.mrb[98].mxu0 }
 0x3f8   :  { %v11053_v0 = vpop.f32.mrb[99].mxu0 }
 0x3f9   :  { %v8996_v1 = vadd.f32 %v11051_v62, %v8956_v60 }
 0x3fb   :  { %v9001_v2 = vmax.f32 %v8996_v1, 0.0 }
 0x3fd   :  { %11072 = vmatmul.mubr.msk.f32.vlgmr.msra.gmra.mrb[96].mxu1 %vm9013_vm1, %v9001_v2 }
 0x3fe   :  { %11078 = vmatprep.mubr.msk.f32.mxu1 %vm11917_vm0, %v11918_v23  ;;  %11089 = vmatpush3.bf16.msra.mxu1 %v11088_v5 }
 0x4d0   :  { %v9083_v7 = vpop.f32.mrb[96].mxu1 }
 0x4d1   :  { %v9084_v8 = vadd.f32 %v9973_v6, %v9083_v7  ;;  %v11073_v9 = vpop.f32.mrb[97].mxu1 }
 0x4d3   :  { %v9087_v10 = vmax.f32 %v9084_v8, 0.0 }
 0x4d5   :  { %11079 = vmatmul.mubr.msk.f32.vlgmr.msra.gmra.mrb[98].mxu1 %vm9097_vm2, %v9087_v10 }
 0x5a8   :  { %v9167_v12 = vpop.f32.mrb[98].mxu1 }
 0x5a9   :  { %v9168_v13 = vadd.f32 %v9975_v11, %v9167_v12  ;;  %v11080_v14 = vpop.f32.mrb[99].mxu1 }
 0x5ab   :  { %9172 = vst.msk [vmem:[#allocation2] sm:$0x3] %vm9171_vm3, %v9168_v13 }
 0x5ac   :  { %11902 = shalt.err (!%p11899_p4)
}
 0x5ad   :  { %s11903_s25 = scalar_lea.hbm %s14583_s7, 32 }
 0x5ae   :  { %p11904_p5 = scmp.ne.s32.totalorder %s14583_s7, %s11903_s25  ;;  %p11907_p6 = scmp.lt.u32.totalorder %s11903_s25, %s14583_s7 }
 0x5b0   :  { %p11909_p7 = pnand %p11907_p6, %p11904_p5 }
 0x5b2   :  { %11912 = shalt.err (!%p11909_p7)
}
 0x5b3   :  { %9182 = dma.vmem_to_hbm [thread:$0]  %s9180_s24, 32, %s14583_s7, [#allocation3]  }
 0x5b4   :  { %11913 = dma.done.wait [#allocation3], 32  }
 0x5b5   :  { %11914 = vsyncadd [#allocation3], 4294967264 }
 0x5b6   :  { %9186 = vsyncpa [#allocation3], 1 }

</bundles_post_ra>
